<compile_context>
chip_gen: v7x
topology: tpu7x:2x2x1
jax: 0.10.0
libtpu: 0.0.40
codegen_flags: <defaults>
</compile_context>

<pallas_src>
import functools

import jax
import jax.numpy as jnp
from jax.experimental import pallas as pl
from jax.experimental.pallas import tpu as pltpu

_TM = 512                       # max row tile for the matmul path
_LANE = 128
_CDT = jnp.bfloat16             # activation / operand dtype (MXU native)
_VMEM_LIMIT = 32 * 1024 * 1024
_DIRECT_VMEM_BUDGET = 20 * 1024 * 1024   # per-call budget for the direct-conv path


def _round_up(x, m):
    return ((x + m - 1) // m) * m


def _cdiv(a, b):
    return -(-a // b)


def _pick_tm(M):
    """8-aligned near-divisor of M; >=2 balanced steps once M > 256 (v7x cores)."""
    if M <= 256:
        return M
    n = max(2, _cdiv(M, _TM))
    return _round_up(_cdiv(M, n), 8)


def _params_1d():
    return pltpu.CompilerParams(
        dimension_semantics=("parallel",),
        vmem_limit_bytes=_VMEM_LIMIT,
    )


# ---------------------------------------------------------------------------
# Pallas kernels
# ---------------------------------------------------------------------------
def _matmul_bias_relu_kernel(x_ref, w_ref, b_ref, o_ref):
    """relu(X @ W + b); used for 1x1 convs and the (tiny) stride-2 stem conv."""
    acc = jnp.dot(x_ref[...], w_ref[...], preferred_element_type=jnp.float32)
    o_ref[...] = jnp.maximum(acc + b_ref[...], 0.0).astype(o_ref.dtype)


def _conv_direct_kernel(x_ref, w_ref, b_ref, o_ref, *, kh, kw, wp, cin, rows_out):
    """Direct stride-1 conv for one batch element.

    x_ref : (1, rows_in, cin) bf16  flattened zero-padded input (+ halo rows)
    w_ref : (kh*kw*cin, Np)  bf16   per-tap weight slabs, BN scale folded in
    b_ref : (1, Np)          f32
    o_ref : (1, rows_out, Np) bf16  rows_out = Ho * Wp (garbage cols sliced off
                                    in the wrapper)
    """
    acc = None
    for i in range(kh):
        for j in range(kw):
            s = i * wp + j                                   # static flat shift
            xs = x_ref[0, s:s + rows_out, :]                 # (rows_out, cin)
            ws = w_ref[(i * kw + j) * cin:(i * kw + j + 1) * cin, :]
            d = jnp.dot(xs, ws, preferred_element_type=jnp.float32)
            acc = d if acc is None else acc + d
    o_ref[0] = jnp.maximum(acc + b_ref[...], 0.0).astype(o_ref.dtype)


def _avgpool_conv_kernel(x_ref, w_ref, b_ref, o_ref, *, kh, kw, wp, rows_out):
    """Fused 3x3 s1 p1 avg-pool (count_include_pad) + 1x1 conv + bias + ReLU.

    The 1/(kh*kw) factor is folded into w_ref; accumulate the window sum in f32.
    """
    acc = x_ref[0, 0:rows_out, :].astype(jnp.float32)
    for i in range(kh):
        for j in range(kw):
            if i == 0 and j == 0:
                continue
            s = i * wp + j
            acc = acc + x_ref[0, s:s + rows_out, :].astype(jnp.float32)
    y = jnp.dot(acc.astype(_CDT), w_ref[...], preferred_element_type=jnp.float32)
    o_ref[0] = jnp.maximum(y + b_ref[...], 0.0).astype(o_ref.dtype)


def _maxpool_s1_kernel(x_ref, o_ref, *, kh, kw, wp, rows_out):
    """3x3 stride-1 max pool via flat shifts; f32 accumulation (v5e: no bf16 VPU)."""
    acc = x_ref[0, 0:rows_out, :].astype(jnp.float32)
    for i in range(kh):
        for j in range(kw):
            if i == 0 and j == 0:
                continue
            s = i * wp + j
            acc = jnp.maximum(acc, x_ref[0, s:s + rows_out, :].astype(jnp.float32))
    o_ref[0] = acc.astype(o_ref.dtype)


# ---------------------------------------------------------------------------
# Wrappers
# ---------------------------------------------------------------------------
def _fused_matmul(X, Wm, b):
    """relu(X @ Wm + b); X:(M,K) bf16, Wm:(K,Np) bf16 (Np % 128 == 0), b:(1,Np) f32."""
    M, K = X.shape
    Np = Wm.shape[-1]
    tm = _pick_tm(M)
    cost = pl.CostEstimate(
        flops=int(2 * M * K * Np),
        transcendentals=0,
        bytes_accessed=int(X.size * 2 + Wm.size * 2 + b.size * 4 + M * Np * 2),
    )
    return pl.pallas_call(
        _matmul_bias_relu_kernel,
        out_shape=jax.ShapeDtypeStruct((M, Np), _CDT),
        grid=(pl.cdiv(M, tm),),
        in_specs=[
            pl.BlockSpec((tm, K), lambda i: (i, 0)),
            pl.BlockSpec((K, Np), lambda i: (0, 0)),
            pl.BlockSpec((1, Np), lambda i: (0, 0)),
        ],
        out_specs=pl.BlockSpec((tm, Np), lambda i: (i, 0)),
        compiler_params=_params_1d(),
        cost_estimate=cost,
    )(X, Wm, b)


def _flatten_halo(x, padding):
    """Zero-pad spatially (plus one extra bottom row as halo) and flatten to rows.

    The extra padded row guarantees every flat slice [s, s+Ho*Wp) with
    s <= (kh-1)*Wp + (kw-1) stays in bounds (Wp >= kw).
    """
    B, H, W, C = x.shape
    xp = jnp.pad(x, ((0, 0), (padding, padding + 1), (padding, padding), (0, 0)))
    Hp, Wp = H + 2 * padding, W + 2 * padding
    xf = xp.reshape(B, (Hp + 1) * Wp, C)
    return xf, Hp, Wp


def _window_slices(x, kh, kw, stride, padding):
    """kh*kw strided slices (each (B,Ho,Wo,C)) — only used by the stride-2 stem conv."""
    B, H, W, C = x.shape
    if padding > 0:
        x = jnp.pad(x, ((0, 0), (padding, padding), (padding, padding), (0, 0)))
    Hp, Wp = H + 2 * padding, W + 2 * padding
    Ho = (Hp - kh) // stride + 1
    Wo = (Wp - kw) // stride + 1
    slices = []
    for i in range(kh):
        for j in range(kw):
            s = jax.lax.slice(
                x,
                (0, i, j, 0),
                (B, i + (Ho - 1) * stride + 1, j + (Wo - 1) * stride + 1, C),
                (1, stride, stride, 1),
            )
            slices.append(s)
    return slices, Ho, Wo


def _prep_weight(w, bias):
    """Pad cout to 128, reshape to (kh*kw*cin, Np), cast bf16; bias -> (1,Np) f32."""
    kh, kw, cin, cout = w.shape
    np_ = _round_up(cout, _LANE)
    Wm = jnp.pad(w, ((0, 0), (0, 0), (0, 0), (0, np_ - cout)))
    Wm = Wm.reshape(kh * kw * cin, np_).astype(_CDT)
    b = jnp.pad(bias, (0, np_ - cout)).reshape(1, np_).astype(jnp.float32)
    return Wm, b, cout, np_


def _conv_direct(x, params, padding):
    """Stride-1 k>1 conv, one pallas_call per layer, no im2col materialization."""
    w, bias = params
    kh, kw, cin, cout = w.shape
    B, H, W, C = x.shape
    assert C == cin and kh > 1
    Wm, b, cout, np_ = _prep_weight(w, bias)
    xf, Hp, Wp = _flatten_halo(x, padding)
    Ho, Wo = Hp - kh + 1, Wp - kw + 1
    rows_in = xf.shape[1]
    rows_out = Ho * Wp
    cost = pl.CostEstimate(
        flops=int(2 * B * rows_out * cin * np_ * kh * kw),
        transcendentals=0,
        bytes_accessed=int(B * (rows_in * cin + rows_out * np_) * 2
                           + Wm.size * 2 + b.size * 4),
    )
    out = pl.pallas_call(
        functools.partial(_conv_direct_kernel, kh=kh, kw=kw, wp=Wp,
                          cin=cin, rows_out=rows_out),
        out_shape=jax.ShapeDtypeStruct((B, rows_out, np_), _CDT),
        grid=(B,),
        in_specs=[
            pl.BlockSpec((1, rows_in, cin), lambda bi: (bi, 0, 0)),
            pl.BlockSpec((kh * kw * cin, np_), lambda bi: (0, 0)),
            pl.BlockSpec((1, np_), lambda bi: (0, 0)),
        ],
        out_specs=pl.BlockSpec((1, rows_out, np_), lambda bi: (bi, 0, 0)),
        compiler_params=_params_1d(),
        cost_estimate=cost,
    )(xf, Wm, b)
    out = out.reshape(B, Ho, Wp, np_)
    return out[:, :, :Wo, :cout]      # drop garbage columns + channel padding


def _direct_fits(x, kh, kw, padding, cout):
    """Conservative VMEM estimate for the per-batch direct-conv blocks."""
    _, H, W, C = x.shape
    Hp, Wp = H + 2 * padding, W + 2 * padding
    np_ = _round_up(cout, _LANE)
    rows_in = (Hp + 1) * Wp
    rows_out = (Hp - kh + 1) * Wp
    bytes_ = (2 * rows_in * C * 2            # double-buffered input block (bf16)
              + kh * kw * C * np_ * 2        # weight slab
              + 2 * rows_out * np_ * 2       # double-buffered output block
              + 2 * rows_out * np_ * 4)      # f32 accumulator temporaries
    return bytes_ <= _DIRECT_VMEM_BUDGET


def conv_bn_relu(x, params, stride=1, padding=0):
    """BasicConv2d: Conv2d(no bias) + folded BatchNorm(eval, eps=1e-3) + ReLU."""
    w, bias = params
    kh, kw, cin, cout = w.shape
    B = x.shape[0]
    if kh == 1 and kw == 1 and stride == 1 and padding == 0:
        Ho, Wo = x.shape[1], x.shape[2]
        Xm = x.reshape(B * Ho * Wo, x.shape[-1])
    elif stride == 1 and _direct_fits(x, kh, kw, padding, cout):
        return _conv_direct(x, params, padding)
    else:
        # im2col fallback (only Conv2d_1a, stride 2, 3-channel input, tiny).
        slices, Ho, Wo = _window_slices(x, kh, kw, stride, padding)
        patches = jnp.concatenate(slices, axis=-1)            # (B,Ho,Wo,kh*kw*C)
        Xm = patches.reshape(B * Ho * Wo, kh * kw * x.shape[-1])
    Wm, b, cout, _ = _prep_weight(w, bias)
    out = _fused_matmul(Xm, Wm, b)
    return out[:, :cout].reshape(B, Ho, Wo, cout)


def fused_1x1_branches(x, params_list):
    """Several 1x1 conv+BN+ReLU branches sharing input x, as ONE matmul.

    Reads x once and fills the 256-wide MXU on v6e/v7x.  Returns per-branch
    slices in the given order (caller orders them so downstream-consumed slices
    start at lane-aligned offsets).
    """
    B, H, W, C = x.shape
    Ws, bs, widths = [], [], []
    for (w, bias) in params_list:
        Ws.append(w.reshape(C, w.shape[-1]))
        bs.append(bias)
        widths.append(w.shape[-1])
    Wcat = jnp.concatenate(Ws, axis=-1)
    bcat = jnp.concatenate(bs, axis=-1)
    n = Wcat.shape[-1]
    np_ = _round_up(n, _LANE)
    Wm = jnp.pad(Wcat, ((0, 0), (0, np_ - n))).astype(_CDT)
    b = jnp.pad(bcat, (0, np_ - n)).reshape(1, np_).astype(jnp.float32)
    y = _fused_matmul(x.reshape(B * H * W, C), Wm, b).reshape(B, H, W, np_)
    outs, off = [], 0
    for cout in widths:
        outs.append(y[..., off:off + cout])
        off += cout
    return outs


def maxpool_3x3_s2(x):
    """MaxPool2d(kernel_size=3, stride=2): stride-1 3x3 max in-kernel, then a
    cheap strided subsample in the wrapper (no 9x slice materialization)."""
    B, H, W, C = x.shape
    xf, Hp, Wp = _flatten_halo(x, 0)
    rows_in = xf.shape[1]
    rows_out = (H - 2) * W
    cost = pl.CostEstimate(
        flops=int(9 * B * rows_out * C),
        transcendentals=0,
        bytes_accessed=int(B * (rows_in + rows_out) * C * 2),
    )
    m1 = pl.pallas_call(
        functools.partial(_maxpool_s1_kernel, kh=3, kw=3, wp=Wp, rows_out=rows_out),
        out_shape=jax.ShapeDtypeStruct((B, rows_out, C), x.dtype),
        grid=(B,),
        in_specs=[pl.BlockSpec((1, rows_in, C), lambda bi: (bi, 0, 0))],
        out_specs=pl.BlockSpec((1, rows_out, C), lambda bi: (bi, 0, 0)),
        compiler_params=_params_1d(),
        cost_estimate=cost,
    )(xf)
    m1 = m1.reshape(B, H - 2, W, C)
    Ho = (H - 3) // 2 + 1
    Wo = (W - 3) // 2 + 1
    return jax.lax.slice(m1, (0, 0, 0, 0),
                         (B, (Ho - 1) * 2 + 1, (Wo - 1) * 2 + 1, C),
                         (1, 2, 2, 1))


def avgpool3x3_conv_bn_relu(x, params):
    """Fused F.avg_pool2d(x,3,1,1) + BasicConv2d 1x1 (InceptionA branch_pool)."""
    w, bias = params
    _, _, cin, cout = w.shape
    B, H, W, C = x.shape
    assert C == cin
    np_ = _round_up(cout, _LANE)
    Wm = jnp.pad(w[0, 0] * (1.0 / 9.0), ((0, 0), (0, np_ - cout))).astype(_CDT)
    b = jnp.pad(bias, (0, np_ - cout)).reshape(1, np_).astype(jnp.float32)
    xf, Hp, Wp = _flatten_halo(x, 1)
    rows_in = xf.shape[1]
    rows_out = H * Wp                         # Ho == H for k3 s1 p1
    cost = pl.CostEstimate(
        flops=int(B * rows_out * C * (9 + 2 * np_)),
        transcendentals=0,
        bytes_accessed=int(B * (rows_in * C + rows_out * np_) * 2
                           + Wm.size * 2 + b.size * 4),
    )
    out = pl.pallas_call(
        functools.partial(_avgpool_conv_kernel, kh=3, kw=3, wp=Wp, rows_out=rows_out),
        out_shape=jax.ShapeDtypeStruct((B, rows_out, np_), _CDT),
        grid=(B,),
        in_specs=[
            pl.BlockSpec((1, rows_in, C), lambda bi: (bi, 0, 0)),
            pl.BlockSpec((C, np_), lambda bi: (0, 0)),
            pl.BlockSpec((1, np_), lambda bi: (0, 0)),
        ],
        out_specs=pl.BlockSpec((1, rows_out, np_), lambda bi: (bi, 0, 0)),
        compiler_params=_params_1d(),
        cost_estimate=cost,
    )(xf, Wm, b)
    out = out.reshape(B, H, Wp, np_)
    return out[:, :, :W, :cout]


# ---------------------------------------------------------------------------
# Deterministic synthetic parameters (shapes follow torchvision Inception3)
# ---------------------------------------------------------------------------
def _basic_conv_params(key, cin, cout, kh, kw, eps=1e-3):
    k1, k2, k3, k4, k5 = jax.random.split(key, 5)
    w = jax.random.normal(k1, (kh, kw, cin, cout), jnp.float32)
    w = w * (1.0 / (kh * kw * cin) ** 0.5)
    gamma = jax.random.uniform(k2, (cout,), jnp.float32, 0.5, 1.5)
    beta = jax.random.normal(k3, (cout,), jnp.float32) * 0.1
    mean = jax.random.normal(k4, (cout,), jnp.float32) * 0.1
    var = jax.random.uniform(k5, (cout,), jnp.float32, 0.5, 1.5)
    scale = gamma / jnp.sqrt(var + eps)          # BN(eval) scale
    bias = beta - mean * scale
    w = w * scale[None, None, None, :]           # fold BN scale into the conv
    return (w, bias)


def init_inception_encoder_params(key):
    keys = iter(jax.random.split(key, 64))
    p = {}
    p["Conv2d_1a_3x3"] = _basic_conv_params(next(keys), 3, 32, 3, 3)
    p["Conv2d_2a_3x3"] = _basic_conv_params(next(keys), 32, 32, 3, 3)
    p["Conv2d_2b_3x3"] = _basic_conv_params(next(keys), 32, 64, 3, 3)
    p["Conv2d_3b_1x1"] = _basic_conv_params(next(keys), 64, 80, 1, 1)
    p["Conv2d_4a_3x3"] = _basic_conv_params(next(keys), 80, 192, 3, 3)
    for name, cin, pool_f in (
        ("Mixed_5b", 192, 32), ("Mixed_5c", 256, 64), ("Mixed_5d", 288, 64)
    ):
        p[name] = {
            "branch1x1": _basic_conv_params(next(keys), cin, 64, 1, 1),
            "branch5x5_1": _basic_conv_params(next(keys), cin, 48, 1, 1),
            "branch5x5_2": _basic_conv_params(next(keys), 48, 64, 5, 5),
            "branch3x3dbl_1": _basic_conv_params(next(keys), cin, 64, 1, 1),
            "branch3x3dbl_2": _basic_conv_params(next(keys), 64, 96, 3, 3),
            "branch3x3dbl_3": _basic_conv_params(next(keys), 96, 96, 3, 3),
            "branch_pool": _basic_conv_params(next(keys), cin, pool_f, 1, 1),
        }
    return p


# ---------------------------------------------------------------------------
# Forward pass (mirrors torchvision InceptionA + Inception3 stem prefix)
# ---------------------------------------------------------------------------
def inception_a(x, p):
    # The three 1x1 branches reading x are one fused matmul; the order puts the
    # two slices that feed further convs at lane-aligned offsets 0 and 128.
    b3, b1, b5 = fused_1x1_branches(
        x, [p["branch3x3dbl_1"], p["branch1x1"], p["branch5x5_1"]])
    b5 = conv_bn_relu(b5, p["branch5x5_2"], padding=2)
    b3 = conv_bn_relu(b3, p["branch3x3dbl_2"], padding=1)
    b3 = conv_bn_relu(b3, p["branch3x3dbl_3"], padding=1)
    bp = avgpool3x3_conv_bn_relu(x, p["branch_pool"])
    # torchvision concat order: [branch1x1, branch5x5, branch3x3dbl, branch_pool]
    return jnp.concatenate([b1, b5, b3, bp], axis=-1)


def inception_encoder_forward(image, params):
    """image: (B, H, W, 3) NHWC -> (B, Ho*Wo, 288)."""
    x = image.astype(_CDT)
    x = conv_bn_relu(x, params["Conv2d_1a_3x3"], stride=2)      # k3 s2
    x = conv_bn_relu(x, params["Conv2d_2a_3x3"])                # k3
    x = conv_bn_relu(x, params["Conv2d_2b_3x3"], padding=1)     # k3 p1
    x = maxpool_3x3_s2(x)                                       # maxpool1
    x = conv_bn_relu(x, params["Conv2d_3b_1x1"])                # k1
    x = conv_bn_relu(x, params["Conv2d_4a_3x3"])                # k3
    x = maxpool_3x3_s2(x)                                       # maxpool2
    x = inception_a(x, params["Mixed_5b"])                      # -> 256 ch
    x = inception_a(x, params["Mixed_5c"])                      # -> 288 ch
    x = inception_a(x, params["Mixed_5d"])                      # -> 288 ch
    B = image.shape[0]
    return x.reshape(B, -1, 288).astype(jnp.float32)


if __name__ == "__main__":
    key = jax.random.PRNGKey(0)
    pkey, xkey = jax.random.split(key)
    params = init_inception_encoder_params(pkey)
    # Small image: 35x35 -> final 2x2 spatial grid -> (B, 4, 288)
    image = jax.random.normal(xkey, (2, 35, 35, 3), jnp.float32)
    fwd = jax.jit(inception_encoder_forward)
    out = fwd(image, params)
    out = jax.block_until_ready(out)
    assert out.shape == (2, 4, 288), out.shape
    assert bool(jnp.all(jnp.isfinite(out)))
    print("KERNEL_OK")
</pallas_src>

<mosaic_0001>
module attributes {stable_mosaic.version = 11 : i64} {
  func.func @_matmul_bias_relu_kernel(%arg0: i32, %arg1: memref<296x27xbf16, #tpu.memory_space<vmem>>, %arg2: memref<27x128xbf16, #tpu.memory_space<vmem>>, %arg3: memref<1x128xf32, #tpu.memory_space<vmem>>, %arg4: memref<296x128xbf16, #tpu.memory_space<vmem>>) attributes {dimension_semantics = [#tpu.dimension_semantics<parallel>], iteration_bounds = array<i64: 2>, scalar_prefetch = 0 : i64, scratch_operands = 0 : i64, tpu.core_type = #tpu.core_type<tc>, window_params = [{transform_indices = @transform_0, window_bounds = array<i64: 296, 27>}, {pipeline_mode = #tpu.pipeline_mode<synchronous>, transform_indices = @transform_1, window_bounds = array<i64: 27, 128>}, {pipeline_mode = #tpu.pipeline_mode<synchronous>, transform_indices = @transform_2, window_bounds = array<i64: 1, 128>}, {transform_indices = @transform_3, window_bounds = array<i64: 296, 128>}]} {
    %c0 = arith.constant 0 : index
    %c0_0 = arith.constant 0 : index
    %0 = vector.load %arg1[%c0, %c0_0] : memref<296x27xbf16, #tpu.memory_space<vmem>>, vector<296x27xbf16>
    %c0_1 = arith.constant 0 : index
    %c0_2 = arith.constant 0 : index
    %1 = vector.load %arg2[%c0_1, %c0_2] : memref<27x128xbf16, #tpu.memory_space<vmem>>, vector<27x128xbf16>
    %cst = arith.constant dense<0.000000e+00> : vector<296x128xf32>
    %2 = tpu.matmul %0, %1, %cst {dimension_numbers = #tpu.dot_dimension_numbers<[1], [0], [0], [1], [0, 0, 1, 1], [], []>} : vector<296x27xbf16>, vector<27x128xbf16>, vector<296x128xf32> -> vector<296x128xf32>
    %c0_3 = arith.constant 0 : index
    %c0_4 = arith.constant 0 : index
    %3 = vector.load %arg3[%c0_3, %c0_4] : memref<1x128xf32, #tpu.memory_space<vmem>>, vector<1x128xf32>
    %4 = vector.broadcast %3 : vector<1x128xf32> to vector<296x128xf32>
    %5 = arith.addf %2, %4 : vector<296x128xf32>
    %cst_5 = arith.constant 0.000000e+00 : f32
    %6 = vector.broadcast %cst_5 : f32 to vector<296x128xf32>
    %7 = arith.maximumf %5, %6 : vector<296x128xf32>
    %8 = arith.truncf %7 : vector<296x128xf32> to vector<296x128xbf16>
    %c0_6 = arith.constant 0 : index
    %c0_7 = arith.constant 0 : index
    %9 = vector.load %arg4[%c0_6, %c0_7] : memref<296x128xbf16, #tpu.memory_space<vmem>>, vector<296x128xbf16>
    tpu.vector_store %arg4[%c0_6, %c0_7], %8 {strides = array<i32>} : memref<296x128xbf16, #tpu.memory_space<vmem>>, vector<296x128xbf16>,
    return
  }
  func.func @transform_0(%arg0: i32) -> (i32, i32) {
    %c0_i32 = arith.constant 0 : i32
    %c0_i32_0 = arith.constant 0 : i32
    return %arg0, %c0_i32 : i32, i32
  }
  func.func @transform_1(%arg0: i32) -> (i32, i32) {
    %c0_i32 = arith.constant 0 : i32
    %c0_i32_0 = arith.constant 0 : i32
    %c0_i32_1 = arith.constant 0 : i32
    return %c0_i32, %c0_i32_0 : i32, i32
  }
  func.func @transform_2(%arg0: i32) -> (i32, i32) {
    %c0_i32 = arith.constant 0 : i32
    %c0_i32_0 = arith.constant 0 : i32
    %c0_i32_1 = arith.constant 0 : i32
    return %c0_i32, %c0_i32_0 : i32, i32
  }
  func.func @transform_3(%arg0: i32) -> (i32, i32) {
    %c0_i32 = arith.constant 0 : i32
    %c0_i32_0 = arith.constant 0 : i32
    return %arg0, %c0_i32 : i32, i32
  }
}

module attributes {stable_mosaic.version = 11 : i64} {
  func.func @_conv_direct_kernel(%arg0: i32, %arg1: memref<1x306x32xbf16, #tpu.memory_space<vmem>>, %arg2: memref<288x128xbf16, #tpu.memory_space<vmem>>, %arg3: memref<1x128xf32, #tpu.memory_space<vmem>>, %arg4: memref<1x255x128xbf16, #tpu.memory_space<vmem>>) attributes {dimension_semantics = [#tpu.dimension_semantics<parallel>], iteration_bounds = array<i64: 2>, scalar_prefetch = 0 : i64, scratch_operands = 0 : i64, tpu.core_type = #tpu.core_type<tc>, window_params = [{transform_indices = @transform_0, window_bounds = array<i64: 1, 306, 32>}, {pipeline_mode = #tpu.pipeline_mode<synchronous>, transform_indices = @transform_1, window_bounds = array<i64: 288, 128>}, {pipeline_mode = #tpu.pipeline_mode<synchronous>, transform_indices = @transform_2, window_bounds = array<i64: 1, 128>}, {transform_indices = @transform_3, window_bounds = array<i64: 1, 255, 128>}]} {
    %c0 = arith.constant 0 : index
    %c0_0 = arith.constant 0 : index
    %c0_1 = arith.constant 0 : index
    %0 = vector.load %arg1[%c0, %c0_0, %c0_1] : memref<1x306x32xbf16, #tpu.memory_space<vmem>>, vector<1x255x32xbf16>
    %1 = vector.shape_cast %0 : vector<1x255x32xbf16> to vector<255x32xbf16>
    %c0_2 = arith.constant 0 : index
    %c0_3 = arith.constant 0 : index
    %2 = vector.load %arg2[%c0_2, %c0_3] : memref<288x128xbf16, #tpu.memory_space<vmem>>, vector<32x128xbf16>
    %cst = arith.constant dense<0.000000e+00> : vector<255x128xf32>
    %3 = tpu.matmul %1, %2, %cst {dimension_numbers = #tpu.dot_dimension_numbers<[1], [0], [0], [1], [0, 0, 1, 1], [], []>} : vector<255x32xbf16>, vector<32x128xbf16>, vector<255x128xf32> -> vector<255x128xf32>
    %c0_4 = arith.constant 0 : index
    %c1 = arith.constant 1 : index
    %c0_5 = arith.constant 0 : index
    %4 = vector.load %arg1[%c0_4, %c1, %c0_5] : memref<1x306x32xbf16, #tpu.memory_space<vmem>>, vector<1x255x32xbf16>
    %5 = vector.shape_cast %4 : vector<1x255x32xbf16> to vector<255x32xbf16>
    %c32 = arith.constant 32 : index
    %c0_6 = arith.constant 0 : index
    %6 = vector.load %arg2[%c32, %c0_6] : memref<288x128xbf16, #tpu.memory_space<vmem>>, vector<32x128xbf16>
    %cst_7 = arith.constant dense<0.000000e+00> : vector<255x128xf32>
    %7 = tpu.matmul %5, %6, %cst_7 {dimension_numbers = #tpu.dot_dimension_numbers<[1], [0], [0], [1], [0, 0, 1, 1], [], []>} : vector<255x32xbf16>, vector<32x128xbf16>, vector<255x128xf32> -> vector<255x128xf32>
    %8 = arith.addf %3, %7 : vector<255x128xf32>
    %c0_8 = arith.constant 0 : index
    %c2 = arith.constant 2 : index
    %c0_9 = arith.constant 0 : index
    %9 = vector.load %arg1[%c0_8, %c2, %c0_9] : memref<1x306x32xbf16, #tpu.memory_space<vmem>>, vector<1x255x32xbf16>
    %10 = vector.shape_cast %9 : vector<1x255x32xbf16> to vector<255x32xbf16>
    %c64 = arith.constant 64 : index
    %c0_10 = arith.constant 0 : index
    %11 = vector.load %arg2[%c64, %c0_10] : memref<288x128xbf16, #tpu.memory_space<vmem>>, vector<32x128xbf16>
    %cst_11 = arith.constant dense<0.000000e+00> : vector<255x128xf32>
    %12 = tpu.matmul %10, %11, %cst_11 {dimension_numbers = #tpu.dot_dimension_numbers<[1], [0], [0], [1], [0, 0, 1, 1], [], []>} : vector<255x32xbf16>, vector<32x128xbf16>, vector<255x128xf32> -> vector<255x128xf32>
    %13 = arith.addf %8, %12 : vector<255x128xf32>
    %c0_12 = arith.constant 0 : index
    %c17 = arith.constant 17 : index
    %c0_13 = arith.constant 0 : index
    %14 = vector.load %arg1[%c0_12, %c17, %c0_13] : memref<1x306x32xbf16, #tpu.memory_space<vmem>>, vector<1x255x32xbf16>
    %15 = vector.shape_cast %14 : vector<1x255x32xbf16> to vector<255x32xbf16>
    %c96 = arith.constant 96 : index
    %c0_14 = arith.constant 0 : index
    %16 = vector.load %arg2[%c96, %c0_14] : memref<288x128xbf16, #tpu.memory_space<vmem>>, vector<32x128xbf16>
    %cst_15 = arith.constant dense<0.000000e+00> : vector<255x128xf32>
    %17 = tpu.matmul %15, %16, %cst_15 {dimension_numbers = #tpu.dot_dimension_numbers<[1], [0], [0], [1], [0, 0, 1, 1], [], []>} : vector<255x32xbf16>, vector<32x128xbf16>, vector<255x128xf32> -> vector<255x128xf32>
    %18 = arith.addf %13, %17 : vector<255x128xf32>
    %c0_16 = arith.constant 0 : index
    %c18 = arith.constant 18 : index
    %c0_17 = arith.constant 0 : index
    %19 = vector.load %arg1[%c0_16, %c18, %c0_17] : memref<1x306x32xbf16, #tpu.memory_space<vmem>>, vector<1x255x32xbf16>
    %20 = vector.shape_cast %19 : vector<1x255x32xbf16> to vector<255x32xbf16>
    %c128 = arith.constant 128 : index
    %c0_18 = arith.constant 0 : index
    %21 = vector.load %arg2[%c128, %c0_18] : memref<288x128xbf16, #tpu.memory_space<vmem>>, vector<32x128xbf16>
    %cst_19 = arith.constant dense<0.000000e+00> : vector<255x128xf32>
    %22 = tpu.matmul %20, %21, %cst_19 {dimension_numbers = #tpu.dot_dimension_numbers<[1], [0], [0], [1], [0, 0, 1, 1], [], []>} : vector<255x32xbf16>, vector<32x128xbf16>, vector<255x128xf32> -> vector<255x128xf32>
    %23 = arith.addf %18, %22 : vector<255x128xf32>
    %c0_20 = arith.constant 0 : index
    %c19 = arith.constant 19 : index
    %c0_21 = arith.constant 0 : index
    %24 = vector.load %arg1[%c0_20, %c19, %c0_21] : memref<1x306x32xbf16, #tpu.memory_space<vmem>>, vector<1x255x32xbf16>
    %25 = vector.shape_cast %24 : vector<1x255x32xbf16> to vector<255x32xbf16>
    %c160 = arith.constant 160 : index
    %c0_22 = arith.constant 0 : index
    %26 = vector.load %arg2[%c160, %c0_22] : memref<288x128xbf16, #tpu.memory_space<vmem>>, vector<32x128xbf16>
    %cst_23 = arith.constant dense<0.000000e+00> : vector<255x128xf32>
    %27 = tpu.matmul %25, %26, %cst_23 {dimension_numbers = #tpu.dot_dimension_numbers<[1], [0], [0], [1], [0, 0, 1, 1], [], []>} : vector<255x32xbf16>, vector<32x128xbf16>, vector<255x128xf32> -> vector<255x128xf32>
    %28 = arith.addf %23, %27 : vector<255x128xf32>
    %c0_24 = arith.constant 0 : index
    %c34 = arith.constant 34 : index
    %c0_25 = arith.constant 0 : index
    %29 = vector.load %arg1[%c0_24, %c34, %c0_25] : memref<1x306x32xbf16, #tpu.memory_space<vmem>>, vector<1x255x32xbf16>
    %30 = vector.shape_cast %29 : vector<1x255x32xbf16> to vector<255x32xbf16>
    %c192 = arith.constant 192 : index
    %c0_26 = arith.constant 0 : index
    %31 = vector.load %arg2[%c192, %c0_26] : memref<288x128xbf16, #tpu.memory_space<vmem>>, vector<32x128xbf16>
    %cst_27 = arith.constant dense<0.000000e+00> : vector<255x128xf32>
    %32 = tpu.matmul %30, %31, %cst_27 {dimension_numbers = #tpu.dot_dimension_numbers<[1], [0], [0], [1], [0, 0, 1, 1], [], []>} : vector<255x32xbf16>, vector<32x128xbf16>, vector<255x128xf32> -> vector<255x128xf32>
    %33 = arith.addf %28, %32 : vector<255x128xf32>
    %c0_28 = arith.constant 0 : index
    %c35 = arith.constant 35 : index
    %c0_29 = arith.constant 0 : index
    %34 = vector.load %arg1[%c0_28, %c35, %c0_29] : memref<1x306x32xbf16, #tpu.memory_space<vmem>>, vector<1x255x32xbf16>
    %35 = vector.shape_cast %34 : vector<1x255x32xbf16> to vector<255x32xbf16>
    %c224 = arith.constant 224 : index
    %c0_30 = arith.constant 0 : index
    %36 = vector.load %arg2[%c224, %c0_30] : memref<288x128xbf16, #tpu.memory_space<vmem>>, vector<32x128xbf16>
    %cst_31 = arith.constant dense<0.000000e+00> : vector<255x128xf32>
    %37 = tpu.matmul %35, %36, %cst_31 {dimension_numbers = #tpu.dot_dimension_numbers<[1], [0], [0], [1], [0, 0, 1, 1], [], []>} : vector<255x32xbf16>, vector<32x128xbf16>, vector<255x128xf32> -> vector<255x128xf32>
    %38 = arith.addf %33, %37 : vector<255x128xf32>
    %c0_32 = arith.constant 0 : index
    %c36 = arith.constant 36 : index
    %c0_33 = arith.constant 0 : index
    %39 = vector.load %arg1[%c0_32, %c36, %c0_33] : memref<1x306x32xbf16, #tpu.memory_space<vmem>>, vector<1x255x32xbf16>
    %40 = vector.shape_cast %39 : vector<1x255x32xbf16> to vector<255x32xbf16>
    %c256 = arith.constant 256 : index
    %c0_34 = arith.constant 0 : index
    %41 = vector.load %arg2[%c256, %c0_34] : memref<288x128xbf16, #tpu.memory_space<vmem>>, vector<32x128xbf16>
    %cst_35 = arith.constant dense<0.000000e+00> : vector<255x128xf32>
    %42 = tpu.matmul %40, %41, %cst_35 {dimension_numbers = #tpu.dot_dimension_numbers<[1], [0], [0], [1], [0, 0, 1, 1], [], []>} : vector<255x32xbf16>, vector<32x128xbf16>, vector<255x128xf32> -> vector<255x128xf32>
    %43 = arith.addf %38, %42 : vector<255x128xf32>
    %c0_36 = arith.constant 0 : index
    %c0_37 = arith.constant 0 : index
    %44 = vector.load %arg3[%c0_36, %c0_37] : memref<1x128xf32, #tpu.memory_space<vmem>>, vector<1x128xf32>
    %45 = vector.broadcast %44 : vector<1x128xf32> to vector<255x128xf32>
    %46 = arith.addf %43, %45 : vector<255x128xf32>
    %cst_38 = arith.constant 0.000000e+00 : f32
    %47 = vector.broadcast %cst_38 : f32 to vector<255x128xf32>
    %48 = arith.maximumf %46, %47 : vector<255x128xf32>
    %49 = arith.truncf %48 : vector<255x128xf32> to vector<255x128xbf16>
    %c0_39 = arith.constant 0 : index
    %c0_40 = arith.constant 0 : index
    %c0_41 = arith.constant 0 : index
    %50 = vector.load %arg4[%c0_39, %c0_40, %c0_41] : memref<1x255x128xbf16, #tpu.memory_space<vmem>>, vector<1x255x128xbf16>
    %51 = vector.shape_cast %50 : vector<1x255x128xbf16> to vector<255x128xbf16>
    %52 = vector.shape_cast %49 : vector<255x128xbf16> to vector<1x255x128xbf16>
    tpu.vector_store %arg4[%c0_39, %c0_40, %c0_41], %52 {strides = array<i32>} : memref<1x255x128xbf16, #tpu.memory_space<vmem>>, vector<1x255x128xbf16>,
    return
  }
  func.func @transform_0(%arg0: i32) -> (i32, i32, i32) {
    %c0_i32 = arith.constant 0 : i32
    %c0_i32_0 = arith.constant 0 : i32
    %c0_i32_1 = arith.constant 0 : i32
    return %arg0, %c0_i32, %c0_i32_0 : i32, i32, i32
  }
  func.func @transform_1(%arg0: i32) -> (i32, i32) {
    %c0_i32 = arith.constant 0 : i32
    %c0_i32_0 = arith.constant 0 : i32
    %c0_i32_1 = arith.constant 0 : i32
    return %c0_i32, %c0_i32_0 : i32, i32
  }
  func.func @transform_2(%arg0: i32) -> (i32, i32) {
    %c0_i32 = arith.constant 0 : i32
    %c0_i32_0 = arith.constant 0 : i32
    %c0_i32_1 = arith.constant 0 : i32
    return %c0_i32, %c0_i32_0 : i32, i32
  }
  func.func @transform_3(%arg0: i32) -> (i32, i32, i32) {
    %c0_i32 = arith.constant 0 : i32
    %c0_i32_0 = arith.constant 0 : i32
    %c0_i32_1 = arith.constant 0 : i32
    return %arg0, %c0_i32, %c0_i32_0 : i32, i32, i32
  }
}

module attributes {stable_mosaic.version = 11 : i64} {
  func.func @_maxpool_s1_kernel(%arg0: i32, %arg1: memref<1x240x64xbf16, #tpu.memory_space<vmem>>, %arg2: memref<1x195x64xbf16, #tpu.memory_space<vmem>>) attributes {dimension_semantics = [#tpu.dimension_semantics<parallel>], iteration_bounds = array<i64: 2>, scalar_prefetch = 0 : i64, scratch_operands = 0 : i64, tpu.core_type = #tpu.core_type<tc>, window_params = [{transform_indices = @transform_0, window_bounds = array<i64: 1, 240, 64>}, {transform_indices = @transform_1, window_bounds = array<i64: 1, 195, 64>}]} {
    %c0 = arith.constant 0 : index
    %c0_0 = arith.constant 0 : index
    %c0_1 = arith.constant 0 : index
    %0 = vector.load %arg1[%c0, %c0_0, %c0_1] : memref<1x240x64xbf16, #tpu.memory_space<vmem>>, vector<1x195x64xbf16>
    %1 = vector.shape_cast %0 : vector<1x195x64xbf16> to vector<195x64xbf16>
    %2 = arith.extf %1 : vector<195x64xbf16> to vector<195x64xf32>
    %c0_2 = arith.constant 0 : index
    %c1 = arith.constant 1 : index
    %c0_3 = arith.constant 0 : index
    %3 = vector.load %arg1[%c0_2, %c1, %c0_3] : memref<1x240x64xbf16, #tpu.memory_space<vmem>>, vector<1x195x64xbf16>
    %4 = vector.shape_cast %3 : vector<1x195x64xbf16> to vector<195x64xbf16>
    %5 = arith.extf %4 : vector<195x64xbf16> to vector<195x64xf32>
    %6 = arith.maximumf %2, %5 : vector<195x64xf32>
    %c0_4 = arith.constant 0 : index
    %c2 = arith.constant 2 : index
    %c0_5 = arith.constant 0 : index
    %7 = vector.load %arg1[%c0_4, %c2, %c0_5] : memref<1x240x64xbf16, #tpu.memory_space<vmem>>, vector<1x195x64xbf16>
    %8 = vector.shape_cast %7 : vector<1x195x64xbf16> to vector<195x64xbf16>
    %9 = arith.extf %8 : vector<195x64xbf16> to vector<195x64xf32>
    %10 = arith.maximumf %6, %9 : vector<195x64xf32>
    %c0_6 = arith.constant 0 : index
    %c15 = arith.constant 15 : index
    %c0_7 = arith.constant 0 : index
    %11 = vector.load %arg1[%c0_6, %c15, %c0_7] : memref<1x240x64xbf16, #tpu.memory_space<vmem>>, vector<1x195x64xbf16>
    %12 = vector.shape_cast %11 : vector<1x195x64xbf16> to vector<195x64xbf16>
    %13 = arith.extf %12 : vector<195x64xbf16> to vector<195x64xf32>
    %14 = arith.maximumf %10, %13 : vector<195x64xf32>
    %c0_8 = arith.constant 0 : index
    %c16 = arith.constant 16 : index
    %c0_9 = arith.constant 0 : index
    %15 = vector.load %arg1[%c0_8, %c16, %c0_9] : memref<1x240x64xbf16, #tpu.memory_space<vmem>>, vector<1x195x64xbf16>
    %16 = vector.shape_cast %15 : vector<1x195x64xbf16> to vector<195x64xbf16>
    %17 = arith.extf %16 : vector<195x64xbf16> to vector<195x64xf32>
    %18 = arith.maximumf %14, %17 : vector<195x64xf32>
    %c0_10 = arith.constant 0 : index
    %c17 = arith.constant 17 : index
    %c0_11 = arith.constant 0 : index
    %19 = vector.load %arg1[%c0_10, %c17, %c0_11] : memref<1x240x64xbf16, #tpu.memory_space<vmem>>, vector<1x195x64xbf16>
    %20 = vector.shape_cast %19 : vector<1x195x64xbf16> to vector<195x64xbf16>
    %21 = arith.extf %20 : vector<195x64xbf16> to vector<195x64xf32>
    %22 = arith.maximumf %18, %21 : vector<195x64xf32>
    %c0_12 = arith.constant 0 : index
    %c30 = arith.constant 30 : index
    %c0_13 = arith.constant 0 : index
    %23 = vector.load %arg1[%c0_12, %c30, %c0_13] : memref<1x240x64xbf16, #tpu.memory_space<vmem>>, vector<1x195x64xbf16>
    %24 = vector.shape_cast %23 : vector<1x195x64xbf16> to vector<195x64xbf16>
    %25 = arith.extf %24 : vector<195x64xbf16> to vector<195x64xf32>
    %26 = arith.maximumf %22, %25 : vector<195x64xf32>
    %c0_14 = arith.constant 0 : index
    %c31 = arith.constant 31 : index
    %c0_15 = arith.constant 0 : index
    %27 = vector.load %arg1[%c0_14, %c31, %c0_15] : memref<1x240x64xbf16, #tpu.memory_space<vmem>>, vector<1x195x64xbf16>
    %28 = vector.shape_cast %27 : vector<1x195x64xbf16> to vector<195x64xbf16>
    %29 = arith.extf %28 : vector<195x64xbf16> to vector<195x64xf32>
    %30 = arith.maximumf %26, %29 : vector<195x64xf32>
    %c0_16 = arith.constant 0 : index
    %c32 = arith.constant 32 : index
    %c0_17 = arith.constant 0 : index
    %31 = vector.load %arg1[%c0_16, %c32, %c0_17] : memref<1x240x64xbf16, #tpu.memory_space<vmem>>, vector<1x195x64xbf16>
    %32 = vector.shape_cast %31 : vector<1x195x64xbf16> to vector<195x64xbf16>
    %33 = arith.extf %32 : vector<195x64xbf16> to vector<195x64xf32>
    %34 = arith.maximumf %30, %33 : vector<195x64xf32>
    %35 = arith.truncf %34 : vector<195x64xf32> to vector<195x64xbf16>
    %c0_18 = arith.constant 0 : index
    %c0_19 = arith.constant 0 : index
    %c0_20 = arith.constant 0 : index
    %36 = vector.load %arg2[%c0_18, %c0_19, %c0_20] : memref<1x195x64xbf16, #tpu.memory_space<vmem>>, vector<1x195x64xbf16>
    %37 = vector.shape_cast %36 : vector<1x195x64xbf16> to vector<195x64xbf16>
    %38 = vector.shape_cast %35 : vector<195x64xbf16> to vector<1x195x64xbf16>
    tpu.vector_store %arg2[%c0_18, %c0_19, %c0_20], %38 {strides = array<i32>} : memref<1x195x64xbf16, #tpu.memory_space<vmem>>, vector<1x195x64xbf16>,
    return
  }
  func.func @transform_0(%arg0: i32) -> (i32, i32, i32) {
    %c0_i32 = arith.constant 0 : i32
    %c0_i32_0 = arith.constant 0 : i32
    %c0_i32_1 = arith.constant 0 : i32
    return %arg0, %c0_i32, %c0_i32_0 : i32, i32, i32
  }
  func.func @transform_1(%arg0: i32) -> (i32, i32, i32) {
    %c0_i32 = arith.constant 0 : i32
    %c0_i32_0 = arith.constant 0 : i32
    %c0_i32_1 = arith.constant 0 : i32
    return %arg0, %c0_i32, %c0_i32_0 : i32, i32, i32
  }
}

module attributes {stable_mosaic.version = 11 : i64} {
  func.func @_matmul_bias_relu_kernel(%arg0: i32, %arg1: memref<98x64xbf16, #tpu.memory_space<vmem>>, %arg2: memref<64x128xbf16, #tpu.memory_space<vmem>>, %arg3: memref<1x128xf32, #tpu.memory_space<vmem>>, %arg4: memref<98x128xbf16, #tpu.memory_space<vmem>>) attributes {dimension_semantics = [#tpu.dimension_semantics<parallel>], iteration_bounds = array<i64: 1>, scalar_prefetch = 0 : i64, scratch_operands = 0 : i64, tpu.core_type = #tpu.core_type<tc>, window_params = [{transform_indices = @transform_0, window_bounds = array<i64: 98, 64>}, {pipeline_mode = #tpu.pipeline_mode<synchronous>, transform_indices = @transform_1, window_bounds = array<i64: 64, 128>}, {pipeline_mode = #tpu.pipeline_mode<synchronous>, transform_indices = @transform_2, window_bounds = array<i64: 1, 128>}, {transform_indices = @transform_3, window_bounds = array<i64: 98, 128>}]} {
    %c0 = arith.constant 0 : index
    %c0_0 = arith.constant 0 : index
    %0 = vector.load %arg1[%c0, %c0_0] : memref<98x64xbf16, #tpu.memory_space<vmem>>, vector<98x64xbf16>
    %c0_1 = arith.constant 0 : index
    %c0_2 = arith.constant 0 : index
    %1 = vector.load %arg2[%c0_1, %c0_2] : memref<64x128xbf16, #tpu.memory_space<vmem>>, vector<64x128xbf16>
    %cst = arith.constant dense<0.000000e+00> : vector<98x128xf32>
    %2 = tpu.matmul %0, %1, %cst {dimension_numbers = #tpu.dot_dimension_numbers<[1], [0], [0], [1], [0, 0, 1, 1], [], []>} : vector<98x64xbf16>, vector<64x128xbf16>, vector<98x128xf32> -> vector<98x128xf32>
    %c0_3 = arith.constant 0 : index
    %c0_4 = arith.constant 0 : index
    %3 = vector.load %arg3[%c0_3, %c0_4] : memref<1x128xf32, #tpu.memory_space<vmem>>, vector<1x128xf32>
    %4 = vector.broadcast %3 : vector<1x128xf32> to vector<98x128xf32>
    %5 = arith.addf %2, %4 : vector<98x128xf32>
    %cst_5 = arith.constant 0.000000e+00 : f32
    %6 = vector.broadcast %cst_5 : f32 to vector<98x128xf32>
    %7 = arith.maximumf %5, %6 : vector<98x128xf32>
    %8 = arith.truncf %7 : vector<98x128xf32> to vector<98x128xbf16>
    %c0_6 = arith.constant 0 : index
    %c0_7 = arith.constant 0 : index
    %9 = vector.load %arg4[%c0_6, %c0_7] : memref<98x128xbf16, #tpu.memory_space<vmem>>, vector<98x128xbf16>
    tpu.vector_store %arg4[%c0_6, %c0_7], %8 {strides = array<i32>} : memref<98x128xbf16, #tpu.memory_space<vmem>>, vector<98x128xbf16>,
    return
  }
  func.func @transform_0(%arg0: i32) -> (i32, i32) {
    %c0_i32 = arith.constant 0 : i32
    %c0_i32_0 = arith.constant 0 : i32
    return %arg0, %c0_i32 : i32, i32
  }
  func.func @transform_1(%arg0: i32) -> (i32, i32) {
    %c0_i32 = arith.constant 0 : i32
    %c0_i32_0 = arith.constant 0 : i32
    %c0_i32_1 = arith.constant 0 : i32
    return %c0_i32, %c0_i32_0 : i32, i32
  }
  func.func @transform_2(%arg0: i32) -> (i32, i32) {
    %c0_i32 = arith.constant 0 : i32
    %c0_i32_0 = arith.constant 0 : i32
    %c0_i32_1 = arith.constant 0 : i32
    return %c0_i32, %c0_i32_0 : i32, i32
  }
  func.func @transform_3(%arg0: i32) -> (i32, i32) {
    %c0_i32 = arith.constant 0 : i32
    %c0_i32_0 = arith.constant 0 : i32
    return %arg0, %c0_i32 : i32, i32
  }
}

module attributes {stable_mosaic.version = 11 : i64} {
  func.func @_conv_direct_kernel(%arg0: i32, %arg1: memref<1x56x80xbf16, #tpu.memory_space<vmem>>, %arg2: memref<720x256xbf16, #tpu.memory_space<vmem>>, %arg3: memref<1x256xf32, #tpu.memory_space<vmem>>, %arg4: memref<1x35x256xbf16, #tpu.memory_space<vmem>>) attributes {dimension_semantics = [#tpu.dimension_semantics<parallel>], iteration_bounds = array<i64: 2>, scalar_prefetch = 0 : i64, scratch_operands = 0 : i64, tpu.core_type = #tpu.core_type<tc>, window_params = [{transform_indices = @transform_0, window_bounds = array<i64: 1, 56, 80>}, {pipeline_mode = #tpu.pipeline_mode<synchronous>, transform_indices = @transform_1, window_bounds = array<i64: 720, 256>}, {pipeline_mode = #tpu.pipeline_mode<synchronous>, transform_indices = @transform_2, window_bounds = array<i64: 1, 256>}, {transform_indices = @transform_3, window_bounds = array<i64: 1, 35, 256>}]} {
    %c0 = arith.constant 0 : index
    %c0_0 = arith.constant 0 : index
    %c0_1 = arith.constant 0 : index
    %0 = vector.load %arg1[%c0, %c0_0, %c0_1] : memref<1x56x80xbf16, #tpu.memory_space<vmem>>, vector<1x35x80xbf16>
    %1 = vector.shape_cast %0 : vector<1x35x80xbf16> to vector<35x80xbf16>
    %c0_2 = arith.constant 0 : index
    %c0_3 = arith.constant 0 : index
    %2 = vector.load %arg2[%c0_2, %c0_3] : memref<720x256xbf16, #tpu.memory_space<vmem>>, vector<80x256xbf16>
    %cst = arith.constant dense<0.000000e+00> : vector<35x256xf32>
    %3 = tpu.matmul %1, %2, %cst {dimension_numbers = #tpu.dot_dimension_numbers<[1], [0], [0], [1], [0, 0, 1, 1], [], []>} : vector<35x80xbf16>, vector<80x256xbf16>, vector<35x256xf32> -> vector<35x256xf32>
    %c0_4 = arith.constant 0 : index
    %c1 = arith.constant 1 : index
    %c0_5 = arith.constant 0 : index
    %4 = vector.load %arg1[%c0_4, %c1, %c0_5] : memref<1x56x80xbf16, #tpu.memory_space<vmem>>, vector<1x35x80xbf16>
    %5 = vector.shape_cast %4 : vector<1x35x80xbf16> to vector<35x80xbf16>
    %c80 = arith.constant 80 : index
    %c0_6 = arith.constant 0 : index
    %6 = vector.load %arg2[%c80, %c0_6] : memref<720x256xbf16, #tpu.memory_space<vmem>>, vector<80x256xbf16>
    %cst_7 = arith.constant dense<0.000000e+00> : vector<35x256xf32>
    %7 = tpu.matmul %5, %6, %cst_7 {dimension_numbers = #tpu.dot_dimension_numbers<[1], [0], [0], [1], [0, 0, 1, 1], [], []>} : vector<35x80xbf16>, vector<80x256xbf16>, vector<35x256xf32> -> vector<35x256xf32>
    %8 = arith.addf %3, %7 : vector<35x256xf32>
    %c0_8 = arith.constant 0 : index
    %c2 = arith.constant 2 : index
    %c0_9 = arith.constant 0 : index
    %9 = vector.load %arg1[%c0_8, %c2, %c0_9] : memref<1x56x80xbf16, #tpu.memory_space<vmem>>, vector<1x35x80xbf16>
    %10 = vector.shape_cast %9 : vector<1x35x80xbf16> to vector<35x80xbf16>
    %c160 = arith.constant 160 : index
    %c0_10 = arith.constant 0 : index
    %11 = vector.load %arg2[%c160, %c0_10] : memref<720x256xbf16, #tpu.memory_space<vmem>>, vector<80x256xbf16>
    %cst_11 = arith.constant dense<0.000000e+00> : vector<35x256xf32>
    %12 = tpu.matmul %10, %11, %cst_11 {dimension_numbers = #tpu.dot_dimension_numbers<[1], [0], [0], [1], [0, 0, 1, 1], [], []>} : vector<35x80xbf16>, vector<80x256xbf16>, vector<35x256xf32> -> vector<35x256xf32>
    %13 = arith.addf %8, %12 : vector<35x256xf32>
    %c0_12 = arith.constant 0 : index
    %c7 = arith.constant 7 : index
    %c0_13 = arith.constant 0 : index
    %14 = vector.load %arg1[%c0_12, %c7, %c0_13] : memref<1x56x80xbf16, #tpu.memory_space<vmem>>, vector<1x35x80xbf16>
    %15 = vector.shape_cast %14 : vector<1x35x80xbf16> to vector<35x80xbf16>
    %c240 = arith.constant 240 : index
    %c0_14 = arith.constant 0 : index
    %16 = vector.load %arg2[%c240, %c0_14] : memref<720x256xbf16, #tpu.memory_space<vmem>>, vector<80x256xbf16>
    %cst_15 = arith.constant dense<0.000000e+00> : vector<35x256xf32>
    %17 = tpu.matmul %15, %16, %cst_15 {dimension_numbers = #tpu.dot_dimension_numbers<[1], [0], [0], [1], [0, 0, 1, 1], [], []>} : vector<35x80xbf16>, vector<80x256xbf16>, vector<35x256xf32> -> vector<35x256xf32>
    %18 = arith.addf %13, %17 : vector<35x256xf32>
    %c0_16 = arith.constant 0 : index
    %c8 = arith.constant 8 : index
    %c0_17 = arith.constant 0 : index
    %19 = vector.load %arg1[%c0_16, %c8, %c0_17] : memref<1x56x80xbf16, #tpu.memory_space<vmem>>, vector<1x35x80xbf16>
    %20 = vector.shape_cast %19 : vector<1x35x80xbf16> to vector<35x80xbf16>
    %c320 = arith.constant 320 : index
    %c0_18 = arith.constant 0 : index
    %21 = vector.load %arg2[%c320, %c0_18] : memref<720x256xbf16, #tpu.memory_space<vmem>>, vector<80x256xbf16>
    %cst_19 = arith.constant dense<0.000000e+00> : vector<35x256xf32>
    %22 = tpu.matmul %20, %21, %cst_19 {dimension_numbers = #tpu.dot_dimension_numbers<[1], [0], [0], [1], [0, 0, 1, 1], [], []>} : vector<35x80xbf16>, vector<80x256xbf16>, vector<35x256xf32> -> vector<35x256xf32>
    %23 = arith.addf %18, %22 : vector<35x256xf32>
    %c0_20 = arith.constant 0 : index
    %c9 = arith.constant 9 : index
    %c0_21 = arith.constant 0 : index
    %24 = vector.load %arg1[%c0_20, %c9, %c0_21] : memref<1x56x80xbf16, #tpu.memory_space<vmem>>, vector<1x35x80xbf16>
    %25 = vector.shape_cast %24 : vector<1x35x80xbf16> to vector<35x80xbf16>
    %c400 = arith.constant 400 : index
    %c0_22 = arith.constant 0 : index
    %26 = vector.load %arg2[%c400, %c0_22] : memref<720x256xbf16, #tpu.memory_space<vmem>>, vector<80x256xbf16>
    %cst_23 = arith.constant dense<0.000000e+00> : vector<35x256xf32>
    %27 = tpu.matmul %25, %26, %cst_23 {dimension_numbers = #tpu.dot_dimension_numbers<[1], [0], [0], [1], [0, 0, 1, 1], [], []>} : vector<35x80xbf16>, vector<80x256xbf16>, vector<35x256xf32> -> vector<35x256xf32>
    %28 = arith.addf %23, %27 : vector<35x256xf32>
    %c0_24 = arith.constant 0 : index
    %c14 = arith.constant 14 : index
    %c0_25 = arith.constant 0 : index
    %29 = vector.load %arg1[%c0_24, %c14, %c0_25] : memref<1x56x80xbf16, #tpu.memory_space<vmem>>, vector<1x35x80xbf16>
    %30 = vector.shape_cast %29 : vector<1x35x80xbf16> to vector<35x80xbf16>
    %c480 = arith.constant 480 : index
    %c0_26 = arith.constant 0 : index
    %31 = vector.load %arg2[%c480, %c0_26] : memref<720x256xbf16, #tpu.memory_space<vmem>>, vector<80x256xbf16>
    %cst_27 = arith.constant dense<0.000000e+00> : vector<35x256xf32>
    %32 = tpu.matmul %30, %31, %cst_27 {dimension_numbers = #tpu.dot_dimension_numbers<[1], [0], [0], [1], [0, 0, 1, 1], [], []>} : vector<35x80xbf16>, vector<80x256xbf16>, vector<35x256xf32> -> vector<35x256xf32>
    %33 = arith.addf %28, %32 : vector<35x256xf32>
    %c0_28 = arith.constant 0 : index
    %c15 = arith.constant 15 : index
    %c0_29 = arith.constant 0 : index
    %34 = vector.load %arg1[%c0_28, %c15, %c0_29] : memref<1x56x80xbf16, #tpu.memory_space<vmem>>, vector<1x35x80xbf16>
    %35 = vector.shape_cast %34 : vector<1x35x80xbf16> to vector<35x80xbf16>
    %c560 = arith.constant 560 : index
    %c0_30 = arith.constant 0 : index
    %36 = vector.load %arg2[%c560, %c0_30] : memref<720x256xbf16, #tpu.memory_space<vmem>>, vector<80x256xbf16>
    %cst_31 = arith.constant dense<0.000000e+00> : vector<35x256xf32>
    %37 = tpu.matmul %35, %36, %cst_31 {dimension_numbers = #tpu.dot_dimension_numbers<[1], [0], [0], [1], [0, 0, 1, 1], [], []>} : vector<35x80xbf16>, vector<80x256xbf16>, vector<35x256xf32> -> vector<35x256xf32>
    %38 = arith.addf %33, %37 : vector<35x256xf32>
    %c0_32 = arith.constant 0 : index
    %c16 = arith.constant 16 : index
    %c0_33 = arith.constant 0 : index
    %39 = vector.load %arg1[%c0_32, %c16, %c0_33] : memref<1x56x80xbf16, #tpu.memory_space<vmem>>, vector<1x35x80xbf16>
    %40 = vector.shape_cast %39 : vector<1x35x80xbf16> to vector<35x80xbf16>
    %c640 = arith.constant 640 : index
    %c0_34 = arith.constant 0 : index
    %41 = vector.load %arg2[%c640, %c0_34] : memref<720x256xbf16, #tpu.memory_space<vmem>>, vector<80x256xbf16>
    %cst_35 = arith.constant dense<0.000000e+00> : vector<35x256xf32>
    %42 = tpu.matmul %40, %41, %cst_35 {dimension_numbers = #tpu.dot_dimension_numbers<[1], [0], [0], [1], [0, 0, 1, 1], [], []>} : vector<35x80xbf16>, vector<80x256xbf16>, vector<35x256xf32> -> vector<35x256xf32>
    %43 = arith.addf %38, %42 : vector<35x256xf32>
    %c0_36 = arith.constant 0 : index
    %c0_37 = arith.constant 0 : index
    %44 = vector.load %arg3[%c0_36, %c0_37] : memref<1x256xf32, #tpu.memory_space<vmem>>, vector<1x256xf32>
    %45 = vector.broadcast %44 : vector<1x256xf32> to vector<35x256xf32>
    %46 = arith.addf %43, %45 : vector<35x256xf32>
    %cst_38 = arith.constant 0.000000e+00 : f32
    %47 = vector.broadcast %cst_38 : f32 to vector<35x256xf32>
    %48 = arith.maximumf %46, %47 : vector<35x256xf32>
    %49 = arith.truncf %48 : vector<35x256xf32> to vector<35x256xbf16>
    %c0_39 = arith.constant 0 : index
    %c0_40 = arith.constant 0 : index
    %c0_41 = arith.constant 0 : index
    %50 = vector.load %arg4[%c0_39, %c0_40, %c0_41] : memref<1x35x256xbf16, #tpu.memory_space<vmem>>, vector<1x35x256xbf16>
    %51 = vector.shape_cast %50 : vector<1x35x256xbf16> to vector<35x256xbf16>
    %52 = vector.shape_cast %49 : vector<35x256xbf16> to vector<1x35x256xbf16>
    tpu.vector_store %arg4[%c0_39, %c0_40, %c0_41], %52 {strides = array<i32>} : memref<1x35x256xbf16, #tpu.memory_space<vmem>>, vector<1x35x256xbf16>,
    return
  }
  func.func @transform_0(%arg0: i32) -> (i32, i32, i32) {
    %c0_i32 = arith.constant 0 : i32
    %c0_i32_0 = arith.constant 0 : i32
    %c0_i32_1 = arith.constant 0 : i32
    return %arg0, %c0_i32, %c0_i32_0 : i32, i32, i32
  }
  func.func @transform_1(%arg0: i32) -> (i32, i32) {
    %c0_i32 = arith.constant 0 : i32
    %c0_i32_0 = arith.constant 0 : i32
    %c0_i32_1 = arith.constant 0 : i32
    return %c0_i32, %c0_i32_0 : i32, i32
  }
  func.func @transform_2(%arg0: i32) -> (i32, i32) {
    %c0_i32 = arith.constant 0 : i32
    %c0_i32_0 = arith.constant 0 : i32
    %c0_i32_1 = arith.constant 0 : i32
    return %c0_i32, %c0_i32_0 : i32, i32
  }
  func.func @transform_3(%arg0: i32) -> (i32, i32, i32) {
    %c0_i32 = arith.constant 0 : i32
    %c0_i32_0 = arith.constant 0 : i32
    %c0_i32_1 = arith.constant 0 : i32
    return %arg0, %c0_i32, %c0_i32_0 : i32, i32, i32
  }
}

module attributes {stable_mosaic.version = 11 : i64} {
  func.func @_maxpool_s1_kernel(%arg0: i32, %arg1: memref<1x30x192xbf16, #tpu.memory_space<vmem>>, %arg2: memref<1x15x192xbf16, #tpu.memory_space<vmem>>) attributes {dimension_semantics = [#tpu.dimension_semantics<parallel>], iteration_bounds = array<i64: 2>, scalar_prefetch = 0 : i64, scratch_operands = 0 : i64, tpu.core_type = #tpu.core_type<tc>, window_params = [{transform_indices = @transform_0, window_bounds = array<i64: 1, 30, 192>}, {transform_indices = @transform_1, window_bounds = array<i64: 1, 15, 192>}]} {
    %c0 = arith.constant 0 : index
    %c0_0 = arith.constant 0 : index
    %c0_1 = arith.constant 0 : index
    %0 = vector.load %arg1[%c0, %c0_0, %c0_1] : memref<1x30x192xbf16, #tpu.memory_space<vmem>>, vector<1x15x192xbf16>
    %1 = vector.shape_cast %0 : vector<1x15x192xbf16> to vector<15x192xbf16>
    %2 = arith.extf %1 : vector<15x192xbf16> to vector<15x192xf32>
    %c0_2 = arith.constant 0 : index
    %c1 = arith.constant 1 : index
    %c0_3 = arith.constant 0 : index
    %3 = vector.load %arg1[%c0_2, %c1, %c0_3] : memref<1x30x192xbf16, #tpu.memory_space<vmem>>, vector<1x15x192xbf16>
    %4 = vector.shape_cast %3 : vector<1x15x192xbf16> to vector<15x192xbf16>
    %5 = arith.extf %4 : vector<15x192xbf16> to vector<15x192xf32>
    %6 = arith.maximumf %2, %5 : vector<15x192xf32>
    %c0_4 = arith.constant 0 : index
    %c2 = arith.constant 2 : index
    %c0_5 = arith.constant 0 : index
    %7 = vector.load %arg1[%c0_4, %c2, %c0_5] : memref<1x30x192xbf16, #tpu.memory_space<vmem>>, vector<1x15x192xbf16>
    %8 = vector.shape_cast %7 : vector<1x15x192xbf16> to vector<15x192xbf16>
    %9 = arith.extf %8 : vector<15x192xbf16> to vector<15x192xf32>
    %10 = arith.maximumf %6, %9 : vector<15x192xf32>
    %c0_6 = arith.constant 0 : index
    %c5 = arith.constant 5 : index
    %c0_7 = arith.constant 0 : index
    %11 = vector.load %arg1[%c0_6, %c5, %c0_7] : memref<1x30x192xbf16, #tpu.memory_space<vmem>>, vector<1x15x192xbf16>
    %12 = vector.shape_cast %11 : vector<1x15x192xbf16> to vector<15x192xbf16>
    %13 = arith.extf %12 : vector<15x192xbf16> to vector<15x192xf32>
    %14 = arith.maximumf %10, %13 : vector<15x192xf32>
    %c0_8 = arith.constant 0 : index
    %c6 = arith.constant 6 : index
    %c0_9 = arith.constant 0 : index
    %15 = vector.load %arg1[%c0_8, %c6, %c0_9] : memref<1x30x192xbf16, #tpu.memory_space<vmem>>, vector<1x15x192xbf16>
    %16 = vector.shape_cast %15 : vector<1x15x192xbf16> to vector<15x192xbf16>
    %17 = arith.extf %16 : vector<15x192xbf16> to vector<15x192xf32>
    %18 = arith.maximumf %14, %17 : vector<15x192xf32>
    %c0_10 = arith.constant 0 : index
    %c7 = arith.constant 7 : index
    %c0_11 = arith.constant 0 : index
    %19 = vector.load %arg1[%c0_10, %c7, %c0_11] : memref<1x30x192xbf16, #tpu.memory_space<vmem>>, vector<1x15x192xbf16>
    %20 = vector.shape_cast %19 : vector<1x15x192xbf16> to vector<15x192xbf16>
    %21 = arith.extf %20 : vector<15x192xbf16> to vector<15x192xf32>
    %22 = arith.maximumf %18, %21 : vector<15x192xf32>
    %c0_12 = arith.constant 0 : index
    %c10 = arith.constant 10 : index
    %c0_13 = arith.constant 0 : index
    %23 = vector.load %arg1[%c0_12, %c10, %c0_13] : memref<1x30x192xbf16, #tpu.memory_space<vmem>>, vector<1x15x192xbf16>
    %24 = vector.shape_cast %23 : vector<1x15x192xbf16> to vector<15x192xbf16>
    %25 = arith.extf %24 : vector<15x192xbf16> to vector<15x192xf32>
    %26 = arith.maximumf %22, %25 : vector<15x192xf32>
    %c0_14 = arith.constant 0 : index
    %c11 = arith.constant 11 : index
    %c0_15 = arith.constant 0 : index
    %27 = vector.load %arg1[%c0_14, %c11, %c0_15] : memref<1x30x192xbf16, #tpu.memory_space<vmem>>, vector<1x15x192xbf16>
    %28 = vector.shape_cast %27 : vector<1x15x192xbf16> to vector<15x192xbf16>
    %29 = arith.extf %28 : vector<15x192xbf16> to vector<15x192xf32>
    %30 = arith.maximumf %26, %29 : vector<15x192xf32>
    %c0_16 = arith.constant 0 : index
    %c12 = arith.constant 12 : index
    %c0_17 = arith.constant 0 : index
    %31 = vector.load %arg1[%c0_16, %c12, %c0_17] : memref<1x30x192xbf16, #tpu.memory_space<vmem>>, vector<1x15x192xbf16>
    %32 = vector.shape_cast %31 : vector<1x15x192xbf16> to vector<15x192xbf16>
    %33 = arith.extf %32 : vector<15x192xbf16> to vector<15x192xf32>
    %34 = arith.maximumf %30, %33 : vector<15x192xf32>
    %35 = arith.truncf %34 : vector<15x192xf32> to vector<15x192xbf16>
    %c0_18 = arith.constant 0 : index
    %c0_19 = arith.constant 0 : index
    %c0_20 = arith.constant 0 : index
    %36 = vector.load %arg2[%c0_18, %c0_19, %c0_20] : memref<1x15x192xbf16, #tpu.memory_space<vmem>>, vector<1x15x192xbf16>
    %37 = vector.shape_cast %36 : vector<1x15x192xbf16> to vector<15x192xbf16>
    %38 = vector.shape_cast %35 : vector<15x192xbf16> to vector<1x15x192xbf16>
    tpu.vector_store %arg2[%c0_18, %c0_19, %c0_20], %38 {strides = array<i32>} : memref<1x15x192xbf16, #tpu.memory_space<vmem>>, vector<1x15x192xbf16>,
    return
  }
  func.func @transform_0(%arg0: i32) -> (i32, i32, i32) {
    %c0_i32 = arith.constant 0 : i32
    %c0_i32_0 = arith.constant 0 : i32
    %c0_i32_1 = arith.constant 0 : i32
    return %arg0, %c0_i32, %c0_i32_0 : i32, i32, i32
  }
  func.func @transform_1(%arg0: i32) -> (i32, i32, i32) {
    %c0_i32 = arith.constant 0 : i32
    %c0_i32_0 = arith.constant 0 : i32
    %c0_i32_1 = arith.constant 0 : i32
    return %arg0, %c0_i32, %c0_i32_0 : i32, i32, i32
  }
}

module attributes {stable_mosaic.version = 11 : i64} {
  func.func @_matmul_bias_relu_kernel(%arg0: i32, %arg1: memref<8x192xbf16, #tpu.memory_space<vmem>>, %arg2: memref<192x256xbf16, #tpu.memory_space<vmem>>, %arg3: memref<1x256xf32, #tpu.memory_space<vmem>>, %arg4: memref<8x256xbf16, #tpu.memory_space<vmem>>) attributes {dimension_semantics = [#tpu.dimension_semantics<parallel>], iteration_bounds = array<i64: 1>, scalar_prefetch = 0 : i64, scratch_operands = 0 : i64, tpu.core_type = #tpu.core_type<tc>, window_params = [{transform_indices = @transform_0, window_bounds = array<i64: 8, 192>}, {pipeline_mode = #tpu.pipeline_mode<synchronous>, transform_indices = @transform_1, window_bounds = array<i64: 192, 256>}, {pipeline_mode = #tpu.pipeline_mode<synchronous>, transform_indices = @transform_2, window_bounds = array<i64: 1, 256>}, {transform_indices = @transform_3, window_bounds = array<i64: 8, 256>}]} {
    %c0 = arith.constant 0 : index
    %c0_0 = arith.constant 0 : index
    %0 = vector.load %arg1[%c0, %c0_0] : memref<8x192xbf16, #tpu.memory_space<vmem>>, vector<8x192xbf16>
    %c0_1 = arith.constant 0 : index
    %c0_2 = arith.constant 0 : index
    %1 = vector.load %arg2[%c0_1, %c0_2] : memref<192x256xbf16, #tpu.memory_space<vmem>>, vector<192x256xbf16>
    %cst = arith.constant dense<0.000000e+00> : vector<8x256xf32>
    %2 = tpu.matmul %0, %1, %cst {dimension_numbers = #tpu.dot_dimension_numbers<[1], [0], [0], [1], [0, 0, 1, 1], [], []>} : vector<8x192xbf16>, vector<192x256xbf16>, vector<8x256xf32> -> vector<8x256xf32>
    %c0_3 = arith.constant 0 : index
    %c0_4 = arith.constant 0 : index
    %3 = vector.load %arg3[%c0_3, %c0_4] : memref<1x256xf32, #tpu.memory_space<vmem>>, vector<1x256xf32>
    %4 = vector.broadcast %3 : vector<1x256xf32> to vector<8x256xf32>
    %5 = arith.addf %2, %4 : vector<8x256xf32>
    %cst_5 = arith.constant 0.000000e+00 : f32
    %6 = vector.broadcast %cst_5 : f32 to vector<8x256xf32>
    %7 = arith.maximumf %5, %6 : vector<8x256xf32>
    %8 = arith.truncf %7 : vector<8x256xf32> to vector<8x256xbf16>
    %c0_6 = arith.constant 0 : index
    %c0_7 = arith.constant 0 : index
    %9 = vector.load %arg4[%c0_6, %c0_7] : memref<8x256xbf16, #tpu.memory_space<vmem>>, vector<8x256xbf16>
    tpu.vector_store %arg4[%c0_6, %c0_7], %8 {strides = array<i32>} : memref<8x256xbf16, #tpu.memory_space<vmem>>, vector<8x256xbf16>,
    return
  }
  func.func @transform_0(%arg0: i32) -> (i32, i32) {
    %c0_i32 = arith.constant 0 : i32
    %c0_i32_0 = arith.constant 0 : i32
    return %arg0, %c0_i32 : i32, i32
  }
  func.func @transform_1(%arg0: i32) -> (i32, i32) {
    %c0_i32 = arith.constant 0 : i32
    %c0_i32_0 = arith.constant 0 : i32
    %c0_i32_1 = arith.constant 0 : i32
    return %c0_i32, %c0_i32_0 : i32, i32
  }
  func.func @transform_2(%arg0: i32) -> (i32, i32) {
    %c0_i32 = arith.constant 0 : i32
    %c0_i32_0 = arith.constant 0 : i32
    %c0_i32_1 = arith.constant 0 : i32
    return %c0_i32, %c0_i32_0 : i32, i32
  }
  func.func @transform_3(%arg0: i32) -> (i32, i32) {
    %c0_i32 = arith.constant 0 : i32
    %c0_i32_0 = arith.constant 0 : i32
    return %arg0, %c0_i32 : i32, i32
  }
}

module attributes {stable_mosaic.version = 11 : i64} {
  func.func @_conv_direct_kernel(%arg0: i32, %arg1: memref<1x20x64xbf16, #tpu.memory_space<vmem>>, %arg2: memref<576x128xbf16, #tpu.memory_space<vmem>>, %arg3: memref<1x128xf32, #tpu.memory_space<vmem>>, %arg4: memref<1x8x128xbf16, #tpu.memory_space<vmem>>) attributes {dimension_semantics = [#tpu.dimension_semantics<parallel>], iteration_bounds = array<i64: 2>, scalar_prefetch = 0 : i64, scratch_operands = 0 : i64, tpu.core_type = #tpu.core_type<tc>, window_params = [{transform_indices = @transform_0, window_bounds = array<i64: 1, 20, 64>}, {pipeline_mode = #tpu.pipeline_mode<synchronous>, transform_indices = @transform_1, window_bounds = array<i64: 576, 128>}, {pipeline_mode = #tpu.pipeline_mode<synchronous>, transform_indices = @transform_2, window_bounds = array<i64: 1, 128>}, {transform_indices = @transform_3, window_bounds = array<i64: 1, 8, 128>}]} {
    %c0 = arith.constant 0 : index
    %c0_0 = arith.constant 0 : index
    %c0_1 = arith.constant 0 : index
    %0 = vector.load %arg1[%c0, %c0_0, %c0_1] : memref<1x20x64xbf16, #tpu.memory_space<vmem>>, vector<1x8x64xbf16>
    %1 = vector.shape_cast %0 : vector<1x8x64xbf16> to vector<8x64xbf16>
    %c0_2 = arith.constant 0 : index
    %c0_3 = arith.constant 0 : index
    %2 = vector.load %arg2[%c0_2, %c0_3] : memref<576x128xbf16, #tpu.memory_space<vmem>>, vector<64x128xbf16>
    %cst = arith.constant dense<0.000000e+00> : vector<8x128xf32>
    %3 = tpu.matmul %1, %2, %cst {dimension_numbers = #tpu.dot_dimension_numbers<[1], [0], [0], [1], [0, 0, 1, 1], [], []>} : vector<8x64xbf16>, vector<64x128xbf16>, vector<8x128xf32> -> vector<8x128xf32>
    %c0_4 = arith.constant 0 : index
    %c1 = arith.constant 1 : index
    %c0_5 = arith.constant 0 : index
    %4 = vector.load %arg1[%c0_4, %c1, %c0_5] : memref<1x20x64xbf16, #tpu.memory_space<vmem>>, vector<1x8x64xbf16>
    %5 = vector.shape_cast %4 : vector<1x8x64xbf16> to vector<8x64xbf16>
    %c64 = arith.constant 64 : index
    %c0_6 = arith.constant 0 : index
    %6 = vector.load %arg2[%c64, %c0_6] : memref<576x128xbf16, #tpu.memory_space<vmem>>, vector<64x128xbf16>
    %cst_7 = arith.constant dense<0.000000e+00> : vector<8x128xf32>
    %7 = tpu.matmul %5, %6, %cst_7 {dimension_numbers = #tpu.dot_dimension_numbers<[1], [0], [0], [1], [0, 0, 1, 1], [], []>} : vector<8x64xbf16>, vector<64x128xbf16>, vector<8x128xf32> -> vector<8x128xf32>
    %8 = arith.addf %3, %7 : vector<8x128xf32>
    %c0_8 = arith.constant 0 : index
    %c2 = arith.constant 2 : index
    %c0_9 = arith.constant 0 : index
    %9 = vector.load %arg1[%c0_8, %c2, %c0_9] : memref<1x20x64xbf16, #tpu.memory_space<vmem>>, vector<1x8x64xbf16>
    %10 = vector.shape_cast %9 : vector<1x8x64xbf16> to vector<8x64xbf16>
    %c128 = arith.constant 128 : index
    %c0_10 = arith.constant 0 : index
    %11 = vector.load %arg2[%c128, %c0_10] : memref<576x128xbf16, #tpu.memory_space<vmem>>, vector<64x128xbf16>
    %cst_11 = arith.constant dense<0.000000e+00> : vector<8x128xf32>
    %12 = tpu.matmul %10, %11, %cst_11 {dimension_numbers = #tpu.dot_dimension_numbers<[1], [0], [0], [1], [0, 0, 1, 1], [], []>} : vector<8x64xbf16>, vector<64x128xbf16>, vector<8x128xf32> -> vector<8x128xf32>
    %13 = arith.addf %8, %12 : vector<8x128xf32>
    %c0_12 = arith.constant 0 : index
    %c4 = arith.constant 4 : index
    %c0_13 = arith.constant 0 : index
    %14 = vector.load %arg1[%c0_12, %c4, %c0_13] : memref<1x20x64xbf16, #tpu.memory_space<vmem>>, vector<1x8x64xbf16>
    %15 = vector.shape_cast %14 : vector<1x8x64xbf16> to vector<8x64xbf16>
    %c192 = arith.constant 192 : index
    %c0_14 = arith.constant 0 : index
    %16 = vector.load %arg2[%c192, %c0_14] : memref<576x128xbf16, #tpu.memory_space<vmem>>, vector<64x128xbf16>
    %cst_15 = arith.constant dense<0.000000e+00> : vector<8x128xf32>
    %17 = tpu.matmul %15, %16, %cst_15 {dimension_numbers = #tpu.dot_dimension_numbers<[1], [0], [0], [1], [0, 0, 1, 1], [], []>} : vector<8x64xbf16>, vector<64x128xbf16>, vector<8x128xf32> -> vector<8x128xf32>
    %18 = arith.addf %13, %17 : vector<8x128xf32>
    %c0_16 = arith.constant 0 : index
    %c5 = arith.constant 5 : index
    %c0_17 = arith.constant 0 : index
    %19 = vector.load %arg1[%c0_16, %c5, %c0_17] : memref<1x20x64xbf16, #tpu.memory_space<vmem>>, vector<1x8x64xbf16>
    %20 = vector.shape_cast %19 : vector<1x8x64xbf16> to vector<8x64xbf16>
    %c256 = arith.constant 256 : index
    %c0_18 = arith.constant 0 : index
    %21 = vector.load %arg2[%c256, %c0_18] : memref<576x128xbf16, #tpu.memory_space<vmem>>, vector<64x128xbf16>
    %cst_19 = arith.constant dense<0.000000e+00> : vector<8x128xf32>
    %22 = tpu.matmul %20, %21, %cst_19 {dimension_numbers = #tpu.dot_dimension_numbers<[1], [0], [0], [1], [0, 0, 1, 1], [], []>} : vector<8x64xbf16>, vector<64x128xbf16>, vector<8x128xf32> -> vector<8x128xf32>
    %23 = arith.addf %18, %22 : vector<8x128xf32>
    %c0_20 = arith.constant 0 : index
    %c6 = arith.constant 6 : index
    %c0_21 = arith.constant 0 : index
    %24 = vector.load %arg1[%c0_20, %c6, %c0_21] : memref<1x20x64xbf16, #tpu.memory_space<vmem>>, vector<1x8x64xbf16>
    %25 = vector.shape_cast %24 : vector<1x8x64xbf16> to vector<8x64xbf16>
    %c320 = arith.constant 320 : index
    %c0_22 = arith.constant 0 : index
    %26 = vector.load %arg2[%c320, %c0_22] : memref<576x128xbf16, #tpu.memory_space<vmem>>, vector<64x128xbf16>
    %cst_23 = arith.constant dense<0.000000e+00> : vector<8x128xf32>
    %27 = tpu.matmul %25, %26, %cst_23 {dimension_numbers = #tpu.dot_dimension_numbers<[1], [0], [0], [1], [0, 0, 1, 1], [], []>} : vector<8x64xbf16>, vector<64x128xbf16>, vector<8x128xf32> -> vector<8x128xf32>
    %28 = arith.addf %23, %27 : vector<8x128xf32>
    %c0_24 = arith.constant 0 : index
    %c8 = arith.constant 8 : index
    %c0_25 = arith.constant 0 : index
    %29 = vector.load %arg1[%c0_24, %c8, %c0_25] : memref<1x20x64xbf16, #tpu.memory_space<vmem>>, vector<1x8x64xbf16>
    %30 = vector.shape_cast %29 : vector<1x8x64xbf16> to vector<8x64xbf16>
    %c384 = arith.constant 384 : index
    %c0_26 = arith.constant 0 : index
    %31 = vector.load %arg2[%c384, %c0_26] : memref<576x128xbf16, #tpu.memory_space<vmem>>, vector<64x128xbf16>
    %cst_27 = arith.constant dense<0.000000e+00> : vector<8x128xf32>
    %32 = tpu.matmul %30, %31, %cst_27 {dimension_numbers = #tpu.dot_dimension_numbers<[1], [0], [0], [1], [0, 0, 1, 1], [], []>} : vector<8x64xbf16>, vector<64x128xbf16>, vector<8x128xf32> -> vector<8x128xf32>
    %33 = arith.addf %28, %32 : vector<8x128xf32>
    %c0_28 = arith.constant 0 : index
    %c9 = arith.constant 9 : index
    %c0_29 = arith.constant 0 : index
    %34 = vector.load %arg1[%c0_28, %c9, %c0_29] : memref<1x20x64xbf16, #tpu.memory_space<vmem>>, vector<1x8x64xbf16>
    %35 = vector.shape_cast %34 : vector<1x8x64xbf16> to vector<8x64xbf16>
    %c448 = arith.constant 448 : index
    %c0_30 = arith.constant 0 : index
    %36 = vector.load %arg2[%c448, %c0_30] : memref<576x128xbf16, #tpu.memory_space<vmem>>, vector<64x128xbf16>
    %cst_31 = arith.constant dense<0.000000e+00> : vector<8x128xf32>
    %37 = tpu.matmul %35, %36, %cst_31 {dimension_numbers = #tpu.dot_dimension_numbers<[1], [0], [0], [1], [0, 0, 1, 1], [], []>} : vector<8x64xbf16>, vector<64x128xbf16>, vector<8x128xf32> -> vector<8x128xf32>
    %38 = arith.addf %33, %37 : vector<8x128xf32>
    %c0_32 = arith.constant 0 : index
    %c10 = arith.constant 10 : index
    %c0_33 = arith.constant 0 : index
    %39 = vector.load %arg1[%c0_32, %c10, %c0_33] : memref<1x20x64xbf16, #tpu.memory_space<vmem>>, vector<1x8x64xbf16>
    %40 = vector.shape_cast %39 : vector<1x8x64xbf16> to vector<8x64xbf16>
    %c512 = arith.constant 512 : index
    %c0_34 = arith.constant 0 : index
    %41 = vector.load %arg2[%c512, %c0_34] : memref<576x128xbf16, #tpu.memory_space<vmem>>, vector<64x128xbf16>
    %cst_35 = arith.constant dense<0.000000e+00> : vector<8x128xf32>
    %42 = tpu.matmul %40, %41, %cst_35 {dimension_numbers = #tpu.dot_dimension_numbers<[1], [0], [0], [1], [0, 0, 1, 1], [], []>} : vector<8x64xbf16>, vector<64x128xbf16>, vector<8x128xf32> -> vector<8x128xf32>
    %43 = arith.addf %38, %42 : vector<8x128xf32>
    %c0_36 = arith.constant 0 : index
    %c0_37 = arith.constant 0 : index
    %44 = vector.load %arg3[%c0_36, %c0_37] : memref<1x128xf32, #tpu.memory_space<vmem>>, vector<1x128xf32>
    %45 = vector.broadcast %44 : vector<1x128xf32> to vector<8x128xf32>
    %46 = arith.addf %43, %45 : vector<8x128xf32>
    %cst_38 = arith.constant 0.000000e+00 : f32
    %47 = vector.broadcast %cst_38 : f32 to vector<8x128xf32>
    %48 = arith.maximumf %46, %47 : vector<8x128xf32>
    %49 = arith.truncf %48 : vector<8x128xf32> to vector<8x128xbf16>
    %c0_39 = arith.constant 0 : index
    %c0_40 = arith.constant 0 : index
    %c0_41 = arith.constant 0 : index
    %50 = vector.load %arg4[%c0_39, %c0_40, %c0_41] : memref<1x8x128xbf16, #tpu.memory_space<vmem>>, vector<1x8x128xbf16>
    %51 = vector.shape_cast %50 : vector<1x8x128xbf16> to vector<8x128xbf16>
    %52 = vector.shape_cast %49 : vector<8x128xbf16> to vector<1x8x128xbf16>
    tpu.vector_store %arg4[%c0_39, %c0_40, %c0_41], %52 {strides = array<i32>} : memref<1x8x128xbf16, #tpu.memory_space<vmem>>, vector<1x8x128xbf16>,
    return
  }
  func.func @transform_0(%arg0: i32) -> (i32, i32, i32) {
    %c0_i32 = arith.constant 0 : i32
    %c0_i32_0 = arith.constant 0 : i32
    %c0_i32_1 = arith.constant 0 : i32
    return %arg0, %c0_i32, %c0_i32_0 : i32, i32, i32
  }
  func.func @transform_1(%arg0: i32) -> (i32, i32) {
    %c0_i32 = arith.constant 0 : i32
    %c0_i32_0 = arith.constant 0 : i32
    %c0_i32_1 = arith.constant 0 : i32
    return %c0_i32, %c0_i32_0 : i32, i32
  }
  func.func @transform_2(%arg0: i32) -> (i32, i32) {
    %c0_i32 = arith.constant 0 : i32
    %c0_i32_0 = arith.constant 0 : i32
    %c0_i32_1 = arith.constant 0 : i32
    return %c0_i32, %c0_i32_0 : i32, i32
  }
  func.func @transform_3(%arg0: i32) -> (i32, i32, i32) {
    %c0_i32 = arith.constant 0 : i32
    %c0_i32_0 = arith.constant 0 : i32
    %c0_i32_1 = arith.constant 0 : i32
    return %arg0, %c0_i32, %c0_i32_0 : i32, i32, i32
  }
}

module attributes {stable_mosaic.version = 11 : i64} {
  func.func @_conv_direct_kernel(%arg0: i32, %arg1: memref<1x20x96xbf16, #tpu.memory_space<vmem>>, %arg2: memref<864x128xbf16, #tpu.memory_space<vmem>>, %arg3: memref<1x128xf32, #tpu.memory_space<vmem>>, %arg4: memref<1x8x128xbf16, #tpu.memory_space<vmem>>) attributes {dimension_semantics = [#tpu.dimension_semantics<parallel>], iteration_bounds = array<i64: 2>, scalar_prefetch = 0 : i64, scratch_operands = 0 : i64, tpu.core_type = #tpu.core_type<tc>, window_params = [{transform_indices = @transform_0, window_bounds = array<i64: 1, 20, 96>}, {pipeline_mode = #tpu.pipeline_mode<synchronous>, transform_indices = @transform_1, window_bounds = array<i64: 864, 128>}, {pipeline_mode = #tpu.pipeline_mode<synchronous>, transform_indices = @transform_2, window_bounds = array<i64: 1, 128>}, {transform_indices = @transform_3, window_bounds = array<i64: 1, 8, 128>}]} {
    %c0 = arith.constant 0 : index
    %c0_0 = arith.constant 0 : index
    %c0_1 = arith.constant 0 : index
    %0 = vector.load %arg1[%c0, %c0_0, %c0_1] : memref<1x20x96xbf16, #tpu.memory_space<vmem>>, vector<1x8x96xbf16>
    %1 = vector.shape_cast %0 : vector<1x8x96xbf16> to vector<8x96xbf16>
    %c0_2 = arith.constant 0 : index
    %c0_3 = arith.constant 0 : index
    %2 = vector.load %arg2[%c0_2, %c0_3] : memref<864x128xbf16, #tpu.memory_space<vmem>>, vector<96x128xbf16>
    %cst = arith.constant dense<0.000000e+00> : vector<8x128xf32>
    %3 = tpu.matmul %1, %2, %cst {dimension_numbers = #tpu.dot_dimension_numbers<[1], [0], [0], [1], [0, 0, 1, 1], [], []>} : vector<8x96xbf16>, vector<96x128xbf16>, vector<8x128xf32> -> vector<8x128xf32>
    %c0_4 = arith.constant 0 : index
    %c1 = arith.constant 1 : index
    %c0_5 = arith.constant 0 : index
    %4 = vector.load %arg1[%c0_4, %c1, %c0_5] : memref<1x20x96xbf16, #tpu.memory_space<vmem>>, vector<1x8x96xbf16>
    %5 = vector.shape_cast %4 : vector<1x8x96xbf16> to vector<8x96xbf16>
    %c96 = arith.constant 96 : index
    %c0_6 = arith.constant 0 : index
    %6 = vector.load %arg2[%c96, %c0_6] : memref<864x128xbf16, #tpu.memory_space<vmem>>, vector<96x128xbf16>
    %cst_7 = arith.constant dense<0.000000e+00> : vector<8x128xf32>
    %7 = tpu.matmul %5, %6, %cst_7 {dimension_numbers = #tpu.dot_dimension_numbers<[1], [0], [0], [1], [0, 0, 1, 1], [], []>} : vector<8x96xbf16>, vector<96x128xbf16>, vector<8x128xf32> -> vector<8x128xf32>
    %8 = arith.addf %3, %7 : vector<8x128xf32>
    %c0_8 = arith.constant 0 : index
    %c2 = arith.constant 2 : index
    %c0_9 = arith.constant 0 : index
    %9 = vector.load %arg1[%c0_8, %c2, %c0_9] : memref<1x20x96xbf16, #tpu.memory_space<vmem>>, vector<1x8x96xbf16>
    %10 = vector.shape_cast %9 : vector<1x8x96xbf16> to vector<8x96xbf16>
    %c192 = arith.constant 192 : index
    %c0_10 = arith.constant 0 : index
    %11 = vector.load %arg2[%c192, %c0_10] : memref<864x128xbf16, #tpu.memory_space<vmem>>, vector<96x128xbf16>
    %cst_11 = arith.constant dense<0.000000e+00> : vector<8x128xf32>
    %12 = tpu.matmul %10, %11, %cst_11 {dimension_numbers = #tpu.dot_dimension_numbers<[1], [0], [0], [1], [0, 0, 1, 1], [], []>} : vector<8x96xbf16>, vector<96x128xbf16>, vector<8x128xf32> -> vector<8x128xf32>
    %13 = arith.addf %8, %12 : vector<8x128xf32>
    %c0_12 = arith.constant 0 : index
    %c4 = arith.constant 4 : index
    %c0_13 = arith.constant 0 : index
    %14 = vector.load %arg1[%c0_12, %c4, %c0_13] : memref<1x20x96xbf16, #tpu.memory_space<vmem>>, vector<1x8x96xbf16>
    %15 = vector.shape_cast %14 : vector<1x8x96xbf16> to vector<8x96xbf16>
    %c288 = arith.constant 288 : index
    %c0_14 = arith.constant 0 : index
    %16 = vector.load %arg2[%c288, %c0_14] : memref<864x128xbf16, #tpu.memory_space<vmem>>, vector<96x128xbf16>
    %cst_15 = arith.constant dense<0.000000e+00> : vector<8x128xf32>
    %17 = tpu.matmul %15, %16, %cst_15 {dimension_numbers = #tpu.dot_dimension_numbers<[1], [0], [0], [1], [0, 0, 1, 1], [], []>} : vector<8x96xbf16>, vector<96x128xbf16>, vector<8x128xf32> -> vector<8x128xf32>
    %18 = arith.addf %13, %17 : vector<8x128xf32>
    %c0_16 = arith.constant 0 : index
    %c5 = arith.constant 5 : index
    %c0_17 = arith.constant 0 : index
    %19 = vector.load %arg1[%c0_16, %c5, %c0_17] : memref<1x20x96xbf16, #tpu.memory_space<vmem>>, vector<1x8x96xbf16>
    %20 = vector.shape_cast %19 : vector<1x8x96xbf16> to vector<8x96xbf16>
    %c384 = arith.constant 384 : index
    %c0_18 = arith.constant 0 : index
    %21 = vector.load %arg2[%c384, %c0_18] : memref<864x128xbf16, #tpu.memory_space<vmem>>, vector<96x128xbf16>
    %cst_19 = arith.constant dense<0.000000e+00> : vector<8x128xf32>
    %22 = tpu.matmul %20, %21, %cst_19 {dimension_numbers = #tpu.dot_dimension_numbers<[1], [0], [0], [1], [0, 0, 1, 1], [], []>} : vector<8x96xbf16>, vector<96x128xbf16>, vector<8x128xf32> -> vector<8x128xf32>
    %23 = arith.addf %18, %22 : vector<8x128xf32>
    %c0_20 = arith.constant 0 : index
    %c6 = arith.constant 6 : index
    %c0_21 = arith.constant 0 : index
    %24 = vector.load %arg1[%c0_20, %c6, %c0_21] : memref<1x20x96xbf16, #tpu.memory_space<vmem>>, vector<1x8x96xbf16>
    %25 = vector.shape_cast %24 : vector<1x8x96xbf16> to vector<8x96xbf16>
    %c480 = arith.constant 480 : index
    %c0_22 = arith.constant 0 : index
    %26 = vector.load %arg2[%c480, %c0_22] : memref<864x128xbf16, #tpu.memory_space<vmem>>, vector<96x128xbf16>
    %cst_23 = arith.constant dense<0.000000e+00> : vector<8x128xf32>
    %27 = tpu.matmul %25, %26, %cst_23 {dimension_numbers = #tpu.dot_dimension_numbers<[1], [0], [0], [1], [0, 0, 1, 1], [], []>} : vector<8x96xbf16>, vector<96x128xbf16>, vector<8x128xf32> -> vector<8x128xf32>
    %28 = arith.addf %23, %27 : vector<8x128xf32>
    %c0_24 = arith.constant 0 : index
    %c8 = arith.constant 8 : index
    %c0_25 = arith.constant 0 : index
    %29 = vector.load %arg1[%c0_24, %c8, %c0_25] : memref<1x20x96xbf16, #tpu.memory_space<vmem>>, vector<1x8x96xbf16>
    %30 = vector.shape_cast %29 : vector<1x8x96xbf16> to vector<8x96xbf16>
    %c576 = arith.constant 576 : index
    %c0_26 = arith.constant 0 : index
    %31 = vector.load %arg2[%c576, %c0_26] : memref<864x128xbf16, #tpu.memory_space<vmem>>, vector<96x128xbf16>
    %cst_27 = arith.constant dense<0.000000e+00> : vector<8x128xf32>
    %32 = tpu.matmul %30, %31, %cst_27 {dimension_numbers = #tpu.dot_dimension_numbers<[1], [0], [0], [1], [0, 0, 1, 1], [], []>} : vector<8x96xbf16>, vector<96x128xbf16>, vector<8x128xf32> -> vector<8x128xf32>
    %33 = arith.addf %28, %32 : vector<8x128xf32>
    %c0_28 = arith.constant 0 : index
    %c9 = arith.constant 9 : index
    %c0_29 = arith.constant 0 : index
    %34 = vector.load %arg1[%c0_28, %c9, %c0_29] : memref<1x20x96xbf16, #tpu.memory_space<vmem>>, vector<1x8x96xbf16>
    %35 = vector.shape_cast %34 : vector<1x8x96xbf16> to vector<8x96xbf16>
    %c672 = arith.constant 672 : index
    %c0_30 = arith.constant 0 : index
    %36 = vector.load %arg2[%c672, %c0_30] : memref<864x128xbf16, #tpu.memory_space<vmem>>, vector<96x128xbf16>
    %cst_31 = arith.constant dense<0.000000e+00> : vector<8x128xf32>
    %37 = tpu.matmul %35, %36, %cst_31 {dimension_numbers = #tpu.dot_dimension_numbers<[1], [0], [0], [1], [0, 0, 1, 1], [], []>} : vector<8x96xbf16>, vector<96x128xbf16>, vector<8x128xf32> -> vector<8x128xf32>
    %38 = arith.addf %33, %37 : vector<8x128xf32>
    %c0_32 = arith.constant 0 : index
    %c10 = arith.constant 10 : index
    %c0_33 = arith.constant 0 : index
    %39 = vector.load %arg1[%c0_32, %c10, %c0_33] : memref<1x20x96xbf16, #tpu.memory_space<vmem>>, vector<1x8x96xbf16>
    %40 = vector.shape_cast %39 : vector<1x8x96xbf16> to vector<8x96xbf16>
    %c768 = arith.constant 768 : index
    %c0_34 = arith.constant 0 : index
    %41 = vector.load %arg2[%c768, %c0_34] : memref<864x128xbf16, #tpu.memory_space<vmem>>, vector<96x128xbf16>
    %cst_35 = arith.constant dense<0.000000e+00> : vector<8x128xf32>
    %42 = tpu.matmul %40, %41, %cst_35 {dimension_numbers = #tpu.dot_dimension_numbers<[1], [0], [0], [1], [0, 0, 1, 1], [], []>} : vector<8x96xbf16>, vector<96x128xbf16>, vector<8x128xf32> -> vector<8x128xf32>
    %43 = arith.addf %38, %42 : vector<8x128xf32>
    %c0_36 = arith.constant 0 : index
    %c0_37 = arith.constant 0 : index
    %44 = vector.load %arg3[%c0_36, %c0_37] : memref<1x128xf32, #tpu.memory_space<vmem>>, vector<1x128xf32>
    %45 = vector.broadcast %44 : vector<1x128xf32> to vector<8x128xf32>
    %46 = arith.addf %43, %45 : vector<8x128xf32>
    %cst_38 = arith.constant 0.000000e+00 : f32
    %47 = vector.broadcast %cst_38 : f32 to vector<8x128xf32>
    %48 = arith.maximumf %46, %47 : vector<8x128xf32>
    %49 = arith.truncf %48 : vector<8x128xf32> to vector<8x128xbf16>
    %c0_39 = arith.constant 0 : index
    %c0_40 = arith.constant 0 : index
    %c0_41 = arith.constant 0 : index
    %50 = vector.load %arg4[%c0_39, %c0_40, %c0_41] : memref<1x8x128xbf16, #tpu.memory_space<vmem>>, vector<1x8x128xbf16>
    %51 = vector.shape_cast %50 : vector<1x8x128xbf16> to vector<8x128xbf16>
    %52 = vector.shape_cast %49 : vector<8x128xbf16> to vector<1x8x128xbf16>
    tpu.vector_store %arg4[%c0_39, %c0_40, %c0_41], %52 {strides = array<i32>} : memref<1x8x128xbf16, #tpu.memory_space<vmem>>, vector<1x8x128xbf16>,
    return
  }
  func.func @transform_0(%arg0: i32) -> (i32, i32, i32) {
    %c0_i32 = arith.constant 0 : i32
    %c0_i32_0 = arith.constant 0 : i32
    %c0_i32_1 = arith.constant 0 : i32
    return %arg0, %c0_i32, %c0_i32_0 : i32, i32, i32
  }
  func.func @transform_1(%arg0: i32) -> (i32, i32) {
    %c0_i32 = arith.constant 0 : i32
    %c0_i32_0 = arith.constant 0 : i32
    %c0_i32_1 = arith.constant 0 : i32
    return %c0_i32, %c0_i32_0 : i32, i32
  }
  func.func @transform_2(%arg0: i32) -> (i32, i32) {
    %c0_i32 = arith.constant 0 : i32
    %c0_i32_0 = arith.constant 0 : i32
    %c0_i32_1 = arith.constant 0 : i32
    return %c0_i32, %c0_i32_0 : i32, i32
  }
  func.func @transform_3(%arg0: i32) -> (i32, i32, i32) {
    %c0_i32 = arith.constant 0 : i32
    %c0_i32_0 = arith.constant 0 : i32
    %c0_i32_1 = arith.constant 0 : i32
    return %arg0, %c0_i32, %c0_i32_0 : i32, i32, i32
  }
}

module attributes {stable_mosaic.version = 11 : i64} {
  func.func @_conv_direct_kernel(%arg0: i32, %arg1: memref<1x42x48xbf16, #tpu.memory_space<vmem>>, %arg2: memref<1200x128xbf16, #tpu.memory_space<vmem>>, %arg3: memref<1x128xf32, #tpu.memory_space<vmem>>, %arg4: memref<1x12x128xbf16, #tpu.memory_space<vmem>>) attributes {dimension_semantics = [#tpu.dimension_semantics<parallel>], iteration_bounds = array<i64: 2>, scalar_prefetch = 0 : i64, scratch_operands = 0 : i64, tpu.core_type = #tpu.core_type<tc>, window_params = [{transform_indices = @transform_0, window_bounds = array<i64: 1, 42, 48>}, {pipeline_mode = #tpu.pipeline_mode<synchronous>, transform_indices = @transform_1, window_bounds = array<i64: 1200, 128>}, {pipeline_mode = #tpu.pipeline_mode<synchronous>, transform_indices = @transform_2, window_bounds = array<i64: 1, 128>}, {transform_indices = @transform_3, window_bounds = array<i64: 1, 12, 128>}]} {
    %c0 = arith.constant 0 : index
    %c0_0 = arith.constant 0 : index
    %c0_1 = arith.constant 0 : index
    %0 = vector.load %arg1[%c0, %c0_0, %c0_1] : memref<1x42x48xbf16, #tpu.memory_space<vmem>>, vector<1x12x48xbf16>
    %1 = vector.shape_cast %0 : vector<1x12x48xbf16> to vector<12x48xbf16>
    %c0_2 = arith.constant 0 : index
    %c0_3 = arith.constant 0 : index
    %2 = vector.load %arg2[%c0_2, %c0_3] : memref<1200x128xbf16, #tpu.memory_space<vmem>>, vector<48x128xbf16>
    %cst = arith.constant dense<0.000000e+00> : vector<12x128xf32>
    %3 = tpu.matmul %1, %2, %cst {dimension_numbers = #tpu.dot_dimension_numbers<[1], [0], [0], [1], [0, 0, 1, 1], [], []>} : vector<12x48xbf16>, vector<48x128xbf16>, vector<12x128xf32> -> vector<12x128xf32>
    %c0_4 = arith.constant 0 : index
    %c1 = arith.constant 1 : index
    %c0_5 = arith.constant 0 : index
    %4 = vector.load %arg1[%c0_4, %c1, %c0_5] : memref<1x42x48xbf16, #tpu.memory_space<vmem>>, vector<1x12x48xbf16>
    %5 = vector.shape_cast %4 : vector<1x12x48xbf16> to vector<12x48xbf16>
    %c48 = arith.constant 48 : index
    %c0_6 = arith.constant 0 : index
    %6 = vector.load %arg2[%c48, %c0_6] : memref<1200x128xbf16, #tpu.memory_space<vmem>>, vector<48x128xbf16>
    %cst_7 = arith.constant dense<0.000000e+00> : vector<12x128xf32>
    %7 = tpu.matmul %5, %6, %cst_7 {dimension_numbers = #tpu.dot_dimension_numbers<[1], [0], [0], [1], [0, 0, 1, 1], [], []>} : vector<12x48xbf16>, vector<48x128xbf16>, vector<12x128xf32> -> vector<12x128xf32>
    %8 = arith.addf %3, %7 : vector<12x128xf32>
    %c0_8 = arith.constant 0 : index
    %c2 = arith.constant 2 : index
    %c0_9 = arith.constant 0 : index
    %9 = vector.load %arg1[%c0_8, %c2, %c0_9] : memref<1x42x48xbf16, #tpu.memory_space<vmem>>, vector<1x12x48xbf16>
    %10 = vector.shape_cast %9 : vector<1x12x48xbf16> to vector<12x48xbf16>
    %c96 = arith.constant 96 : index
    %c0_10 = arith.constant 0 : index
    %11 = vector.load %arg2[%c96, %c0_10] : memref<1200x128xbf16, #tpu.memory_space<vmem>>, vector<48x128xbf16>
    %cst_11 = arith.constant dense<0.000000e+00> : vector<12x128xf32>
    %12 = tpu.matmul %10, %11, %cst_11 {dimension_numbers = #tpu.dot_dimension_numbers<[1], [0], [0], [1], [0, 0, 1, 1], [], []>} : vector<12x48xbf16>, vector<48x128xbf16>, vector<12x128xf32> -> vector<12x128xf32>
    %13 = arith.addf %8, %12 : vector<12x128xf32>
    %c0_12 = arith.constant 0 : index
    %c3 = arith.constant 3 : index
    %c0_13 = arith.constant 0 : index
    %14 = vector.load %arg1[%c0_12, %c3, %c0_13] : memref<1x42x48xbf16, #tpu.memory_space<vmem>>, vector<1x12x48xbf16>
    %15 = vector.shape_cast %14 : vector<1x12x48xbf16> to vector<12x48xbf16>
    %c144 = arith.constant 144 : index
    %c0_14 = arith.constant 0 : index
    %16 = vector.load %arg2[%c144, %c0_14] : memref<1200x128xbf16, #tpu.memory_space<vmem>>, vector<48x128xbf16>
    %cst_15 = arith.constant dense<0.000000e+00> : vector<12x128xf32>
    %17 = tpu.matmul %15, %16, %cst_15 {dimension_numbers = #tpu.dot_dimension_numbers<[1], [0], [0], [1], [0, 0, 1, 1], [], []>} : vector<12x48xbf16>, vector<48x128xbf16>, vector<12x128xf32> -> vector<12x128xf32>
    %18 = arith.addf %13, %17 : vector<12x128xf32>
    %c0_16 = arith.constant 0 : index
    %c4 = arith.constant 4 : index
    %c0_17 = arith.constant 0 : index
    %19 = vector.load %arg1[%c0_16, %c4, %c0_17] : memref<1x42x48xbf16, #tpu.memory_space<vmem>>, vector<1x12x48xbf16>
    %20 = vector.shape_cast %19 : vector<1x12x48xbf16> to vector<12x48xbf16>
    %c192 = arith.constant 192 : index
    %c0_18 = arith.constant 0 : index
    %21 = vector.load %arg2[%c192, %c0_18] : memref<1200x128xbf16, #tpu.memory_space<vmem>>, vector<48x128xbf16>
    %cst_19 = arith.constant dense<0.000000e+00> : vector<12x128xf32>
    %22 = tpu.matmul %20, %21, %cst_19 {dimension_numbers = #tpu.dot_dimension_numbers<[1], [0], [0], [1], [0, 0, 1, 1], [], []>} : vector<12x48xbf16>, vector<48x128xbf16>, vector<12x128xf32> -> vector<12x128xf32>
    %23 = arith.addf %18, %22 : vector<12x128xf32>
    %c0_20 = arith.constant 0 : index
    %c6 = arith.constant 6 : index
    %c0_21 = arith.constant 0 : index
    %24 = vector.load %arg1[%c0_20, %c6, %c0_21] : memref<1x42x48xbf16, #tpu.memory_space<vmem>>, vector<1x12x48xbf16>
    %25 = vector.shape_cast %24 : vector<1x12x48xbf16> to vector<12x48xbf16>
    %c240 = arith.constant 240 : index
    %c0_22 = arith.constant 0 : index
    %26 = vector.load %arg2[%c240, %c0_22] : memref<1200x128xbf16, #tpu.memory_space<vmem>>, vector<48x128xbf16>
    %cst_23 = arith.constant dense<0.000000e+00> : vector<12x128xf32>
    %27 = tpu.matmul %25, %26, %cst_23 {dimension_numbers = #tpu.dot_dimension_numbers<[1], [0], [0], [1], [0, 0, 1, 1], [], []>} : vector<12x48xbf16>, vector<48x128xbf16>, vector<12x128xf32> -> vector<12x128xf32>
    %28 = arith.addf %23, %27 : vector<12x128xf32>
    %c0_24 = arith.constant 0 : index
    %c7 = arith.constant 7 : index
    %c0_25 = arith.constant 0 : index
    %29 = vector.load %arg1[%c0_24, %c7, %c0_25] : memref<1x42x48xbf16, #tpu.memory_space<vmem>>, vector<1x12x48xbf16>
    %30 = vector.shape_cast %29 : vector<1x12x48xbf16> to vector<12x48xbf16>
    %c288 = arith.constant 288 : index
    %c0_26 = arith.constant 0 : index
    %31 = vector.load %arg2[%c288, %c0_26] : memref<1200x128xbf16, #tpu.memory_space<vmem>>, vector<48x128xbf16>
    %cst_27 = arith.constant dense<0.000000e+00> : vector<12x128xf32>
    %32 = tpu.matmul %30, %31, %cst_27 {dimension_numbers = #tpu.dot_dimension_numbers<[1], [0], [0], [1], [0, 0, 1, 1], [], []>} : vector<12x48xbf16>, vector<48x128xbf16>, vector<12x128xf32> -> vector<12x128xf32>
    %33 = arith.addf %28, %32 : vector<12x128xf32>
    %c0_28 = arith.constant 0 : index
    %c8 = arith.constant 8 : index
    %c0_29 = arith.constant 0 : index
    %34 = vector.load %arg1[%c0_28, %c8, %c0_29] : memref<1x42x48xbf16, #tpu.memory_space<vmem>>, vector<1x12x48xbf16>
    %35 = vector.shape_cast %34 : vector<1x12x48xbf16> to vector<12x48xbf16>
    %c336 = arith.constant 336 : index
    %c0_30 = arith.constant 0 : index
    %36 = vector.load %arg2[%c336, %c0_30] : memref<1200x128xbf16, #tpu.memory_space<vmem>>, vector<48x128xbf16>
    %cst_31 = arith.constant dense<0.000000e+00> : vector<12x128xf32>
    %37 = tpu.matmul %35, %36, %cst_31 {dimension_numbers = #tpu.dot_dimension_numbers<[1], [0], [0], [1], [0, 0, 1, 1], [], []>} : vector<12x48xbf16>, vector<48x128xbf16>, vector<12x128xf32> -> vector<12x128xf32>
    %38 = arith.addf %33, %37 : vector<12x128xf32>
    %c0_32 = arith.constant 0 : index
    %c9 = arith.constant 9 : index
    %c0_33 = arith.constant 0 : index
    %39 = vector.load %arg1[%c0_32, %c9, %c0_33] : memref<1x42x48xbf16, #tpu.memory_space<vmem>>, vector<1x12x48xbf16>
    %40 = vector.shape_cast %39 : vector<1x12x48xbf16> to vector<12x48xbf16>
    %c384 = arith.constant 384 : index
    %c0_34 = arith.constant 0 : index
    %41 = vector.load %arg2[%c384, %c0_34] : memref<1200x128xbf16, #tpu.memory_space<vmem>>, vector<48x128xbf16>
    %cst_35 = arith.constant dense<0.000000e+00> : vector<12x128xf32>
    %42 = tpu.matmul %40, %41, %cst_35 {dimension_numbers = #tpu.dot_dimension_numbers<[1], [0], [0], [1], [0, 0, 1, 1], [], []>} : vector<12x48xbf16>, vector<48x128xbf16>, vector<12x128xf32> -> vector<12x128xf32>
    %43 = arith.addf %38, %42 : vector<12x128xf32>
    %c0_36 = arith.constant 0 : index
    %c10 = arith.constant 10 : index
    %c0_37 = arith.constant 0 : index
    %44 = vector.load %arg1[%c0_36, %c10, %c0_37] : memref<1x42x48xbf16, #tpu.memory_space<vmem>>, vector<1x12x48xbf16>
    %45 = vector.shape_cast %44 : vector<1x12x48xbf16> to vector<12x48xbf16>
    %c432 = arith.constant 432 : index
    %c0_38 = arith.constant 0 : index
    %46 = vector.load %arg2[%c432, %c0_38] : memref<1200x128xbf16, #tpu.memory_space<vmem>>, vector<48x128xbf16>
    %cst_39 = arith.constant dense<0.000000e+00> : vector<12x128xf32>
    %47 = tpu.matmul %45, %46, %cst_39 {dimension_numbers = #tpu.dot_dimension_numbers<[1], [0], [0], [1], [0, 0, 1, 1], [], []>} : vector<12x48xbf16>, vector<48x128xbf16>, vector<12x128xf32> -> vector<12x128xf32>
    %48 = arith.addf %43, %47 : vector<12x128xf32>
    %c0_40 = arith.constant 0 : index
    %c12 = arith.constant 12 : index
    %c0_41 = arith.constant 0 : index
    %49 = vector.load %arg1[%c0_40, %c12, %c0_41] : memref<1x42x48xbf16, #tpu.memory_space<vmem>>, vector<1x12x48xbf16>
    %50 = vector.shape_cast %49 : vector<1x12x48xbf16> to vector<12x48xbf16>
    %c480 = arith.constant 480 : index
    %c0_42 = arith.constant 0 : index
    %51 = vector.load %arg2[%c480, %c0_42] : memref<1200x128xbf16, #tpu.memory_space<vmem>>, vector<48x128xbf16>
    %cst_43 = arith.constant dense<0.000000e+00> : vector<12x128xf32>
    %52 = tpu.matmul %50, %51, %cst_43 {dimension_numbers = #tpu.dot_dimension_numbers<[1], [0], [0], [1], [0, 0, 1, 1], [], []>} : vector<12x48xbf16>, vector<48x128xbf16>, vector<12x128xf32> -> vector<12x128xf32>
    %53 = arith.addf %48, %52 : vector<12x128xf32>
    %c0_44 = arith.constant 0 : index
    %c13 = arith.constant 13 : index
    %c0_45 = arith.constant 0 : index
    %54 = vector.load %arg1[%c0_44, %c13, %c0_45] : memref<1x42x48xbf16, #tpu.memory_space<vmem>>, vector<1x12x48xbf16>
    %55 = vector.shape_cast %54 : vector<1x12x48xbf16> to vector<12x48xbf16>
    %c528 = arith.constant 528 : index
    %c0_46 = arith.constant 0 : index
    %56 = vector.load %arg2[%c528, %c0_46] : memref<1200x128xbf16, #tpu.memory_space<vmem>>, vector<48x128xbf16>
    %cst_47 = arith.constant dense<0.000000e+00> : vector<12x128xf32>
    %57 = tpu.matmul %55, %56, %cst_47 {dimension_numbers = #tpu.dot_dimension_numbers<[1], [0], [0], [1], [0, 0, 1, 1], [], []>} : vector<12x48xbf16>, vector<48x128xbf16>, vector<12x128xf32> -> vector<12x128xf32>
    %58 = arith.addf %53, %57 : vector<12x128xf32>
    %c0_48 = arith.constant 0 : index
    %c14 = arith.constant 14 : index
    %c0_49 = arith.constant 0 : index
    %59 = vector.load %arg1[%c0_48, %c14, %c0_49] : memref<1x42x48xbf16, #tpu.memory_space<vmem>>, vector<1x12x48xbf16>
    %60 = vector.shape_cast %59 : vector<1x12x48xbf16> to vector<12x48xbf16>
    %c576 = arith.constant 576 : index
    %c0_50 = arith.constant 0 : index
    %61 = vector.load %arg2[%c576, %c0_50] : memref<1200x128xbf16, #tpu.memory_space<vmem>>, vector<48x128xbf16>
    %cst_51 = arith.constant dense<0.000000e+00> : vector<12x128xf32>
    %62 = tpu.matmul %60, %61, %cst_51 {dimension_numbers = #tpu.dot_dimension_numbers<[1], [0], [0], [1], [0, 0, 1, 1], [], []>} : vector<12x48xbf16>, vector<48x128xbf16>, vector<12x128xf32> -> vector<12x128xf32>
    %63 = arith.addf %58, %62 : vector<12x128xf32>
    %c0_52 = arith.constant 0 : index
    %c15 = arith.constant 15 : index
    %c0_53 = arith.constant 0 : index
    %64 = vector.load %arg1[%c0_52, %c15, %c0_53] : memref<1x42x48xbf16, #tpu.memory_space<vmem>>, vector<1x12x48xbf16>
    %65 = vector.shape_cast %64 : vector<1x12x48xbf16> to vector<12x48xbf16>
    %c624 = arith.constant 624 : index
    %c0_54 = arith.constant 0 : index
    %66 = vector.load %arg2[%c624, %c0_54] : memref<1200x128xbf16, #tpu.memory_space<vmem>>, vector<48x128xbf16>
    %cst_55 = arith.constant dense<0.000000e+00> : vector<12x128xf32>
    %67 = tpu.matmul %65, %66, %cst_55 {dimension_numbers = #tpu.dot_dimension_numbers<[1], [0], [0], [1], [0, 0, 1, 1], [], []>} : vector<12x48xbf16>, vector<48x128xbf16>, vector<12x128xf32> -> vector<12x128xf32>
    %68 = arith.addf %63, %67 : vector<12x128xf32>
    %c0_56 = arith.constant 0 : index
    %c16 = arith.constant 16 : index
    %c0_57 = arith.constant 0 : index
    %69 = vector.load %arg1[%c0_56, %c16, %c0_57] : memref<1x42x48xbf16, #tpu.memory_space<vmem>>, vector<1x12x48xbf16>
    %70 = vector.shape_cast %69 : vector<1x12x48xbf16> to vector<12x48xbf16>
    %c672 = arith.constant 672 : index
    %c0_58 = arith.constant 0 : index
    %71 = vector.load %arg2[%c672, %c0_58] : memref<1200x128xbf16, #tpu.memory_space<vmem>>, vector<48x128xbf16>
    %cst_59 = arith.constant dense<0.000000e+00> : vector<12x128xf32>
    %72 = tpu.matmul %70, %71, %cst_59 {dimension_numbers = #tpu.dot_dimension_numbers<[1], [0], [0], [1], [0, 0, 1, 1], [], []>} : vector<12x48xbf16>, vector<48x128xbf16>, vector<12x128xf32> -> vector<12x128xf32>
    %73 = arith.addf %68, %72 : vector<12x128xf32>
    %c0_60 = arith.constant 0 : index
    %c18 = arith.constant 18 : index
    %c0_61 = arith.constant 0 : index
    %74 = vector.load %arg1[%c0_60, %c18, %c0_61] : memref<1x42x48xbf16, #tpu.memory_space<vmem>>, vector<1x12x48xbf16>
    %75 = vector.shape_cast %74 : vector<1x12x48xbf16> to vector<12x48xbf16>
    %c720 = arith.constant 720 : index
    %c0_62 = arith.constant 0 : index
    %76 = vector.load %arg2[%c720, %c0_62] : memref<1200x128xbf16, #tpu.memory_space<vmem>>, vector<48x128xbf16>
    %cst_63 = arith.constant dense<0.000000e+00> : vector<12x128xf32>
    %77 = tpu.matmul %75, %76, %cst_63 {dimension_numbers = #tpu.dot_dimension_numbers<[1], [0], [0], [1], [0, 0, 1, 1], [], []>} : vector<12x48xbf16>, vector<48x128xbf16>, vector<12x128xf32> -> vector<12x128xf32>
    %78 = arith.addf %73, %77 : vector<12x128xf32>
    %c0_64 = arith.constant 0 : index
    %c19 = arith.constant 19 : index
    %c0_65 = arith.constant 0 : index
    %79 = vector.load %arg1[%c0_64, %c19, %c0_65] : memref<1x42x48xbf16, #tpu.memory_space<vmem>>, vector<1x12x48xbf16>
    %80 = vector.shape_cast %79 : vector<1x12x48xbf16> to vector<12x48xbf16>
    %c768 = arith.constant 768 : index
    %c0_66 = arith.constant 0 : index
    %81 = vector.load %arg2[%c768, %c0_66] : memref<1200x128xbf16, #tpu.memory_space<vmem>>, vector<48x128xbf16>
    %cst_67 = arith.constant dense<0.000000e+00> : vector<12x128xf32>
    %82 = tpu.matmul %80, %81, %cst_67 {dimension_numbers = #tpu.dot_dimension_numbers<[1], [0], [0], [1], [0, 0, 1, 1], [], []>} : vector<12x48xbf16>, vector<48x128xbf16>, vector<12x128xf32> -> vector<12x128xf32>
    %83 = arith.addf %78, %82 : vector<12x128xf32>
    %c0_68 = arith.constant 0 : index
    %c20 = arith.constant 20 : index
    %c0_69 = arith.constant 0 : index
    %84 = vector.load %arg1[%c0_68, %c20, %c0_69] : memref<1x42x48xbf16, #tpu.memory_space<vmem>>, vector<1x12x48xbf16>
    %85 = vector.shape_cast %84 : vector<1x12x48xbf16> to vector<12x48xbf16>
    %c816 = arith.constant 816 : index
    %c0_70 = arith.constant 0 : index
    %86 = vector.load %arg2[%c816, %c0_70] : memref<1200x128xbf16, #tpu.memory_space<vmem>>, vector<48x128xbf16>
    %cst_71 = arith.constant dense<0.000000e+00> : vector<12x128xf32>
    %87 = tpu.matmul %85, %86, %cst_71 {dimension_numbers = #tpu.dot_dimension_numbers<[1], [0], [0], [1], [0, 0, 1, 1], [], []>} : vector<12x48xbf16>, vector<48x128xbf16>, vector<12x128xf32> -> vector<12x128xf32>
    %88 = arith.addf %83, %87 : vector<12x128xf32>
    %c0_72 = arith.constant 0 : index
    %c21 = arith.constant 21 : index
    %c0_73 = arith.constant 0 : index
    %89 = vector.load %arg1[%c0_72, %c21, %c0_73] : memref<1x42x48xbf16, #tpu.memory_space<vmem>>, vector<1x12x48xbf16>
    %90 = vector.shape_cast %89 : vector<1x12x48xbf16> to vector<12x48xbf16>
    %c864 = arith.constant 864 : index
    %c0_74 = arith.constant 0 : index
    %91 = vector.load %arg2[%c864, %c0_74] : memref<1200x128xbf16, #tpu.memory_space<vmem>>, vector<48x128xbf16>
    %cst_75 = arith.constant dense<0.000000e+00> : vector<12x128xf32>
    %92 = tpu.matmul %90, %91, %cst_75 {dimension_numbers = #tpu.dot_dimension_numbers<[1], [0], [0], [1], [0, 0, 1, 1], [], []>} : vector<12x48xbf16>, vector<48x128xbf16>, vector<12x128xf32> -> vector<12x128xf32>
    %93 = arith.addf %88, %92 : vector<12x128xf32>
    %c0_76 = arith.constant 0 : index
    %c22 = arith.constant 22 : index
    %c0_77 = arith.constant 0 : index
    %94 = vector.load %arg1[%c0_76, %c22, %c0_77] : memref<1x42x48xbf16, #tpu.memory_space<vmem>>, vector<1x12x48xbf16>
    %95 = vector.shape_cast %94 : vector<1x12x48xbf16> to vector<12x48xbf16>
    %c912 = arith.constant 912 : index
    %c0_78 = arith.constant 0 : index
    %96 = vector.load %arg2[%c912, %c0_78] : memref<1200x128xbf16, #tpu.memory_space<vmem>>, vector<48x128xbf16>
    %cst_79 = arith.constant dense<0.000000e+00> : vector<12x128xf32>
    %97 = tpu.matmul %95, %96, %cst_79 {dimension_numbers = #tpu.dot_dimension_numbers<[1], [0], [0], [1], [0, 0, 1, 1], [], []>} : vector<12x48xbf16>, vector<48x128xbf16>, vector<12x128xf32> -> vector<12x128xf32>
    %98 = arith.addf %93, %97 : vector<12x128xf32>
    %c0_80 = arith.constant 0 : index
    %c24 = arith.constant 24 : index
    %c0_81 = arith.constant 0 : index
    %99 = vector.load %arg1[%c0_80, %c24, %c0_81] : memref<1x42x48xbf16, #tpu.memory_space<vmem>>, vector<1x12x48xbf16>
    %100 = vector.shape_cast %99 : vector<1x12x48xbf16> to vector<12x48xbf16>
    %c960 = arith.constant 960 : index
    %c0_82 = arith.constant 0 : index
    %101 = vector.load %arg2[%c960, %c0_82] : memref<1200x128xbf16, #tpu.memory_space<vmem>>, vector<48x128xbf16>
    %cst_83 = arith.constant dense<0.000000e+00> : vector<12x128xf32>
    %102 = tpu.matmul %100, %101, %cst_83 {dimension_numbers = #tpu.dot_dimension_numbers<[1], [0], [0], [1], [0, 0, 1, 1], [], []>} : vector<12x48xbf16>, vector<48x128xbf16>, vector<12x128xf32> -> vector<12x128xf32>
    %103 = arith.addf %98, %102 : vector<12x128xf32>
    %c0_84 = arith.constant 0 : index
    %c25 = arith.constant 25 : index
    %c0_85 = arith.constant 0 : index
    %104 = vector.load %arg1[%c0_84, %c25, %c0_85] : memref<1x42x48xbf16, #tpu.memory_space<vmem>>, vector<1x12x48xbf16>
    %105 = vector.shape_cast %104 : vector<1x12x48xbf16> to vector<12x48xbf16>
    %c1008 = arith.constant 1008 : index
    %c0_86 = arith.constant 0 : index
    %106 = vector.load %arg2[%c1008, %c0_86] : memref<1200x128xbf16, #tpu.memory_space<vmem>>, vector<48x128xbf16>
    %cst_87 = arith.constant dense<0.000000e+00> : vector<12x128xf32>
    %107 = tpu.matmul %105, %106, %cst_87 {dimension_numbers = #tpu.dot_dimension_numbers<[1], [0], [0], [1], [0, 0, 1, 1], [], []>} : vector<12x48xbf16>, vector<48x128xbf16>, vector<12x128xf32> -> vector<12x128xf32>
    %108 = arith.addf %103, %107 : vector<12x128xf32>
    %c0_88 = arith.constant 0 : index
    %c26 = arith.constant 26 : index
    %c0_89 = arith.constant 0 : index
    %109 = vector.load %arg1[%c0_88, %c26, %c0_89] : memref<1x42x48xbf16, #tpu.memory_space<vmem>>, vector<1x12x48xbf16>
    %110 = vector.shape_cast %109 : vector<1x12x48xbf16> to vector<12x48xbf16>
    %c1056 = arith.constant 1056 : index
    %c0_90 = arith.constant 0 : index
    %111 = vector.load %arg2[%c1056, %c0_90] : memref<1200x128xbf16, #tpu.memory_space<vmem>>, vector<48x128xbf16>
    %cst_91 = arith.constant dense<0.000000e+00> : vector<12x128xf32>
    %112 = tpu.matmul %110, %111, %cst_91 {dimension_numbers = #tpu.dot_dimension_numbers<[1], [0], [0], [1], [0, 0, 1, 1], [], []>} : vector<12x48xbf16>, vector<48x128xbf16>, vector<12x128xf32> -> vector<12x128xf32>
    %113 = arith.addf %108, %112 : vector<12x128xf32>
    %c0_92 = arith.constant 0 : index
    %c27 = arith.constant 27 : index
    %c0_93 = arith.constant 0 : index
    %114 = vector.load %arg1[%c0_92, %c27, %c0_93] : memref<1x42x48xbf16, #tpu.memory_space<vmem>>, vector<1x12x48xbf16>
    %115 = vector.shape_cast %114 : vector<1x12x48xbf16> to vector<12x48xbf16>
    %c1104 = arith.constant 1104 : index
    %c0_94 = arith.constant 0 : index
    %116 = vector.load %arg2[%c1104, %c0_94] : memref<1200x128xbf16, #tpu.memory_space<vmem>>, vector<48x128xbf16>
    %cst_95 = arith.constant dense<0.000000e+00> : vector<12x128xf32>
    %117 = tpu.matmul %115, %116, %cst_95 {dimension_numbers = #tpu.dot_dimension_numbers<[1], [0], [0], [1], [0, 0, 1, 1], [], []>} : vector<12x48xbf16>, vector<48x128xbf16>, vector<12x128xf32> -> vector<12x128xf32>
    %118 = arith.addf %113, %117 : vector<12x128xf32>
    %c0_96 = arith.constant 0 : index
    %c28 = arith.constant 28 : index
    %c0_97 = arith.constant 0 : index
    %119 = vector.load %arg1[%c0_96, %c28, %c0_97] : memref<1x42x48xbf16, #tpu.memory_space<vmem>>, vector<1x12x48xbf16>
    %120 = vector.shape_cast %119 : vector<1x12x48xbf16> to vector<12x48xbf16>
    %c1152 = arith.constant 1152 : index
    %c0_98 = arith.constant 0 : index
    %121 = vector.load %arg2[%c1152, %c0_98] : memref<1200x128xbf16, #tpu.memory_space<vmem>>, vector<48x128xbf16>
    %cst_99 = arith.constant dense<0.000000e+00> : vector<12x128xf32>
    %122 = tpu.matmul %120, %121, %cst_99 {dimension_numbers = #tpu.dot_dimension_numbers<[1], [0], [0], [1], [0, 0, 1, 1], [], []>} : vector<12x48xbf16>, vector<48x128xbf16>, vector<12x128xf32> -> vector<12x128xf32>
    %123 = arith.addf %118, %122 : vector<12x128xf32>
    %c0_100 = arith.constant 0 : index
    %c0_101 = arith.constant 0 : index
    %124 = vector.load %arg3[%c0_100, %c0_101] : memref<1x128xf32, #tpu.memory_space<vmem>>, vector<1x128xf32>
    %125 = vector.broadcast %124 : vector<1x128xf32> to vector<12x128xf32>
    %126 = arith.addf %123, %125 : vector<12x128xf32>
    %cst_102 = arith.constant 0.000000e+00 : f32
    %127 = vector.broadcast %cst_102 : f32 to vector<12x128xf32>
    %128 = arith.maximumf %126, %127 : vector<12x128xf32>
    %129 = arith.truncf %128 : vector<12x128xf32> to vector<12x128xbf16>
    %c0_103 = arith.constant 0 : index
    %c0_104 = arith.constant 0 : index
    %c0_105 = arith.constant 0 : index
    %130 = vector.load %arg4[%c0_103, %c0_104, %c0_105] : memref<1x12x128xbf16, #tpu.memory_space<vmem>>, vector<1x12x128xbf16>
    %131 = vector.shape_cast %130 : vector<1x12x128xbf16> to vector<12x128xbf16>
    %132 = vector.shape_cast %129 : vector<12x128xbf16> to vector<1x12x128xbf16>
    tpu.vector_store %arg4[%c0_103, %c0_104, %c0_105], %132 {strides = array<i32>} : memref<1x12x128xbf16, #tpu.memory_space<vmem>>, vector<1x12x128xbf16>,
    return
  }
  func.func @transform_0(%arg0: i32) -> (i32, i32, i32) {
    %c0_i32 = arith.constant 0 : i32
    %c0_i32_0 = arith.constant 0 : i32
    %c0_i32_1 = arith.constant 0 : i32
    return %arg0, %c0_i32, %c0_i32_0 : i32, i32, i32
  }
  func.func @transform_1(%arg0: i32) -> (i32, i32) {
    %c0_i32 = arith.constant 0 : i32
    %c0_i32_0 = arith.constant 0 : i32
    %c0_i32_1 = arith.constant 0 : i32
    return %c0_i32, %c0_i32_0 : i32, i32
  }
  func.func @transform_2(%arg0: i32) -> (i32, i32) {
    %c0_i32 = arith.constant 0 : i32
    %c0_i32_0 = arith.constant 0 : i32
    %c0_i32_1 = arith.constant 0 : i32
    return %c0_i32, %c0_i32_0 : i32, i32
  }
  func.func @transform_3(%arg0: i32) -> (i32, i32, i32) {
    %c0_i32 = arith.constant 0 : i32
    %c0_i32_0 = arith.constant 0 : i32
    %c0_i32_1 = arith.constant 0 : i32
    return %arg0, %c0_i32, %c0_i32_0 : i32, i32, i32
  }
}

module attributes {stable_mosaic.version = 11 : i64} {
  func.func @_avgpool_conv_kernel(%arg0: i32, %arg1: memref<1x20x192xbf16, #tpu.memory_space<vmem>>, %arg2: memref<192x128xbf16, #tpu.memory_space<vmem>>, %arg3: memref<1x128xf32, #tpu.memory_space<vmem>>, %arg4: memref<1x8x128xbf16, #tpu.memory_space<vmem>>) attributes {dimension_semantics = [#tpu.dimension_semantics<parallel>], iteration_bounds = array<i64: 2>, scalar_prefetch = 0 : i64, scratch_operands = 0 : i64, tpu.core_type = #tpu.core_type<tc>, window_params = [{transform_indices = @transform_0, window_bounds = array<i64: 1, 20, 192>}, {pipeline_mode = #tpu.pipeline_mode<synchronous>, transform_indices = @transform_1, window_bounds = array<i64: 192, 128>}, {pipeline_mode = #tpu.pipeline_mode<synchronous>, transform_indices = @transform_2, window_bounds = array<i64: 1, 128>}, {transform_indices = @transform_3, window_bounds = array<i64: 1, 8, 128>}]} {
    %c0 = arith.constant 0 : index
    %c0_0 = arith.constant 0 : index
    %c0_1 = arith.constant 0 : index
    %0 = vector.load %arg1[%c0, %c0_0, %c0_1] : memref<1x20x192xbf16, #tpu.memory_space<vmem>>, vector<1x8x192xbf16>
    %1 = vector.shape_cast %0 : vector<1x8x192xbf16> to vector<8x192xbf16>
    %2 = arith.extf %1 : vector<8x192xbf16> to vector<8x192xf32>
    %c0_2 = arith.constant 0 : index
    %c1 = arith.constant 1 : index
    %c0_3 = arith.constant 0 : index
    %3 = vector.load %arg1[%c0_2, %c1, %c0_3] : memref<1x20x192xbf16, #tpu.memory_space<vmem>>, vector<1x8x192xbf16>
    %4 = vector.shape_cast %3 : vector<1x8x192xbf16> to vector<8x192xbf16>
    %5 = arith.extf %4 : vector<8x192xbf16> to vector<8x192xf32>
    %6 = arith.addf %2, %5 : vector<8x192xf32>
    %c0_4 = arith.constant 0 : index
    %c2 = arith.constant 2 : index
    %c0_5 = arith.constant 0 : index
    %7 = vector.load %arg1[%c0_4, %c2, %c0_5] : memref<1x20x192xbf16, #tpu.memory_space<vmem>>, vector<1x8x192xbf16>
    %8 = vector.shape_cast %7 : vector<1x8x192xbf16> to vector<8x192xbf16>
    %9 = arith.extf %8 : vector<8x192xbf16> to vector<8x192xf32>
    %10 = arith.addf %6, %9 : vector<8x192xf32>
    %c0_6 = arith.constant 0 : index
    %c4 = arith.constant 4 : index
    %c0_7 = arith.constant 0 : index
    %11 = vector.load %arg1[%c0_6, %c4, %c0_7] : memref<1x20x192xbf16, #tpu.memory_space<vmem>>, vector<1x8x192xbf16>
    %12 = vector.shape_cast %11 : vector<1x8x192xbf16> to vector<8x192xbf16>
    %13 = arith.extf %12 : vector<8x192xbf16> to vector<8x192xf32>
    %14 = arith.addf %10, %13 : vector<8x192xf32>
    %c0_8 = arith.constant 0 : index
    %c5 = arith.constant 5 : index
    %c0_9 = arith.constant 0 : index
    %15 = vector.load %arg1[%c0_8, %c5, %c0_9] : memref<1x20x192xbf16, #tpu.memory_space<vmem>>, vector<1x8x192xbf16>
    %16 = vector.shape_cast %15 : vector<1x8x192xbf16> to vector<8x192xbf16>
    %17 = arith.extf %16 : vector<8x192xbf16> to vector<8x192xf32>
    %18 = arith.addf %14, %17 : vector<8x192xf32>
    %c0_10 = arith.constant 0 : index
    %c6 = arith.constant 6 : index
    %c0_11 = arith.constant 0 : index
    %19 = vector.load %arg1[%c0_10, %c6, %c0_11] : memref<1x20x192xbf16, #tpu.memory_space<vmem>>, vector<1x8x192xbf16>
    %20 = vector.shape_cast %19 : vector<1x8x192xbf16> to vector<8x192xbf16>
    %21 = arith.extf %20 : vector<8x192xbf16> to vector<8x192xf32>
    %22 = arith.addf %18, %21 : vector<8x192xf32>
    %c0_12 = arith.constant 0 : index
    %c8 = arith.constant 8 : index
    %c0_13 = arith.constant 0 : index
    %23 = vector.load %arg1[%c0_12, %c8, %c0_13] : memref<1x20x192xbf16, #tpu.memory_space<vmem>>, vector<1x8x192xbf16>
    %24 = vector.shape_cast %23 : vector<1x8x192xbf16> to vector<8x192xbf16>
    %25 = arith.extf %24 : vector<8x192xbf16> to vector<8x192xf32>
    %26 = arith.addf %22, %25 : vector<8x192xf32>
    %c0_14 = arith.constant 0 : index
    %c9 = arith.constant 9 : index
    %c0_15 = arith.constant 0 : index
    %27 = vector.load %arg1[%c0_14, %c9, %c0_15] : memref<1x20x192xbf16, #tpu.memory_space<vmem>>, vector<1x8x192xbf16>
    %28 = vector.shape_cast %27 : vector<1x8x192xbf16> to vector<8x192xbf16>
    %29 = arith.extf %28 : vector<8x192xbf16> to vector<8x192xf32>
    %30 = arith.addf %26, %29 : vector<8x192xf32>
    %c0_16 = arith.constant 0 : index
    %c10 = arith.constant 10 : index
    %c0_17 = arith.constant 0 : index
    %31 = vector.load %arg1[%c0_16, %c10, %c0_17] : memref<1x20x192xbf16, #tpu.memory_space<vmem>>, vector<1x8x192xbf16>
    %32 = vector.shape_cast %31 : vector<1x8x192xbf16> to vector<8x192xbf16>
    %33 = arith.extf %32 : vector<8x192xbf16> to vector<8x192xf32>
    %34 = arith.addf %30, %33 : vector<8x192xf32>
    %35 = arith.truncf %34 : vector<8x192xf32> to vector<8x192xbf16>
    %c0_18 = arith.constant 0 : index
    %c0_19 = arith.constant 0 : index
    %36 = vector.load %arg2[%c0_18, %c0_19] : memref<192x128xbf16, #tpu.memory_space<vmem>>, vector<192x128xbf16>
    %cst = arith.constant dense<0.000000e+00> : vector<8x128xf32>
    %37 = tpu.matmul %35, %36, %cst {dimension_numbers = #tpu.dot_dimension_numbers<[1], [0], [0], [1], [0, 0, 1, 1], [], []>} : vector<8x192xbf16>, vector<192x128xbf16>, vector<8x128xf32> -> vector<8x128xf32>
    %c0_20 = arith.constant 0 : index
    %c0_21 = arith.constant 0 : index
    %38 = vector.load %arg3[%c0_20, %c0_21] : memref<1x128xf32, #tpu.memory_space<vmem>>, vector<1x128xf32>
    %39 = vector.broadcast %38 : vector<1x128xf32> to vector<8x128xf32>
    %40 = arith.addf %37, %39 : vector<8x128xf32>
    %cst_22 = arith.constant 0.000000e+00 : f32
    %41 = vector.broadcast %cst_22 : f32 to vector<8x128xf32>
    %42 = arith.maximumf %40, %41 : vector<8x128xf32>
    %43 = arith.truncf %42 : vector<8x128xf32> to vector<8x128xbf16>
    %c0_23 = arith.constant 0 : index
    %c0_24 = arith.constant 0 : index
    %c0_25 = arith.constant 0 : index
    %44 = vector.load %arg4[%c0_23, %c0_24, %c0_25] : memref<1x8x128xbf16, #tpu.memory_space<vmem>>, vector<1x8x128xbf16>
    %45 = vector.shape_cast %44 : vector<1x8x128xbf16> to vector<8x128xbf16>
    %46 = vector.shape_cast %43 : vector<8x128xbf16> to vector<1x8x128xbf16>
    tpu.vector_store %arg4[%c0_23, %c0_24, %c0_25], %46 {strides = array<i32>} : memref<1x8x128xbf16, #tpu.memory_space<vmem>>, vector<1x8x128xbf16>,
    return
  }
  func.func @transform_0(%arg0: i32) -> (i32, i32, i32) {
    %c0_i32 = arith.constant 0 : i32
    %c0_i32_0 = arith.constant 0 : i32
    %c0_i32_1 = arith.constant 0 : i32
    return %arg0, %c0_i32, %c0_i32_0 : i32, i32, i32
  }
  func.func @transform_1(%arg0: i32) -> (i32, i32) {
    %c0_i32 = arith.constant 0 : i32
    %c0_i32_0 = arith.constant 0 : i32
    %c0_i32_1 = arith.constant 0 : i32
    return %c0_i32, %c0_i32_0 : i32, i32
  }
  func.func @transform_2(%arg0: i32) -> (i32, i32) {
    %c0_i32 = arith.constant 0 : i32
    %c0_i32_0 = arith.constant 0 : i32
    %c0_i32_1 = arith.constant 0 : i32
    return %c0_i32, %c0_i32_0 : i32, i32
  }
  func.func @transform_3(%arg0: i32) -> (i32, i32, i32) {
    %c0_i32 = arith.constant 0 : i32
    %c0_i32_0 = arith.constant 0 : i32
    %c0_i32_1 = arith.constant 0 : i32
    return %arg0, %c0_i32, %c0_i32_0 : i32, i32, i32
  }
}

module attributes {stable_mosaic.version = 11 : i64} {
  func.func @_matmul_bias_relu_kernel(%arg0: i32, %arg1: memref<8x256xbf16, #tpu.memory_space<vmem>>, %arg2: memref<256x256xbf16, #tpu.memory_space<vmem>>, %arg3: memref<1x256xf32, #tpu.memory_space<vmem>>, %arg4: memref<8x256xbf16, #tpu.memory_space<vmem>>) attributes {dimension_semantics = [#tpu.dimension_semantics<parallel>], iteration_bounds = array<i64: 1>, scalar_prefetch = 0 : i64, scratch_operands = 0 : i64, tpu.core_type = #tpu.core_type<tc>, window_params = [{transform_indices = @transform_0, window_bounds = array<i64: 8, 256>}, {pipeline_mode = #tpu.pipeline_mode<synchronous>, transform_indices = @transform_1, window_bounds = array<i64: 256, 256>}, {pipeline_mode = #tpu.pipeline_mode<synchronous>, transform_indices = @transform_2, window_bounds = array<i64: 1, 256>}, {transform_indices = @transform_3, window_bounds = array<i64: 8, 256>}]} {
    %c0 = arith.constant 0 : index
    %c0_0 = arith.constant 0 : index
    %0 = vector.load %arg1[%c0, %c0_0] : memref<8x256xbf16, #tpu.memory_space<vmem>>, vector<8x256xbf16>
    %c0_1 = arith.constant 0 : index
    %c0_2 = arith.constant 0 : index
    %1 = vector.load %arg2[%c0_1, %c0_2] : memref<256x256xbf16, #tpu.memory_space<vmem>>, vector<256x256xbf16>
    %cst = arith.constant dense<0.000000e+00> : vector<8x256xf32>
    %2 = tpu.matmul %0, %1, %cst {dimension_numbers = #tpu.dot_dimension_numbers<[1], [0], [0], [1], [0, 0, 1, 1], [], []>} : vector<8x256xbf16>, vector<256x256xbf16>, vector<8x256xf32> -> vector<8x256xf32>
    %c0_3 = arith.constant 0 : index
    %c0_4 = arith.constant 0 : index
    %3 = vector.load %arg3[%c0_3, %c0_4] : memref<1x256xf32, #tpu.memory_space<vmem>>, vector<1x256xf32>
    %4 = vector.broadcast %3 : vector<1x256xf32> to vector<8x256xf32>
    %5 = arith.addf %2, %4 : vector<8x256xf32>
    %cst_5 = arith.constant 0.000000e+00 : f32
    %6 = vector.broadcast %cst_5 : f32 to vector<8x256xf32>
    %7 = arith.maximumf %5, %6 : vector<8x256xf32>
    %8 = arith.truncf %7 : vector<8x256xf32> to vector<8x256xbf16>
    %c0_6 = arith.constant 0 : index
    %c0_7 = arith.constant 0 : index
    %9 = vector.load %arg4[%c0_6, %c0_7] : memref<8x256xbf16, #tpu.memory_space<vmem>>, vector<8x256xbf16>
    tpu.vector_store %arg4[%c0_6, %c0_7], %8 {strides = array<i32>} : memref<8x256xbf16, #tpu.memory_space<vmem>>, vector<8x256xbf16>,
    return
  }
  func.func @transform_0(%arg0: i32) -> (i32, i32) {
    %c0_i32 = arith.constant 0 : i32
    %c0_i32_0 = arith.constant 0 : i32
    return %arg0, %c0_i32 : i32, i32
  }
  func.func @transform_1(%arg0: i32) -> (i32, i32) {
    %c0_i32 = arith.constant 0 : i32
    %c0_i32_0 = arith.constant 0 : i32
    %c0_i32_1 = arith.constant 0 : i32
    return %c0_i32, %c0_i32_0 : i32, i32
  }
  func.func @transform_2(%arg0: i32) -> (i32, i32) {
    %c0_i32 = arith.constant 0 : i32
    %c0_i32_0 = arith.constant 0 : i32
    %c0_i32_1 = arith.constant 0 : i32
    return %c0_i32, %c0_i32_0 : i32, i32
  }
  func.func @transform_3(%arg0: i32) -> (i32, i32) {
    %c0_i32 = arith.constant 0 : i32
    %c0_i32_0 = arith.constant 0 : i32
    return %arg0, %c0_i32 : i32, i32
  }
}

module attributes {stable_mosaic.version = 11 : i64} {
  func.func @_avgpool_conv_kernel(%arg0: i32, %arg1: memref<1x20x256xbf16, #tpu.memory_space<vmem>>, %arg2: memref<256x128xbf16, #tpu.memory_space<vmem>>, %arg3: memref<1x128xf32, #tpu.memory_space<vmem>>, %arg4: memref<1x8x128xbf16, #tpu.memory_space<vmem>>) attributes {dimension_semantics = [#tpu.dimension_semantics<parallel>], iteration_bounds = array<i64: 2>, scalar_prefetch = 0 : i64, scratch_operands = 0 : i64, tpu.core_type = #tpu.core_type<tc>, window_params = [{transform_indices = @transform_0, window_bounds = array<i64: 1, 20, 256>}, {pipeline_mode = #tpu.pipeline_mode<synchronous>, transform_indices = @transform_1, window_bounds = array<i64: 256, 128>}, {pipeline_mode = #tpu.pipeline_mode<synchronous>, transform_indices = @transform_2, window_bounds = array<i64: 1, 128>}, {transform_indices = @transform_3, window_bounds = array<i64: 1, 8, 128>}]} {
    %c0 = arith.constant 0 : index
    %c0_0 = arith.constant 0 : index
    %c0_1 = arith.constant 0 : index
    %0 = vector.load %arg1[%c0, %c0_0, %c0_1] : memref<1x20x256xbf16, #tpu.memory_space<vmem>>, vector<1x8x256xbf16>
    %1 = vector.shape_cast %0 : vector<1x8x256xbf16> to vector<8x256xbf16>
    %2 = arith.extf %1 : vector<8x256xbf16> to vector<8x256xf32>
    %c0_2 = arith.constant 0 : index
    %c1 = arith.constant 1 : index
    %c0_3 = arith.constant 0 : index
    %3 = vector.load %arg1[%c0_2, %c1, %c0_3] : memref<1x20x256xbf16, #tpu.memory_space<vmem>>, vector<1x8x256xbf16>
    %4 = vector.shape_cast %3 : vector<1x8x256xbf16> to vector<8x256xbf16>
    %5 = arith.extf %4 : vector<8x256xbf16> to vector<8x256xf32>
    %6 = arith.addf %2, %5 : vector<8x256xf32>
    %c0_4 = arith.constant 0 : index
    %c2 = arith.constant 2 : index
    %c0_5 = arith.constant 0 : index
    %7 = vector.load %arg1[%c0_4, %c2, %c0_5] : memref<1x20x256xbf16, #tpu.memory_space<vmem>>, vector<1x8x256xbf16>
    %8 = vector.shape_cast %7 : vector<1x8x256xbf16> to vector<8x256xbf16>
    %9 = arith.extf %8 : vector<8x256xbf16> to vector<8x256xf32>
    %10 = arith.addf %6, %9 : vector<8x256xf32>
    %c0_6 = arith.constant 0 : index
    %c4 = arith.constant 4 : index
    %c0_7 = arith.constant 0 : index
    %11 = vector.load %arg1[%c0_6, %c4, %c0_7] : memref<1x20x256xbf16, #tpu.memory_space<vmem>>, vector<1x8x256xbf16>
    %12 = vector.shape_cast %11 : vector<1x8x256xbf16> to vector<8x256xbf16>
    %13 = arith.extf %12 : vector<8x256xbf16> to vector<8x256xf32>
    %14 = arith.addf %10, %13 : vector<8x256xf32>
    %c0_8 = arith.constant 0 : index
    %c5 = arith.constant 5 : index
    %c0_9 = arith.constant 0 : index
    %15 = vector.load %arg1[%c0_8, %c5, %c0_9] : memref<1x20x256xbf16, #tpu.memory_space<vmem>>, vector<1x8x256xbf16>
    %16 = vector.shape_cast %15 : vector<1x8x256xbf16> to vector<8x256xbf16>
    %17 = arith.extf %16 : vector<8x256xbf16> to vector<8x256xf32>
    %18 = arith.addf %14, %17 : vector<8x256xf32>
    %c0_10 = arith.constant 0 : index
    %c6 = arith.constant 6 : index
    %c0_11 = arith.constant 0 : index
    %19 = vector.load %arg1[%c0_10, %c6, %c0_11] : memref<1x20x256xbf16, #tpu.memory_space<vmem>>, vector<1x8x256xbf16>
    %20 = vector.shape_cast %19 : vector<1x8x256xbf16> to vector<8x256xbf16>
    %21 = arith.extf %20 : vector<8x256xbf16> to vector<8x256xf32>
    %22 = arith.addf %18, %21 : vector<8x256xf32>
    %c0_12 = arith.constant 0 : index
    %c8 = arith.constant 8 : index
    %c0_13 = arith.constant 0 : index
    %23 = vector.load %arg1[%c0_12, %c8, %c0_13] : memref<1x20x256xbf16, #tpu.memory_space<vmem>>, vector<1x8x256xbf16>
    %24 = vector.shape_cast %23 : vector<1x8x256xbf16> to vector<8x256xbf16>
    %25 = arith.extf %24 : vector<8x256xbf16> to vector<8x256xf32>
    %26 = arith.addf %22, %25 : vector<8x256xf32>
    %c0_14 = arith.constant 0 : index
    %c9 = arith.constant 9 : index
    %c0_15 = arith.constant 0 : index
    %27 = vector.load %arg1[%c0_14, %c9, %c0_15] : memref<1x20x256xbf16, #tpu.memory_space<vmem>>, vector<1x8x256xbf16>
    %28 = vector.shape_cast %27 : vector<1x8x256xbf16> to vector<8x256xbf16>
    %29 = arith.extf %28 : vector<8x256xbf16> to vector<8x256xf32>
    %30 = arith.addf %26, %29 : vector<8x256xf32>
    %c0_16 = arith.constant 0 : index
    %c10 = arith.constant 10 : index
    %c0_17 = arith.constant 0 : index
    %31 = vector.load %arg1[%c0_16, %c10, %c0_17] : memref<1x20x256xbf16, #tpu.memory_space<vmem>>, vector<1x8x256xbf16>
    %32 = vector.shape_cast %31 : vector<1x8x256xbf16> to vector<8x256xbf16>
    %33 = arith.extf %32 : vector<8x256xbf16> to vector<8x256xf32>
    %34 = arith.addf %30, %33 : vector<8x256xf32>
    %35 = arith.truncf %34 : vector<8x256xf32> to vector<8x256xbf16>
    %c0_18 = arith.constant 0 : index
    %c0_19 = arith.constant 0 : index
    %36 = vector.load %arg2[%c0_18, %c0_19] : memref<256x128xbf16, #tpu.memory_space<vmem>>, vector<256x128xbf16>
    %cst = arith.constant dense<0.000000e+00> : vector<8x128xf32>
    %37 = tpu.matmul %35, %36, %cst {dimension_numbers = #tpu.dot_dimension_numbers<[1], [0], [0], [1], [0, 0, 1, 1], [], []>} : vector<8x256xbf16>, vector<256x128xbf16>, vector<8x128xf32> -> vector<8x128xf32>
    %c0_20 = arith.constant 0 : index
    %c0_21 = arith.constant 0 : index
    %38 = vector.load %arg3[%c0_20, %c0_21] : memref<1x128xf32, #tpu.memory_space<vmem>>, vector<1x128xf32>
    %39 = vector.broadcast %38 : vector<1x128xf32> to vector<8x128xf32>
    %40 = arith.addf %37, %39 : vector<8x128xf32>
    %cst_22 = arith.constant 0.000000e+00 : f32
    %41 = vector.broadcast %cst_22 : f32 to vector<8x128xf32>
    %42 = arith.maximumf %40, %41 : vector<8x128xf32>
    %43 = arith.truncf %42 : vector<8x128xf32> to vector<8x128xbf16>
    %c0_23 = arith.constant 0 : index
    %c0_24 = arith.constant 0 : index
    %c0_25 = arith.constant 0 : index
    %44 = vector.load %arg4[%c0_23, %c0_24, %c0_25] : memref<1x8x128xbf16, #tpu.memory_space<vmem>>, vector<1x8x128xbf16>
    %45 = vector.shape_cast %44 : vector<1x8x128xbf16> to vector<8x128xbf16>
    %46 = vector.shape_cast %43 : vector<8x128xbf16> to vector<1x8x128xbf16>
    tpu.vector_store %arg4[%c0_23, %c0_24, %c0_25], %46 {strides = array<i32>} : memref<1x8x128xbf16, #tpu.memory_space<vmem>>, vector<1x8x128xbf16>,
    return
  }
  func.func @transform_0(%arg0: i32) -> (i32, i32, i32) {
    %c0_i32 = arith.constant 0 : i32
    %c0_i32_0 = arith.constant 0 : i32
    %c0_i32_1 = arith.constant 0 : i32
    return %arg0, %c0_i32, %c0_i32_0 : i32, i32, i32
  }
  func.func @transform_1(%arg0: i32) -> (i32, i32) {
    %c0_i32 = arith.constant 0 : i32
    %c0_i32_0 = arith.constant 0 : i32
    %c0_i32_1 = arith.constant 0 : i32
    return %c0_i32, %c0_i32_0 : i32, i32
  }
  func.func @transform_2(%arg0: i32) -> (i32, i32) {
    %c0_i32 = arith.constant 0 : i32
    %c0_i32_0 = arith.constant 0 : i32
    %c0_i32_1 = arith.constant 0 : i32
    return %c0_i32, %c0_i32_0 : i32, i32
  }
  func.func @transform_3(%arg0: i32) -> (i32, i32, i32) {
    %c0_i32 = arith.constant 0 : i32
    %c0_i32_0 = arith.constant 0 : i32
    %c0_i32_1 = arith.constant 0 : i32
    return %arg0, %c0_i32, %c0_i32_0 : i32, i32, i32
  }
}

module attributes {stable_mosaic.version = 11 : i64} {
  func.func @_matmul_bias_relu_kernel(%arg0: i32, %arg1: memref<8x288xbf16, #tpu.memory_space<vmem>>, %arg2: memref<288x256xbf16, #tpu.memory_space<vmem>>, %arg3: memref<1x256xf32, #tpu.memory_space<vmem>>, %arg4: memref<8x256xbf16, #tpu.memory_space<vmem>>) attributes {dimension_semantics = [#tpu.dimension_semantics<parallel>], iteration_bounds = array<i64: 1>, scalar_prefetch = 0 : i64, scratch_operands = 0 : i64, tpu.core_type = #tpu.core_type<tc>, window_params = [{transform_indices = @transform_0, window_bounds = array<i64: 8, 288>}, {pipeline_mode = #tpu.pipeline_mode<synchronous>, transform_indices = @transform_1, window_bounds = array<i64: 288, 256>}, {pipeline_mode = #tpu.pipeline_mode<synchronous>, transform_indices = @transform_2, window_bounds = array<i64: 1, 256>}, {transform_indices = @transform_3, window_bounds = array<i64: 8, 256>}]} {
    %c0 = arith.constant 0 : index
    %c0_0 = arith.constant 0 : index
    %0 = vector.load %arg1[%c0, %c0_0] : memref<8x288xbf16, #tpu.memory_space<vmem>>, vector<8x288xbf16>
    %c0_1 = arith.constant 0 : index
    %c0_2 = arith.constant 0 : index
    %1 = vector.load %arg2[%c0_1, %c0_2] : memref<288x256xbf16, #tpu.memory_space<vmem>>, vector<288x256xbf16>
    %cst = arith.constant dense<0.000000e+00> : vector<8x256xf32>
    %2 = tpu.matmul %0, %1, %cst {dimension_numbers = #tpu.dot_dimension_numbers<[1], [0], [0], [1], [0, 0, 1, 1], [], []>} : vector<8x288xbf16>, vector<288x256xbf16>, vector<8x256xf32> -> vector<8x256xf32>
    %c0_3 = arith.constant 0 : index
    %c0_4 = arith.constant 0 : index
    %3 = vector.load %arg3[%c0_3, %c0_4] : memref<1x256xf32, #tpu.memory_space<vmem>>, vector<1x256xf32>
    %4 = vector.broadcast %3 : vector<1x256xf32> to vector<8x256xf32>
    %5 = arith.addf %2, %4 : vector<8x256xf32>
    %cst_5 = arith.constant 0.000000e+00 : f32
    %6 = vector.broadcast %cst_5 : f32 to vector<8x256xf32>
    %7 = arith.maximumf %5, %6 : vector<8x256xf32>
    %8 = arith.truncf %7 : vector<8x256xf32> to vector<8x256xbf16>
    %c0_6 = arith.constant 0 : index
    %c0_7 = arith.constant 0 : index
    %9 = vector.load %arg4[%c0_6, %c0_7] : memref<8x256xbf16, #tpu.memory_space<vmem>>, vector<8x256xbf16>
    tpu.vector_store %arg4[%c0_6, %c0_7], %8 {strides = array<i32>} : memref<8x256xbf16, #tpu.memory_space<vmem>>, vector<8x256xbf16>,
    return
  }
  func.func @transform_0(%arg0: i32) -> (i32, i32) {
    %c0_i32 = arith.constant 0 : i32
    %c0_i32_0 = arith.constant 0 : i32
    return %arg0, %c0_i32 : i32, i32
  }
  func.func @transform_1(%arg0: i32) -> (i32, i32) {
    %c0_i32 = arith.constant 0 : i32
    %c0_i32_0 = arith.constant 0 : i32
    %c0_i32_1 = arith.constant 0 : i32
    return %c0_i32, %c0_i32_0 : i32, i32
  }
  func.func @transform_2(%arg0: i32) -> (i32, i32) {
    %c0_i32 = arith.constant 0 : i32
    %c0_i32_0 = arith.constant 0 : i32
    %c0_i32_1 = arith.constant 0 : i32
    return %c0_i32, %c0_i32_0 : i32, i32
  }
  func.func @transform_3(%arg0: i32) -> (i32, i32) {
    %c0_i32 = arith.constant 0 : i32
    %c0_i32_0 = arith.constant 0 : i32
    return %arg0, %c0_i32 : i32, i32
  }
}

module attributes {stable_mosaic.version = 11 : i64} {
  func.func @_avgpool_conv_kernel(%arg0: i32, %arg1: memref<1x20x288xbf16, #tpu.memory_space<vmem>>, %arg2: memref<288x128xbf16, #tpu.memory_space<vmem>>, %arg3: memref<1x128xf32, #tpu.memory_space<vmem>>, %arg4: memref<1x8x128xbf16, #tpu.memory_space<vmem>>) attributes {dimension_semantics = [#tpu.dimension_semantics<parallel>], iteration_bounds = array<i64: 2>, scalar_prefetch = 0 : i64, scratch_operands = 0 : i64, tpu.core_type = #tpu.core_type<tc>, window_params = [{transform_indices = @transform_0, window_bounds = array<i64: 1, 20, 288>}, {pipeline_mode = #tpu.pipeline_mode<synchronous>, transform_indices = @transform_1, window_bounds = array<i64: 288, 128>}, {pipeline_mode = #tpu.pipeline_mode<synchronous>, transform_indices = @transform_2, window_bounds = array<i64: 1, 128>}, {transform_indices = @transform_3, window_bounds = array<i64: 1, 8, 128>}]} {
    %c0 = arith.constant 0 : index
    %c0_0 = arith.constant 0 : index
    %c0_1 = arith.constant 0 : index
    %0 = vector.load %arg1[%c0, %c0_0, %c0_1] : memref<1x20x288xbf16, #tpu.memory_space<vmem>>, vector<1x8x288xbf16>
    %1 = vector.shape_cast %0 : vector<1x8x288xbf16> to vector<8x288xbf16>
    %2 = arith.extf %1 : vector<8x288xbf16> to vector<8x288xf32>
    %c0_2 = arith.constant 0 : index
    %c1 = arith.constant 1 : index
    %c0_3 = arith.constant 0 : index
    %3 = vector.load %arg1[%c0_2, %c1, %c0_3] : memref<1x20x288xbf16, #tpu.memory_space<vmem>>, vector<1x8x288xbf16>
    %4 = vector.shape_cast %3 : vector<1x8x288xbf16> to vector<8x288xbf16>
    %5 = arith.extf %4 : vector<8x288xbf16> to vector<8x288xf32>
    %6 = arith.addf %2, %5 : vector<8x288xf32>
    %c0_4 = arith.constant 0 : index
    %c2 = arith.constant 2 : index
    %c0_5 = arith.constant 0 : index
    %7 = vector.load %arg1[%c0_4, %c2, %c0_5] : memref<1x20x288xbf16, #tpu.memory_space<vmem>>, vector<1x8x288xbf16>
    %8 = vector.shape_cast %7 : vector<1x8x288xbf16> to vector<8x288xbf16>
    %9 = arith.extf %8 : vector<8x288xbf16> to vector<8x288xf32>
    %10 = arith.addf %6, %9 : vector<8x288xf32>
    %c0_6 = arith.constant 0 : index
    %c4 = arith.constant 4 : index
    %c0_7 = arith.constant 0 : index
    %11 = vector.load %arg1[%c0_6, %c4, %c0_7] : memref<1x20x288xbf16, #tpu.memory_space<vmem>>, vector<1x8x288xbf16>
    %12 = vector.shape_cast %11 : vector<1x8x288xbf16> to vector<8x288xbf16>
    %13 = arith.extf %12 : vector<8x288xbf16> to vector<8x288xf32>
    %14 = arith.addf %10, %13 : vector<8x288xf32>
    %c0_8 = arith.constant 0 : index
    %c5 = arith.constant 5 : index
    %c0_9 = arith.constant 0 : index
    %15 = vector.load %arg1[%c0_8, %c5, %c0_9] : memref<1x20x288xbf16, #tpu.memory_space<vmem>>, vector<1x8x288xbf16>
    %16 = vector.shape_cast %15 : vector<1x8x288xbf16> to vector<8x288xbf16>
    %17 = arith.extf %16 : vector<8x288xbf16> to vector<8x288xf32>
    %18 = arith.addf %14, %17 : vector<8x288xf32>
    %c0_10 = arith.constant 0 : index
    %c6 = arith.constant 6 : index
    %c0_11 = arith.constant 0 : index
    %19 = vector.load %arg1[%c0_10, %c6, %c0_11] : memref<1x20x288xbf16, #tpu.memory_space<vmem>>, vector<1x8x288xbf16>
    %20 = vector.shape_cast %19 : vector<1x8x288xbf16> to vector<8x288xbf16>
    %21 = arith.extf %20 : vector<8x288xbf16> to vector<8x288xf32>
    %22 = arith.addf %18, %21 : vector<8x288xf32>
    %c0_12 = arith.constant 0 : index
    %c8 = arith.constant 8 : index
    %c0_13 = arith.constant 0 : index
    %23 = vector.load %arg1[%c0_12, %c8, %c0_13] : memref<1x20x288xbf16, #tpu.memory_space<vmem>>, vector<1x8x288xbf16>
    %24 = vector.shape_cast %23 : vector<1x8x288xbf16> to vector<8x288xbf16>
    %25 = arith.extf %24 : vector<8x288xbf16> to vector<8x288xf32>
    %26 = arith.addf %22, %25 : vector<8x288xf32>
    %c0_14 = arith.constant 0 : index
    %c9 = arith.constant 9 : index
    %c0_15 = arith.constant 0 : index
    %27 = vector.load %arg1[%c0_14, %c9, %c0_15] : memref<1x20x288xbf16, #tpu.memory_space<vmem>>, vector<1x8x288xbf16>
    %28 = vector.shape_cast %27 : vector<1x8x288xbf16> to vector<8x288xbf16>
    %29 = arith.extf %28 : vector<8x288xbf16> to vector<8x288xf32>
    %30 = arith.addf %26, %29 : vector<8x288xf32>
    %c0_16 = arith.constant 0 : index
    %c10 = arith.constant 10 : index
    %c0_17 = arith.constant 0 : index
    %31 = vector.load %arg1[%c0_16, %c10, %c0_17] : memref<1x20x288xbf16, #tpu.memory_space<vmem>>, vector<1x8x288xbf16>
    %32 = vector.shape_cast %31 : vector<1x8x288xbf16> to vector<8x288xbf16>
    %33 = arith.extf %32 : vector<8x288xbf16> to vector<8x288xf32>
    %34 = arith.addf %30, %33 : vector<8x288xf32>
    %35 = arith.truncf %34 : vector<8x288xf32> to vector<8x288xbf16>
    %c0_18 = arith.constant 0 : index
    %c0_19 = arith.constant 0 : index
    %36 = vector.load %arg2[%c0_18, %c0_19] : memref<288x128xbf16, #tpu.memory_space<vmem>>, vector<288x128xbf16>
    %cst = arith.constant dense<0.000000e+00> : vector<8x128xf32>
    %37 = tpu.matmul %35, %36, %cst {dimension_numbers = #tpu.dot_dimension_numbers<[1], [0], [0], [1], [0, 0, 1, 1], [], []>} : vector<8x288xbf16>, vector<288x128xbf16>, vector<8x128xf32> -> vector<8x128xf32>
    %c0_20 = arith.constant 0 : index
    %c0_21 = arith.constant 0 : index
    %38 = vector.load %arg3[%c0_20, %c0_21] : memref<1x128xf32, #tpu.memory_space<vmem>>, vector<1x128xf32>
    %39 = vector.broadcast %38 : vector<1x128xf32> to vector<8x128xf32>
    %40 = arith.addf %37, %39 : vector<8x128xf32>
    %cst_22 = arith.constant 0.000000e+00 : f32
    %41 = vector.broadcast %cst_22 : f32 to vector<8x128xf32>
    %42 = arith.maximumf %40, %41 : vector<8x128xf32>
    %43 = arith.truncf %42 : vector<8x128xf32> to vector<8x128xbf16>
    %c0_23 = arith.constant 0 : index
    %c0_24 = arith.constant 0 : index
    %c0_25 = arith.constant 0 : index
    %44 = vector.load %arg4[%c0_23, %c0_24, %c0_25] : memref<1x8x128xbf16, #tpu.memory_space<vmem>>, vector<1x8x128xbf16>
    %45 = vector.shape_cast %44 : vector<1x8x128xbf16> to vector<8x128xbf16>
    %46 = vector.shape_cast %43 : vector<8x128xbf16> to vector<1x8x128xbf16>
    tpu.vector_store %arg4[%c0_23, %c0_24, %c0_25], %46 {strides = array<i32>} : memref<1x8x128xbf16, #tpu.memory_space<vmem>>, vector<1x8x128xbf16>,
    return
  }
  func.func @transform_0(%arg0: i32) -> (i32, i32, i32) {
    %c0_i32 = arith.constant 0 : i32
    %c0_i32_0 = arith.constant 0 : i32
    %c0_i32_1 = arith.constant 0 : i32
    return %arg0, %c0_i32, %c0_i32_0 : i32, i32, i32
  }
  func.func @transform_1(%arg0: i32) -> (i32, i32) {
    %c0_i32 = arith.constant 0 : i32
    %c0_i32_0 = arith.constant 0 : i32
    %c0_i32_1 = arith.constant 0 : i32
    return %c0_i32, %c0_i32_0 : i32, i32
  }
  func.func @transform_2(%arg0: i32) -> (i32, i32) {
    %c0_i32 = arith.constant 0 : i32
    %c0_i32_0 = arith.constant 0 : i32
    %c0_i32_1 = arith.constant 0 : i32
    return %c0_i32, %c0_i32_0 : i32, i32
  }
  func.func @transform_3(%arg0: i32) -> (i32, i32, i32) {
    %c0_i32 = arith.constant 0 : i32
    %c0_i32_0 = arith.constant 0 : i32
    %c0_i32_1 = arith.constant 0 : i32
    return %arg0, %c0_i32, %c0_i32_0 : i32, i32, i32
  }
}

</mosaic_0001>

<bundles_post_ra>
// kernel: inception_encoder_forward.22
= control target key start
LH: loop header
LB: loop body
LE: loop exit
PB: predicated region body
PF: predicated region fallthrough
CT: control target
= control target key end

     0   :  { %s1751_s12 = smov 0   ;;  %s1753_s13 = smov 0   ;;  %s2080_s0 = inlined_call_operand.vmem [shape: bf16[578,27], index: 0, kind: input, shape index: {}]   ;;  %s2081_s1 = inlined_call_operand.vmem [shape: bf16[27,128], index: 1, kind: input, shape index: {}]   ;;  %s2082_s2 = inlined_call_operand.vmem [shape: f32[1,128], index: 2, kind: input, shape index: {}]   ;;  %s2083_s3 = inlined_call_operand.vmem [shape: bf16[578,128], index: 3, kind: output, shape index: {}]  }
   0x1   :  { %s1755_s14 = smov 0  }
   0x2 LB: > { %s1764_s15 = sadd.s32 4294967295, %s1694_s14   ;;  %s1766_s16 = sadd.s32 1, %s1694_s14   ;;  %s1694_s14 = sphi %s1755_s14, %s2090_s14   ;;  %s1690_s13 = sphi %s1753_s13, %s2089_s13   ;;  %s1686_s12 = sphi %s1751_s12, %s2088_s12  }
   0x3   : > { %s85_s17 = ssub.s32 %s1694_s14, %s1766_s16  ;;  %s88_s18 = sadd.s32 1, %s1690_s13 }
   0x4   : > { %p86_p0 = scmp.eq.s32.totalorder %s85_s17, 0  ;;  %p98_p1 = scmp.ne.s32.totalorder %s1690_s13, %s1686_s12 }
   0x5   : > { %p99_p2 = scmp.eq.s32.totalorder %s1764_s15, 1  ;;  %p1180_p3 = scmp.ge.s32.totalorder %s1694_s14, 1 }
   0x6   : > { %s1774_s19 = scalar_select %p86_p0, %s1690_s13, %s88_s18  }
   0x7   : > { %p1776_p4 = por %p99_p2, %p98_p1  ;;  %p146_p5 = scmp.lt.s32.totalorder %s1694_s14, 3 }
   0x9   : > { %p147_p6 = pnand %p1180_p3, %p146_p5 }
   0xa   : > { %v1615_v0 = vld [vmem:[%s2081_s1] sm:$0xff] (!%p147_p6)   ;;  %v1728_v1 = vmov (!%p147_p6), 0.0   ;;  %v1616_v2 = vld [vmem:[%s2081_s1 + $0x8] sm:$0x3f] (!%p147_p6)   ;;  %vm403_vm0 = vcmask (!%p147_p6), 1044480   ;;  %vm404_vm1 = vcmask (!%p147_p6), 1045504  }
   0xb   : > { %150 = sbr.rel (%p147_p6) target bundleno = 402 (0x192), region = 32  ;;  %1438 = vmatprep.subr.bf16.mxu0 (!%p147_p6), %v1728_v1  ;;  %1518 = vmatprep.subr.bf16.mxu1 (!%p147_p6), %v1728_v1  ;;  %v1729_v3 = vmov (!%p147_p6), 65535   ;;  %vm1730_vm2 = vmmov (!%p147_p6), 0   ;;  %vm345_vm3 = vcmask (!%p147_p6), 220160   ;;  %v1879_v26 = vld [vmem:[%s2082_s2] ss:$0 sm:$0xff] (!%p147_p6) }
   0xc   : > { %1439 = vmatpush3.bf16.msra.mxu0 (!%p147_p6), %v1615_v0  ;;  %1520 = vmatpush3.bf16.msra.mxu1 (!%p147_p6), %v1615_v0  ;;  %s1789_s25 = smul.u32 (!%p147_p6), 37, %s1764_s15  ;;  %v405_v4 = vsel (!%p147_p6), %vm403_vm0, 4294967295, %v1729_v3  ;;  %s170_s6 = sand.u32 (!%p147_p6), 1, %s1686_s12  }
   0xd   : > { %1440 = vmatprep.subr.bf16.mxu0 (!%p147_p6), %v1728_v1  ;;  %1442 = vmatprep.mubr.msk.bf16.mxu0 (!%p147_p6), %vm1730_vm2, %v1728_v1  ;;  %v406_v5 = vsel (!%p147_p6), %vm404_vm1, %v405_v4, 0  ;;  %s1522_s7 = smul.u32 (!%p147_p6), 148, %s170_s6 }
   0xe   : > { %p178_p7 = scmp.lt.s32.totalorder (!%p147_p6), %s1789_s25, 72  ;;  %1519 = vmatprep.subr.bf16.mxu1 (!%p147_p6), %v1728_v1  ;;  %1482 = vmatprep.mubr.msk.bf16.mxu1 (!%p147_p6), %vm1730_vm2, %v1728_v1  ;;  %v408_v6 = vand.u32 (!%p147_p6), %v1616_v2, %v406_v5 }
   0xf   : > { %s1886_s8 = scalar_lea.vmem (!%p147_p6), [#allocation2], %s1522_s7  }
  0x10   : > { %1441 = vmatpush3.bf16.msra.mxu0 (!%p147_p6), %v408_v6  ;;  %1521 = vmatpush3.bf16.msra.mxu1 (!%p147_p6), %v408_v6 }
  0x12   : > { %s179_s26 = scalar_select %p178_p7, %s1789_s25, 72 }
  0x13   : > { %s825_s9 = ssub.s32 (%p1776_p4), 73, %s1789_s25  ;;  %s1309_s10 = smul.u32 (%p1776_p4), 148, %s1764_s15 }
  0x14   : > { %s1181_s27 = sshll.u32 %s179_s26, 2  ;;  %p826_p8 = scmp.lt.s32.totalorder (%p1776_p4), %s825_s9, 37 }
  0x15   : > { %s1802_s30 = scalar_lea.vmem %s2080_s0, %s1181_s27  ;;  %s1947_s14 = scalar_lea.vmem (%p1776_p4), %s2083_s3, %s1309_s10  }
  0x16   : > { %v1617_v7 = vld [vmem:[%s1802_s30] sm:$0xff]   ;;  %v1618_v8 = vld [vmem:[%s1802_s30 + $0x50] sm:$0xff]   ;;  %v1619_v9 = vld [vmem:[%s1802_s30 + $0x8] sm:$0xff]  }
  0x17   : > { %1443 = vmatmul.mubr.msk.bf16.vlgmr.msra.gmra.mrb[0].mxu0 %vm345_vm3, %v1617_v7  ;;  %1483 = vmatmul.mubr.msk.bf16.vlgmr.msra.gmra.mrb[0].mxu1 %vm345_vm3, %v1618_v8  ;;  %v1620_v10 = vld [vmem:[%s1802_s30 + $0x58] sm:$0xff]   ;;  %v1621_v11 = vld [vmem:[%s1802_s30 + $0x10] sm:$0xff]   ;;  %v1622_v12 = vld [vmem:[%s1802_s30 + $0x60] sm:$0xff]  }
  0x18   : > { %1446 = vmatprep.mubr.msk.bf16.mxu0 %vm1730_vm2, %v1728_v1  ;;  %1486 = vmatprep.mubr.msk.bf16.mxu1 %vm1730_vm2, %v1728_v1  ;;  %v1623_v13 = vld [vmem:[%s1802_s30 + $0x18] sm:$0xff]   ;;  %v1624_v14 = vld [vmem:[%s1802_s30 + $0x68] sm:$0xff]   ;;  %v1625_v15 = vld [vmem:[%s1802_s30 + $0x20] sm:$0xff]  }
  0x19   : > { %v1626_v16 = vld [vmem:[%s1802_s30 + $0x70] sm:$0xff]   ;;  %v1627_v17 = vld [vmem:[%s1802_s30 + $0x28] sm:$0xff]   ;;  %v1628_v18 = vld [vmem:[%s1802_s30 + $0x78] sm:$0xff]  }
  0x1a   : > { %v1629_v19 = vld [vmem:[%s1802_s30 + $0x30] sm:$0xff]   ;;  %v1630_v20 = vld [vmem:[%s1802_s30 + $0x80] sm:$0xff]   ;;  %v1631_v21 = vld [vmem:[%s1802_s30 + $0x38] sm:$0xff]  }
  0x1b   : > { %v1632_v22 = vld [vmem:[%s1802_s30 + $0x88] sm:$0xff]   ;;  %v1633_v23 = vld [vmem:[%s1802_s30 + $0x40] sm:$0xff]   ;;  %v1634_v24 = vld [vmem:[%s1802_s30 + $0x90] ss:$0 sps:$4 sm:$0xff]  }
  0x1c   : > { %v1635_v25 = vld [vmem:[%s1802_s30 + $0x48] sm:$0xff]  }
  0x1f   : > { %1447 = vmatmul.mubr.msk.bf16.gmra.mrb[4].mxu0 %vm345_vm3, %v1619_v9  ;;  %1487 = vmatmul.mubr.msk.bf16.gmra.mrb[4].mxu1 %vm345_vm3, %v1620_v10 }
  0x20   : > { %1450 = vmatprep.mubr.msk.bf16.mxu0 %vm1730_vm2, %v1728_v1  ;;  %1490 = vmatprep.mubr.msk.bf16.mxu1 %vm1730_vm2, %v1728_v1 }
  0x27   : > { %1451 = vmatmul.mubr.msk.bf16.gmra.mrb[8].mxu0 %vm345_vm3, %v1621_v11  ;;  %1491 = vmatmul.mubr.msk.bf16.gmra.mrb[8].mxu1 %vm345_vm3, %v1622_v12 }
  0x28   : > { %1454 = vmatprep.mubr.msk.bf16.mxu0 %vm1730_vm2, %v1728_v1  ;;  %1494 = vmatprep.mubr.msk.bf16.mxu1 %vm1730_vm2, %v1728_v1 }
  0x2f   : > { %1455 = vmatmul.mubr.msk.bf16.gmra.mrb[12].mxu0 %vm345_vm3, %v1623_v13  ;;  %1495 = vmatmul.mubr.msk.bf16.gmra.mrb[12].mxu1 %vm345_vm3, %v1624_v14 }
  0x30   : > { %1458 = vmatprep.mubr.msk.bf16.mxu0 %vm1730_vm2, %v1728_v1  ;;  %1498 = vmatprep.mubr.msk.bf16.mxu1 %vm1730_vm2, %v1728_v1 }
  0x37   : > { %1459 = vmatmul.mubr.msk.bf16.gmra.mrb[16].mxu0 %vm345_vm3, %v1625_v15  ;;  %1499 = vmatmul.mubr.msk.bf16.gmra.mrb[16].mxu1 %vm345_vm3, %v1626_v16 }
  0x38   : > { %1462 = vmatprep.mubr.msk.bf16.mxu0 %vm1730_vm2, %v1728_v1  ;;  %1502 = vmatprep.mubr.msk.bf16.mxu1 %vm1730_vm2, %v1728_v1 }
  0x3f   : > { %1463 = vmatmul.mubr.msk.bf16.gmra.mrb[20].mxu0 %vm345_vm3, %v1627_v17  ;;  %1503 = vmatmul.mubr.msk.bf16.gmra.mrb[20].mxu1 %vm345_vm3, %v1628_v18 }
  0x40   : > { %1466 = vmatprep.mubr.msk.bf16.mxu0 %vm1730_vm2, %v1728_v1  ;;  %1506 = vmatprep.mubr.msk.bf16.mxu1 %vm1730_vm2, %v1728_v1 }
  0x47   : > { %1467 = vmatmul.mubr.msk.bf16.gmra.mrb[24].mxu0 %vm345_vm3, %v1629_v19  ;;  %1507 = vmatmul.mubr.msk.bf16.gmra.mrb[24].mxu1 %vm345_vm3, %v1630_v20 }
  0x48   : > { %1470 = vmatprep.mubr.msk.bf16.mxu0 %vm1730_vm2, %v1728_v1  ;;  %1510 = vmatprep.mubr.msk.bf16.mxu1 %vm1730_vm2, %v1728_v1 }
  0x4f   : > { %1471 = vmatmul.mubr.msk.bf16.gmra.mrb[28].mxu0 %vm345_vm3, %v1631_v21  ;;  %1511 = vmatmul.mubr.msk.bf16.gmra.mrb[28].mxu1 %vm345_vm3, %v1632_v22 }
  0x50   : > { %1474 = vmatprep.mubr.msk.bf16.mxu0 %vm1730_vm2, %v1728_v1  ;;  %1514 = vmatprep.mubr.msk.bf16.mxu1 %vm1730_vm2, %v1728_v1 }
  0x57   : > { %1475 = vmatmul.mubr.msk.bf16.gmra.mrb[32].mxu0 %vm345_vm3, %v1633_v23  ;;  %1515 = vmatmul.mubr.msk.bf16.gmra.mrb[32].mxu1 %vm345_vm3, %v1634_v24 }
  0x58   : > { %1478 = vmatprep.mubr.msk.bf16.mxu0 %vm1730_vm2, %v1728_v1 }
  0x5f   : > { %1479 = vmatmul.mubr.msk.bf16.gmra.mrb[36].mxu0 %vm345_vm3, %v1635_v25 }
  0xea   : > { %v444_v27 = vpop.f32.mrb[0].mxu0  ;;  %v524_v30 = vpop.f32.mrb[0].mxu1 }
  0xeb   : > { %v445_v28 = vadd.f32 %v1879_v26, %v444_v27  ;;  %v1444_v29 = vpop.f32.mrb[1].mxu0  ;;  %v525_v32 = vadd.f32 %v1879_v26, %v524_v30  ;;  %v1484_v33 = vpop.f32.mrb[1].mxu1 }
  0xec   : > { %v447_v31 = vpop.f32.mrb[2].mxu0  ;;  %v527_v36 = vpop.f32.mrb[2].mxu1 }
  0xed   : > { %v448_v34 = vadd.f32 %v1879_v26, %v447_v31  ;;  %v1445_v35 = vpop.f32.mrb[3].mxu0  ;;  %v614_v37 = vmax.f32 %v525_v32, 0.0  ;;  %v528_v38 = vadd.f32 %v1879_v26, %v527_v36  ;;  %v1485_v39 = vpop.f32.mrb[3].mxu1  ;;  %v594_v40 = vmax.f32 %v445_v28, 0.0 }
  0xef   : > { %v595_v41 = vmax.f32 %v448_v34, 0.0  ;;  %v615_v42 = vmax.f32 %v528_v38, 0.0 }
  0xf1   : > { %v1313_v43 = vpack.c.bf16 %v595_v41, %v594_v40  ;;  %v1363_v45 = vpack.c.bf16 %v615_v42, %v614_v37 }
  0xf2   : > { %v452_v44 = vpop.f32.mrb[4].mxu0  ;;  %v532_v48 = vpop.f32.mrb[4].mxu1 }
  0xf3   : > { %1314 = vst [vmem:[%s1886_s8] sm:$0xff] %v1313_v43   ;;  %v453_v46 = vadd.f32 %v1879_v26, %v452_v44  ;;  %v1448_v47 = vpop.f32.mrb[5].mxu0  ;;  %1409 = vst [vmem:[%s1886_s8 + $0x50] sm:$0xff] %v1363_v45   ;;  %v533_v50 = vadd.f32 %v1879_v26, %v532_v48  ;;  %v1488_v51 = vpop.f32.mrb[5].mxu1 }
  0xf4   : > { %v455_v49 = vpop.f32.mrb[6].mxu0  ;;  %v535_v54 = vpop.f32.mrb[6].mxu1 }
  0xf5   : > { %v456_v52 = vadd.f32 %v1879_v26, %v455_v49  ;;  %v1449_v53 = vpop.f32.mrb[7].mxu0  ;;  %v616_v55 = vmax.f32 %v533_v50, 0.0  ;;  %v536_v56 = vadd.f32 %v1879_v26, %v535_v54  ;;  %v1489_v57 = vpop.f32.mrb[7].mxu1  ;;  %v596_v58 = vmax.f32 %v453_v46, 0.0 }
  0xf7   : > { %v597_v59 = vmax.f32 %v456_v52, 0.0  ;;  %v617_v60 = vmax.f32 %v536_v56, 0.0 }
  0xf9   : > { %v1318_v61 = vpack.c.bf16 %v597_v59, %v596_v58  ;;  %v1368_v63 = vpack.c.bf16 %v617_v60, %v616_v55 }
  0xfa   : > { %v460_v62 = vpop.f32.mrb[8].mxu0  ;;  %v540_v2 = vpop.f32.mrb[8].mxu1 }
  0xfb   : > { %1400 = vst [vmem:[%s1886_s8 + $0x8] sm:$0xff] %v1318_v61   ;;  %v461_v0 = vadd.f32 %v1879_v26, %v460_v62  ;;  %v1452_v1 = vpop.f32.mrb[9].mxu0  ;;  %1410 = vst [vmem:[%s1886_s8 + $0x58] sm:$0xff] %v1368_v63   ;;  %v541_v4 = vadd.f32 %v1879_v26, %v540_v2  ;;  %v1492_v5 = vpop.f32.mrb[9].mxu1 }
  0xfc   : > { %v463_v3 = vpop.f32.mrb[10].mxu0  ;;  %v543_v8 = vpop.f32.mrb[10].mxu1 }
  0xfd   : > { %v464_v6 = vadd.f32 %v1879_v26, %v463_v3  ;;  %v1453_v7 = vpop.f32.mrb[11].mxu0  ;;  %v618_v9 = vmax.f32 %v541_v4, 0.0  ;;  %v544_v10 = vadd.f32 %v1879_v26, %v543_v8  ;;  %v1493_v11 = vpop.f32.mrb[11].mxu1  ;;  %v598_v12 = vmax.f32 %v461_v0, 0.0 }
  0xff   : > { %v599_v13 = vmax.f32 %v464_v6, 0.0  ;;  %v619_v14 = vmax.f32 %v544_v10, 0.0 }
 0x101   : > { %v1323_v15 = vpack.c.bf16 %v599_v13, %v598_v12  ;;  %v1373_v17 = vpack.c.bf16 %v619_v14, %v618_v9 }
 0x102   : > { %v468_v16 = vpop.f32.mrb[12].mxu0  ;;  %v548_v20 = vpop.f32.mrb[12].mxu1 }
 0x103   : > { %1401 = vst [vmem:[%s1886_s8 + $0x10] sm:$0xff] %v1323_v15   ;;  %v469_v18 = vadd.f32 %v1879_v26, %v468_v16  ;;  %v1456_v19 = vpop.f32.mrb[13].mxu0  ;;  %1411 = vst [vmem:[%s1886_s8 + $0x60] sm:$0xff] %v1373_v17   ;;  %v549_v22 = vadd.f32 %v1879_v26, %v548_v20  ;;  %v1496_v23 = vpop.f32.mrb[13].mxu1 }
 0x104   : > { %v471_v21 = vpop.f32.mrb[14].mxu0  ;;  %v551_v27 = vpop.f32.mrb[14].mxu1 }
 0x105   : > { %v472_v24 = vadd.f32 %v1879_v26, %v471_v21  ;;  %v1457_v25 = vpop.f32.mrb[15].mxu0  ;;  %v620_v28 = vmax.f32 %v549_v22, 0.0  ;;  %v552_v29 = vadd.f32 %v1879_v26, %v551_v27  ;;  %v1497_v30 = vpop.f32.mrb[15].mxu1  ;;  %v600_v31 = vmax.f32 %v469_v18, 0.0 }
 0x107   : > { %v601_v32 = vmax.f32 %v472_v24, 0.0  ;;  %v621_v33 = vmax.f32 %v552_v29, 0.0 }
 0x109   : > { %v1328_v34 = vpack.c.bf16 %v601_v32, %v600_v31  ;;  %v1378_v36 = vpack.c.bf16 %v621_v33, %v620_v28 }
 0x10a   : > { %v476_v35 = vpop.f32.mrb[16].mxu0  ;;  %v556_v39 = vpop.f32.mrb[16].mxu1 }
 0x10b   : > { %1402 = vst [vmem:[%s1886_s8 + $0x18] sm:$0xff] %v1328_v34   ;;  %v477_v37 = vadd.f32 %v1879_v26, %v476_v35  ;;  %v1460_v38 = vpop.f32.mrb[17].mxu0  ;;  %1412 = vst [vmem:[%s1886_s8 + $0x68] sm:$0xff] %v1378_v36   ;;  %v557_v41 = vadd.f32 %v1879_v26, %v556_v39  ;;  %v1500_v42 = vpop.f32.mrb[17].mxu1 }
 0x10c   : > { %v479_v40 = vpop.f32.mrb[18].mxu0  ;;  %v559_v45 = vpop.f32.mrb[18].mxu1 }
 0x10d   : > { %v480_v43 = vadd.f32 %v1879_v26, %v479_v40  ;;  %v1461_v44 = vpop.f32.mrb[19].mxu0  ;;  %v622_v46 = vmax.f32 %v557_v41, 0.0  ;;  %v560_v47 = vadd.f32 %v1879_v26, %v559_v45  ;;  %v1501_v48 = vpop.f32.mrb[19].mxu1  ;;  %v602_v49 = vmax.f32 %v477_v37, 0.0 }
 0x10f   : > { %v603_v50 = vmax.f32 %v480_v43, 0.0  ;;  %v623_v51 = vmax.f32 %v560_v47, 0.0 }
 0x111   : > { %v1333_v52 = vpack.c.bf16 %v603_v50, %v602_v49  ;;  %v1383_v54 = vpack.c.bf16 %v623_v51, %v622_v46 }
 0x112   : > { %v484_v53 = vpop.f32.mrb[20].mxu0  ;;  %v564_v57 = vpop.f32.mrb[20].mxu1 }
 0x113   : > { %1403 = vst [vmem:[%s1886_s8 + $0x20] sm:$0xff] %v1333_v52   ;;  %v485_v55 = vadd.f32 %v1879_v26, %v484_v53  ;;  %v1464_v56 = vpop.f32.mrb[21].mxu0  ;;  %1413 = vst [vmem:[%s1886_s8 + $0x70] sm:$0xff] %v1383_v54   ;;  %v565_v59 = vadd.f32 %v1879_v26, %v564_v57  ;;  %v1504_v60 = vpop.f32.mrb[21].mxu1 }
 0x114   : > { %v487_v58 = vpop.f32.mrb[22].mxu0  ;;  %v567_v63 = vpop.f32.mrb[22].mxu1 }
 0x115   : > { %v488_v61 = vadd.f32 %v1879_v26, %v487_v58  ;;  %v1465_v62 = vpop.f32.mrb[23].mxu0  ;;  %v624_v0 = vmax.f32 %v565_v59, 0.0  ;;  %v568_v1 = vadd.f32 %v1879_v26, %v567_v63  ;;  %v1505_v2 = vpop.f32.mrb[23].mxu1  ;;  %v604_v3 = vmax.f32 %v485_v55, 0.0 }
 0x117   : > { %v605_v4 = vmax.f32 %v488_v61, 0.0  ;;  %v625_v5 = vmax.f32 %v568_v1, 0.0 }
 0x119   : > { %v1338_v6 = vpack.c.bf16 %v605_v4, %v604_v3  ;;  %v1388_v8 = vpack.c.bf16 %v625_v5, %v624_v0 }
 0x11a   : > { %v492_v7 = vpop.f32.mrb[24].mxu0  ;;  %v572_v11 = vpop.f32.mrb[24].mxu1 }
 0x11b   : > { %1404 = vst [vmem:[%s1886_s8 + $0x28] sm:$0xff] %v1338_v6   ;;  %v493_v9 = vadd.f32 %v1879_v26, %v492_v7  ;;  %v1468_v10 = vpop.f32.mrb[25].mxu0  ;;  %1414 = vst [vmem:[%s1886_s8 + $0x78] sm:$0xff] %v1388_v8   ;;  %v573_v13 = vadd.f32 %v1879_v26, %v572_v11  ;;  %v1508_v14 = vpop.f32.mrb[25].mxu1 }
 0x11c   : > { %v495_v12 = vpop.f32.mrb[26].mxu0  ;;  %v575_v17 = vpop.f32.mrb[26].mxu1 }
 0x11d   : > { %v496_v15 = vadd.f32 %v1879_v26, %v495_v12  ;;  %v1469_v16 = vpop.f32.mrb[27].mxu0  ;;  %v626_v18 = vmax.f32 %v573_v13, 0.0  ;;  %v576_v19 = vadd.f32 %v1879_v26, %v575_v17  ;;  %v1509_v20 = vpop.f32.mrb[27].mxu1  ;;  %v606_v21 = vmax.f32 %v493_v9, 0.0 }
 0x11f   : > { %v607_v22 = vmax.f32 %v496_v15, 0.0  ;;  %v627_v23 = vmax.f32 %v576_v19, 0.0 }
 0x121   : > { %v1343_v24 = vpack.c.bf16 %v607_v22, %v606_v21  ;;  %v1393_v27 = vpack.c.bf16 %v627_v23, %v626_v18 }
 0x122   : > { %v500_v25 = vpop.f32.mrb[28].mxu0  ;;  %v580_v30 = vpop.f32.mrb[28].mxu1 }
 0x123   : > { %1405 = vst [vmem:[%s1886_s8 + $0x30] sm:$0xff] %v1343_v24   ;;  %v501_v28 = vadd.f32 %v1879_v26, %v500_v25  ;;  %v1472_v29 = vpop.f32.mrb[29].mxu0  ;;  %1415 = vst [vmem:[%s1886_s8 + $0x80] sm:$0xff] %v1393_v27   ;;  %v581_v32 = vadd.f32 %v1879_v26, %v580_v30  ;;  %v1512_v33 = vpop.f32.mrb[29].mxu1 }
 0x124   : > { %v503_v31 = vpop.f32.mrb[30].mxu0  ;;  %v583_v36 = vpop.f32.mrb[30].mxu1 }
 0x125   : > { %v504_v34 = vadd.f32 %v1879_v26, %v503_v31  ;;  %v1473_v35 = vpop.f32.mrb[31].mxu0  ;;  %v628_v37 = vmax.f32 %v581_v32, 0.0  ;;  %v584_v38 = vadd.f32 %v1879_v26, %v583_v36  ;;  %v1513_v39 = vpop.f32.mrb[31].mxu1  ;;  %v608_v40 = vmax.f32 %v501_v28, 0.0 }
 0x127   : > { %v609_v41 = vmax.f32 %v504_v34, 0.0  ;;  %v629_v42 = vmax.f32 %v584_v38, 0.0 }
 0x129   : > { %v1348_v43 = vpack.c.bf16 %v609_v41, %v608_v40  ;;  %v1398_v45 = vpack.c.bf16 %v629_v42, %v628_v37 }
 0x12a   : > { %v508_v44 = vpop.f32.mrb[32].mxu0  ;;  %v588_v48 = vpop.f32.mrb[32].mxu1 }
 0x12b   : > { %1406 = vst [vmem:[%s1886_s8 + $0x38] sm:$0xff] %v1348_v43   ;;  %v509_v46 = vadd.f32 %v1879_v26, %v508_v44  ;;  %v1476_v47 = vpop.f32.mrb[33].mxu0  ;;  %1416 = vst [vmem:[%s1886_s8 + $0x88] sm:$0xff] %v1398_v45   ;;  %v589_v50 = vadd.f32 %v1879_v26, %v588_v48  ;;  %v1516_v51 = vpop.f32.mrb[33].mxu1 }
 0x12c   : > { %v511_v49 = vpop.f32.mrb[34].mxu0  ;;  %v591_v54 = vpop.f32.mrb[34].mxu1 }
 0x12d   : > { %v512_v52 = vadd.f32 %v1879_v26, %v511_v49  ;;  %v1477_v53 = vpop.f32.mrb[35].mxu0  ;;  %v630_v55 = vmax.f32 %v589_v50, 0.0  ;;  %v1517_v56 = vpop.f32.mrb[35].mxu1  ;;  %v610_v57 = vmax.f32 %v509_v46, 0.0 }
 0x12f   : > { %v611_v58 = vmax.f32 %v512_v52, 0.0  ;;  %v1308_v59 = vpack.c.bf16 %v630_v55, %v630_v55 }
 0x131   : > { %v1353_v60 = vpack.c.bf16 %v611_v58, %v610_v57  ;;  %816 = vst [vmem:[%s1886_s8 + $0x90] sm:$0xf] %v1308_v59 }
 0x132   : > { %v516_v61 = vpop.f32.mrb[36].mxu0 }
 0x133   : > { %1407 = vst [vmem:[%s1886_s8 + $0x40] sm:$0xff] %v1353_v60   ;;  %v517_v62 = vadd.f32 %v1879_v26, %v516_v61  ;;  %v1480_v63 = vpop.f32.mrb[37].mxu0 }
 0x134   : > { %v519_v0 = vpop.f32.mrb[38].mxu0 }
 0x135   : > { %v520_v1 = vadd.f32 %v1879_v26, %v519_v0  ;;  %v1481_v2 = vpop.f32.mrb[39].mxu0  ;;  %v612_v3 = vmax.f32 %v517_v62, 0.0  ;;  %823 = sbr.rel (!%p1776_p4) target bundleno = 402 (0x192), region = 36 }
 0x137   : > { %v613_v4 = vmax.f32 %v520_v1, 0.0 }
 0x139   : > { %v1358_v5 = vpack.c.bf16 %v613_v4, %v612_v3 }
 0x13b   : > { %1408 = vst [vmem:[%s1886_s8 + $0x48] sm:$0xff] %v1358_v5  }
 0x13c   : > { %s2092_s9 = smov (!%p826_p8, %s825_s9), 37 }
 0x13d   : > { %s1260_s17 = sshll.u32 %s2092_s9, 6 }
 0x13e   : > { %p1263_p9 = scmp.eq.s32.totalorder %s1260_s17, 0 }
 0x13f   : > { %1636 = sdivrem.u32 (!%p1263_p9), %s2092_s9, 37 }
 0x140   : > { %834 = sbr.rel (%p1263_p9) target bundleno = 402 (0x192), region = 40 }
 0x148   : > { %s1953_s18 = spop.drf %1636 }
 0x149   : > { %p1264_p10 = scmp.le.s32.totalorder %s1953_s18, 0 }
 0x14a   : > { %s2085_s15 = smov (!%p1264_p10), %s1947_s14  ;;  %s2086_s20 = smov (!%p1264_p10), %s1886_s8 }
 0x14b   : > { %1133 = sbr.rel (%p1264_p10) target bundleno = 373 (0x175), region = 112  ;;  %s1962_s21 = smov (!%p1264_p10), 0  }
 0x14c   : > { %s1964_s22 = smov (!%p1264_p10), 0  }
 0x152 LB: >> { %v851_v26 = vld [vmem:[%s1702_s20] sm:$0xf]  ;;  %v853_v6 = vld [vmem:[%s1702_s20 + $0x4] sm:$0xf]  ;;  %v855_v7 = vld [vmem:[%s1702_s20 + $0x8] sm:$0xf]  ;;  %s1710_s22 = sphi %s1964_s22, %s845_s22   ;;  %s1706_s21 = sphi %s1962_s21, %s2087_s21   ;;  %s1702_s20 = sphi %s2086_s20, %s930_s20   ;;  %s1698_s15 = sphi %s2085_s15, %s931_s15  }
 0x153   : >> { %852 = vst [vmem:[%s1698_s15] sm:$0xf] %v851_v26  ;;  %854 = vst [vmem:[%s1698_s15 + $0x4] sm:$0xf] %v853_v6  ;;  %v857_v8 = vld [vmem:[%s1702_s20 + $0xc] sm:$0xf]  ;;  %s925_s23 = sadd.s32 1, %s1706_s21 }
 0x154   : >> { %856 = vst [vmem:[%s1698_s15 + $0x8] sm:$0xf] %v855_v7  ;;  %v859_v9 = vld [vmem:[%s1702_s20 + $0x10] sm:$0xf]  ;;  %v861_v10 = vld [vmem:[%s1702_s20 + $0x14] sm:$0xf]  ;;  %p926_p11 = scmp.ge.s32.totalorder %s925_s23, %s1953_s18 }
 0x155   : >> { %858 = vst [vmem:[%s1698_s15 + $0xc] sm:$0xf] %v857_v8  ;;  %860 = vst [vmem:[%s1698_s15 + $0x10] sm:$0xf] %v859_v9  ;;  %v863_v11 = vld [vmem:[%s1702_s20 + $0x18] sm:$0xf] }
 0x156   : >> { %862 = vst [vmem:[%s1698_s15 + $0x14] sm:$0xf] %v861_v10  ;;  %v865_v12 = vld [vmem:[%s1702_s20 + $0x1c] sm:$0xf]  ;;  %v867_v13 = vld [vmem:[%s1702_s20 + $0x20] sm:$0xf] }
 0x157   : >> { %864 = vst [vmem:[%s1698_s15 + $0x18] sm:$0xf] %v863_v11  ;;  %866 = vst [vmem:[%s1698_s15 + $0x1c] sm:$0xf] %v865_v12  ;;  %v869_v14 = vld [vmem:[%s1702_s20 + $0x24] sm:$0xf] }
 0x158   : >> { %868 = vst [vmem:[%s1698_s15 + $0x20] sm:$0xf] %v867_v13  ;;  %v871_v15 = vld [vmem:[%s1702_s20 + $0x28] sm:$0xf]  ;;  %v873_v16 = vld [vmem:[%s1702_s20 + $0x2c] sm:$0xf] }
 0x159   : >> { %870 = vst [vmem:[%s1698_s15 + $0x24] sm:$0xf] %v869_v14  ;;  %872 = vst [vmem:[%s1698_s15 + $0x28] sm:$0xf] %v871_v15  ;;  %v875_v17 = vld [vmem:[%s1702_s20 + $0x30] sm:$0xf] }
 0x15a   : >> { %874 = vst [vmem:[%s1698_s15 + $0x2c] sm:$0xf] %v873_v16  ;;  %v877_v18 = vld [vmem:[%s1702_s20 + $0x34] sm:$0xf]  ;;  %v879_v19 = vld [vmem:[%s1702_s20 + $0x38] sm:$0xf] }
 0x15b   : >> { %876 = vst [vmem:[%s1698_s15 + $0x30] sm:$0xf] %v875_v17  ;;  %878 = vst [vmem:[%s1698_s15 + $0x34] sm:$0xf] %v877_v18  ;;  %v881_v20 = vld [vmem:[%s1702_s20 + $0x3c] sm:$0xf] }
 0x15c   : >> { %880 = vst [vmem:[%s1698_s15 + $0x38] sm:$0xf] %v879_v19  ;;  %v883_v21 = vld [vmem:[%s1702_s20 + $0x40] sm:$0xf]  ;;  %v885_v22 = vld [vmem:[%s1702_s20 + $0x44] sm:$0xf] }
 0x15d   : >> { %882 = vst [vmem:[%s1698_s15 + $0x3c] sm:$0xf] %v881_v20  ;;  %884 = vst [vmem:[%s1698_s15 + $0x40] sm:$0xf] %v883_v21  ;;  %v887_v23 = vld [vmem:[%s1702_s20 + $0x48] sm:$0xf] }
 0x15e   : >> { %886 = vst [vmem:[%s1698_s15 + $0x44] sm:$0xf] %v885_v22  ;;  %v889_v24 = vld [vmem:[%s1702_s20 + $0x4c] sm:$0xf]  ;;  %v891_v25 = vld [vmem:[%s1702_s20 + $0x50] sm:$0xf] }
 0x15f   : >> { %888 = vst [vmem:[%s1698_s15 + $0x48] sm:$0xf] %v887_v23  ;;  %890 = vst [vmem:[%s1698_s15 + $0x4c] sm:$0xf] %v889_v24  ;;  %v893_v27 = vld [vmem:[%s1702_s20 + $0x54] sm:$0xf] }
 0x160   : >> { %892 = vst [vmem:[%s1698_s15 + $0x50] sm:$0xf] %v891_v25  ;;  %v895_v28 = vld [vmem:[%s1702_s20 + $0x58] sm:$0xf]  ;;  %v897_v29 = vld [vmem:[%s1702_s20 + $0x5c] sm:$0xf] }
 0x161   : >> { %894 = vst [vmem:[%s1698_s15 + $0x54] sm:$0xf] %v893_v27  ;;  %896 = vst [vmem:[%s1698_s15 + $0x58] sm:$0xf] %v895_v28  ;;  %v899_v30 = vld [vmem:[%s1702_s20 + $0x60] sm:$0xf] }
 0x162   : >> { %898 = vst [vmem:[%s1698_s15 + $0x5c] sm:$0xf] %v897_v29  ;;  %v901_v31 = vld [vmem:[%s1702_s20 + $0x64] sm:$0xf]  ;;  %v903_v32 = vld [vmem:[%s1702_s20 + $0x68] sm:$0xf] }
 0x163   : >> { %900 = vst [vmem:[%s1698_s15 + $0x60] sm:$0xf] %v899_v30  ;;  %902 = vst [vmem:[%s1698_s15 + $0x64] sm:$0xf] %v901_v31  ;;  %v905_v33 = vld [vmem:[%s1702_s20 + $0x6c] sm:$0xf] }
 0x164   : >> { %904 = vst [vmem:[%s1698_s15 + $0x68] sm:$0xf] %v903_v32  ;;  %v907_v34 = vld [vmem:[%s1702_s20 + $0x70] sm:$0xf]  ;;  %v909_v35 = vld [vmem:[%s1702_s20 + $0x74] sm:$0xf] }
 0x165   : >> { %906 = vst [vmem:[%s1698_s15 + $0x6c] sm:$0xf] %v905_v33  ;;  %908 = vst [vmem:[%s1698_s15 + $0x70] sm:$0xf] %v907_v34  ;;  %v911_v36 = vld [vmem:[%s1702_s20 + $0x78] sm:$0xf] }
 0x166   : >> { %910 = vst [vmem:[%s1698_s15 + $0x74] sm:$0xf] %v909_v35  ;;  %v913_v37 = vld [vmem:[%s1702_s20 + $0x7c] sm:$0xf]  ;;  %v915_v38 = vld [vmem:[%s1702_s20 + $0x80] sm:$0xf] }
 0x167   : >> { %912 = vst [vmem:[%s1698_s15 + $0x78] sm:$0xf] %v911_v36  ;;  %914 = vst [vmem:[%s1698_s15 + $0x7c] sm:$0xf] %v913_v37  ;;  %v917_v39 = vld [vmem:[%s1702_s20 + $0x84] sm:$0xf] }
 0x168   : >> { %916 = vst [vmem:[%s1698_s15 + $0x80] sm:$0xf] %v915_v38  ;;  %v919_v40 = vld [vmem:[%s1702_s20 + $0x88] sm:$0xf]  ;;  %v921_v41 = vld [vmem:[%s1702_s20 + $0x8c] sm:$0xf] }
 0x169   : >> { %918 = vst [vmem:[%s1698_s15 + $0x84] sm:$0xf] %v917_v39  ;;  %920 = vst [vmem:[%s1698_s15 + $0x88] sm:$0xf] %v919_v40  ;;  %v923_v42 = vld [vmem:[%s1702_s20 + $0x90] sm:$0xf] }
 0x16a   : >> { %922 = vst [vmem:[%s1698_s15 + $0x8c] sm:$0xf] %v921_v41  ;;  %924 = vst [vmem:[%s1698_s15 + $0x90] sm:$0xf] %v923_v42  ;;  %s2094_s23 = smov (%p926_p11, %s925_s23), 0  ;;  %s845_s22 = sadd.s32 1, %s1710_s22  }
 0x16b   : >> { %s928_s24 = smul.u32 148, %s2094_s23  ;;  %p844_p12 = scmp.ge.s32.totalorder %s845_s22, %s1953_s18 }
 0x16c   : >> { %s2087_s21 = smov %s2094_s23 }
 0x16d   : >> { %s930_s20 = scalar_lea.vmem %s1886_s8, %s928_s24 [#allocation2]   ;;  %s931_s15 = scalar_lea.vmem %s1947_s14, %s928_s24  }
 0x16e   : > { %847 = sbr.rel (!%p844_p12) target bundleno = 338 (0x152), region = 118 }
 0x175 PF: > { %1638 = sdivrem.u32 %s2092_s9, 37 }
 0x176   : > { %s1265_s25 = smul.u32 148, %s1953_s18 }
 0x178   : > { %s936_s26 = scalar_lea.vmem %s1886_s8, %s1265_s25 [#allocation2]   ;;  %s938_s27 = scalar_lea.vmem %s1947_s14, %s1265_s25  }
 0x17e   : > { %s1639_s28 = spop.drf %1638 }
 0x17f   : > { %p1267_p13 = scmp.le.s32.totalorder %s1639_s28, 0 }
 0x180   : > { %s1712_s29 = smov (!%p1267_p13), %s938_s27   ;;  %s1716_s30 = smov (!%p1267_p13), %s936_s26  }
 0x181   : > { %1147 = sbr.rel (%p1267_p13) target bundleno = 402 (0x192), region = 123  ;;  %s1720_s4 = smov (!%p1267_p13), 0  }
 0x182   : > { %s1724_s5 = smov (!%p1267_p13), 0  }
 0x188 LB: >> { %v948_v43 = vld [vmem:[%s1718_s30] sm:$0xf]  ;;  %s950_s6 = sadd.s32 1, %s1722_s4  ;;  %s942_s5 = sadd.s32 1, %s1726_s5   ;;  %s1726_s5 = sphi %s1724_s5, %s942_s5   ;;  %s1722_s4 = sphi %s1720_s4, %s1721_s4   ;;  %s1718_s30 = sphi %s1716_s30, %s955_s30   ;;  %s1714_s29 = sphi %s1712_s29, %s956_s29  }
 0x189   : >> { %949 = vst [vmem:[%s1714_s29] sm:$0xf] %v948_v43  ;;  %p951_p0 = scmp.ge.s32.totalorder %s950_s6, %s1639_s28  ;;  %p941_p1 = scmp.ge.s32.totalorder %s942_s5, %s1639_s28 }
 0x18b   : >> { %s2096_s6 = smov (%p951_p0, %s950_s6), 0  ;;  %944 = sbr.rel (!%p941_p1) target bundleno = 392 (0x188), region = 129 }
 0x18c   : >> { %s1268_s7 = sshll.u32 %s2096_s6, 2  ;;  %s1721_s4 = smov %s2096_s6  }
 0x18d   : >> { %s955_s30 = scalar_lea.vmem %s936_s26, %s1268_s7 [#allocation2]   ;;  %s956_s29 = scalar_lea.vmem %s938_s27, %s1268_s7  }
 0x192 PF: > { %p10_p2 = scmp.ge.s32.totalorder %s1766_s16, 4   ;;  %s2088_s12 = smov %s1690_s13 }
 0x193   : > { %s2089_s13 = smov %s1774_s19  ;;  %s2090_s14 = smov %s1766_s16 }
 0x194   :  { %12 = sbr.rel (!%p10_p2) target bundleno = 2 (0x2), region = 140 }

// kernel: inception_encoder_forward.23
= control target key start
LH: loop header
LB: loop body
LE: loop exit
PB: predicated region body
PF: predicated region fallthrough
CT: control target
= control target key end

     0   :  { %s5279_s12 = smov 0   ;;  %s6048_s0 = inlined_call_operand.vmem [shape: bf16[2,306,32], index: 0, kind: input, shape index: {}]   ;;  %s6049_s1 = inlined_call_operand.vmem [shape: bf16[288,128], index: 1, kind: input, shape index: {}]   ;;  %s6050_s2 = inlined_call_operand.vmem [shape: f32[1,128], index: 2, kind: input, shape index: {}]   ;;  %s6051_s3 = inlined_call_operand.vmem [shape: bf16[2,255,128], index: 3, kind: output, shape index: {}]  }
   0x1 LB: > { %s3971_s13 = sadd.s32 4294967295, %s5257_s12   ;;  %p3975_p0 = scmp.ge.s32.totalorder %s5257_s12, 1  ;;  %s5257_s12 = sphi %s5279_s12, %s13_s12  }
   0x2   : > { %p137_p1 = scmp.lt.s32.totalorder %s5257_s12, 3 }
   0x4   : > { %p138_p2 = pnand %p3975_p0, %p137_p1 }
   0x5   : > { %v5138_v0 = vld [vmem:[%s6049_s1 + $0x40] sm:$0xff] (!%p138_p2)   ;;  %p161_p3 = scmp.lt.s32.totalorder (!%p138_p2), %s3971_s13, 1  ;;  %v5139_v1 = vld [vmem:[%s6049_s1 + $0x10] sm:$0xff] (!%p138_p2)   ;;  %v5140_v2 = vld [vmem:[%s6049_s1 + $0x48] sm:$0xff] (!%p138_p2)   ;;  %vm432_vm0 = vcmask (!%p138_p2), 261120   ;;  %vm967_vm2 = vcmask (!%p138_p2), 1046528  }
   0x6   : > { %141 = sbr.rel (%p138_p2) target bundleno = 531 (0x213), region = 32  ;;  %4689 = vmatprep.subr.bf16.mxu0 (!%p138_p2), %v5138_v0  ;;  %4545 = vmatprep.subr.bf16.mxu1 (!%p138_p2), %v5139_v1  ;;  %v5141_v3 = vld [vmem:[%s6049_s1 + $0x18] sm:$0xff] (!%p138_p2)   ;;  %v5147_v4 = vld [vmem:[%s6049_s1] sm:$0xff] (!%p138_p2)   ;;  %v5148_v5 = vld [vmem:[%s6049_s1 + $0x50] sm:$0xff] (!%p138_p2)   ;;  %vm292_vm1 = vsmask.f32 (!%p138_p2), 7424 }
   0x7   : > { %4690 = vmatpush3.bf16.msra.mxu0 (!%p138_p2), %v5138_v0  ;;  %4546 = vmatpush3.bf16.msra.mxu1 (!%p138_p2), %v5139_v1  ;;  %v5157_v53 = vld [vmem:[%s6049_s1 + $0x58] sm:$0xff] (!%p138_p2)   ;;  %vm2160_vm3 = vsmask.f32 (!%p138_p2), 6400  ;;  %vm3393_vm4 = vcmask (!%p138_p2), 1045504   ;;  %vm3910_vm5 = vcmask (!%p138_p2), 1043456  }
   0x8   : > { %4691 = vmatprep.subr.bf16.mxu0 (!%p138_p2), %v5140_v2  ;;  %4547 = vmatprep.subr.bf16.mxu1 (!%p138_p2), %v5141_v3  ;;  %vm3911_vm6 = vsmask.f32 (!%p138_p2), 3328 }
   0x9   : > { %vm3912_vm7 = vmand (!%p138_p2), %vm3910_vm5, %vm3911_vm6 }
   0xb   : > { %4692 = vmatpush3.bf16.msra.mxu0 (!%p138_p2), %v5140_v2  ;;  %4548 = vmatpush3.bf16.msra.mxu1 (!%p138_p2), %v5141_v3 }
   0xc   : > { %4725 = vmatprep.subr.bf16.mxu0 (!%p138_p2), %v5148_v5  ;;  %4581 = vmatprep.subr.bf16.mxu1 (!%p138_p2), %v5147_v4 }
   0xd   : > { %s6053_s13 = smov (!%p161_p3, %s3971_s13), 1 }
   0xe   : > { %s5129_s22 = smul.u32 156, %s6053_s13  ;;  %s4261_s8 = sshll.u32 %s6053_s13, 7 }
   0xf   : > { %s5993_s11 = scalar_lea.vmem %s6051_s3, %s4261_s8 }
  0x10   : > { %s5308_s27 = scalar_lea.vmem %s6048_s0, %s5129_s22 }
  0x11   : > { %v5314_v6 = vld [vmem:[%s5308_s27 + $0x8] sm:$0xfe]   ;;  %v5317_v7 = vld [vmem:[%s5308_s27 + $0x10] sm:$0xff]   ;;  %v5320_v8 = vld [vmem:[%s5308_s27 + $0x18] sm:$0xff]  }
  0x12   : > { %v1870_v9 = vrot.slane %v5314_v6, 1  ;;  %v1871_v10 = vrot.slane %v5317_v7, 1  ;;  %v1873_v11 = vrot.slane %v5320_v8, 1  ;;  %v5326_v12 = vld [vmem:[%s5308_s27] sm:$0xff]   ;;  %v5330_v14 = vld [vmem:[%s5308_s27 + $0x8] sm:$0xff]   ;;  %v5337_v18 = vld [vmem:[%s5308_s27 + $0x10] sm:$0xff]  }
  0x13   : > { %v294_v16 = vshrl.u32 %v5326_v12, 16  ;;  %v296_v17 = vshll.u32 %v5326_v12, 16  ;;  %v5340_v19 = vld [vmem:[%s5308_s27 + $0x20] sm:$0xff]   ;;  %v301_v20 = vshll.u32 %v5330_v14, 16  ;;  %v305_v21 = vshrl.u32 %v5330_v14, 16  ;;  %v5348_v25 = vld [vmem:[%s5308_s27 + $0x28] sm:$0xff]  }
  0x14   : > { %v1872_v13 = vsel %vm967_vm2, %v1870_v9, %v1871_v10  ;;  %v1874_v15 = vsel %vm967_vm2, %v1871_v10, %v1873_v11  ;;  %v309_v23 = vshll.u32 %v5337_v18, 16  ;;  %v1875_v24 = vrot.slane %v5340_v19, 1  ;;  %v5351_v27 = vld [vmem:[%s5308_s27 + $0x18] sm:$0xff]   ;;  %v5359_v35 = vld [vmem:[%s5308_s27 + $0x20] sm:$0xff]   ;;  %v5365_v39 = vld [vmem:[%s5308_s27 + $0x30] sm:$0xff]  }
  0x15   : > { %4693 = vmatprep.mubr.msk.bf16.mxu0 %vm432_vm0, %v1872_v13  ;;  %v298_v22 = vrot.slane %v296_v17, 1  ;;  %v303_v26 = vrot.slane %v301_v20, 1  ;;  %v1877_v31 = vrot.slane %v5348_v25, 1  ;;  %v313_v33 = vshrl.u32 %v5337_v18, 16  ;;  %v5372_v45 = vld [vmem:[%s5308_s27 + $0x38] sm:$0xff]   ;;  %v5375_v46 = vld [vmem:[%s5308_s27 + $0x28] sm:$0xff]  }
  0x16   : > { %4694 = vmatmul.mubr.msk.bf16.vlgmr.msra.gmra.mrb[0].mxu0 %vm432_vm0, %v1874_v15  ;;  %v311_v29 = vrot.slane %v309_v23, 1  ;;  %v1876_v30 = vsel %vm967_vm2, %v1873_v11, %v1875_v24  ;;  %v317_v34 = vshll.u32 %v5351_v27, 16  ;;  %v321_v36 = vshrl.u32 %v5351_v27, 16  ;;  %v5387_v54 = vld [vmem:[%s5308_s27 + $0x30] sm:$0xff]   ;;  %v5396_v60 = vld [vmem:[%s5308_s27 + $0x40] sm:$0xff]   ;;  %v5399_v62 = vld [vmem:[%s5308_s27 + $0x48] sm:$0xff]  }
  0x17   : > { %4726 = vmatpush3.bf16.msra.mxu0 %v5148_v5  ;;  %v299_v28 = vor.u32 %v298_v22, %v294_v16  ;;  %v307_v32 = vor.u32 %v305_v21, %v303_v26  ;;  %4697 = vmatprep.mubr.msk.bf16.mxu0 %vm432_vm0, %v1876_v30  ;;  %v1878_v38 = vsel %vm967_vm2, %v1875_v24, %v1877_v31  ;;  %v2162_v40 = vshrl.u32 %v5314_v6, 16  ;;  %v5404_v1 = vld [vmem:[%s5308_s27 + $0x38] sm:$0xff]   ;;  %v5414_v16 = vld [vmem:[%s5308_s27 + $0x40] sm:$0xff]   ;;  %v5164_v30 = vld [vmem:[%s6049_s1 + $0x8] sm:$0xff]  }
  0x18   : > { %v315_v42 = vor.u32 %v313_v33, %v311_v29  ;;  %v319_v43 = vrot.slane %v317_v34, 1  ;;  %v325_v44 = vshll.u32 %v5359_v35, 16  ;;  %v1879_v47 = vrot.slane %v5365_v39, 1  ;;  %4727 = vmatprep.subr.bf16.mxu0 %v5157_v53 }
  0x19   : > { %v304_v37 = vsel %vm292_vm1, %v299_v28, %v303_v26  ;;  %v312_v41 = vsel %vm292_vm1, %v307_v32, %v311_v29  ;;  %v329_v48 = vshrl.u32 %v5359_v35, 16  ;;  %v1881_v52 = vrot.slane %v5372_v45, 1  ;;  %v5426_v29 = vld [vmem:[%s5308_s27 + $0x48] sm:$0xff]  }
  0x1a   : > { %4549 = vmatprep.mubr.msk.bf16.mxu1 %vm432_vm0, %v304_v37  ;;  %v320_v49 = vsel %vm292_vm1, %v315_v42, %v319_v43  ;;  %v323_v50 = vor.u32 %v321_v36, %v319_v43  ;;  %v327_v51 = vrot.slane %v325_v44, 1  ;;  %v1880_v55 = vsel %vm967_vm2, %v1877_v31, %v1879_v47 }
  0x1b   : > { %4550 = vmatmul.mubr.msk.bf16.vlgmr.msra.gmra.mrb[0].mxu1 %vm432_vm0, %v312_v41  ;;  %v333_v56 = vshll.u32 %v5375_v46, 16  ;;  %v337_v57 = vshrl.u32 %v5375_v46, 16  ;;  %v341_v59 = vshll.u32 %v5387_v54, 16  ;;  %4728 = vmatpush3.bf16.msra.mxu0 %v5157_v53  ;;  %v1883_v0 = vrot.slane %v5396_v60, 1 }
  0x1c   : > { %4582 = vmatpush3.bf16.msra.mxu1 %v5147_v4  ;;  %4553 = vmatprep.mubr.msk.bf16.mxu1 %vm432_vm0, %v320_v49  ;;  %v331_v58 = vor.u32 %v329_v48, %v327_v51  ;;  %v328_v63 = vsel %vm292_vm1, %v323_v50, %v327_v51  ;;  %v345_v2 = vshrl.u32 %v5387_v54, 16  ;;  %v1882_v3 = vsel %vm967_vm2, %v1879_v47, %v1881_v52  ;;  %v5444_v47 = vld [vmem:[%s5308_s27 + $0x50] sm:$0xff]  }
  0x1d   : > { %v335_v61 = vrot.slane %v333_v56, 1  ;;  %v343_v5 = vrot.slane %v341_v59, 1  ;;  %v1884_v10 = vsel %vm967_vm2, %v1881_v52, %v1883_v0  ;;  %v349_v11 = vshll.u32 %v5404_v1, 16  ;;  %4583 = vmatprep.subr.bf16.mxu1 %v5164_v30 }
  0x1e   : > { %4698 = vmatmul.mubr.msk.bf16.gmra.mrb[4].mxu0 %vm432_vm0, %v1878_v38  ;;  %v1885_v13 = vrot.slane %v5399_v62, 1  ;;  %v2164_v17 = vrot.slane %v2162_v40, 1  ;;  %v2165_v21 = vshll.u32 %v5314_v6, 16  ;;  %v2170_v22 = vshrl.u32 %v5317_v7, 16  ;;  %v5165_v6 = vld [vmem:[%s6049_s1 + $0x60] sm:$0xff]  }
  0x1f   : > { %4701 = vmatprep.mubr.msk.bf16.mxu0 %vm432_vm0, %v1880_v55  ;;  %v336_v4 = vsel %vm292_vm1, %v331_v58, %v335_v61  ;;  %v339_v9 = vor.u32 %v337_v57, %v335_v61  ;;  %v347_v15 = vor.u32 %v345_v2, %v343_v5  ;;  %v351_v20 = vrot.slane %v349_v11, 1  ;;  %4761 = vmatprep.subr.bf16.mxu0 %v5165_v6  ;;  %v5454_v57 = vld [vmem:[%s5308_s27 + $0x58] sm:$0xff]  }
  0x20   : > { %v2173_v23 = vshll.u32 %v5317_v7, 16  ;;  %v353_v24 = vshrl.u32 %v5404_v1, 16  ;;  %v2179_v26 = vshrl.u32 %v5320_v8, 16  ;;  %v2182_v28 = vshll.u32 %v5320_v8, 16  ;;  %4584 = vmatpush3.bf16.msra.mxu1 %v5164_v30 }
  0x21   : > { %v344_v7 = vsel %vm292_vm1, %v339_v9, %v343_v5  ;;  %v2167_v31 = vrot.slane %v2165_v21, 2  ;;  %v2172_v32 = vrot.slane %v2170_v22, 1  ;;  %v1886_v33 = vsel %vm967_vm2, %v1883_v0, %v1885_v13 }
  0x22   : > { %v357_v8 = vshll.u32 %v5414_v16, 16  ;;  %v2175_v34 = vrot.slane %v2173_v23, 2  ;;  %v352_v36 = vsel %vm292_vm1, %v347_v15, %v351_v20  ;;  %v2181_v38 = vrot.slane %v2179_v26, 1  ;;  %v5474_v23 = vld [vmem:[%s5308_s27 + $0x60] sm:$0xff]  }
  0x23   : > { %4554 = vmatmul.mubr.msk.bf16.gmra.mrb[4].mxu1 %vm432_vm0, %v328_v63  ;;  %v2168_v37 = vor.u32 %v2167_v31, %v2164_v17  ;;  %v361_v40 = vshrl.u32 %v5414_v16, 16  ;;  %v2184_v42 = vrot.slane %v2182_v28, 2  ;;  %v365_v43 = vshll.u32 %v5426_v29, 16  ;;  %v5469_v17 = vld [vmem:[%s6049_s1 + $0x20] sm:$0xff]  }
  0x24   : > { %4557 = vmatprep.mubr.msk.bf16.mxu1 %vm432_vm0, %v336_v4  ;;  %v2176_v41 = vor.u32 %v2175_v34, %v2172_v32  ;;  %v2188_v44 = vshrl.u32 %v5340_v19, 16  ;;  %v2191_v48 = vshll.u32 %v5340_v19, 16  ;;  %v355_v49 = vor.u32 %v353_v24, %v351_v20  ;;  %4617 = vmatprep.subr.bf16.mxu1 %v5469_v17 }
  0x25   : > { %v359_v50 = vrot.slane %v357_v8, 1  ;;  %v2197_v55 = vshrl.u32 %v5348_v25, 16  ;;  %v2200_v56 = vshll.u32 %v5348_v25, 16  ;;  %v2185_v19 = vor.u32 %v2184_v42, %v2181_v38 }
  0x26   : > { %4702 = vmatmul.mubr.msk.bf16.gmra.mrb[8].mxu0 %vm432_vm0, %v1882_v3  ;;  %v2177_v51 = vsel %vm2160_vm3, %v2168_v37, %v2176_v41  ;;  %v2190_v52 = vrot.slane %v2188_v44, 1  ;;  %v2193_v53 = vrot.slane %v2191_v48, 2  ;;  %v367_v59 = vrot.slane %v365_v43, 1 }
  0x27   : > { %4705 = vmatprep.mubr.msk.bf16.mxu0 %vm432_vm0, %v1884_v10  ;;  %v363_v58 = vor.u32 %v361_v40, %v359_v50  ;;  %v373_v61 = vshll.u32 %v5444_v47, 16  ;;  %v2206_v0 = vshrl.u32 %v5365_v39, 16  ;;  %v360_v2 = vsel %vm292_vm1, %v355_v49, %v359_v50  ;;  %v5172_v50 = vld [vmem:[%s5308_s27 + $0x50] sm:$0xff]  }
  0x28   : > { %v2194_v63 = vor.u32 %v2193_v53, %v2190_v52  ;;  %v369_v3 = vshrl.u32 %v5426_v29, 16  ;;  %v2209_v4 = vshll.u32 %v5365_v39, 16  ;;  %v2199_v25 = vrot.slane %v2197_v55, 1  ;;  %v5501_v52 = vld [vmem:[%s5308_s27 + $0x70] sm:$0xff]  }
  0x29   : > { %v2202_v5 = vrot.slane %v2200_v56, 2  ;;  %v377_v9 = vshrl.u32 %v5444_v47, 16  ;;  %v381_v10 = vshll.u32 %v5454_v57, 16  ;;  %v2186_v11 = vsel %vm2160_vm3, %v2176_v41, %v2185_v19  ;;  %v5507_v56 = vld [vmem:[%s5308_s27 + $0x78] sm:$0xff]  }
  0x2a   : > { %v368_v15 = vsel %vm292_vm1, %v363_v58, %v367_v59  ;;  %v375_v20 = vrot.slane %v373_v61, 1  ;;  %v2195_v21 = vsel %vm2160_vm3, %v2185_v19, %v2194_v63  ;;  %v2208_v22 = vrot.slane %v2206_v0, 1 }
  0x2b   : > { %4558 = vmatmul.mubr.msk.bf16.gmra.mrb[8].mxu1 %vm432_vm0, %v344_v7  ;;  %v2211_v39 = vrot.slane %v2209_v4, 2  ;;  %v371_v24 = vor.u32 %v369_v3, %v367_v59  ;;  %v2203_v26 = vor.u32 %v2202_v5, %v2199_v25  ;;  %v383_v30 = vrot.slane %v381_v10, 1  ;;  %v5175_v7 = vld [vmem:[%s6049_s1 + $0x68] sm:$0xff]   ;;  %v5173_v10 = vld [vmem:[%s5308_s27 + $0x58] sm:$0xff]  }
  0x2c   : > { %4561 = vmatprep.mubr.msk.bf16.mxu1 %vm432_vm0, %v352_v36  ;;  %v379_v28 = vor.u32 %v377_v9, %v375_v20  ;;  %v2215_v31 = vshrl.u32 %v5372_v45, 16  ;;  %v2218_v32 = vshll.u32 %v5372_v45, 16  ;;  %v2224_v34 = vshrl.u32 %v5396_v60, 16 }
  0x2d   : > { %v2212_v8 = vor.u32 %v2211_v39, %v2208_v22  ;;  %v2227_v36 = vshll.u32 %v5396_v60, 16  ;;  %v389_v37 = vshll.u32 %v5474_v23, 16  ;;  %v2204_v38 = vsel %vm2160_vm3, %v2194_v63, %v2203_v26 }
  0x2e   : > { %4706 = vmatmul.mubr.msk.bf16.gmra.mrb[12].mxu0 %vm432_vm0, %v1886_v33  ;;  %v5486_v33 = vld [vmem:[%s5308_s27 + $0x68] sm:$0xff]   ;;  %v384_v40 = vsel %vm292_vm1, %v379_v28, %v383_v30  ;;  %v385_v45 = vshrl.u32 %v5454_v57, 16  ;;  %v2217_v41 = vrot.slane %v2215_v31, 1  ;;  %v2220_v42 = vrot.slane %v2218_v32, 2  ;;  %v5176_v28 = vld [vmem:[%s5308_s27 + $0x60] sm:$0xff]  }
  0x2f   : > { %4729 = vmatprep.mubr.msk.bf16.mxu0 %vm432_vm0, %v2177_v51  ;;  %v393_v43 = vshrl.u32 %v5474_v23, 16  ;;  %v397_v44 = vshll.u32 %v5486_v33, 16  ;;  %v2213_v60 = vsel %vm2160_vm3, %v2203_v26, %v2212_v8  ;;  %v2226_v48 = vrot.slane %v2224_v34, 1 }
  0x30   : > { %v2229_v49 = vrot.slane %v2227_v36, 2  ;;  %v391_v51 = vrot.slane %v389_v37, 1  ;;  %v387_v53 = vor.u32 %v385_v45, %v383_v30  ;;  %v2233_v55 = vshrl.u32 %v5399_v62, 16 }
  0x31   : > { %v2221_v19 = vor.u32 %v2220_v42, %v2217_v41  ;;  %v399_v59 = vrot.slane %v397_v44, 1  ;;  %v2236_v61 = vshll.u32 %v5399_v62, 16  ;;  %v2242_v0 = vshrl.u32 %v5172_v50, 16  ;;  %v5178_v41 = vld [vmem:[%s5308_s27 + $0x70] sm:$0xff]  }
  0x32   : > { %v395_v58 = vor.u32 %v393_v43, %v391_v51  ;;  %v2230_v63 = vor.u32 %v2229_v49, %v2226_v48  ;;  %v405_v3 = vshll.u32 %v5501_v52, 16  ;;  %v392_v4 = vsel %vm292_vm1, %v387_v53, %v391_v51 }
  0x33   : > { %4562 = vmatmul.mubr.msk.bf16.gmra.mrb[12].mxu1 %vm432_vm0, %v360_v2  ;;  %v2245_v2 = vshll.u32 %v5172_v50, 16  ;;  %v401_v25 = vshrl.u32 %v5486_v33, 16  ;;  %v2235_v5 = vrot.slane %v2233_v55, 1  ;;  %v413_v9 = vshll.u32 %v5507_v56, 16 }
  0x34   : > { %4565 = vmatprep.mubr.msk.bf16.mxu1 %vm432_vm0, %v368_v15  ;;  %v2222_v15 = vsel %vm2160_vm3, %v2212_v8, %v2221_v19  ;;  %v409_v22 = vshrl.u32 %v5501_v52, 16  ;;  %v2231_v39 = vsel %vm2160_vm3, %v2221_v19, %v2230_v63  ;;  %v407_v30 = vrot.slane %v405_v3, 1  ;;  %v5179_v3 = vld [vmem:[%s5308_s27 + $0x78] sm:$0xff]  }
  0x35   : > { %v2247_v26 = vrot.slane %v2245_v2, 2  ;;  %v415_v31 = vrot.slane %v413_v9, 1  ;;  %v2251_v34 = vshrl.u32 %v5173_v10, 16  ;;  %v2254_v36 = vshll.u32 %v5173_v10, 16 }
  0x36   : > { %4730 = vmatmul.mubr.msk.bf16.vlgmr.msra.gmra.mrb[0].mxu0 %vm432_vm0, %v2186_v11  ;;  %v5519_v11 = vld [vmem:[%s6049_s1 + $0x70] sm:$0xff]   ;;  %v411_v8 = vor.u32 %v409_v22, %v407_v30  ;;  %v417_v51 = vshrl.u32 %v5507_v56, 16 }
  0x37   : > { %4762 = vmatpush3.bf16.msra.mxu0 %v5165_v6  ;;  %4733 = vmatprep.mubr.msk.bf16.mxu0 %vm432_vm0, %v2195_v21  ;;  %v376_v6 = vsel %vm292_vm1, %v371_v24, %v375_v20  ;;  %v400_v20 = vsel %vm292_vm1, %v395_v58, %v399_v59  ;;  %v2238_v21 = vrot.slane %v2236_v61, 2  ;;  %v2244_v24 = vrot.slane %v2242_v0, 1 }
  0x38   : > { %4763 = vmatprep.subr.bf16.mxu0 %v5175_v7  ;;  %v416_v43 = vsel %vm292_vm1, %v411_v8, %v415_v31  ;;  %v2253_v44 = vrot.slane %v2251_v34, 1  ;;  %v2281_v61 = vshll.u32 %v5178_v41, 16 }
  0x39   : > { %v2239_v32 = vor.u32 %v2238_v21, %v2235_v5  ;;  %v2248_v37 = vor.u32 %v2247_v26, %v2244_v24  ;;  %v2290_v21 = vshll.u32 %v5179_v3, 16  ;;  %v5181_v26 = vld [vmem:[%s5308_s27 + $0x88] ss:$0 sps:$4 sm:$0x11]  }
  0x3a   : > { %v2283_v10 = vrot.slane %v2281_v61, 2  ;;  %v2305_v34 = vshrl.u32 %v5181_v26, 16 }
  0x3b   : > { %4764 = vmatpush3.bf16.msra.mxu0 %v5175_v7  ;;  %4566 = vmatmul.mubr.msk.bf16.gmra.mrb[16].mxu1 %vm432_vm0, %v376_v6  ;;  %v403_v7 = vor.u32 %v401_v25, %v399_v59  ;;  %v2260_v6 = vshrl.u32 %v5176_v28, 16  ;;  %v2240_v42 = vsel %vm2160_vm3, %v2230_v63, %v2239_v32  ;;  %v2249_v48 = vsel %vm2160_vm3, %v2239_v32, %v2248_v37 }
  0x3c   : > { %4569 = vmatprep.mubr.msk.bf16.mxu1 %vm432_vm0, %v384_v40  ;;  %4797 = vmatprep.subr.bf16.mxu0 %v5519_v11  ;;  %v5177_v40 = vld [vmem:[%s5308_s27 + $0x68] sm:$0xff]   ;;  %v2278_v59 = vshrl.u32 %v5178_v41, 16  ;;  %v419_v63 = vor.u32 %v417_v51, %v415_v31  ;;  %v2292_v31 = vrot.slane %v2290_v21, 2 }
  0x3d   : > { %v408_v45 = vsel %vm292_vm1, %v403_v7, %v407_v30  ;;  %v2262_v49 = vrot.slane %v2260_v6, 1  ;;  %v2269_v53 = vshrl.u32 %v5177_v40, 16  ;;  %v2272_v55 = vshll.u32 %v5177_v40, 16  ;;  %v5567_v6 = vld [vmem:[%s6049_s1 + $0x30] sm:$0xff]   ;;  %v5596_v51 = vld [vmem:[%s5308_s27 + $0x28] sm:$0xff]  }
  0x3e   : > { %4734 = vmatmul.mubr.msk.bf16.gmra.mrb[4].mxu0 %vm432_vm0, %v2204_v38  ;;  %v2263_v38 = vshll.u32 %v5176_v28, 16  ;;  %v2280_v9 = vrot.slane %v2278_v59, 1  ;;  %v5185_v28 = vld [vmem:[%s6049_s1 + $0x28] sm:$0xff]  }
  0x3f   : > { %4737 = vmatprep.mubr.msk.bf16.mxu0 %vm432_vm0, %v2213_v60  ;;  %v2256_v60 = vrot.slane %v2254_v36, 2  ;;  %v2271_v0 = vrot.slane %v2269_v53, 1  ;;  %v2274_v2 = vrot.slane %v2272_v55, 2  ;;  %v2691_v53 = vrot.slane %v5596_v51, 1  ;;  %v5607_v55 = vld [vmem:[%s5308_s27 + $0x30] sm:$0xff]   ;;  %v5196_v21 = vld [vmem:[%s5308_s27 + $0x8] sm:$0xff]  }
  0x40   : > { %v2265_v50 = vrot.slane %v2263_v38, 2  ;;  %v2284_v22 = vor.u32 %v2283_v10, %v2280_v9  ;;  %v2693_v59 = vrot.slane %v5607_v55, 1 }
  0x41   : > { %v2257_v19 = vor.u32 %v2256_v60, %v2253_v44 }
  0x42   : > { %v2266_v58 = vor.u32 %v2265_v50, %v2262_v49  ;;  %v5592_v50 = vld [vmem:[%s5308_s27 + $0x20] sm:$0xff]  }
  0x43   : > { %4570 = vmatmul.mubr.msk.bf16.gmra.mrb[20].mxu1 %vm432_vm0, %v392_v4  ;;  %v5180_v4 = vld [vmem:[%s5308_s27 + $0x80] sm:$0xff]   ;;  %v2258_v25 = vsel %vm2160_vm3, %v2248_v37, %v2257_v19  ;;  %v2308_v37 = vshll.u32 %v5181_v26, 16 }
  0x44   : > { %4573 = vmatprep.mubr.msk.bf16.mxu1 %vm432_vm0, %v400_v20  ;;  %v2267_v5 = vsel %vm2160_vm3, %v2257_v19, %v2266_v58  ;;  %v2287_v20 = vshrl.u32 %v5179_v3, 16  ;;  %v2299_v24 = vshll.u32 %v5180_v4, 16 }
  0x46   : > { %4738 = vmatmul.mubr.msk.bf16.gmra.mrb[8].mxu0 %vm432_vm0, %v2222_v15  ;;  %v2275_v15 = vor.u32 %v2274_v2, %v2271_v0  ;;  %v2289_v7 = vrot.slane %v2287_v20, 1  ;;  %v2301_v8 = vrot.slane %v2299_v24, 2  ;;  %v5633_v0 = vld [vmem:[%s5308_s27 + $0x40] sm:$0xff]   ;;  %v969_v24 = vrot.slane %v5196_v21, 1 }
  0x47   : > { %4741 = vmatprep.mubr.msk.bf16.mxu0 %vm432_vm0, %v2231_v39  ;;  %v2296_v39 = vshrl.u32 %v5180_v4, 16  ;;  %v2697_v2 = vrot.slane %v5633_v0, 1  ;;  %v5195_v20 = vld [vmem:[%s5308_s27] sm:$0xfe]   ;;  %v2994_v21 = vshrl.u32 %v5592_v50, 16 }
  0x48   : > { %v2276_v30 = vsel %vm2160_vm3, %v2266_v58, %v2275_v15  ;;  %v2293_v36 = vor.u32 %v2292_v31, %v2289_v7  ;;  %v5611_v58 = vld [vmem:[%s5308_s27 + $0x38] sm:$0xff]  }
  0x49   : > { %v2298_v32 = vrot.slane %v2296_v39, 1  ;;  %v2695_v61 = vrot.slane %v5611_v58, 1  ;;  %v968_v39 = vrot.slane %v5195_v20, 1  ;;  %v5202_v31 = vld [vmem:[%s5308_s27 + $0x18] sm:$0xff]  }
  0x4a   : > { %v2294_v40 = vsel %vm2160_vm3, %v2284_v22, %v2293_v36 }
  0x4b   : > { %4574 = vmatmul.mubr.msk.bf16.gmra.mrb[24].mxu1 %vm432_vm0, %v408_v45  ;;  %v2302_v38 = vor.u32 %v2301_v8, %v2298_v32  ;;  %v2310_v45 = vrot.slane %v2308_v37, 2  ;;  %v2698_v4 = vsel %vm967_vm2, %v2695_v61, %v2697_v2  ;;  %v970_v7 = vsel %vm967_vm2, %v968_v39, %v969_v24 }
  0x4c   : > { %4577 = vmatprep.mubr.msk.bf16.mxu1 %vm432_vm0, %v416_v43  ;;  %v5580_v43 = vld [vmem:[%s5308_s27 + $0x18] sm:$0xff]  }
  0x4d   : > { %v2303_v41 = vsel %vm2160_vm3, %v2293_v36, %v2302_v38 }
  0x4e   : > { %4742 = vmatmul.mubr.msk.bf16.gmra.mrb[12].mxu0 %vm432_vm0, %v2240_v42 }
  0x4f   : > { %4745 = vmatprep.mubr.msk.bf16.mxu0 %vm432_vm0, %v2249_v48  ;;  %v2687_v48 = vrot.slane %v5580_v43, 1 }
  0x53   : > { %4578 = vmatmul.mubr.msk.bf16.gmra.mrb[28].mxu1 %vm432_vm0, %v419_v63  ;;  %v5629_v63 = vld [vmem:[%s6049_s1 + $0x80] sm:$0xff]  }
  0x54   : > { %4585 = vmatprep.mubr.msk.bf16.mxu1 %vm432_vm0, %v5326_v12  ;;  %v2285_v12 = vsel %vm2160_vm3, %v2275_v15, %v2284_v22  ;;  %v5666_v15 = vld [vmem:[%s5308_s27 + $0x60] sm:$0xff]   ;;  %v5672_v22 = vld [vmem:[%s5308_s27 + $0x68] sm:$0xff]  }
  0x55   : > { %v2707_v26 = vrot.slane %v5672_v22, 1 }
  0x56   : > { %4746 = vmatmul.mubr.msk.bf16.gmra.mrb[16].mxu0 %vm432_vm0, %v2258_v25  ;;  %v5650_v25 = vld [vmem:[%s5308_s27 + $0x50] sm:$0xff]  }
  0x57   : > { %4749 = vmatprep.mubr.msk.bf16.mxu0 %vm432_vm0, %v2267_v5  ;;  %v5654_v5 = vld [vmem:[%s5308_s27 + $0x58] sm:$0xff]  }
  0x58   : > { %v2703_v9 = vrot.slane %v5654_v5, 1 }
  0x5b   : > { %4586 = vmatmul.mubr.msk.bf16.vlgmr.msra.gmra.mrb[0].mxu1 %vm432_vm0, %v5330_v14  ;;  %v2566_v14 = vld [vmem:[%s5308_s27 + $0x10] sm:$0xe] }
  0x5c   : > { %4618 = vmatpush3.bf16.msra.mxu1 %v5469_v17  ;;  %4589 = vmatprep.mubr.msk.bf16.mxu1 %vm432_vm0, %v5337_v18  ;;  %v5571_v17 = vld [vmem:[%s5308_s27 + $0x14] sm:$0xf]  ;;  %v2307_v18 = vrot.slane %v2305_v34, 1  ;;  %v973_v34 = vrot.slane %v5202_v31, 1  ;;  %v2996_v31 = vrot.slane %v2994_v21, 1 }
  0x5d   : > { %4619 = vmatprep.subr.bf16.mxu1 %v5185_v28  ;;  %v5577_v42 = vcombine.low %v2566_v14, %v5571_v17 }
  0x5e   : > { %4750 = vmatmul.mubr.msk.bf16.gmra.mrb[20].mxu0 %vm432_vm0, %v2276_v30  ;;  %v2311_v44 = vor.u32 %v2310_v45, %v2307_v18 }
  0x5f   : > { %4753 = vmatprep.mubr.msk.bf16.mxu0 %vm432_vm0, %v2285_v12  ;;  %v2686_v60 = vrot.slane %v5577_v42, 1  ;;  %v5691_v12 = vld [vmem:[%s5308_s27 + $0x78] sm:$0xff]  }
  0x60   : > { %4620 = vmatpush3.bf16.msra.mxu1 %v5185_v28  ;;  %v2312_v49 = vsel %vm2160_vm3, %v2302_v38, %v2311_v44  ;;  %v5199_v28 = vld [vmem:[%s5308_s27 + $0x10] sm:$0xff]   ;;  %v2711_v36 = vrot.slane %v5691_v12, 1  ;;  %v5203_v38 = vld [vmem:[%s5308_s27 + $0x20] sm:$0xff]   ;;  %v5213_v44 = vld [vmem:[%s6049_s1 + $0x38] sm:$0xff]  }
  0x61   : > { %4653 = vmatprep.subr.bf16.mxu1 %v5567_v6  ;;  %v971_v32 = vrot.slane %v5199_v28, 1 }
  0x63   : > { %4590 = vmatmul.mubr.msk.bf16.gmra.mrb[4].mxu1 %vm432_vm0, %v5351_v27  ;;  %v2688_v27 = vsel %vm967_vm2, %v2686_v60, %v2687_v48  ;;  %v972_v37 = vsel %vm967_vm2, %v969_v24, %v971_v32  ;;  %v974_v18 = vsel %vm967_vm2, %v971_v32, %v973_v34  ;;  %v975_v60 = vrot.slane %v5203_v38, 1 }
  0x64   : > { %4593 = vmatprep.mubr.msk.bf16.mxu1 %vm432_vm0, %v5359_v35  ;;  %v2689_v35 = vrot.slane %v5592_v50, 1  ;;  %v3003_v24 = vshrl.u32 %v5596_v51, 16 }
  0x66   : > { %4754 = vmatmul.mubr.msk.bf16.gmra.mrb[24].mxu0 %vm432_vm0, %v2294_v40  ;;  %v2690_v19 = vsel %vm967_vm2, %v2687_v48, %v2689_v35  ;;  %v5704_v40 = vld [vmem:[%s5308_s27 + $0x80] sm:$0xff]  }
  0x67   : > { %4757 = vmatprep.mubr.msk.bf16.mxu0 %vm432_vm0, %v2303_v41  ;;  %v5710_v41 = vld [vmem:[%s5308_s27 + $0x88] sm:$0xff]   ;;  %v2713_v48 = vrot.slane %v5704_v40, 1 }
  0x6b   : > { %4594 = vmatmul.mubr.msk.bf16.gmra.mrb[8].mxu1 %vm432_vm0, %v5375_v46  ;;  %v2692_v46 = vsel %vm967_vm2, %v2689_v35, %v2691_v53  ;;  %v2715_v35 = vrot.slane %v5710_v41, 1 }
  0x6c   : > { %4597 = vmatprep.mubr.msk.bf16.mxu1 %vm432_vm0, %v5387_v54  ;;  %v5198_v54 = vld [vmem:[%s6049_s1 + $0x78] sm:$0xff]  }
  0x6e   : > { %4758 = vmatmul.mubr.msk.bf16.gmra.mrb[28].mxu0 %vm432_vm0, %v2312_v49 }
  0x6f   : > { %4765 = vmatprep.mubr.msk.bf16.mxu0 %vm432_vm0, %v2688_v27  ;;  %v2977_v27 = vshrl.u32 %v5577_v42, 16 }
  0x73   : > { %4598 = vmatmul.mubr.msk.bf16.gmra.mrb[12].mxu1 %vm432_vm0, %v5404_v1  ;;  %v2694_v1 = vsel %vm967_vm2, %v2691_v53, %v2693_v59  ;;  %v2980_v53 = vshll.u32 %v5577_v42, 16  ;;  %v5737_v42 = vld [vmem:[%s6049_s1 + $0x40] sm:$0xff]  }
  0x74   : > { %4601 = vmatprep.mubr.msk.bf16.mxu1 %vm432_vm0, %v5414_v16  ;;  %v2696_v16 = vsel %vm967_vm2, %v2693_v59, %v2695_v61  ;;  %v2714_v59 = vsel %vm967_vm2, %v2711_v36, %v2713_v48 }
  0x76   : > { %4766 = vmatmul.mubr.msk.bf16.vlgmr.msra.gmra.mrb[0].mxu0 %vm432_vm0, %v2690_v19  ;;  %v2988_v19 = vshll.u32 %v5580_v43, 16 }
  0x77   : > { %4798 = vmatpush3.bf16.msra.mxu0 %v5519_v11  ;;  %4769 = vmatprep.mubr.msk.bf16.mxu0 %vm432_vm0, %v2692_v46  ;;  %v5637_v11 = vld [vmem:[%s5308_s27 + $0x48] sm:$0xff]   ;;  %v976_v46 = vsel %vm967_vm2, %v973_v34, %v975_v60 }
  0x78   : > { %4799 = vmatprep.subr.bf16.mxu0 %v5198_v54  ;;  %v2699_v3 = vrot.slane %v5637_v11, 1 }
  0x7b   : > { %4800 = vmatpush3.bf16.msra.mxu0 %v5198_v54  ;;  %4602 = vmatmul.mubr.msk.bf16.gmra.mrb[16].mxu1 %vm432_vm0, %v5426_v29  ;;  %v2700_v29 = vsel %vm967_vm2, %v2697_v2, %v2699_v3  ;;  %v5207_v54 = vld [vmem:[%s5308_s27 + $0x30] sm:$0xff]   ;;  %v2979_v2 = vrot.slane %v2977_v27, 1 }
  0x7c   : > { %4833 = vmatprep.subr.bf16.mxu0 %v5629_v63  ;;  %4605 = vmatprep.mubr.msk.bf16.mxu1 %vm432_vm0, %v5444_v47  ;;  %v2701_v47 = vrot.slane %v5650_v25, 1  ;;  %v5215_v27 = vld [vmem:[%s5308_s27 + $0x50] sm:$0xff]  }
  0x7e   : > { %4770 = vmatmul.mubr.msk.bf16.gmra.mrb[4].mxu0 %vm432_vm0, %v2694_v1  ;;  %v2702_v10 = vsel %vm967_vm2, %v2699_v3, %v2701_v47  ;;  %v5731_v1 = vld [vmem:[%s5308_s27 + $0x90] ss:$0 sps:$4 sm:$0x11]   ;;  %v2716_v3 = vsel %vm967_vm2, %v2713_v48, %v2715_v35  ;;  %v3024_v48 = vshll.u32 %v5611_v58, 16 }
  0x7f   : > { %4773 = vmatprep.mubr.msk.bf16.mxu0 %vm432_vm0, %v2696_v16  ;;  %v5210_v16 = vld [vmem:[%s5308_s27 + $0x38] sm:$0xff]  }
  0x80   : > { %v981_v20 = vrot.slane %v5210_v16, 1  ;;  %v5224_v16 = vld [vmem:[%s6049_s1 + $0x88] sm:$0xff]  }
  0x83   : > { %4606 = vmatmul.mubr.msk.bf16.gmra.mrb[20].mxu1 %vm432_vm0, %v5454_v57  ;;  %v2704_v57 = vsel %vm967_vm2, %v2701_v47, %v2703_v9  ;;  %v2990_v47 = vrot.slane %v2988_v19, 2 }
  0x84   : > { %4609 = vmatprep.mubr.msk.bf16.mxu1 %vm432_vm0, %v5474_v23  ;;  %v2705_v23 = vrot.slane %v5666_v15, 1 }
  0x86   : > { %4774 = vmatmul.mubr.msk.bf16.gmra.mrb[8].mxu0 %vm432_vm0, %v2698_v4  ;;  %v2706_v30 = vsel %vm967_vm2, %v2703_v9, %v2705_v23  ;;  %v2982_v4 = vrot.slane %v2980_v53, 2  ;;  %v979_v9 = vrot.slane %v5207_v54, 1 }
  0x87   : > { %4777 = vmatprep.mubr.msk.bf16.mxu0 %vm432_vm0, %v2700_v29 }
  0x8b   : > { %4610 = vmatmul.mubr.msk.bf16.gmra.mrb[24].mxu1 %vm432_vm0, %v5486_v33  ;;  %v5686_v33 = vld [vmem:[%s5308_s27 + $0x70] sm:$0xff]  }
  0x8c   : > { %4613 = vmatprep.mubr.msk.bf16.mxu1 %vm432_vm0, %v5501_v52  ;;  %v2708_v52 = vsel %vm967_vm2, %v2705_v23, %v2707_v26  ;;  %v2709_v8 = vrot.slane %v5686_v33, 1  ;;  %v2983_v23 = vor.u32 %v2982_v4, %v2979_v2  ;;  %v987_v2 = vrot.slane %v5215_v27, 1 }
  0x8e   : > { %4778 = vmatmul.mubr.msk.bf16.gmra.mrb[12].mxu0 %vm432_vm0, %v2702_v10  ;;  %v2710_v14 = vsel %vm967_vm2, %v2707_v26, %v2709_v8  ;;  %v2712_v45 = vsel %vm967_vm2, %v2709_v8, %v2711_v36  ;;  %v2717_v10 = vrot.slane %v5731_v1, 1  ;;  %v3006_v26 = vshll.u32 %v5596_v51, 16  ;;  %v5212_v8 = vld [vmem:[%s5308_s27 + $0x48] sm:$0xff]  }
  0x8f   : > { %4781 = vmatprep.mubr.msk.bf16.mxu0 %vm432_vm0, %v2704_v57  ;;  %v2997_v57 = vshll.u32 %v5592_v50, 16  ;;  %v3005_v36 = vrot.slane %v3003_v24, 1 }
  0x91   : > { %v2999_v32 = vrot.slane %v2997_v57, 2  ;;  %v5217_v57 = vld [vmem:[%s5308_s27 + $0x60] sm:$0xff]  }
  0x93   : > { %4614 = vmatmul.mubr.msk.bf16.gmra.mrb[28].mxu1 %vm432_vm0, %v5507_v56  ;;  %v5206_v56 = vld [vmem:[%s5308_s27 + $0x28] sm:$0xff]  }
  0x94   : > { %4621 = vmatprep.mubr.msk.bf16.mxu1 %vm432_vm0, %v970_v7  ;;  %v977_v49 = vrot.slane %v5206_v56, 1  ;;  %v2718_v7 = vsel %vm967_vm2, %v2715_v35, %v2717_v10  ;;  %v985_v56 = vrot.slane %v5212_v8, 1  ;;  %v3039_v10 = vshrl.u32 %v5637_v11, 16 }
  0x95   : > { %v3048_v8 = vshrl.u32 %v5650_v25, 16 }
  0x96   : > { %4782 = vmatmul.mubr.msk.bf16.gmra.mrb[16].mxu0 %vm432_vm0, %v2706_v30  ;;  %v978_v61 = vsel %vm967_vm2, %v975_v60, %v977_v49  ;;  %v980_v28 = vsel %vm967_vm2, %v977_v49, %v979_v9  ;;  %v5211_v30 = vld [vmem:[%s5308_s27 + $0x40] sm:$0xff]   ;;  %v3021_v60 = vshrl.u32 %v5611_v58, 16  ;;  %v988_v21 = vsel %vm967_vm2, %v985_v56, %v987_v2 }
  0x97   : > { %4785 = vmatprep.mubr.msk.bf16.mxu0 %vm432_vm0, %v2708_v52  ;;  %v982_v52 = vsel %vm967_vm2, %v979_v9, %v981_v20  ;;  %v983_v38 = vrot.slane %v5211_v30, 1  ;;  %v3041_v30 = vrot.slane %v3039_v10, 1 }
  0x99   : > { %v984_v49 = vsel %vm967_vm2, %v981_v20, %v983_v38  ;;  %v986_v53 = vsel %vm967_vm2, %v983_v38, %v985_v56  ;;  %v3042_v20 = vshll.u32 %v5637_v11, 16  ;;  %v3060_v38 = vshll.u32 %v5654_v5, 16  ;;  %v5219_v56 = vld [vmem:[%s5308_s27 + $0x70] sm:$0xff]  }
  0x9b   : > { %4622 = vmatmul.mubr.msk.bf16.vlgmr.msra.gmra.mrb[0].mxu1 %vm432_vm0, %v972_v37  ;;  %v3008_v37 = vrot.slane %v3006_v26, 2  ;;  %v5218_v26 = vld [vmem:[%s5308_s27 + $0x68] sm:$0xff]  }
  0x9c   : > { %4654 = vmatpush3.bf16.msra.mxu1 %v5567_v6  ;;  %4625 = vmatprep.mubr.msk.bf16.mxu1 %vm432_vm0, %v974_v18  ;;  %v2985_v6 = vshrl.u32 %v5580_v43, 16  ;;  %v3012_v18 = vshrl.u32 %v5607_v55, 16 }
  0x9d   : > { %4655 = vmatprep.subr.bf16.mxu1 %v5213_v44 }
  0x9e   : > { %4786 = vmatmul.mubr.msk.bf16.gmra.mrb[20].mxu0 %vm432_vm0, %v2710_v14  ;;  %v2987_v29 = vrot.slane %v2985_v6, 1  ;;  %v3000_v14 = vor.u32 %v2999_v32, %v2996_v31  ;;  %v3014_v6 = vrot.slane %v3012_v18, 1  ;;  %v993_v32 = vrot.slane %v5218_v26, 1  ;;  %v5220_v18 = vld [vmem:[%s5308_s27 + $0x78] sm:$0xff]  }
  0x9f   : > { %4789 = vmatprep.mubr.msk.bf16.mxu0 %vm432_vm0, %v2712_v45  ;;  %v3015_v45 = vshll.u32 %v5607_v55, 16 }
  0xa0   : > { %4656 = vmatpush3.bf16.msra.mxu1 %v5213_v44  ;;  %v2991_v39 = vor.u32 %v2990_v47, %v2987_v29  ;;  %v3009_v44 = vor.u32 %v3008_v37, %v3005_v36  ;;  %v3030_v29 = vshrl.u32 %v5633_v0, 16  ;;  %v3033_v47 = vshll.u32 %v5633_v0, 16 }
  0xa1   : > { %4869 = vmatprep.subr.bf16.mxu1 %v5737_v42  ;;  %v3017_v19 = vrot.slane %v3015_v45, 2  ;;  %v3057_v37 = vshrl.u32 %v5654_v5, 16 }
  0xa2   : > { %v2992_v34 = vsel %vm2160_vm3, %v2983_v23, %v2991_v39  ;;  %v3001_v35 = vsel %vm2160_vm3, %v2991_v39, %v3000_v14  ;;  %v3010_v54 = vsel %vm2160_vm3, %v3000_v14, %v3009_v44  ;;  %v3032_v39 = vrot.slane %v3030_v29, 1 }
  0xa3   : > { %4626 = vmatmul.mubr.msk.bf16.gmra.mrb[4].mxu1 %vm432_vm0, %v976_v46  ;;  %v5216_v46 = vld [vmem:[%s5308_s27 + $0x58] sm:$0xff]   ;;  %v3035_v24 = vrot.slane %v3033_v47, 2 }
  0xa4   : > { %4629 = vmatprep.mubr.msk.bf16.mxu1 %vm432_vm0, %v978_v61  ;;  %v3026_v61 = vrot.slane %v3024_v48, 2  ;;  %v989_v4 = vrot.slane %v5216_v46, 1  ;;  %v3066_v46 = vshrl.u32 %v5666_v15, 16 }
  0xa5   : > { %v3036_v31 = vor.u32 %v3035_v24, %v3032_v39 }
  0xa6   : > { %4790 = vmatmul.mubr.msk.bf16.gmra.mrb[24].mxu0 %vm432_vm0, %v2714_v59  ;;  %v3023_v59 = vrot.slane %v3021_v60, 1  ;;  %v990_v23 = vsel %vm967_vm2, %v987_v2, %v989_v4  ;;  %v3050_v60 = vrot.slane %v3048_v8, 1  ;;  %v3068_v10 = vrot.slane %v3066_v46, 1 }
  0xa7   : > { %4793 = vmatprep.mubr.msk.bf16.mxu0 %vm432_vm0, %v2716_v3  ;;  %v3018_v3 = vor.u32 %v3017_v19, %v3014_v6  ;;  %v995_v6 = vrot.slane %v5219_v56, 1  ;;  %v997_v19 = vrot.slane %v5220_v18, 1  ;;  %v3087_v8 = vshll.u32 %v5686_v33, 16 }
  0xa8   : > { %v3027_v9 = vor.u32 %v3026_v61, %v3023_v59  ;;  %v5223_v61 = vld [vmem:[%s5308_s27 + $0x10] sm:$0xff]  }
  0xa9   : > { %v996_v29 = vsel %vm967_vm2, %v993_v32, %v995_v6  ;;  %v998_v47 = vsel %vm967_vm2, %v995_v6, %v997_v19 }
  0xaa   : > { %v3037_v45 = vsel %vm2160_vm3, %v3027_v9, %v3036_v31 }
  0xab   : > { %4630 = vmatmul.mubr.msk.bf16.gmra.mrb[8].mxu1 %vm432_vm0, %v980_v28  ;;  %v3028_v28 = vsel %vm2160_vm3, %v3018_v3, %v3027_v9  ;;  %v5221_v9 = vld [vmem:[%s5308_s27 + $0x80] ss:$0 sps:$4 sm:$0x11]  }
  0xac   : > { %4633 = vmatprep.mubr.msk.bf16.mxu1 %vm432_vm0, %v982_v52  ;;  %v991_v52 = vrot.slane %v5217_v57, 1 }
  0xae   : > { %4794 = vmatmul.mubr.msk.bf16.gmra.mrb[28].mxu0 %vm432_vm0, %v2718_v7  ;;  %v3044_v7 = vrot.slane %v3042_v20, 2  ;;  %v992_v14 = vsel %vm967_vm2, %v989_v4, %v991_v52  ;;  %v3078_v4 = vshll.u32 %v5672_v22, 16 }
  0xaf   : > { %4801 = vmatprep.mubr.msk.bf16.mxu0 %vm432_vm0, %v2992_v34  ;;  %v3051_v34 = vshll.u32 %v5650_v25, 16 }
  0xb0   : > { %v3045_v36 = vor.u32 %v3044_v7, %v3041_v30  ;;  %v3080_v26 = vrot.slane %v3078_v4, 2  ;;  %v999_v30 = vrot.slane %v5221_v9, 1  ;;  %v3111_v9 = vshrl.u32 %v5710_v41, 16 }
  0xb1   : > { %v3053_v48 = vrot.slane %v3051_v34, 2 }
  0xb2   : > { %v3046_v27 = vsel %vm2160_vm3, %v3036_v31, %v3045_v36  ;;  %v1000_v18 = vsel %vm967_vm2, %v997_v19, %v999_v30  ;;  %v3102_v19 = vshrl.u32 %v5704_v40, 16 }
  0xb3   : > { %4634 = vmatmul.mubr.msk.bf16.gmra.mrb[12].mxu1 %vm432_vm0, %v984_v49  ;;  %v5222_v49 = vld [vmem:[%s5308_s27 + $0x8] sm:$0xff]   ;;  %v3054_v59 = vor.u32 %v3053_v48, %v3050_v60  ;;  %v3089_v48 = vrot.slane %v3087_v8, 2 }
  0xb4   : > { %4637 = vmatprep.mubr.msk.bf16.mxu1 %vm432_vm0, %v986_v53  ;;  %v3062_v53 = vrot.slane %v3060_v38, 2  ;;  %v1371_v57 = vshrl.u32 %v5222_v49, 16  ;;  %v3096_v38 = vshll.u32 %v5691_v12, 16 }
  0xb6   : > { %4802 = vmatmul.mubr.msk.bf16.vlgmr.msra.gmra.mrb[0].mxu0 %vm432_vm0, %v3001_v35  ;;  %v3059_v35 = vrot.slane %v3057_v37, 1  ;;  %v3093_v37 = vshrl.u32 %v5691_v12, 16  ;;  %v3098_v46 = vrot.slane %v3096_v38, 2  ;;  %v3123_v38 = vshll.u32 %v5731_v1, 16 }
  0xb7   : > { %4834 = vmatpush3.bf16.msra.mxu0 %v5629_v63  ;;  %4805 = vmatprep.mubr.msk.bf16.mxu0 %vm432_vm0, %v3010_v54  ;;  %v3019_v63 = vsel %vm2160_vm3, %v3009_v44, %v3018_v3  ;;  %v994_v44 = vsel %vm967_vm2, %v991_v52, %v993_v32  ;;  %v3069_v54 = vshll.u32 %v5666_v15, 16  ;;  %v3075_v3 = vshrl.u32 %v5672_v22, 16 }
  0xb8   : > { %4835 = vmatprep.subr.bf16.mxu0 %v5224_v16  ;;  %v3063_v2 = vor.u32 %v3062_v53, %v3059_v35  ;;  %v3084_v32 = vshrl.u32 %v5686_v33, 16  ;;  %v3095_v6 = vrot.slane %v3093_v37, 1  ;;  %v3120_v37 = vshrl.u32 %v5731_v1, 16 }
  0xb9   : > { %v3071_v20 = vrot.slane %v3069_v54, 2  ;;  %v3077_v24 = vrot.slane %v3075_v3, 1  ;;  %v3125_v1 = vrot.slane %v3123_v38, 2 }
  0xba   : > { %v3064_v39 = vsel %vm2160_vm3, %v3054_v59, %v3063_v2  ;;  %v3086_v60 = vrot.slane %v3084_v32, 1 }
  0xbb   : > { %4836 = vmatpush3.bf16.msra.mxu0 %v5224_v16  ;;  %4638 = vmatmul.mubr.msk.bf16.gmra.mrb[16].mxu1 %vm432_vm0, %v988_v21  ;;  %v1373_v16 = vshll.u32 %v5222_v49, 16  ;;  %v3055_v21 = vsel %vm2160_vm3, %v3045_v36, %v3054_v59  ;;  %v3072_v7 = vor.u32 %v3071_v20, %v3068_v10  ;;  %v3081_v34 = vor.u32 %v3080_v26, %v3077_v24  ;;  %v5226_v36 = vld [vmem:[%s5308_s27 + $0x20] sm:$0xff]  }
  0xbc   : > { %4641 = vmatprep.mubr.msk.bf16.mxu1 %vm432_vm0, %v990_v23  ;;  %v1378_v23 = vshll.u32 %v5223_v61, 16  ;;  %v1394_v53 = vshll.u32 %v5226_v36, 16  ;;  %v3114_v10 = vshll.u32 %v5710_v41, 16 }
  0xbd   : > { %v3082_v35 = vsel %vm2160_vm3, %v3072_v7, %v3081_v34 }
  0xbe   : > { %4806 = vmatmul.mubr.msk.bf16.gmra.mrb[4].mxu0 %vm432_vm0, %v3019_v63  ;;  %v1375_v63 = vrot.slane %v1373_v16, 1  ;;  %v1380_v31 = vrot.slane %v1378_v23, 1  ;;  %v5228_v16 = vld [vmem:[%s5308_s27 + $0x30] sm:$0xff]  }
  0xbf   : > { %4809 = vmatprep.mubr.msk.bf16.mxu0 %vm432_vm0, %v3028_v28  ;;  %v5225_v28 = vld [vmem:[%s5308_s27 + $0x18] sm:$0xff]  }
  0xc0   : > { %v1376_v52 = vor.u32 %v1375_v63, %v1371_v57  ;;  %v1386_v56 = vshll.u32 %v5225_v28, 16  ;;  %v1390_v49 = vshrl.u32 %v5225_v28, 16  ;;  %v3104_v57 = vrot.slane %v3102_v19, 1 }
  0xc2   : > { %v1388_v59 = vrot.slane %v1386_v56, 1 }
  0xc3   : > { %4642 = vmatmul.mubr.msk.bf16.gmra.mrb[20].mxu1 %vm432_vm0, %v992_v14  ;;  %v1382_v14 = vshrl.u32 %v5223_v61, 16  ;;  %v3105_v61 = vshll.u32 %v5704_v40, 16 }
  0xc4   : > { %4645 = vmatprep.mubr.msk.bf16.mxu1 %vm432_vm0, %v994_v44  ;;  %v1381_v44 = vsel %vm292_vm1, %v1376_v52, %v1380_v31  ;;  %v1392_v3 = vor.u32 %v1390_v49, %v1388_v59  ;;  %v3116_v52 = vrot.slane %v3114_v10, 2  ;;  %v1414_v49 = vshrl.u32 %v5228_v16, 16 }
  0xc5   : > { %v1384_v54 = vor.u32 %v1382_v14, %v1380_v31  ;;  %v3107_v63 = vrot.slane %v3105_v61, 2  ;;  %v5229_v31 = vld [vmem:[%s5308_s27 + $0x38] sm:$0xff]   ;;  %v5230_v14 = vld [vmem:[%s5308_s27 + $0x40] sm:$0xff]  }
  0xc6   : > { %4810 = vmatmul.mubr.msk.bf16.gmra.mrb[8].mxu0 %vm432_vm0, %v3037_v45  ;;  %v3073_v45 = vsel %vm2160_vm3, %v3063_v2, %v3072_v7  ;;  %v3090_v2 = vor.u32 %v3089_v48, %v3086_v60  ;;  %v3113_v7 = vrot.slane %v3111_v9, 1  ;;  %v1430_v9 = vshrl.u32 %v5230_v14, 16 }
  0xc7   : > { %4813 = vmatprep.mubr.msk.bf16.mxu0 %vm432_vm0, %v3046_v27  ;;  %v5227_v27 = vld [vmem:[%s5308_s27 + $0x28] sm:$0xff]   ;;  %v1389_v20 = vsel %vm292_vm1, %v1384_v54, %v1388_v59  ;;  %v3108_v8 = vor.u32 %v3107_v63, %v3104_v57 }
  0xc8   : > { %v1402_v4 = vshll.u32 %v5227_v27, 16  ;;  %v1406_v23 = vshrl.u32 %v5227_v27, 16  ;;  %v3091_v24 = vsel %vm2160_vm3, %v3081_v34, %v3090_v2  ;;  %v3117_v56 = vor.u32 %v3116_v52, %v3113_v7  ;;  %v5231_v59 = vld [vmem:[%s5308_s27 + $0x48] sm:$0xff]  }
  0xc9   : > { %v3122_v27 = vrot.slane %v3120_v37, 1  ;;  %v3399_v7 = vrot.slane %v5596_v51, 2 }
  0xca   : > { %v1404_v26 = vrot.slane %v1402_v4, 1 }
  0xcb   : > { %4646 = vmatmul.mubr.msk.bf16.gmra.mrb[24].mxu1 %vm432_vm0, %v996_v29  ;;  %v1396_v29 = vrot.slane %v1394_v53, 1  ;;  %v1426_v53 = vshll.u32 %v5230_v14, 16  ;;  %v3126_v61 = vor.u32 %v3125_v1, %v3122_v27  ;;  %v5236_v14 = vld [vmem:[%s5308_s27 + $0x68] sm:$0xff]  }
  0xcc   : > { %4649 = vmatprep.mubr.msk.bf16.mxu1 %vm432_vm0, %v998_v47  ;;  %v3099_v47 = vor.u32 %v3098_v46, %v3095_v6  ;;  %v3118_v6 = vsel %vm2160_vm3, %v3108_v8, %v3117_v56 }
  0xcd   : > { %v1397_v28 = vsel %vm292_vm1, %v1392_v3, %v1396_v29  ;;  %v5233_v3 = vld [vmem:[%s5308_s27 + $0x50] sm:$0xff]   ;;  %v3127_v10 = vsel %vm2160_vm3, %v3117_v56, %v3126_v61  ;;  %v3401_v56 = vrot.slane %v5607_v55, 2  ;;  %v5239_v61 = vld [vmem:[%s5308_s27 + $0x80] sm:$0xff]  }
  0xce   : > { %4814 = vmatmul.mubr.msk.bf16.gmra.mrb[12].mxu0 %vm432_vm0, %v3055_v21  ;;  %v1398_v21 = vshrl.u32 %v5226_v36, 16  ;;  %v3100_v30 = vsel %vm2160_vm3, %v3090_v2, %v3099_v47  ;;  %v1408_v36 = vor.u32 %v1406_v23, %v1404_v26  ;;  %v3109_v60 = vsel %vm2160_vm3, %v3099_v47, %v3108_v8 }
  0xcf   : > { %4817 = vmatprep.mubr.msk.bf16.mxu0 %vm432_vm0, %v3064_v39  ;;  %v1410_v39 = vshll.u32 %v5228_v16, 16  ;;  %v1428_v2 = vrot.slane %v1426_v53, 1  ;;  %v1442_v57 = vshll.u32 %v5233_v3, 16  ;;  %v3402_v27 = vsel %vm3393_vm4, %v3399_v7, %v3401_v56 }
  0xd0   : > { %v1400_v32 = vor.u32 %v1398_v21, %v1396_v29  ;;  %v3395_v29 = vrot.slane %v5580_v43, 2  ;;  %v1438_v21 = vshrl.u32 %v5231_v59, 16 }
  0xd1   : > { %v1412_v34 = vrot.slane %v1410_v39, 1  ;;  %v5234_v39 = vld [vmem:[%s5308_s27 + $0x58] sm:$0xff]   ;;  %v1432_v43 = vor.u32 %v1430_v9, %v1428_v2  ;;  %v1490_v9 = vshll.u32 %v5239_v61, 16 }
  0xd2   : > { %v1450_v52 = vshll.u32 %v5234_v39, 16 }
  0xd3   : > { %4650 = vmatmul.mubr.msk.bf16.gmra.mrb[28].mxu1 %vm432_vm0, %v1000_v18  ;;  %v1418_v18 = vshll.u32 %v5229_v31, 16  ;;  %v1413_v48 = vsel %vm292_vm1, %v1408_v36, %v1412_v34  ;;  %v1416_v19 = vor.u32 %v1414_v49, %v1412_v34  ;;  %v1454_v34 = vshrl.u32 %v5234_v39, 16 }
  0xd4   : > { %4657 = vmatprep.mubr.msk.bf16.mxu1 %vm432_vm0, %v1381_v44  ;;  %v1405_v44 = vsel %vm292_vm1, %v1400_v32, %v1404_v26  ;;  %v1446_v32 = vshrl.u32 %v5233_v3, 16 }
  0xd5   : > { %v1420_v54 = vrot.slane %v1418_v18, 1 }
  0xd6   : > { %4818 = vmatmul.mubr.msk.bf16.gmra.mrb[16].mxu0 %vm432_vm0, %v3073_v45  ;;  %v3381_v45 = vld [vmem:[%s5308_s27 + $0x10] sm:$0xc] }
  0xd7   : > { %4821 = vmatprep.mubr.msk.bf16.mxu0 %vm432_vm0, %v3082_v35  ;;  %v1422_v35 = vshrl.u32 %v5229_v31, 16  ;;  %v4206_v46 = vcombine.low %v3381_v45, %v5571_v17  ;;  %v1434_v17 = vshll.u32 %v5231_v59, 16  ;;  %v1421_v47 = vsel %vm292_vm1, %v1416_v19, %v1420_v54  ;;  %v5237_v45 = vld [vmem:[%s5308_s27 + $0x70] sm:$0xff]  }
  0xd8   : > { %v1474_v53 = vshll.u32 %v5237_v45, 16 }
  0xd9   : > { %v1424_v16 = vor.u32 %v1422_v35, %v1420_v54  ;;  %v3394_v4 = vrot.slane %v4206_v46, 2  ;;  %v1436_v23 = vrot.slane %v1434_v17, 1  ;;  %v1470_v35 = vshrl.u32 %v5236_v14, 16  ;;  %v5238_v46 = vld [vmem:[%s5308_s27 + $0x78] sm:$0xff]  }
  0xda   : > { %v3405_v54 = vrot.slane %v5633_v0, 2  ;;  %v1476_v19 = vrot.slane %v1474_v53, 1 }
  0xdb   : > { %4658 = vmatmul.mubr.msk.bf16.vlgmr.msra.gmra.mrb[0].mxu1 %vm432_vm0, %v1389_v20  ;;  %v1429_v20 = vsel %vm292_vm1, %v1424_v16, %v1428_v2  ;;  %v3396_v63 = vsel %vm3393_vm4, %v3394_v4, %v3395_v29  ;;  %v1440_v26 = vor.u32 %v1438_v21, %v1436_v23  ;;  %v1437_v31 = vsel %vm292_vm1, %v1432_v43, %v1436_v23 }
  0xdc   : > { %4871 = vmatpush3.bf16.msra.mxu1 %v5737_v42  ;;  %4661 = vmatprep.mubr.msk.bf16.mxu1 %vm432_vm0, %v1397_v28  ;;  %v5242_v42 = vld [vmem:[%s6049_s1 + $0x48] sm:$0xff]   ;;  %v1444_v28 = vrot.slane %v1442_v57, 1  ;;  %v3407_v16 = vrot.slane %v5637_v11, 2  ;;  %v1482_v2 = vshll.u32 %v5238_v46, 16  ;;  %v1478_v4 = vshrl.u32 %v5237_v45, 16 }
  0xdd   : > { %4870 = vmatprep.subr.bf16.mxu1 %v5242_v42  ;;  %v1492_v57 = vrot.slane %v1490_v9, 1 }
  0xde   : > { %4822 = vmatmul.mubr.msk.bf16.gmra.mrb[20].mxu0 %vm432_vm0, %v3091_v24  ;;  %v3397_v24 = vrot.slane %v5592_v50, 2  ;;  %v1445_v36 = vsel %vm292_vm1, %v1440_v26, %v1444_v28  ;;  %v1452_v50 = vrot.slane %v1450_v52, 1  ;;  %v1448_v51 = vor.u32 %v1446_v32, %v1444_v28 }
  0xdf   : > { %4825 = vmatprep.mubr.msk.bf16.mxu0 %vm432_vm0, %v3100_v30  ;;  %v5235_v30 = vld [vmem:[%s5308_s27 + $0x60] sm:$0xff]   ;;  %v1484_v0 = vrot.slane %v1482_v2, 1  ;;  %v1480_v11 = vor.u32 %v1478_v4, %v1476_v19  ;;  %v1494_v26 = vshrl.u32 %v5239_v61, 16 }
  0xe0   : > { %4872 = vmatpush3.bf16.msra.mxu1 %v5242_v42  ;;  %v3398_v8 = vsel %vm3393_vm4, %v3395_v29, %v3397_v24  ;;  %v1458_v37 = vshll.u32 %v5235_v30, 16  ;;  %v3400_v38 = vsel %vm3393_vm4, %v3397_v24, %v3399_v7  ;;  %v1456_v42 = vor.u32 %v1454_v34, %v1452_v50 }
  0xe1   : > { %v1462_v49 = vshrl.u32 %v5235_v30, 16  ;;  %v1485_v23 = vsel %vm292_vm1, %v1480_v11, %v1484_v0  ;;  %v3415_v30 = vrot.slane %v5672_v22, 2  ;;  %v1496_v7 = vor.u32 %v1494_v26, %v1492_v57 }
  0xe2   : > { %v1460_v18 = vrot.slane %v1458_v37, 1  ;;  %v3417_v22 = vrot.slane %v5686_v33, 2  ;;  %v5246_v33 = vld [vmem:[%s5308_s27 + $0x68] sm:$0xff]  }
  0xe3   : > { %4662 = vmatmul.mubr.msk.bf16.gmra.mrb[4].mxu1 %vm432_vm0, %v1405_v44  ;;  %v3403_v44 = vrot.slane %v5611_v58, 2 }
  0xe4   : > { %4665 = vmatprep.mubr.msk.bf16.mxu1 %vm432_vm0, %v1413_v48  ;;  %v1453_v48 = vsel %vm292_vm1, %v1448_v51, %v1452_v50  ;;  %v1461_v1 = vsel %vm292_vm1, %v1456_v42, %v1460_v18  ;;  %v1464_v58 = vor.u32 %v1462_v49, %v1460_v18  ;;  %v3418_v37 = vsel %vm3393_vm4, %v3415_v30, %v3417_v22  ;;  %v5247_v51 = vld [vmem:[%s5308_s27 + $0x70] sm:$0xff]  }
  0xe5   : > { %v3406_v29 = vsel %vm3393_vm4, %v3403_v44, %v3405_v54  ;;  %v3423_v42 = vrot.slane %v5710_v41, 2 }
  0xe6   : > { %4826 = vmatmul.mubr.msk.bf16.gmra.mrb[24].mxu0 %vm432_vm0, %v3109_v60  ;;  %v1466_v60 = vshll.u32 %v5236_v14, 16  ;;  %v1893_v14 = vrot.slane %v5246_v33, 1 }
  0xe7   : > { %4829 = vmatprep.mubr.msk.bf16.mxu0 %vm432_vm0, %v3118_v6  ;;  %v3404_v6 = vsel %vm3393_vm4, %v3401_v56, %v3403_v44  ;;  %v1895_v56 = vrot.slane %v5247_v51, 1 }
  0xe8   : > { %v1468_v55 = vrot.slane %v1466_v60, 1  ;;  %v5240_v60 = vld [vmem:[%s5308_s27 + $0x90] ss:$0 sps:$4 sm:$0x33]  }
  0xe9   : > { %v1896_v44 = vsel %vm967_vm2, %v1893_v14, %v1895_v56  ;;  %v3425_v41 = vrot.slane %v5240_v60, 2 }
  0xea   : > { %v1472_v59 = vor.u32 %v1470_v35, %v1468_v55  ;;  %v1469_v3 = vsel %vm292_vm1, %v1464_v58, %v1468_v55  ;;  %v5250_v55 = vld [vmem:[%s5308_s27 + $0x88] ss:$0 sps:$4 sm:$0x11]  }
  0xeb   : > { %4666 = vmatmul.mubr.msk.bf16.gmra.mrb[8].mxu1 %vm432_vm0, %v1421_v47  ;;  %v1486_v47 = vshrl.u32 %v5238_v46, 16  ;;  %v3426_v53 = vsel %vm3393_vm4, %v3423_v42, %v3425_v41  ;;  %v1901_v46 = vrot.slane %v5250_v55, 1 }
  0xec   : > { %4669 = vmatprep.mubr.msk.bf16.mxu1 %vm432_vm0, %v1429_v20  ;;  %v1477_v17 = vsel %vm292_vm1, %v1472_v59, %v1476_v19  ;;  %v3409_v20 = vrot.slane %v5650_v25, 2  ;;  %v3413_v25 = vrot.slane %v5666_v15, 2  ;;  %v5244_v15 = vld [vmem:[%s5308_s27 + $0x58] sm:$0xff]  }
  0xed   : > { %v1488_v21 = vor.u32 %v1486_v47, %v1484_v0 }
  0xee   : > { %4830 = vmatmul.mubr.msk.bf16.gmra.mrb[28].mxu0 %vm432_vm0, %v3127_v10  ;;  %v3408_v10 = vsel %vm3393_vm4, %v3405_v54, %v3407_v16  ;;  %v3410_v39 = vsel %vm3393_vm4, %v3407_v16, %v3409_v20  ;;  %v3416_v32 = vsel %vm3393_vm4, %v3413_v25, %v3415_v30 }
  0xef   : > { %4837 = vmatprep.mubr.msk.bf16.mxu0 %vm432_vm0, %v3396_v63  ;;  %v3411_v63 = vrot.slane %v5654_v5, 2  ;;  %v1493_v43 = vsel %vm292_vm1, %v1488_v21, %v1492_v57  ;;  %v5243_v5 = vld [vmem:[%s5308_s27 + $0x50] sm:$0xff]  }
  0xf0   : > { %v1887_v28 = vrot.slane %v5243_v5, 1 }
  0xf1   : > { %v3412_v24 = vsel %vm3393_vm4, %v3409_v20, %v3411_v63  ;;  %v3414_v52 = vsel %vm3393_vm4, %v3411_v63, %v3413_v25  ;;  %v5979_v20 = vld [vmem:[%s6050_s2] ss:$0 sm:$0xff] }
  0xf3   : > { %4670 = vmatmul.mubr.msk.bf16.gmra.mrb[12].mxu1 %vm432_vm0, %v1437_v31  ;;  %v1888_v31 = vsel %vm967_vm2, %v1885_v13, %v1887_v28  ;;  %v3419_v13 = vrot.slane %v5691_v12, 2  ;;  %v3421_v12 = vrot.slane %v5704_v40, 2  ;;  %v5248_v40 = vld [vmem:[%s5308_s27 + $0x78] sm:$0xff]  }
  0xf4   : > { %4673 = vmatprep.mubr.msk.bf16.mxu1 %vm432_vm0, %v1445_v36  ;;  %v5245_v36 = vld [vmem:[%s5308_s27 + $0x60] sm:$0xff]   ;;  %v1897_v49 = vrot.slane %v5248_v40, 1 }
  0xf5   : > { %v1891_v62 = vrot.slane %v5245_v36, 1  ;;  %v3420_v50 = vsel %vm3393_vm4, %v3417_v22, %v3419_v13  ;;  %v3422_v45 = vsel %vm3393_vm4, %v3419_v13, %v3421_v12 }
  0xf6   : > { %4838 = vmatmul.mubr.msk.bf16.vlgmr.msra.gmra.mrb[0].mxu0 %vm432_vm0, %v3398_v8  ;;  %v1889_v8 = vrot.slane %v5244_v15, 1  ;;  %v1898_v35 = vsel %vm967_vm2, %v1895_v56, %v1897_v49 }
  0xf7   : > { %4841 = vmatprep.mubr.msk.bf16.mxu0 %vm432_vm0, %v3400_v38  ;;  %v1894_v18 = vsel %vm967_vm2, %v1891_v62, %v1893_v14 }
  0xf8   : > { %v1890_v34 = vsel %vm967_vm2, %v1887_v28, %v1889_v8  ;;  %v1892_v38 = vsel %vm967_vm2, %v1889_v8, %v1891_v62 }
  0xfb   : > { %4674 = vmatmul.mubr.msk.bf16.gmra.mrb[16].mxu1 %vm432_vm0, %v1453_v48  ;;  %v3424_v48 = vsel %vm3393_vm4, %v3421_v12, %v3423_v42 }
  0xfc   : > { %4677 = vmatprep.mubr.msk.bf16.mxu1 %vm432_vm0, %v1461_v1 }
  0xfe   : > { %4842 = vmatmul.mubr.msk.bf16.gmra.mrb[4].mxu0 %vm432_vm0, %v3402_v27  ;;  %v5249_v27 = vld [vmem:[%s5308_s27 + $0x80] sm:$0xff]  }
  0xff   : > { %4845 = vmatprep.mubr.msk.bf16.mxu0 %vm432_vm0, %v3404_v6  ;;  %v1899_v1 = vrot.slane %v5249_v27, 1 }
 0x101   : > { %v1900_v6 = vsel %vm967_vm2, %v1897_v49, %v1899_v1  ;;  %v1902_v58 = vsel %vm967_vm2, %v1899_v1, %v1901_v46 }
 0x103   : > { %4678 = vmatmul.mubr.msk.bf16.gmra.mrb[20].mxu1 %vm432_vm0, %v1469_v3 }
 0x104   : > { %4681 = vmatprep.mubr.msk.bf16.mxu1 %vm432_vm0, %v1477_v17 }
 0x106   : > { %4846 = vmatmul.mubr.msk.bf16.gmra.mrb[8].mxu0 %vm432_vm0, %v3406_v29 }
 0x107   : > { %4849 = vmatprep.mubr.msk.bf16.mxu0 %vm432_vm0, %v3408_v10 }
 0x10b   : > { %4682 = vmatmul.mubr.msk.bf16.gmra.mrb[24].mxu1 %vm432_vm0, %v1485_v23 }
 0x10c   : > { %4685 = vmatprep.mubr.msk.bf16.mxu1 %vm432_vm0, %v1493_v43 }
 0x10e   : > { %4850 = vmatmul.mubr.msk.bf16.gmra.mrb[12].mxu0 %vm432_vm0, %v3410_v39 }
 0x10f   : > { %4853 = vmatprep.mubr.msk.bf16.mxu0 %vm432_vm0, %v3412_v24 }
 0x113   : > { %4686 = vmatmul.mubr.msk.bf16.gmra.mrb[28].mxu1 %vm432_vm0, %v1496_v7 }
 0x114   : > { %4709 = vmatprep.mubr.msk.bf16.mxu1 %vm432_vm0, %v1888_v31 }
 0x116   : > { %4854 = vmatmul.mubr.msk.bf16.gmra.mrb[16].mxu0 %vm432_vm0, %v3414_v52 }
 0x117   : > { %4857 = vmatprep.mubr.msk.bf16.mxu0 %vm432_vm0, %v3416_v32 }
 0x11b   : > { %4710 = vmatmul.mubr.msk.bf16.vlgmr.msra.gmra.mrb[16].mxu1 %vm432_vm0, %v1890_v34 }
 0x11c   : > { %4713 = vmatprep.mubr.msk.bf16.mxu1 %vm432_vm0, %v1892_v38 }
 0x11e   : > { %4858 = vmatmul.mubr.msk.bf16.gmra.mrb[20].mxu0 %vm432_vm0, %v3418_v37 }
 0x11f   : > { %4861 = vmatprep.mubr.msk.bf16.mxu0 %vm432_vm0, %v3420_v50 }
 0x123   : > { %4714 = vmatmul.mubr.msk.bf16.gmra.mrb[20].mxu1 %vm432_vm0, %v1894_v18 }
 0x124   : > { %4717 = vmatprep.mubr.msk.bf16.mxu1 %vm432_vm0, %v1896_v44 }
 0x126   : > { %4862 = vmatmul.mubr.msk.bf16.gmra.mrb[24].mxu0 %vm432_vm0, %v3422_v45 }
 0x127   : > { %4865 = vmatprep.mubr.msk.bf16.mxu0 %vm432_vm0, %v3424_v48 }
 0x12b   : > { %4718 = vmatmul.mubr.msk.bf16.gmra.mrb[24].mxu1 %vm432_vm0, %v1898_v35 }
 0x12c   : > { %4721 = vmatprep.mubr.msk.bf16.mxu1 %vm432_vm0, %v1900_v6 }
 0x12e   : > { %4866 = vmatmul.mubr.msk.bf16.gmra.mrb[28].mxu0 %vm432_vm0, %v3426_v53 }
 0x133   : > { %4722 = vmatmul.mubr.msk.bf16.gmra.mrb[28].mxu1 %vm432_vm0, %v1902_v58 }
 0x1ae   : > { %v4659_v54 = vpop.f32.mrb[0].mxu1 }
 0x1af   : > { %v1591_v59 = vpop.f32.mrb[1].mxu1 }
 0x1b0   : > { %v4660_v19 = vpop.f32.mrb[2].mxu1 }
 0x1b1   : > { %v1594_v61 = vpop.f32.mrb[3].mxu1 }
 0x1b6   : > { %v4663_v16 = vpop.f32.mrb[4].mxu1 }
 0x1b7   : > { %v1607_v2 = vpop.f32.mrb[5].mxu1 }
 0x1b8   : > { %v4664_v3 = vpop.f32.mrb[6].mxu1 }
 0x1b9   : > { %v1610_v4 = vpop.f32.mrb[7].mxu1 }
 0x1be   : > { %v4667_v29 = vpop.f32.mrb[8].mxu1 }
 0x1bf   : > { %v1623_v17 = vpop.f32.mrb[9].mxu1 }
 0x1c0   : > { %v4668_v47 = vpop.f32.mrb[10].mxu1 }
 0x1c1   : > { %v1626_v9 = vpop.f32.mrb[11].mxu1 }
 0x1c6   : > { %v5972_v10 = vpop.f32.mrb[12].mxu1 }
 0x1c7   : > { %v5974_v0 = vpop.f32.mrb[13].mxu1 }
 0x1c8   : > { %v5981_v21 = vpop.f32.mrb[14].mxu1 }
 0x1c9   : > { %v4839_v11 = vpop.f32.mrb[0].mxu0  ;;  %v5983_v23 = vpop.f32.mrb[15].mxu1 }
 0x1ca   : > { %v4873_v57 = vadd.f32 %v4839_v11, %v4659_v54  ;;  %v3521_v63 = vpop.f32.mrb[1].mxu0 }
 0x1cb   : > { %v4874_v39 = vadd.f32 %v3521_v63, %v1591_v59  ;;  %v4840_v43 = vpop.f32.mrb[2].mxu0 }
 0x1cc   : > { %v3689_v24 = vadd.f32 %v4873_v57, %v5979_v20  ;;  %v4875_v26 = vadd.f32 %v4840_v43, %v4660_v19  ;;  %v3524_v25 = vpop.f32.mrb[3].mxu0 }
 0x1cd   : > { %v3687_v5 = vadd.f32 %v4874_v39, %v5979_v20  ;;  %v4876_v28 = vadd.f32 %v3524_v25, %v1594_v61 }
 0x1ce   : > { %v3690_v30 = vadd.f32 %v4875_v26, %v5979_v20  ;;  %v3721_v52 = vmax.f32 %v3689_v24, 0.0 }
 0x1cf   : > { %v3688_v7 = vadd.f32 %v4876_v28, %v5979_v20  ;;  %v3719_v32 = vmax.f32 %v3687_v5, 0.0 }
 0x1d0   : > { %v3722_v31 = vmax.f32 %v3690_v30, 0.0 }
 0x1d1   : > { %v3720_v15 = vmax.f32 %v3688_v7, 0.0  ;;  %v4843_v8 = vpop.f32.mrb[4].mxu0 }
 0x1d2   : > { %v4302_v22 = vpack.c.bf16 %v3722_v31, %v3721_v52  ;;  %v4877_v36 = vadd.f32 %v4843_v8, %v4663_v16  ;;  %v3537_v62 = vpop.f32.mrb[5].mxu0 }
 0x1d3   : > { %v4297_v13 = vpack.c.bf16 %v3720_v15, %v3719_v32  ;;  %v4878_v34 = vadd.f32 %v3537_v62, %v1607_v2  ;;  %v4844_v37 = vpop.f32.mrb[6].mxu0 }
 0x1d4   : > { %4369 = vst [vmem:[%s5993_s11 + $0x8] sm:$0xff] %v4302_v22   ;;  %v3693_v38 = vadd.f32 %v4877_v36, %v5979_v20  ;;  %v4879_v50 = vadd.f32 %v4844_v37, %v4664_v3  ;;  %v3540_v33 = vpop.f32.mrb[7].mxu0 }
 0x1d5   : > { %4298 = vst [vmem:[%s5993_s11] sm:$0xff] %v4297_v13   ;;  %v3691_v14 = vadd.f32 %v4878_v34, %v5979_v20  ;;  %v4880_v12 = vadd.f32 %v3540_v33, %v1610_v4 }
 0x1d6   : > { %v3694_v51 = vadd.f32 %v4879_v50, %v5979_v20  ;;  %v3725_v42 = vmax.f32 %v3693_v38, 0.0 }
 0x1d7   : > { %v3692_v56 = vadd.f32 %v4880_v12, %v5979_v20  ;;  %v3723_v45 = vmax.f32 %v3691_v14, 0.0 }
 0x1d8   : > { %v3726_v18 = vmax.f32 %v3694_v51, 0.0 }
 0x1d9   : > { %v3724_v44 = vmax.f32 %v3692_v56, 0.0  ;;  %v4847_v60 = vpop.f32.mrb[8].mxu0 }
 0x1da   : > { %v4312_v48 = vpack.c.bf16 %v3726_v18, %v3725_v42  ;;  %v4881_v40 = vadd.f32 %v4847_v60, %v4667_v29  ;;  %v3553_v49 = vpop.f32.mrb[9].mxu0 }
 0x1db   : > { %v4307_v41 = vpack.c.bf16 %v3724_v44, %v3723_v45  ;;  %v4882_v27 = vadd.f32 %v3553_v49, %v1623_v17  ;;  %v4848_v1 = vpop.f32.mrb[10].mxu0 }
 0x1dc   : > { %4371 = vst [vmem:[%s5993_s11 + $0x18] sm:$0xff] %v4312_v48   ;;  %v3697_v35 = vadd.f32 %v4881_v40, %v5979_v20  ;;  %v4883_v53 = vadd.f32 %v4848_v1, %v4668_v47  ;;  %v3556_v6 = vpop.f32.mrb[11].mxu0 }
 0x1dd   : > { %4370 = vst [vmem:[%s5993_s11 + $0x10] sm:$0xff] %v4307_v41   ;;  %v3695_v55 = vadd.f32 %v4882_v27, %v5979_v20  ;;  %v4884_v46 = vadd.f32 %v3556_v6, %v1626_v9 }
 0x1de   : > { %v3698_v58 = vadd.f32 %v4883_v53, %v5979_v20  ;;  %v3729_v59 = vmax.f32 %v3697_v35, 0.0 }
 0x1df   : > { %v3696_v54 = vadd.f32 %v4884_v46, %v5979_v20  ;;  %v3727_v61 = vmax.f32 %v3695_v55, 0.0 }
 0x1e0   : > { %v3730_v19 = vmax.f32 %v3698_v58, 0.0 }
 0x1e1   : > { %v3728_v16 = vmax.f32 %v3696_v54, 0.0  ;;  %v4851_v2 = vpop.f32.mrb[12].mxu0 }
 0x1e2   : > { %v4322_v3 = vpack.c.bf16 %v3730_v19, %v3729_v59  ;;  %v4885_v4 = vadd.f32 %v4851_v2, %v5972_v10  ;;  %v3569_v29 = vpop.f32.mrb[13].mxu0 }
 0x1e3   : > { %v4317_v17 = vpack.c.bf16 %v3728_v16, %v3727_v61  ;;  %v4886_v47 = vadd.f32 %v3569_v29, %v5974_v0  ;;  %v4852_v11 = vpop.f32.mrb[14].mxu0 }
 0x1e4   : > { %4373 = vst [vmem:[%s5993_s11 + $0x28] sm:$0xff] %v4322_v3   ;;  %v3701_v9 = vadd.f32 %v4885_v4, %v5979_v20  ;;  %v4887_v57 = vadd.f32 %v4852_v11, %v5981_v21  ;;  %v3572_v63 = vpop.f32.mrb[15].mxu0 }
 0x1e5   : > { %4372 = vst [vmem:[%s5993_s11 + $0x20] sm:$0xff] %v4317_v17   ;;  %v3699_v39 = vadd.f32 %v4886_v47, %v5979_v20  ;;  %v4888_v43 = vadd.f32 %v3572_v63, %v5983_v23 }
 0x1e6   : > { %v3702_v10 = vadd.f32 %v4887_v57, %v5979_v20  ;;  %v3733_v26 = vmax.f32 %v3701_v9, 0.0 }
 0x1e7   : > { %v3700_v24 = vadd.f32 %v4888_v43, %v5979_v20  ;;  %v3731_v25 = vmax.f32 %v3699_v39, 0.0 }
 0x1e8   : > { %v3734_v0 = vmax.f32 %v3702_v10, 0.0 }
 0x1e9   : > { %v3732_v5 = vmax.f32 %v3700_v24, 0.0  ;;  %v4855_v28 = vpop.f32.mrb[16].mxu0 }
 0x1ea   : > { %v4332_v30 = vpack.c.bf16 %v3734_v0, %v3733_v26  ;;  %v3585_v7 = vpop.f32.mrb[17].mxu0 }
 0x1eb   : > { %v4327_v21 = vpack.c.bf16 %v3732_v5, %v3731_v25  ;;  %v4856_v52 = vpop.f32.mrb[18].mxu0 }
 0x1ec   : > { %4375 = vst [vmem:[%s5993_s11 + $0x38] sm:$0xff] %v4332_v30   ;;  %v3588_v31 = vpop.f32.mrb[19].mxu0 }
 0x1ed   : > { %4374 = vst [vmem:[%s5993_s11 + $0x30] sm:$0xff] %v4327_v21  }
 0x1ee   : > { %v4711_v32 = vpop.f32.mrb[16].mxu1 }
 0x1ef   : > { %v4889_v15 = vadd.f32 %v4855_v28, %v4711_v32  ;;  %v2061_v8 = vpop.f32.mrb[17].mxu1 }
 0x1f0   : > { %v4890_v22 = vadd.f32 %v3585_v7, %v2061_v8  ;;  %v4712_v36 = vpop.f32.mrb[18].mxu1 }
 0x1f1   : > { %v4859_v23 = vpop.f32.mrb[20].mxu0  ;;  %v3705_v13 = vadd.f32 %v4889_v15, %v5979_v20  ;;  %v4891_v34 = vadd.f32 %v4856_v52, %v4712_v36  ;;  %v2064_v37 = vpop.f32.mrb[19].mxu1 }
 0x1f2   : > { %v3601_v62 = vpop.f32.mrb[21].mxu0  ;;  %v3703_v50 = vadd.f32 %v4890_v22, %v5979_v20  ;;  %v4892_v33 = vadd.f32 %v3588_v31, %v2064_v37 }
 0x1f3   : > { %v4860_v38 = vpop.f32.mrb[22].mxu0  ;;  %v3706_v12 = vadd.f32 %v4891_v34, %v5979_v20  ;;  %v3737_v56 = vmax.f32 %v3705_v13, 0.0 }
 0x1f4   : > { %v3604_v14 = vpop.f32.mrb[23].mxu0  ;;  %v3704_v51 = vadd.f32 %v4892_v33, %v5979_v20  ;;  %v3735_v18 = vmax.f32 %v3703_v50, 0.0 }
 0x1f5   : > { %v3738_v42 = vmax.f32 %v3706_v12, 0.0 }
 0x1f6   : > { %v3736_v45 = vmax.f32 %v3704_v51, 0.0  ;;  %v4715_v44 = vpop.f32.mrb[20].mxu1 }
 0x1f7   : > { %v4342_v60 = vpack.c.bf16 %v3738_v42, %v3737_v56  ;;  %v4893_v48 = vadd.f32 %v4859_v23, %v4715_v44  ;;  %v2077_v40 = vpop.f32.mrb[21].mxu1 }
 0x1f8   : > { %v4337_v41 = vpack.c.bf16 %v3736_v45, %v3735_v18  ;;  %v4894_v27 = vadd.f32 %v3601_v62, %v2077_v40  ;;  %v4716_v1 = vpop.f32.mrb[22].mxu1  ;;  %v3913_v45 = vld [vmem:[%s5993_s11 + $0x7c] sm:$0xf] }
 0x1f9   : > { %v4863_v49 = vpop.f32.mrb[24].mxu0  ;;  %4377 = vst [vmem:[%s5993_s11 + $0x48] sm:$0xff] %v4342_v60   ;;  %v3709_v53 = vadd.f32 %v4893_v48, %v5979_v20  ;;  %v4895_v6 = vadd.f32 %v4860_v38, %v4716_v1  ;;  %v2080_v55 = vpop.f32.mrb[23].mxu1 }
 0x1fa   : > { %v3617_v35 = vpop.f32.mrb[25].mxu0  ;;  %4376 = vst [vmem:[%s5993_s11 + $0x40] sm:$0xff] %v4337_v41   ;;  %v3707_v58 = vadd.f32 %v4894_v27, %v5979_v20  ;;  %v4896_v54 = vadd.f32 %v3604_v14, %v2080_v55 }
 0x1fb   : > { %v4864_v46 = vpop.f32.mrb[26].mxu0  ;;  %v3710_v19 = vadd.f32 %v4895_v6, %v5979_v20  ;;  %v3741_v16 = vmax.f32 %v3709_v53, 0.0 }
 0x1fc   : > { %v3620_v59 = vpop.f32.mrb[27].mxu0  ;;  %v3708_v61 = vadd.f32 %v4896_v54, %v5979_v20  ;;  %v3739_v3 = vmax.f32 %v3707_v58, 0.0 }
 0x1fd   : > { %v3742_v2 = vmax.f32 %v3710_v19, 0.0 }
 0x1fe   : > { %v3740_v4 = vmax.f32 %v3708_v61, 0.0  ;;  %v4719_v29 = vpop.f32.mrb[24].mxu1 }
 0x1ff   : > { %v4352_v17 = vpack.c.bf16 %v3742_v2, %v3741_v16  ;;  %v4897_v47 = vadd.f32 %v4863_v49, %v4719_v29  ;;  %v2093_v11 = vpop.f32.mrb[25].mxu1 }
 0x200   : > { %v4347_v57 = vpack.c.bf16 %v3740_v4, %v3739_v3  ;;  %v4898_v63 = vadd.f32 %v3617_v35, %v2093_v11  ;;  %v4720_v39 = vpop.f32.mrb[26].mxu1 }
 0x201   : > { %v4867_v9 = vpop.f32.mrb[28].mxu0  ;;  %4379 = vst [vmem:[%s5993_s11 + $0x58] sm:$0xff] %v4352_v17   ;;  %v3713_v10 = vadd.f32 %v4897_v47, %v5979_v20  ;;  %v4899_v24 = vadd.f32 %v4864_v46, %v4720_v39  ;;  %v2096_v26 = vpop.f32.mrb[27].mxu1 }
 0x202   : > { %v3633_v43 = vpop.f32.mrb[29].mxu0  ;;  %4378 = vst [vmem:[%s5993_s11 + $0x50] sm:$0xff] %v4347_v57   ;;  %v3711_v25 = vadd.f32 %v4898_v63, %v5979_v20  ;;  %v4900_v5 = vadd.f32 %v3620_v59, %v2096_v26 }
 0x203   : > { %v4868_v0 = vpop.f32.mrb[30].mxu0  ;;  %v3714_v30 = vadd.f32 %v4899_v24, %v5979_v20  ;;  %v3745_v21 = vmax.f32 %v3713_v10, 0.0 }
 0x204   : > { %v3636_v28 = vpop.f32.mrb[31].mxu0  ;;  %v3712_v7 = vadd.f32 %v4900_v5, %v5979_v20  ;;  %v3743_v31 = vmax.f32 %v3711_v25, 0.0 }
 0x205   : > { %v3746_v52 = vmax.f32 %v3714_v30, 0.0 }
 0x206   : > { %v3744_v32 = vmax.f32 %v3712_v7, 0.0  ;;  %v4723_v15 = vpop.f32.mrb[28].mxu1 }
 0x207   : > { %v4362_v8 = vpack.c.bf16 %v3746_v52, %v3745_v21  ;;  %v4901_v23 = vadd.f32 %v4867_v9, %v4723_v15  ;;  %v2109_v22 = vpop.f32.mrb[29].mxu1 }
 0x208   : > { %v4357_v36 = vpack.c.bf16 %v3744_v32, %v3743_v31  ;;  %v4902_v62 = vadd.f32 %v3633_v43, %v2109_v22  ;;  %v4724_v13 = vpop.f32.mrb[30].mxu1 }
 0x209   : > { %4381 = vst [vmem:[%s5993_s11 + $0x68] sm:$0xff] %v4362_v8   ;;  %v3717_v34 = vadd.f32 %v4901_v23, %v5979_v20  ;;  %v4903_v37 = vadd.f32 %v4868_v0, %v4724_v13  ;;  %v2112_v38 = vpop.f32.mrb[31].mxu1 }
 0x20a   : > { %4380 = vst [vmem:[%s5993_s11 + $0x60] sm:$0xff] %v4357_v36   ;;  %v3715_v50 = vadd.f32 %v4902_v62, %v5979_v20  ;;  %v4904_v33 = vadd.f32 %v3636_v28, %v2112_v38 }
 0x20b   : > { %v3749_v14 = vmax.f32 %v3717_v34, 0.0  ;;  %v3718_v12 = vadd.f32 %v4903_v37, %v5979_v20 }
 0x20c   : > { %v3716_v51 = vadd.f32 %v4904_v33, %v5979_v20  ;;  %v3747_v18 = vmax.f32 %v3715_v50, 0.0 }
 0x20d   : > { %v4292_v56 = vpack.c.bf16 %v3749_v14, %v3749_v14  ;;  %v3750_v42 = vmax.f32 %v3718_v12, 0.0 }
 0x20e   : > { %v3748_v44 = vmax.f32 %v3716_v51, 0.0 }
 0x20f   : > { %3909 = vst [vmem:[%s5993_s11 + $0x78] sm:$0xf] %v4292_v56  ;;  %v4293_v60 = vpack.c.bf16 %v3750_v42, %v3750_v42 }
 0x210   : > { %v4367_v48 = vpack.c.bf16 %v3748_v44, %v3747_v18 }
 0x211   : > { %v3914_v40 = vsel %vm3912_vm7, %v4293_v60, %v3913_v45 }
 0x212   : > { %3915 = vst [vmem:[%s5993_s11 + $0x7c] sm:$0xf] %v3914_v40  ;;  %4382 = vst [vmem:[%s5993_s11 + $0x70] sm:$0xff] %v4367_v48  }
 0x213 PF: > { %s13_s12 = sadd.s32 1, %s5257_s12  }
 0x214   : > { %p10_p4 = scmp.ge.s32.totalorder %s13_s12, 4  }
 0x216   :  { %12 = sbr.rel (!%p10_p4) target bundleno = 1 (0x1), region = 62 }

// kernel: inception_encoder_forward.25
= control target key start
LH: loop header
LB: loop body
LE: loop exit
PB: predicated region body
PF: predicated region fallthrough
CT: control target
= control target key end

     0   :  { %s1096_s6 = smov 0   ;;  %s1468_s0 = inlined_call_operand.vmem [shape: bf16[2,240,64], index: 0, kind: input, shape index: {}]   ;;  %s1469_s1 = inlined_call_operand.vmem [shape: bf16[2,195,64], index: 1, kind: output, shape index: {}]  }
   0x1 LB: > { %s940_s7 = sadd.s32 4294967295, %s1084_s6   ;;  %p944_p0 = scmp.ge.s32.totalorder %s1084_s6, 1  ;;  %s1084_s6 = sphi %s1096_s6, %s11_s6  }
   0x2   : > { %p87_p1 = scmp.lt.s32.totalorder %s1084_s6, 3 }
   0x4   : > { %p88_p2 = pnand %p944_p0, %p87_p1 }
   0x5   : > { %p107_p3 = scmp.lt.s32.totalorder (!%p88_p2), %s940_s7, 1  ;;  %vm192_vm0 = vcmask (!%p88_p2), 1046528   ;;  %vm298_vm1 = vcmask (!%p88_p2), 1045504   ;;  %vm410_vm2 = vcmask (!%p88_p2), 1040384   ;;  %vm587_vm3 = vcmask (!%p88_p2), 1041408  }
   0x6   : > { %91 = sbr.rel (%p88_p2) target bundleno = 145 (0x91), region = 24  ;;  %vm854_vm4 = vcmask (!%p88_p2), 519168   ;;  %vm879_vm5 = vcmask (!%p88_p2), 517120   ;;  %vm880_vm6 = vsmask.f32 (!%p88_p2), 1280 }
   0x7   : > { %vm881_vm7 = vmand (!%p88_p2), %vm879_vm5, %vm880_vm6 }
   0xd   : > { %s1471_s7 = smov (!%p107_p3, %s940_s7), 1 }
   0xe   : > { %s1068_s8 = smul.u32 120, %s1471_s7 }
   0xf   : > { %s1069_s12 = smul.u32 100, %s1471_s7 }
  0x10   : > { %s1110_s11 = scalar_lea.vmem %s1468_s0, %s1068_s8 }
  0x11   : > { %v1000_v0 = vld [vmem:[%s1110_s11] sm:$0xff]   ;;  %v1055_v1 = vld [vmem:[%s1110_s11 + $0x8] sm:$0xff]   ;;  %v1056_v2 = vld [vmem:[%s1110_s11 + $0x10] sm:$0xff]   ;;  %s1180_s15 = scalar_lea.vmem %s1469_s1, %s1069_s12 }
  0x12   : > { %v1001_v3 = vunpack.c.l.bf16 %v1000_v0  ;;  %v1002_v4 = vunpack.c.h.bf16 %v1000_v0  ;;  %v1005_v5 = vunpack.c.l.bf16 %v1055_v1  ;;  %v1115_v6 = vunpack.c.h.bf16 %v1055_v1  ;;  %v292_v7 = vld [vmem:[%s1110_s11] sm:$0xe]  ;;  %v398_v8 = vld [vmem:[%s1110_s11 + $0x4] sm:$0x8]  ;;  %v575_v9 = vld [vmem:[%s1110_s11 + $0xc] sm:$0x8] }
  0x13   : > { %v1120_v10 = vunpack.c.l.bf16 %v1056_v2  ;;  %v294_v11 = vunpack.c.l.bf16 %v292_v7  ;;  %v402_v12 = vunpack.c.l.bf16 %v398_v8  ;;  %v579_v13 = vunpack.c.l.bf16 %v575_v9  ;;  %v1057_v46 = vld [vmem:[%s1110_s11 + $0x18] sm:$0xff]  }
  0x14   : > { %v193_v14 = vrot.slane %v1001_v3, 1  ;;  %v194_v15 = vrot.slane %v1002_v4, 1  ;;  %v196_v16 = vrot.slane %v1005_v5, 1  ;;  %v198_v17 = vrot.slane %v1115_v6, 1 }
  0x15   : > { %v299_v18 = vrot.slane %v294_v11, 2  ;;  %v300_v19 = vrot.slane %v1002_v4, 2  ;;  %v302_v20 = vrot.slane %v1005_v5, 2  ;;  %v304_v21 = vrot.slane %v1115_v6, 2 }
  0x16   : > { %v195_v22 = vsel %vm192_vm0, %v193_v14, %v194_v15  ;;  %v199_v23 = vsel %vm192_vm0, %v196_v16, %v198_v17  ;;  %v411_v24 = vrot.slane %v402_v12, 7  ;;  %v412_v25 = vrot.slane %v1005_v5, 7 }
  0x17   : > { %v267_v26 = vmax.f32 %v1001_v3, %v195_v22  ;;  %v269_v27 = vmax.f32 %v1005_v5, %v199_v23  ;;  %v301_v28 = vsel %vm298_vm1, %v299_v18, %v300_v19  ;;  %v305_v29 = vsel %vm298_vm1, %v302_v20, %v304_v21 }
  0x18   : > { %v413_v30 = vsel %vm410_vm2, %v411_v24, %v412_v25  ;;  %v416_v31 = vrot.slane %v1120_v10, 7  ;;  %v588_v32 = vrot.slane %v579_v13, 6  ;;  %v589_v33 = vrot.slane %v1120_v10, 6 }
  0x19   : > { %v373_v34 = vmax.f32 %v267_v26, %v301_v28  ;;  %v375_v35 = vmax.f32 %v269_v27, %v305_v29  ;;  %v689_v36 = vrot.slane %v579_v13, 7  ;;  %v1131_v37 = vunpack.c.h.bf16 %v1056_v2  ;;  %v1058_v13 = vld [vmem:[%s1110_s11 + $0x20] sm:$0xff]  }
  0x1a   : > { %v590_v38 = vsel %vm587_vm3, %v588_v32, %v589_v33  ;;  %v197_v39 = vsel %vm192_vm0, %v194_v15, %v196_v16  ;;  %v200_v40 = vrot.slane %v1120_v10, 1  ;;  %v303_v41 = vsel %vm298_vm1, %v300_v19, %v302_v20 }
  0x1b   : > { %v487_v42 = vmax.f32 %v373_v34, %v413_v30  ;;  %v690_v43 = vsel %vm410_vm2, %v689_v36, %v416_v31  ;;  %v268_v44 = vmax.f32 %v1002_v4, %v197_v39  ;;  %v306_v45 = vrot.slane %v1120_v10, 2 }
  0x1c   : > { %v201_v47 = vsel %vm192_vm0, %v198_v17, %v200_v40  ;;  %v414_v48 = vrot.slane %v1115_v6, 7  ;;  %v418_v49 = vrot.slane %v1131_v37, 7  ;;  %v591_v50 = vrot.slane %v1131_v37, 6 }
  0x1d   : > { %v514_v51 = vmax.f32 %v487_v42, %v1005_v5  ;;  %v270_v52 = vmax.f32 %v1115_v6, %v201_v47  ;;  %v307_v53 = vsel %vm298_vm1, %v304_v21, %v306_v45  ;;  %v374_v54 = vmax.f32 %v268_v44, %v303_v41 }
  0x1e   : > { %v415_v55 = vsel %vm410_vm2, %v412_v25, %v414_v48  ;;  %v419_v56 = vsel %vm410_vm2, %v416_v31, %v418_v49  ;;  %v592_v57 = vsel %vm587_vm3, %v589_v33, %v591_v50  ;;  %v1149_v58 = vunpack.c.l.bf16 %v1057_v46 }
  0x1f   : > { %v550_v59 = vmax.f32 %v514_v51, %v199_v23  ;;  %v376_v60 = vmax.f32 %v270_v52, %v307_v53  ;;  %v488_v61 = vmax.f32 %v374_v54, %v415_v55  ;;  %v202_v62 = vrot.slane %v1131_v37, 1  ;;  %v1059_v52 = vld [vmem:[%s1110_s11 + $0x28] sm:$0xff]  }
  0x20   : > { %v308_v63 = vrot.slane %v1131_v37, 2  ;;  %v417_v0 = vsel %vm410_vm2, %v414_v48, %v416_v31  ;;  %v420_v1 = vrot.slane %v1149_v58, 7  ;;  %v593_v2 = vrot.slane %v1149_v58, 6 }
  0x21   : > { %v664_v3 = vmax.f32 %v550_v59, %v590_v38  ;;  %v490_v4 = vmax.f32 %v376_v60, %v419_v56  ;;  %v515_v5 = vmax.f32 %v488_v61, %v1115_v6  ;;  %v203_v7 = vsel %vm192_vm0, %v200_v40, %v202_v62 }
  0x22   : > { %v271_v8 = vmax.f32 %v1120_v10, %v203_v7  ;;  %v309_v9 = vsel %vm298_vm1, %v306_v45, %v308_v63  ;;  %v421_v11 = vsel %vm410_vm2, %v418_v49, %v420_v1  ;;  %v489_v12 = vmax.f32 %v375_v35, %v417_v0 }
  0x23   : > { %v701_v14 = vmax.f32 %v664_v3, %v690_v43  ;;  %v517_v15 = vmax.f32 %v490_v4, %v1131_v37  ;;  %v551_v16 = vmax.f32 %v515_v5, %v201_v47  ;;  %v594_v17 = vsel %vm587_vm3, %v591_v50, %v593_v2 }
  0x24   : > { %v377_v18 = vmax.f32 %v271_v8, %v309_v9  ;;  %v516_v6 = vmax.f32 %v489_v12, %v1120_v10  ;;  %v1166_v19 = vunpack.c.h.bf16 %v1057_v46  ;;  %v204_v20 = vrot.slane %v1149_v58, 1 }
  0x25   : > { %v728_v21 = vmax.f32 %v701_v14, %v1120_v10  ;;  %v665_v22 = vmax.f32 %v551_v16, %v592_v57  ;;  %v310_v23 = vrot.slane %v1149_v58, 2  ;;  %v1171_v24 = vunpack.c.l.bf16 %v1058_v13 }
  0x26   : > { %v491_v25 = vmax.f32 %v377_v18, %v421_v11  ;;  %v552_v26 = vmax.f32 %v516_v6, %v203_v7  ;;  %v205_v27 = vsel %vm192_vm0, %v202_v62, %v204_v20  ;;  %v422_v28 = vrot.slane %v1166_v19, 7 }
  0x27   : > { %v974_v29 = vpack.c.bf16 %v728_v21, %v728_v21  ;;  %v702_v30 = vmax.f32 %v665_v22, %v419_v56  ;;  %v272_v31 = vmax.f32 %v1131_v37, %v205_v27  ;;  %v311_v32 = vsel %vm298_vm1, %v308_v63, %v310_v23 }
  0x28   : > { %v518_v10 = vmax.f32 %v491_v25, %v1149_v58  ;;  %v666_v33 = vmax.f32 %v552_v26, %v594_v17  ;;  %v423_v34 = vsel %vm410_vm2, %v420_v1, %v422_v28  ;;  %v553_v35 = vmax.f32 %v517_v15, %v205_v27 }
  0x29   : > { %855 = vst.msk [vmem:[%s1180_s15] sm:$0xf] %vm854_vm4, %v974_v29  ;;  %v729_v36 = vmax.f32 %v702_v30, %v1131_v37  ;;  %v378_v38 = vmax.f32 %v272_v31, %v311_v32  ;;  %v595_v39 = vrot.slane %v1166_v19, 6  ;;  %v206_v40 = vrot.slane %v1166_v19, 1 }
  0x2a   : > { %v703_v41 = vmax.f32 %v666_v33, %v421_v11  ;;  %v312_v42 = vrot.slane %v1166_v19, 2  ;;  %v424_v43 = vrot.slane %v1171_v24, 7  ;;  %v597_v44 = vrot.slane %v1171_v24, 6 }
  0x2b   : > { %v975_v45 = vpack.c.bf16 %v729_v36, %v729_v36  ;;  %v492_v46 = vmax.f32 %v378_v38, %v423_v34  ;;  %v596_v47 = vsel %vm587_vm3, %v593_v2, %v595_v39  ;;  %v207_v37 = vsel %vm192_vm0, %v204_v20, %v206_v40 }
  0x2c   : > { %v730_v48 = vmax.f32 %v703_v41, %v1149_v58  ;;  %v667_v49 = vmax.f32 %v553_v35, %v596_v47  ;;  %v273_v50 = vmax.f32 %v1149_v58, %v207_v37  ;;  %v313_v51 = vsel %vm298_vm1, %v310_v23, %v312_v42  ;;  %v1061_v47 = vld [vmem:[%s1110_s11 + $0x38] sm:$0xff]  }
  0x2d   : > { %856 = vst.msk [vmem:[%s1180_s15 + $0x4] sm:$0xf] %vm854_vm4, %v975_v45  ;;  %v519_v53 = vmax.f32 %v492_v46, %v1166_v19  ;;  %v425_v54 = vsel %vm410_vm2, %v422_v28, %v424_v43  ;;  %v554_v55 = vmax.f32 %v518_v10, %v207_v37  ;;  %v598_v56 = vsel %vm587_vm3, %v595_v39, %v597_v44 }
  0x2e   : > { %v976_v57 = vpack.c.bf16 %v730_v48, %v730_v48  ;;  %v704_v59 = vmax.f32 %v667_v49, %v423_v34  ;;  %v379_v60 = vmax.f32 %v273_v50, %v313_v51  ;;  %v1018_v61 = vunpack.c.h.bf16 %v1058_v13 }
  0x2f   : > { %v668_v62 = vmax.f32 %v554_v55, %v598_v56  ;;  %v208_v58 = vrot.slane %v1171_v24, 1  ;;  %v314_v63 = vrot.slane %v1171_v24, 2  ;;  %v1205_v0 = vunpack.c.l.bf16 %v1059_v52 }
  0x30   : > { %857 = vst.msk [vmem:[%s1180_s15 + $0x8] sm:$0xf] %vm854_vm4, %v976_v57  ;;  %v731_v1 = vmax.f32 %v704_v59, %v1166_v19  ;;  %v493_v2 = vmax.f32 %v379_v60, %v425_v54  ;;  %v426_v3 = vrot.slane %v1018_v61, 7  ;;  %v599_v4 = vrot.slane %v1018_v61, 6 }
  0x31   : > { %v705_v5 = vmax.f32 %v668_v62, %v425_v54  ;;  %v209_v7 = vsel %vm192_vm0, %v206_v40, %v208_v58  ;;  %v315_v8 = vsel %vm298_vm1, %v312_v42, %v314_v63  ;;  %v210_v9 = vrot.slane %v1018_v61, 1  ;;  %v1060_v42 = vld [vmem:[%s1110_s11 + $0x30] sm:$0xff]  }
  0x32   : > { %v977_v11 = vpack.c.bf16 %v731_v1, %v731_v1  ;;  %v520_v12 = vmax.f32 %v493_v2, %v1171_v24  ;;  %v274_v13 = vmax.f32 %v1166_v19, %v209_v7  ;;  %v427_v14 = vsel %vm410_vm2, %v424_v43, %v426_v3 }
  0x33   : > { %v732_v15 = vmax.f32 %v705_v5, %v1171_v24  ;;  %v555_v16 = vmax.f32 %v519_v53, %v209_v7  ;;  %v600_v17 = vsel %vm587_vm3, %v597_v44, %v599_v4  ;;  %v211_v18 = vsel %vm192_vm0, %v208_v58, %v210_v9 }
  0x34   : > { %858 = vst.msk [vmem:[%s1180_s15 + $0xc] sm:$0xf] %vm854_vm4, %v977_v11  ;;  %v380_v6 = vmax.f32 %v274_v13, %v315_v8  ;;  %v275_v20 = vmax.f32 %v1171_v24, %v211_v18  ;;  %v316_v21 = vrot.slane %v1018_v61, 2  ;;  %v428_v22 = vrot.slane %v1205_v0, 7 }
  0x35   : > { %v978_v23 = vpack.c.bf16 %v732_v15, %v732_v15  ;;  %v669_v19 = vmax.f32 %v555_v16, %v600_v17  ;;  %v556_v25 = vmax.f32 %v520_v12, %v211_v18  ;;  %v601_v26 = vrot.slane %v1205_v0, 6 }
  0x36   : > { %v494_v27 = vmax.f32 %v380_v6, %v427_v14  ;;  %v317_v28 = vsel %vm298_vm1, %v314_v63, %v316_v21  ;;  %v429_v29 = vsel %vm410_vm2, %v426_v3, %v428_v22  ;;  %v1225_v30 = vunpack.c.h.bf16 %v1059_v52 }
  0x37   : > { %859 = vst.msk [vmem:[%s1180_s15 + $0x10] sm:$0xf] %vm854_vm4, %v978_v23  ;;  %v706_v31 = vmax.f32 %v669_v19, %v427_v14  ;;  %v381_v24 = vmax.f32 %v275_v20, %v317_v28  ;;  %v602_v32 = vsel %vm587_vm3, %v599_v4, %v601_v26  ;;  %v212_v10 = vrot.slane %v1205_v0, 1 }
  0x38   : > { %v521_v33 = vmax.f32 %v494_v27, %v1018_v61  ;;  %v670_v34 = vmax.f32 %v556_v25, %v602_v32  ;;  %v318_v35 = vrot.slane %v1205_v0, 2  ;;  %v430_v36 = vrot.slane %v1225_v30, 7 }
  0x39   : > { %v733_v38 = vmax.f32 %v706_v31, %v1018_v61  ;;  %v495_v39 = vmax.f32 %v381_v24, %v429_v29  ;;  %v213_v40 = vsel %vm192_vm0, %v210_v9, %v212_v10  ;;  %v603_v41 = vrot.slane %v1225_v30, 6 }
  0x3a   : > { %v707_v43 = vmax.f32 %v670_v34, %v429_v29  ;;  %v276_v44 = vmax.f32 %v1018_v61, %v213_v40  ;;  %v319_v45 = vsel %vm298_vm1, %v316_v21, %v318_v35  ;;  %v431_v46 = vsel %vm410_vm2, %v428_v22, %v430_v36 }
  0x3b   : > { %v979_v37 = vpack.c.bf16 %v733_v38, %v733_v38  ;;  %v522_v48 = vmax.f32 %v495_v39, %v1205_v0  ;;  %v557_v49 = vmax.f32 %v521_v33, %v213_v40  ;;  %v604_v50 = vsel %vm587_vm3, %v601_v26, %v603_v41  ;;  %v1062_v40 = vld [vmem:[%s1110_s11 + $0x40] sm:$0xff]  }
  0x3c   : > { %v734_v51 = vmax.f32 %v707_v43, %v1205_v0  ;;  %v382_v52 = vmax.f32 %v276_v44, %v319_v45  ;;  %v1025_v53 = vunpack.c.l.bf16 %v1060_v42  ;;  %v214_v54 = vrot.slane %v1225_v30, 1 }
  0x3d   : > { %860 = vst.msk [vmem:[%s1180_s15 + $0x14] sm:$0xf] %vm854_vm4, %v979_v37  ;;  %v671_v55 = vmax.f32 %v557_v49, %v604_v50  ;;  %v320_v56 = vrot.slane %v1225_v30, 2  ;;  %v1246_v57 = vunpack.c.h.bf16 %v1060_v42  ;;  %v1248_v59 = vunpack.c.l.bf16 %v1061_v47 }
  0x3e   : > { %v980_v60 = vpack.c.bf16 %v734_v51, %v734_v51  ;;  %v496_v61 = vmax.f32 %v382_v52, %v431_v46  ;;  %v215_v62 = vsel %vm192_vm0, %v212_v10, %v214_v54  ;;  %v432_v58 = vrot.slane %v1025_v53, 7 }
  0x3f   : > { %v708_v63 = vmax.f32 %v671_v55, %v431_v46  ;;  %v277_v1 = vmax.f32 %v1205_v0, %v215_v62  ;;  %v321_v2 = vsel %vm298_vm1, %v318_v35, %v320_v56  ;;  %v558_v3 = vmax.f32 %v522_v48, %v215_v62 }
  0x40   : > { %861 = vst.msk [vmem:[%s1180_s15 + $0x18] sm:$0xf] %vm854_vm4, %v980_v60  ;;  %v523_v4 = vmax.f32 %v496_v61, %v1225_v30  ;;  %v433_v5 = vsel %vm410_vm2, %v430_v36, %v432_v58  ;;  %v605_v7 = vrot.slane %v1025_v53, 6  ;;  %v216_v8 = vrot.slane %v1025_v53, 1 }
  0x41   : > { %v735_v9 = vmax.f32 %v708_v63, %v1225_v30  ;;  %v383_v11 = vmax.f32 %v277_v1, %v321_v2  ;;  %v322_v12 = vrot.slane %v1025_v53, 2  ;;  %v434_v13 = vrot.slane %v1246_v57, 7 }
  0x42   : > { %v606_v0 = vsel %vm587_vm3, %v603_v41, %v605_v7  ;;  %v217_v14 = vsel %vm192_vm0, %v214_v54, %v216_v8  ;;  %v607_v15 = vrot.slane %v1246_v57, 6  ;;  %v218_v16 = vrot.slane %v1246_v57, 1 }
  0x43   : > { %v981_v17 = vpack.c.bf16 %v735_v9, %v735_v9  ;;  %v497_v18 = vmax.f32 %v383_v11, %v433_v5  ;;  %v672_v6 = vmax.f32 %v558_v3, %v606_v0  ;;  %v278_v20 = vmax.f32 %v1225_v30, %v217_v14 }
  0x44   : > { %v323_v21 = vsel %vm298_vm1, %v320_v56, %v322_v12  ;;  %v435_v22 = vsel %vm410_vm2, %v432_v58, %v434_v13  ;;  %v559_v23 = vmax.f32 %v523_v4, %v217_v14  ;;  %v608_v19 = vsel %vm587_vm3, %v605_v7, %v607_v15 }
  0x45   : > { %862 = vst.msk [vmem:[%s1180_s15 + $0x1c] sm:$0xf] %vm854_vm4, %v981_v17  ;;  %v524_v25 = vmax.f32 %v497_v18, %v1025_v53  ;;  %v709_v26 = vmax.f32 %v672_v6, %v433_v5  ;;  %v384_v27 = vmax.f32 %v278_v20, %v323_v21  ;;  %v219_v28 = vsel %vm192_vm0, %v216_v8, %v218_v16 }
  0x46   : > { %v673_v29 = vmax.f32 %v559_v23, %v608_v19  ;;  %v279_v31 = vmax.f32 %v1025_v53, %v219_v28  ;;  %v324_v24 = vrot.slane %v1246_v57, 2  ;;  %v436_v30 = vrot.slane %v1248_v59, 7 }
  0x47   : > { %v736_v32 = vmax.f32 %v709_v26, %v1025_v53  ;;  %v498_v10 = vmax.f32 %v384_v27, %v435_v22  ;;  %v560_v33 = vmax.f32 %v524_v25, %v219_v28  ;;  %v609_v34 = vrot.slane %v1248_v59, 6 }
  0x48   : > { %v710_v35 = vmax.f32 %v673_v29, %v435_v22  ;;  %v325_v36 = vsel %vm298_vm1, %v322_v12, %v324_v24  ;;  %v437_v38 = vsel %vm410_vm2, %v434_v13, %v436_v30  ;;  %v1275_v39 = vunpack.c.h.bf16 %v1061_v47 }
  0x49   : > { %v982_v41 = vpack.c.bf16 %v736_v32, %v736_v32  ;;  %v525_v42 = vmax.f32 %v498_v10, %v1246_v57  ;;  %v385_v43 = vmax.f32 %v279_v31, %v325_v36  ;;  %v610_v44 = vsel %vm587_vm3, %v607_v15, %v609_v34 }
  0x4a   : > { %v737_v45 = vmax.f32 %v710_v35, %v1246_v57  ;;  %v674_v46 = vmax.f32 %v560_v33, %v610_v44  ;;  %v220_v37 = vrot.slane %v1248_v59, 1  ;;  %v326_v48 = vrot.slane %v1248_v59, 2 }
  0x4b   : > { %863 = vst.msk [vmem:[%s1180_s15 + $0x20] sm:$0xf] %vm854_vm4, %v982_v41  ;;  %v499_v49 = vmax.f32 %v385_v43, %v437_v38  ;;  %v438_v47 = vrot.slane %v1275_v39, 7  ;;  %v611_v50 = vrot.slane %v1275_v39, 6  ;;  %v1287_v51 = vunpack.c.l.bf16 %v1062_v40 }
  0x4c   : > { %v983_v52 = vpack.c.bf16 %v737_v45, %v737_v45  ;;  %v711_v53 = vmax.f32 %v674_v46, %v437_v38  ;;  %v221_v54 = vsel %vm192_vm0, %v218_v16, %v220_v37  ;;  %v327_v55 = vsel %vm298_vm1, %v324_v24, %v326_v48 }
  0x4d   : > { %v526_v56 = vmax.f32 %v499_v49, %v1248_v59  ;;  %v280_v60 = vmax.f32 %v1246_v57, %v221_v54  ;;  %v439_v61 = vsel %vm410_vm2, %v436_v30, %v438_v47  ;;  %v561_v62 = vmax.f32 %v525_v42, %v221_v54 }
  0x4e   : > { %864 = vst.msk [vmem:[%s1180_s15 + $0x24] sm:$0xf] %vm854_vm4, %v983_v52  ;;  %v738_v58 = vmax.f32 %v711_v53, %v1248_v59  ;;  %v612_v63 = vsel %vm587_vm3, %v609_v34, %v611_v50  ;;  %v222_v1 = vrot.slane %v1275_v39, 1  ;;  %v328_v2 = vrot.slane %v1275_v39, 2 }
  0x4f   : > { %v386_v3 = vmax.f32 %v280_v60, %v327_v55  ;;  %v675_v4 = vmax.f32 %v561_v62, %v612_v63  ;;  %v440_v5 = vrot.slane %v1287_v51, 7  ;;  %v613_v57 = vrot.slane %v1287_v51, 6 }
  0x50   : > { %v984_v7 = vpack.c.bf16 %v738_v58, %v738_v58  ;;  %v223_v8 = vsel %vm192_vm0, %v220_v37, %v222_v1  ;;  %v329_v9 = vsel %vm298_vm1, %v326_v48, %v328_v2  ;;  %v1304_v11 = vunpack.c.h.bf16 %v1062_v40 }
  0x51   : > { %v500_v12 = vmax.f32 %v386_v3, %v439_v61  ;;  %v712_v13 = vmax.f32 %v675_v4, %v439_v61  ;;  %v281_v0 = vmax.f32 %v1248_v59, %v223_v8  ;;  %v441_v14 = vsel %vm410_vm2, %v438_v47, %v440_v5  ;;  %v1063_v59 = vld [vmem:[%s1110_s11 + $0x48] sm:$0xff]   ;;  %v1064_v47 = vld [vmem:[%s1110_s11 + $0x50] sm:$0xff]  }
  0x52   : > { %865 = vst.msk [vmem:[%s1180_s15 + $0x28] sm:$0xf] %vm854_vm4, %v984_v7  ;;  %v562_v15 = vmax.f32 %v526_v56, %v223_v8  ;;  %v614_v16 = vsel %vm587_vm3, %v611_v50, %v613_v57  ;;  %v224_v17 = vrot.slane %v1287_v51, 1  ;;  %v330_v18 = vrot.slane %v1287_v51, 2 }
  0x53   : > { %v527_v6 = vmax.f32 %v500_v12, %v1275_v39  ;;  %v739_v20 = vmax.f32 %v712_v13, %v1275_v39  ;;  %v387_v21 = vmax.f32 %v281_v0, %v329_v9  ;;  %v442_v22 = vrot.slane %v1304_v11, 7 }
  0x54   : > { %v676_v23 = vmax.f32 %v562_v15, %v614_v16  ;;  %v225_v19 = vsel %vm192_vm0, %v222_v1, %v224_v17  ;;  %v331_v25 = vsel %vm298_vm1, %v328_v2, %v330_v18  ;;  %v615_v26 = vrot.slane %v1304_v11, 6 }
  0x55   : > { %v985_v27 = vpack.c.bf16 %v739_v20, %v739_v20  ;;  %v501_v28 = vmax.f32 %v387_v21, %v441_v14  ;;  %v282_v29 = vmax.f32 %v1275_v39, %v225_v19  ;;  %v443_v31 = vsel %vm410_vm2, %v440_v5, %v442_v22 }
  0x56   : > { %v713_v24 = vmax.f32 %v676_v23, %v441_v14  ;;  %v563_v30 = vmax.f32 %v527_v6, %v225_v19  ;;  %v616_v32 = vsel %vm587_vm3, %v613_v57, %v615_v26  ;;  %v1323_v10 = vunpack.c.l.bf16 %v1063_v59  ;;  %v1065_v19 = vld [vmem:[%s1110_s11 + $0x58] sm:$0xff]  }
  0x57   : > { %866 = vst.msk [vmem:[%s1180_s15 + $0x2c] sm:$0xf] %vm854_vm4, %v985_v27  ;;  %v528_v33 = vmax.f32 %v501_v28, %v1287_v51  ;;  %v388_v34 = vmax.f32 %v282_v29, %v331_v25  ;;  %v226_v35 = vrot.slane %v1304_v11, 1  ;;  %v332_v36 = vrot.slane %v1304_v11, 2 }
  0x58   : > { %v740_v38 = vmax.f32 %v713_v24, %v1287_v51  ;;  %v677_v39 = vmax.f32 %v563_v30, %v616_v32  ;;  %v444_v40 = vrot.slane %v1323_v10, 7  ;;  %v617_v41 = vrot.slane %v1323_v10, 6 }
  0x59   : > { %v502_v42 = vmax.f32 %v388_v34, %v443_v31  ;;  %v227_v43 = vsel %vm192_vm0, %v224_v17, %v226_v35  ;;  %v333_v44 = vsel %vm298_vm1, %v330_v18, %v332_v36  ;;  %v1335_v45 = vunpack.c.h.bf16 %v1063_v59 }
  0x5a   : > { %v986_v46 = vpack.c.bf16 %v740_v38, %v740_v38  ;;  %v714_v37 = vmax.f32 %v677_v39, %v443_v31  ;;  %v283_v48 = vmax.f32 %v1287_v51, %v227_v43  ;;  %v445_v49 = vsel %vm410_vm2, %v442_v22, %v444_v40 }
  0x5b   : > { %v529_v50 = vmax.f32 %v502_v42, %v1304_v11  ;;  %v564_v52 = vmax.f32 %v528_v33, %v227_v43  ;;  %v618_v53 = vsel %vm587_vm3, %v615_v26, %v617_v41  ;;  %v228_v54 = vrot.slane %v1323_v10, 1 }
  0x5c   : > { %867 = vst.msk [vmem:[%s1180_s15 + $0x30] sm:$0xf] %vm854_vm4, %v986_v46  ;;  %v741_v55 = vmax.f32 %v714_v37, %v1304_v11  ;;  %v389_v56 = vmax.f32 %v283_v48, %v333_v44  ;;  %v334_v60 = vrot.slane %v1323_v10, 2  ;;  %v446_v51 = vrot.slane %v1335_v45, 7 }
  0x5d   : > { %v678_v61 = vmax.f32 %v564_v52, %v618_v53  ;;  %v229_v62 = vsel %vm192_vm0, %v226_v35, %v228_v54  ;;  %v619_v58 = vrot.slane %v1335_v45, 6  ;;  %v1350_v63 = vunpack.c.l.bf16 %v1064_v47 }
  0x5e   : > { %v987_v1 = vpack.c.bf16 %v741_v55, %v741_v55  ;;  %v503_v2 = vmax.f32 %v389_v56, %v445_v49  ;;  %v284_v3 = vmax.f32 %v1304_v11, %v229_v62  ;;  %v335_v4 = vsel %vm298_vm1, %v332_v36, %v334_v60 }
  0x5f   : > { %v715_v5 = vmax.f32 %v678_v61, %v445_v49  ;;  %v447_v57 = vsel %vm410_vm2, %v444_v40, %v446_v51  ;;  %v565_v7 = vmax.f32 %v529_v50, %v229_v62  ;;  %v620_v8 = vsel %vm587_vm3, %v617_v41, %v619_v58 }
  0x60   : > { %868 = vst.msk [vmem:[%s1180_s15 + $0x34] sm:$0xf] %vm854_vm4, %v987_v1  ;;  %v530_v9 = vmax.f32 %v503_v2, %v1323_v10  ;;  %v390_v12 = vmax.f32 %v284_v3, %v335_v4  ;;  %v230_v13 = vrot.slane %v1335_v45, 1  ;;  %v336_v0 = vrot.slane %v1335_v45, 2 }
  0x61   : > { %v742_v11 = vmax.f32 %v715_v5, %v1323_v10  ;;  %v679_v14 = vmax.f32 %v565_v7, %v620_v8  ;;  %v448_v15 = vrot.slane %v1350_v63, 7  ;;  %v621_v16 = vrot.slane %v1350_v63, 6 }
  0x62   : > { %v504_v17 = vmax.f32 %v390_v12, %v447_v57  ;;  %v231_v18 = vsel %vm192_vm0, %v228_v54, %v230_v13  ;;  %v337_v6 = vsel %vm298_vm1, %v334_v60, %v336_v0  ;;  %v1366_v20 = vunpack.c.h.bf16 %v1064_v47 }
  0x63   : > { %v988_v21 = vpack.c.bf16 %v742_v11, %v742_v11  ;;  %v716_v22 = vmax.f32 %v679_v14, %v447_v57  ;;  %v285_v59 = vmax.f32 %v1323_v10, %v231_v18  ;;  %v449_v23 = vsel %vm410_vm2, %v446_v51, %v448_v15  ;;  %v1066_v14 = vld [vmem:[%s1110_s11 + $0x60] sm:$0xff]  }
  0x64   : > { %v531_v25 = vmax.f32 %v504_v17, %v1335_v45  ;;  %v566_v26 = vmax.f32 %v530_v9, %v231_v18  ;;  %v622_v27 = vsel %vm587_vm3, %v619_v58, %v621_v16  ;;  %v232_v28 = vrot.slane %v1350_v63, 1 }
  0x65   : > { %869 = vst.msk [vmem:[%s1180_s15 + $0x38] sm:$0xf] %vm854_vm4, %v988_v21  ;;  %v743_v29 = vmax.f32 %v716_v22, %v1335_v45  ;;  %v391_v31 = vmax.f32 %v285_v59, %v337_v6  ;;  %v338_v24 = vrot.slane %v1350_v63, 2  ;;  %v450_v30 = vrot.slane %v1366_v20, 7  ;;  %v141_v6 = vld [vmem:[%s1110_s11 + $0x60] sm:$0x3] }
  0x66   : > { %v680_v32 = vmax.f32 %v566_v26, %v622_v27  ;;  %v233_v10 = vsel %vm192_vm0, %v230_v13, %v232_v28  ;;  %v623_v33 = vrot.slane %v1366_v20, 6  ;;  %v1381_v34 = vunpack.c.l.bf16 %v1065_v19  ;;  %v293_v27 = vld [vmem:[%s1110_s11 + $0x60] sm:$0x7] }
  0x67   : > { %v989_v35 = vpack.c.bf16 %v743_v29, %v743_v29  ;;  %v505_v36 = vmax.f32 %v391_v31, %v449_v23  ;;  %v286_v38 = vmax.f32 %v1335_v45, %v233_v10  ;;  %v339_v39 = vsel %vm298_vm1, %v336_v0, %v338_v24 }
  0x68   : > { %v717_v40 = vmax.f32 %v680_v32, %v449_v23  ;;  %v451_v41 = vsel %vm410_vm2, %v448_v15, %v450_v30  ;;  %v567_v42 = vmax.f32 %v531_v25, %v233_v10  ;;  %v624_v43 = vsel %vm587_vm3, %v621_v16, %v623_v33 }
  0x69   : > { %870 = vst.msk [vmem:[%s1180_s15 + $0x3c] sm:$0xf] %vm854_vm4, %v989_v35  ;;  %v532_v44 = vmax.f32 %v505_v36, %v1350_v63  ;;  %v392_v46 = vmax.f32 %v286_v38, %v339_v39  ;;  %v234_v37 = vrot.slane %v1366_v20, 1  ;;  %v340_v48 = vrot.slane %v1366_v20, 2 }
  0x6a   : > { %v744_v49 = vmax.f32 %v717_v40, %v1350_v63  ;;  %v681_v45 = vmax.f32 %v567_v42, %v624_v43  ;;  %v452_v47 = vrot.slane %v1381_v34, 7  ;;  %v625_v50 = vrot.slane %v1381_v34, 6 }
  0x6b   : > { %v506_v52 = vmax.f32 %v392_v46, %v451_v41  ;;  %v235_v53 = vsel %vm192_vm0, %v232_v28, %v234_v37  ;;  %v341_v54 = vsel %vm298_vm1, %v338_v24, %v340_v48  ;;  %v1397_v55 = vunpack.c.h.bf16 %v1065_v19 }
  0x6c   : > { %v990_v56 = vpack.c.bf16 %v744_v49, %v744_v49  ;;  %v718_v60 = vmax.f32 %v681_v45, %v451_v41  ;;  %v287_v51 = vmax.f32 %v1350_v63, %v235_v53  ;;  %v453_v61 = vsel %vm410_vm2, %v450_v30, %v452_v47  ;;  %v401_v30 = vld [vmem:[%s1110_s11 + $0x68] sm:$0x1] }
  0x6d   : > { %v533_v62 = vmax.f32 %v506_v52, %v1366_v20  ;;  %v568_v58 = vmax.f32 %v532_v44, %v235_v53  ;;  %v626_v1 = vsel %vm587_vm3, %v623_v33, %v625_v50  ;;  %v236_v2 = vrot.slane %v1381_v34, 1 }
  0x6e   : > { %871 = vst.msk [vmem:[%s1180_s15 + $0x40] sm:$0xf] %vm854_vm4, %v990_v56  ;;  %v745_v3 = vmax.f32 %v718_v60, %v1366_v20  ;;  %v393_v4 = vmax.f32 %v287_v51, %v341_v54  ;;  %v342_v5 = vrot.slane %v1381_v34, 2  ;;  %v454_v63 = vrot.slane %v1397_v55, 7 }
  0x6f   : > { %v682_v57 = vmax.f32 %v568_v58, %v626_v1  ;;  %v237_v7 = vsel %vm192_vm0, %v234_v37, %v236_v2  ;;  %v627_v8 = vrot.slane %v1397_v55, 6  ;;  %v238_v9 = vrot.slane %v1397_v55, 1  ;;  %v1067_v58 = vld [vmem:[%s1110_s11 + $0x68] sm:$0xff]  }
  0x70   : > { %v991_v12 = vpack.c.bf16 %v745_v3, %v745_v3  ;;  %v507_v13 = vmax.f32 %v393_v4, %v453_v61  ;;  %v288_v0 = vmax.f32 %v1366_v20, %v237_v7  ;;  %v343_v11 = vsel %vm298_vm1, %v340_v48, %v342_v5  ;;  %v512_v1 = vld [vmem:[%s1110_s11 + $0x68] sm:$0x3] }
  0x71   : > { %v719_v15 = vmax.f32 %v682_v57, %v453_v61  ;;  %v455_v16 = vsel %vm410_vm2, %v452_v47, %v454_v63  ;;  %v569_v17 = vmax.f32 %v533_v62, %v237_v7  ;;  %v628_v18 = vsel %vm587_vm3, %v625_v50, %v627_v8 }
  0x72   : > { %872 = vst.msk [vmem:[%s1180_s15 + $0x44] sm:$0xf] %vm854_vm4, %v991_v12  ;;  %v534_v21 = vmax.f32 %v507_v13, %v1381_v34  ;;  %v394_v22 = vmax.f32 %v288_v0, %v343_v11  ;;  %v239_v59 = vsel %vm192_vm0, %v236_v2, %v238_v9  ;;  %v344_v20 = vrot.slane %v1397_v55, 2 }
  0x73   : > { %v746_v23 = vmax.f32 %v719_v15, %v1381_v34  ;;  %v683_v19 = vmax.f32 %v569_v17, %v628_v18  ;;  %v289_v25 = vmax.f32 %v1381_v34, %v239_v59  ;;  %v1049_v26 = vunpack.c.l.bf16 %v1066_v14  ;;  %v578_v17 = vld [vmem:[%s1110_s11 + $0x70] sm:$0x1] }
  0x74   : > { %v508_v28 = vmax.f32 %v394_v22, %v455_v16  ;;  %v345_v29 = vsel %vm298_vm1, %v342_v5, %v344_v20  ;;  %v570_v31 = vmax.f32 %v534_v21, %v239_v59  ;;  %v166_v24 = vunpack.c.l.bf16 %v141_v6 }
  0x75   : > { %v992_v32 = vpack.c.bf16 %v746_v23, %v746_v23  ;;  %v720_v10 = vmax.f32 %v683_v19, %v455_v16  ;;  %v395_v33 = vmax.f32 %v289_v25, %v345_v29  ;;  %v456_v35 = vrot.slane %v1049_v26, 7 }
  0x76   : > { %v535_v36 = vmax.f32 %v508_v28, %v1397_v55  ;;  %v629_v38 = vrot.slane %v1049_v26, 6  ;;  %v240_v39 = vrot.slane %v166_v24, 1  ;;  %v295_v40 = vunpack.c.l.bf16 %v293_v27 }
  0x77   : > { %873 = vst.msk [vmem:[%s1180_s15 + $0x48] sm:$0xf] %vm854_vm4, %v992_v32  ;;  %v747_v34 = vmax.f32 %v720_v10, %v1397_v55  ;;  %v457_v41 = vsel %vm410_vm2, %v454_v63, %v456_v35  ;;  %v1050_v42 = vunpack.c.h.bf16 %v1066_v14  ;;  %v405_v43 = vunpack.c.l.bf16 %v401_v30 }
  0x78   : > { %v509_v44 = vmax.f32 %v395_v33, %v457_v41  ;;  %v630_v46 = vsel %vm587_vm3, %v627_v8, %v629_v38  ;;  %v241_v37 = vsel %vm192_vm0, %v238_v9, %v240_v39  ;;  %v291_v48 = vmax.f32 %v166_v24, %v240_v39  ;;  %v726_v33 = vld [vmem:[%s1110_s11 + $0x70] sm:$0x3] }
  0x79   : > { %v993_v49 = vpack.c.bf16 %v747_v34, %v747_v34  ;;  %v684_v45 = vmax.f32 %v570_v31, %v630_v46  ;;  %v290_v47 = vmax.f32 %v1397_v55, %v241_v37  ;;  %v346_v50 = vrot.slane %v295_v40, 2 }
  0x7a   : > { %v536_v52 = vmax.f32 %v509_v44, %v1049_v26  ;;  %v458_v53 = vrot.slane %v1050_v42, 7  ;;  %v460_v54 = vrot.slane %v405_v43, 7  ;;  %v540_v56 = vrot.slane %v1049_v26, 1 }
  0x7b   : > { %874 = vst.msk [vmem:[%s1180_s15 + $0x4c] sm:$0xf] %vm854_vm4, %v993_v49  ;;  %v721_v60 = vmax.f32 %v684_v45, %v457_v41  ;;  %v347_v51 = vsel %vm298_vm1, %v344_v20, %v346_v50  ;;  %v397_v61 = vmax.f32 %v291_v48, %v346_v50  ;;  %v631_v62 = vrot.slane %v1050_v42, 6  ;;  %v882_v50 = vld [vmem:[%s1180_s15 + $0x60] sm:$0x3] }
  0x7c   : > { %v396_v2 = vmax.f32 %v290_v47, %v347_v51  ;;  %v459_v3 = vsel %vm410_vm2, %v456_v35, %v458_v53  ;;  %v461_v55 = vsel %vm410_vm2, %v458_v53, %v460_v54  ;;  %v541_v4 = vsel %vm192_vm0, %v238_v9, %v540_v56 }
  0x7d   : > { %v748_v5 = vmax.f32 %v721_v60, %v1049_v26  ;;  %v571_v63 = vmax.f32 %v535_v36, %v541_v4  ;;  %v632_v57 = vsel %vm587_vm3, %v629_v38, %v631_v62  ;;  %v542_v7 = vrot.slane %v1050_v42, 1 }
  0x7e   : > { %v510_v8 = vmax.f32 %v396_v2, %v459_v3  ;;  %v1053_v12 = vunpack.c.l.bf16 %v1067_v58  ;;  %v513_v13 = vunpack.c.l.bf16 %v512_v1  ;;  %v1054_v0 = vunpack.c.h.bf16 %v1067_v58 }
  0x7f   : > { %v994_v11 = vpack.c.bf16 %v748_v5, %v748_v5  ;;  %v685_v14 = vmax.f32 %v571_v63, %v632_v57  ;;  %v543_v15 = vsel %vm192_vm0, %v540_v56, %v542_v7  ;;  %v511_v16 = vmax.f32 %v397_v61, %v461_v55 }
  0x80   : > { %v537_v18 = vmax.f32 %v510_v8, %v1050_v42  ;;  %v572_v6 = vmax.f32 %v536_v52, %v543_v15  ;;  %v633_v21 = vrot.slane %v1053_v12, 6  ;;  %v691_v9 = vrot.slane %v1053_v12, 7 }
  0x81   : > { %875 = vst.msk [vmem:[%s1180_s15 + $0x50] sm:$0xf] %vm854_vm4, %v994_v11  ;;  %v722_v22 = vmax.f32 %v685_v14, %v459_v3  ;;  %v544_v59 = vrot.slane %v513_v13, 1  ;;  %v635_v20 = vrot.slane %v1054_v0, 6  ;;  %v693_v23 = vrot.slane %v1054_v0, 7 }
  0x82   : > { %v634_v19 = vsel %vm587_vm3, %v631_v62, %v633_v21  ;;  %v692_v25 = vsel %vm410_vm2, %v458_v53, %v691_v9  ;;  %v538_v26 = vmax.f32 %v511_v16, %v513_v13  ;;  %v582_v27 = vunpack.c.l.bf16 %v578_v17 }
  0x83   : > { %v749_v28 = vmax.f32 %v722_v22, %v1050_v42  ;;  %v686_v29 = vmax.f32 %v572_v6, %v634_v19  ;;  %v545_v31 = vsel %vm192_vm0, %v542_v7, %v544_v59  ;;  %v636_v24 = vsel %vm587_vm3, %v633_v21, %v635_v20 }
  0x84   : > { %v573_v30 = vmax.f32 %v537_v18, %v545_v31  ;;  %v574_v32 = vmax.f32 %v538_v26, %v544_v59  ;;  %v637_v10 = vrot.slane %v582_v27, 6  ;;  %v694_v38 = vsel %vm410_vm2, %v691_v9, %v693_v23 }
  0x85   : > { %v995_v35 = vpack.c.bf16 %v749_v28, %v749_v28  ;;  %v723_v36 = vmax.f32 %v686_v29, %v692_v25  ;;  %v695_v39 = vrot.slane %v582_v27, 7  ;;  %v727_v44 = vunpack.c.l.bf16 %v726_v33 }
  0x86   : > { %v687_v40 = vmax.f32 %v573_v30, %v636_v24  ;;  %v638_v34 = vsel %vm587_vm3, %v635_v20, %v637_v10 }
  0x87   : > { %876 = vst.msk [vmem:[%s1180_s15 + $0x54] sm:$0xf] %vm854_vm4, %v995_v35  ;;  %v750_v41 = vmax.f32 %v723_v36, %v1053_v12  ;;  %v688_v42 = vmax.f32 %v574_v32, %v638_v34  ;;  %v696_v43 = vsel %vm410_vm2, %v693_v23, %v695_v39 }
  0x88   : > { %v724_v46 = vmax.f32 %v687_v40, %v694_v38 }
  0x89   : > { %v996_v37 = vpack.c.bf16 %v750_v41, %v750_v41  ;;  %v725_v48 = vmax.f32 %v688_v42, %v696_v43 }
  0x8a   : > { %v751_v49 = vmax.f32 %v724_v46, %v1054_v0 }
  0x8b   : > { %877 = vst.msk [vmem:[%s1180_s15 + $0x58] sm:$0xf] %vm854_vm4, %v996_v37  ;;  %v752_v45 = vmax.f32 %v725_v48, %v727_v44 }
  0x8c   : > { %v997_v47 = vpack.c.bf16 %v751_v49, %v751_v49 }
  0x8d   : > { %v998_v52 = vpack.c.bf16 %v752_v45, %v752_v45 }
  0x8e   : > { %878 = vst.msk [vmem:[%s1180_s15 + $0x5c] sm:$0xf] %vm854_vm4, %v997_v47 }
  0x8f   : > { %v883_v53 = vsel %vm881_vm7, %v998_v52, %v882_v50 }
  0x90   : > { %884 = vst [vmem:[%s1180_s15 + $0x60] sm:$0x3] %v883_v53 }
  0x91 PF: > { %s11_s6 = sadd.s32 1, %s1084_s6  }
  0x92   : > { %p8_p4 = scmp.ge.s32.totalorder %s11_s6, 4  }
  0x94   :  { %10 = sbr.rel (!%p8_p4) target bundleno = 1 (0x1), region = 54 }

// kernel: inception_encoder_forward.26
= control target key start
LH: loop header
LB: loop body
LE: loop exit
PB: predicated region body
PF: predicated region fallthrough
CT: control target
= control target key end

     0   :  { %v441_v0 = vmov 0.0   ;;  %vm442_vm0 = vmmov 0   ;;  %vm100_vm1 = vcmask 523264   ;;  %s549_s1 = inlined_call_operand.vmem [shape: bf16[64,128], index: 1, kind: input, shape index: {}]   ;;  %s550_s0 = inlined_call_operand.vmem [shape: bf16[98,64], index: 0, kind: input, shape index: {}]   ;;  %s551_s2 = inlined_call_operand.vmem [shape: f32[1,128], index: 2, kind: input, shape index: {}]   ;;  %s552_s3 = inlined_call_operand.vmem [shape: bf16[98,128], index: 3, kind: output, shape index: {}]  }
   0x1   :  { %384 = vmatprep.subr.bf16.mxu0 %v441_v0  ;;  %v430_v1 = vld [vmem:[%s549_s1] sm:$0xff]   ;;  %420 = vmatprep.subr.bf16.mxu1 %v441_v0  ;;  %v431_v2 = vld [vmem:[%s549_s1 + $0x8] sm:$0xff]   ;;  %v432_v3 = vld [vmem:[%s549_s1 + $0x10] sm:$0xff]  }
   0x2   :  { %392 = vmatprep.mubr.msk.bf16.mxu0 %vm442_vm0, %v441_v0  ;;  %408 = vmatprep.mubr.msk.bf16.mxu1 %vm442_vm0, %v441_v0  ;;  %v433_v4 = vld [vmem:[%s549_s1 + $0x18] sm:$0xff]   ;;  %v434_v5 = vld [vmem:[%s550_s0] sm:$0xff]   ;;  %v436_v7 = vld [vmem:[%s550_s0 + $0x8] sm:$0xff]  }
   0x3   :  { %385 = vmatpush3.bf16.msra.mxu0 %v430_v1  ;;  %424 = vmatpush3.bf16.msra.mxu1 %v430_v1  ;;  %v435_v6 = vld [vmem:[%s550_s0 + $0x20] sm:$0xff]   ;;  %v437_v8 = vld [vmem:[%s550_s0 + $0x28] sm:$0xff]   ;;  %v438_v9 = vld [vmem:[%s550_s0 + $0x10] sm:$0xff]  }
   0x4   :  { %386 = vmatprep.subr.bf16.mxu0 %v441_v0  ;;  %421 = vmatprep.subr.bf16.mxu1 %v441_v0  ;;  %v439_v10 = vld [vmem:[%s550_s0 + $0x30] ss:$0 sps:$4 sm:$0x11]   ;;  %v440_v11 = vld [vmem:[%s550_s0 + $0x18] sm:$0xff]   ;;  %v513_v12 = vld [vmem:[%s551_s2] ss:$0 sm:$0xff] }
   0x7   :  { %387 = vmatpush3.bf16.msra.mxu0 %v431_v2  ;;  %425 = vmatpush3.bf16.msra.mxu1 %v431_v2 }
   0x8   :  { %388 = vmatprep.subr.bf16.mxu0 %v441_v0  ;;  %422 = vmatprep.subr.bf16.mxu1 %v441_v0 }
   0xb   :  { %389 = vmatpush3.bf16.msra.mxu0 %v432_v3  ;;  %426 = vmatpush3.bf16.msra.mxu1 %v432_v3 }
   0xc   :  { %390 = vmatprep.subr.bf16.mxu0 %v441_v0  ;;  %423 = vmatprep.subr.bf16.mxu1 %v441_v0 }
   0xf   :  { %391 = vmatpush3.bf16.msra.mxu0 %v433_v4  ;;  %427 = vmatpush3.bf16.msra.mxu1 %v433_v4 }
  0x12   :  { %393 = vmatmul.mubr.msk.bf16.vlgmr.msra.gmra.mrb[0].mxu0 %vm100_vm1, %v434_v5  ;;  %409 = vmatmul.mubr.msk.bf16.vlgmr.msra.gmra.mrb[0].mxu1 %vm100_vm1, %v435_v6 }
  0x13   :  { %396 = vmatprep.mubr.msk.bf16.mxu0 %vm442_vm0, %v441_v0  ;;  %412 = vmatprep.mubr.msk.bf16.mxu1 %vm442_vm0, %v441_v0 }
  0x1a   :  { %397 = vmatmul.mubr.msk.bf16.gmra.mrb[4].mxu0 %vm100_vm1, %v436_v7  ;;  %413 = vmatmul.mubr.msk.bf16.gmra.mrb[4].mxu1 %vm100_vm1, %v437_v8 }
  0x1b   :  { %400 = vmatprep.mubr.msk.bf16.mxu0 %vm442_vm0, %v441_v0  ;;  %416 = vmatprep.mubr.msk.bf16.mxu1 %vm442_vm0, %v441_v0 }
  0x22   :  { %401 = vmatmul.mubr.msk.bf16.gmra.mrb[8].mxu0 %vm100_vm1, %v438_v9  ;;  %417 = vmatmul.mubr.msk.bf16.gmra.mrb[8].mxu1 %vm100_vm1, %v439_v10 }
  0x23   :  { %404 = vmatprep.mubr.msk.bf16.mxu0 %vm442_vm0, %v441_v0 }
  0x2a   :  { %405 = vmatmul.mubr.msk.bf16.gmra.mrb[12].mxu0 %vm100_vm1, %v440_v11 }
  0xe5   :  { %v156_v13 = vpop.f32.mrb[0].mxu0  ;;  %v188_v14 = vpop.f32.mrb[0].mxu1 }
  0xe6   :  { %v157_v15 = vadd.f32 %v513_v12, %v156_v13  ;;  %v394_v16 = vpop.f32.mrb[1].mxu0  ;;  %v189_v17 = vadd.f32 %v513_v12, %v188_v14  ;;  %v410_v18 = vpop.f32.mrb[1].mxu1 }
  0xe7   :  { %v159_v19 = vpop.f32.mrb[2].mxu0  ;;  %v191_v20 = vpop.f32.mrb[2].mxu1 }
  0xe8   :  { %v160_v21 = vadd.f32 %v513_v12, %v159_v19  ;;  %v395_v22 = vpop.f32.mrb[3].mxu0  ;;  %v218_v23 = vmax.f32 %v189_v17, 0.0  ;;  %v192_v24 = vadd.f32 %v513_v12, %v191_v20  ;;  %v411_v25 = vpop.f32.mrb[3].mxu1  ;;  %v210_v26 = vmax.f32 %v157_v15, 0.0 }
  0xea   :  { %v211_v27 = vmax.f32 %v160_v21, 0.0  ;;  %v219_v28 = vmax.f32 %v192_v24, 0.0 }
  0xec   :  { %v341_v29 = vpack.c.bf16 %v211_v27, %v210_v26  ;;  %v361_v30 = vpack.c.bf16 %v219_v28, %v218_v23 }
  0xed   :  { %v164_v31 = vpop.f32.mrb[4].mxu0  ;;  %v196_v32 = vpop.f32.mrb[4].mxu1 }
  0xee   :  { %342 = vst [vmem:[%s552_s3] sm:$0xff] %v341_v29   ;;  %v165_v33 = vadd.f32 %v513_v12, %v164_v31  ;;  %v398_v34 = vpop.f32.mrb[5].mxu0  ;;  %371 = vst [vmem:[%s552_s3 + $0x20] sm:$0xff] %v361_v30   ;;  %v197_v35 = vadd.f32 %v513_v12, %v196_v32  ;;  %v414_v36 = vpop.f32.mrb[5].mxu1 }
  0xef   :  { %v167_v37 = vpop.f32.mrb[6].mxu0  ;;  %v199_v38 = vpop.f32.mrb[6].mxu1 }
  0xf0   :  { %v168_v39 = vadd.f32 %v513_v12, %v167_v37  ;;  %v399_v40 = vpop.f32.mrb[7].mxu0  ;;  %v220_v41 = vmax.f32 %v197_v35, 0.0  ;;  %v200_v42 = vadd.f32 %v513_v12, %v199_v38  ;;  %v415_v43 = vpop.f32.mrb[7].mxu1  ;;  %v212_v44 = vmax.f32 %v165_v33, 0.0 }
  0xf2   :  { %v213_v45 = vmax.f32 %v168_v39, 0.0  ;;  %v221_v46 = vmax.f32 %v200_v42, 0.0 }
  0xf4   :  { %v346_v47 = vpack.c.bf16 %v213_v45, %v212_v44  ;;  %v366_v48 = vpack.c.bf16 %v221_v46, %v220_v41 }
  0xf5   :  { %v172_v49 = vpop.f32.mrb[8].mxu0  ;;  %v204_v50 = vpop.f32.mrb[8].mxu1 }
  0xf6   :  { %368 = vst [vmem:[%s552_s3 + $0x8] sm:$0xff] %v346_v47   ;;  %v173_v51 = vadd.f32 %v513_v12, %v172_v49  ;;  %v402_v52 = vpop.f32.mrb[9].mxu0  ;;  %372 = vst [vmem:[%s552_s3 + $0x28] sm:$0xff] %v366_v48   ;;  %v205_v53 = vadd.f32 %v513_v12, %v204_v50  ;;  %v418_v54 = vpop.f32.mrb[9].mxu1 }
  0xf7   :  { %v175_v55 = vpop.f32.mrb[10].mxu0  ;;  %v207_v56 = vpop.f32.mrb[10].mxu1 }
  0xf8   :  { %v176_v57 = vadd.f32 %v513_v12, %v175_v55  ;;  %v403_v58 = vpop.f32.mrb[11].mxu0  ;;  %v222_v59 = vmax.f32 %v205_v53, 0.0  ;;  %v419_v60 = vpop.f32.mrb[11].mxu1  ;;  %v214_v61 = vmax.f32 %v173_v51, 0.0 }
  0xfa   :  { %v215_v62 = vmax.f32 %v176_v57, 0.0  ;;  %v337_v63 = vpack.c.bf16 %v222_v59, %v222_v59 }
  0xfc   :  { %v351_v0 = vpack.c.bf16 %v215_v62, %v214_v61  ;;  %288 = vst [vmem:[%s552_s3 + $0x30] sm:$0x1] %v337_v63 }
  0xfd   :  { %v180_v1 = vpop.f32.mrb[12].mxu0 }
  0xfe   :  { %369 = vst [vmem:[%s552_s3 + $0x10] sm:$0xff] %v351_v0   ;;  %v181_v2 = vadd.f32 %v513_v12, %v180_v1  ;;  %v406_v3 = vpop.f32.mrb[13].mxu0 }
  0xff   :  { %v183_v4 = vpop.f32.mrb[14].mxu0 }
 0x100   :  { %v184_v5 = vadd.f32 %v513_v12, %v183_v4  ;;  %v407_v6 = vpop.f32.mrb[15].mxu0  ;;  %v216_v7 = vmax.f32 %v181_v2, 0.0 }
 0x102   :  { %v217_v8 = vmax.f32 %v184_v5, 0.0 }
 0x104   :  { %v356_v9 = vpack.c.bf16 %v217_v8, %v216_v7 }
 0x106   :  { %370 = vst [vmem:[%s552_s3 + $0x18] sm:$0xff] %v356_v9  }

// kernel: inception_encoder_forward.28
= control target key start
LH: loop header
LB: loop body
LE: loop exit
PB: predicated region body
PF: predicated region fallthrough
CT: control target
= control target key end

     0   :  { %s452_s6 = smov 0   ;;  %s546_s0 = inlined_call_operand.vmem [shape: bf16[2,30,192], index: 0, kind: input, shape index: {}]   ;;  %s547_s1 = inlined_call_operand.vmem [shape: bf16[2,15,192], index: 1, kind: output, shape index: {}]  }
   0x1 LB: > { %s409_s7 = sadd.s32 4294967295, %s440_s6   ;;  %p413_p0 = scmp.ge.s32.totalorder %s440_s6, 1  ;;  %s440_s6 = sphi %s452_s6, %s11_s6  }
   0x2   : > { %p87_p1 = scmp.lt.s32.totalorder %s440_s6, 3 }
   0x4   : > { %p88_p2 = pnand %p413_p0, %p87_p1 }
   0x5   : > { %p107_p3 = scmp.lt.s32.totalorder (!%p88_p2), %s409_s7, 1  ;;  %vm127_vm0 = vcmask (!%p88_p2), 1046528   ;;  %vm152_vm1 = vcmask (!%p88_p2), 1045504   ;;  %vm181_vm2 = vcmask (!%p88_p2), 1042432   ;;  %vm210_vm3 = vcmask (!%p88_p2), 1041408  }
   0x6   : > { %91 = sbr.rel (%p88_p2) target bundleno = 57 (0x39), region = 24  ;;  %vm229_vm4 = vcmask (!%p88_p2), 1040384   ;;  %vm281_vm5 = vcmask (!%p88_p2), 1044480   ;;  %vm345_vm6 = vsmask.f32 (!%p88_p2), 3328  ;;  %vm310_vm7 = vcmask (!%p88_p2), 1043456  }
   0x7   : > { %vm341_vm8 = vcmask (!%p88_p2), 523268   ;;  %vm348_vm9 = vsmask.f32 (!%p88_p2), 7424  ;;  %vm526_vm10 = vmand (!%p88_p2), %vm310_vm7, %vm345_vm6 }
   0x8   : > { %vm349_vm11 = vmand (!%p88_p2), %vm341_vm8, %vm348_vm9 }
   0x9   : > { %vm342_vm12 = vmor (!%p88_p2), %vm341_vm8, %vm310_vm7 }
   0xa   : > { %vm350_vm13 = vmor (!%p88_p2), %vm349_vm11, %vm526_vm10 }
   0xd   : > { %s551_s7 = smov (!%p107_p3, %s409_s7), 1 }
   0xe   : > { %s422_s8 = sshll.u32 %s551_s7, 5  ;;  %s423_s12 = sshll.u32 %s551_s7, 4 }
   0xf   : > { %s466_s11 = scalar_lea.vmem %s546_s0, %s422_s8  ;;  %s116_s15 = scalar_lea.vmem %s547_s1, %s423_s12 }
  0x10   : > { %v117_v0 = vld [vmem:[%s466_s11] sm:$0xff]  ;;  %v118_v1 = vld [vmem:[%s466_s11 + $0x8] sm:$0xff]  ;;  %v143_v7 = vld [vmem:[%s466_s11 + $0x10] sm:$0x11] }
  0x11   : > { %v142_v2 = vld [vmem:[%s466_s11] sm:$0xee]  ;;  %v119_v3 = vunpack.c.l.bf16 %v117_v0  ;;  %v120_v4 = vunpack.c.h.bf16 %v117_v0  ;;  %v471_v5 = vunpack.c.l.bf16 %v118_v1  ;;  %v473_v6 = vunpack.c.h.bf16 %v118_v1  ;;  %v172_v25 = vld [vmem:[%s466_s11 + $0x10] sm:$0x33] }
  0x12   : > { %v144_v8 = vunpack.c.l.bf16 %v142_v2  ;;  %v145_v9 = vunpack.c.h.bf16 %v142_v2  ;;  %v146_v10 = vunpack.c.l.bf16 %v143_v7  ;;  %v147_v11 = vunpack.c.h.bf16 %v143_v7  ;;  %v171_v20 = vld [vmem:[%s466_s11] sm:$0xcc]  ;;  %v201_v43 = vld [vmem:[%s466_s11 + $0x10] sm:$0x77] }
  0x13   : > { %v128_v12 = vrot.slane %v119_v3, 1  ;;  %v129_v13 = vrot.slane %v471_v5, 1  ;;  %v131_v14 = vrot.slane %v120_v4, 1  ;;  %v132_v15 = vrot.slane %v473_v6, 1  ;;  %v200_v38 = vld [vmem:[%s466_s11] sm:$0x88] }
  0x14   : > { %v153_v16 = vrot.slane %v144_v8, 2  ;;  %v154_v17 = vrot.slane %v471_v5, 2  ;;  %v156_v18 = vrot.slane %v145_v9, 2  ;;  %v157_v19 = vrot.slane %v473_v6, 2 }
  0x15   : > { %v130_v21 = vsel %vm127_vm0, %v128_v12, %v129_v13  ;;  %v133_v22 = vsel %vm127_vm0, %v131_v14, %v132_v15  ;;  %v140_v23 = vmax.f32 %v471_v5, %v129_v13  ;;  %v141_v24 = vmax.f32 %v473_v6, %v132_v15  ;;  %v248_v14 = vld [vmem:[%s466_s11 + $0x8] sm:$0xee]  ;;  %v249_v15 = vld [vmem:[%s466_s11 + $0x10] sm:$0xff] }
  0x16   : > { %v138_v26 = vmax.f32 %v119_v3, %v130_v21  ;;  %v139_v27 = vmax.f32 %v120_v4, %v133_v22  ;;  %v155_v28 = vsel %vm152_vm1, %v153_v16, %v154_v17  ;;  %v158_v29 = vsel %vm152_vm1, %v156_v18, %v157_v19 }
  0x17   : > { %v159_v30 = vrot.slane %v146_v10, 2  ;;  %v161_v31 = vrot.slane %v147_v11, 2  ;;  %v173_v32 = vunpack.c.l.bf16 %v171_v20  ;;  %v174_v33 = vunpack.c.h.bf16 %v171_v20  ;;  %v250_v20 = vld [vmem:[%s466_s11 + $0x18] sm:$0x11] }
  0x18   : > { %v167_v34 = vmax.f32 %v138_v26, %v155_v28  ;;  %v168_v35 = vmax.f32 %v139_v27, %v158_v29  ;;  %v175_v36 = vunpack.c.l.bf16 %v172_v25  ;;  %v176_v37 = vunpack.c.h.bf16 %v172_v25 }
  0x19   : > { %v160_v39 = vsel %vm152_vm1, %v154_v17, %v159_v30  ;;  %v162_v40 = vsel %vm152_vm1, %v157_v19, %v161_v31  ;;  %v182_v41 = vrot.slane %v173_v32, 5  ;;  %v183_v42 = vrot.slane %v471_v5, 5 }
  0x1a   : > { %v169_v44 = vmax.f32 %v140_v23, %v160_v39  ;;  %v170_v45 = vmax.f32 %v141_v24, %v162_v40  ;;  %v185_v46 = vrot.slane %v174_v33, 5  ;;  %v186_v47 = vrot.slane %v473_v6, 5 }
  0x1b   : > { %v184_v48 = vsel %vm181_vm2, %v182_v41, %v183_v42  ;;  %v188_v49 = vrot.slane %v175_v36, 5  ;;  %v190_v50 = vrot.slane %v176_v37, 5  ;;  %v202_v51 = vunpack.c.l.bf16 %v200_v38 }
  0x1c   : > { %v187_v52 = vsel %vm181_vm2, %v185_v46, %v186_v47  ;;  %v196_v53 = vmax.f32 %v167_v34, %v184_v48  ;;  %v203_v54 = vunpack.c.h.bf16 %v200_v38  ;;  %v204_v55 = vunpack.c.l.bf16 %v201_v43 }
  0x1d   : > { %v189_v56 = vsel %vm181_vm2, %v183_v42, %v188_v49  ;;  %v191_v57 = vsel %vm181_vm2, %v186_v47, %v190_v50  ;;  %v197_v58 = vmax.f32 %v168_v35, %v187_v52  ;;  %v205_v59 = vunpack.c.h.bf16 %v201_v43  ;;  %v301_v52 = vld [vmem:[%s466_s11 + $0x18] sm:$0x33] }
  0x1e   : > { %v198_v60 = vmax.f32 %v169_v44, %v189_v56  ;;  %v199_v61 = vmax.f32 %v170_v45, %v191_v57  ;;  %v211_v62 = vrot.slane %v202_v51, 6  ;;  %v212_v63 = vrot.slane %v471_v5, 6 }
  0x1f   : > { %v214_v0 = vrot.slane %v203_v54, 6  ;;  %v215_v1 = vrot.slane %v473_v6, 6  ;;  %v217_v2 = vrot.slane %v204_v55, 6  ;;  %v219_v3 = vrot.slane %v205_v59, 6 }
  0x20   : > { %v213_v4 = vsel %vm210_vm3, %v211_v62, %v212_v63  ;;  %v230_v7 = vrot.slane %v202_v51, 7  ;;  %v231_v8 = vrot.slane %v471_v5, 7  ;;  %v233_v9 = vrot.slane %v203_v54, 7  ;;  %v300_v51 = vld [vmem:[%s466_s11 + $0x8] sm:$0xcc] }
  0x21   : > { %v216_v10 = vsel %vm210_vm3, %v214_v0, %v215_v1  ;;  %v218_v11 = vsel %vm210_vm3, %v212_v63, %v217_v2  ;;  %v220_v12 = vsel %vm210_vm3, %v215_v1, %v219_v3  ;;  %v225_v13 = vmax.f32 %v196_v53, %v213_v4 }
  0x22   : > { %v226_v16 = vmax.f32 %v197_v58, %v216_v10  ;;  %v227_v17 = vmax.f32 %v198_v60, %v218_v11  ;;  %v228_v18 = vmax.f32 %v199_v61, %v220_v12  ;;  %v232_v19 = vsel %vm229_vm4, %v230_v7, %v231_v8 }
  0x23   : > { %v234_v21 = vrot.slane %v473_v6, 7  ;;  %v236_v5 = vrot.slane %v204_v55, 7  ;;  %v238_v22 = vrot.slane %v205_v59, 7  ;;  %v244_v23 = vmax.f32 %v225_v13, %v232_v19 }
  0x24   : > { %v251_v24 = vunpack.c.l.bf16 %v248_v14  ;;  %v252_v25 = vunpack.c.h.bf16 %v248_v14  ;;  %v253_v26 = vunpack.c.l.bf16 %v249_v15  ;;  %v254_v27 = vunpack.c.h.bf16 %v249_v15 }
  0x25   : > { %v235_v28 = vsel %vm229_vm4, %v233_v9, %v234_v21  ;;  %v237_v29 = vsel %vm229_vm4, %v231_v8, %v236_v5  ;;  %v239_v30 = vsel %vm229_vm4, %v234_v21, %v238_v22  ;;  %v255_v31 = vunpack.c.l.bf16 %v250_v20  ;;  %v351_v22 = vld [vmem:[%s116_s15 + $0x8] sm:$0xff] }
  0x26   : > { %v245_v32 = vmax.f32 %v226_v16, %v235_v28  ;;  %v246_v33 = vmax.f32 %v227_v17, %v237_v29  ;;  %v247_v34 = vmax.f32 %v228_v18, %v239_v30  ;;  %v256_v35 = vunpack.c.h.bf16 %v250_v20 }
  0x27   : > { %v263_v6 = vrot.slane %v251_v24, 2  ;;  %v264_v36 = vrot.slane %v253_v26, 2  ;;  %v266_v37 = vrot.slane %v252_v25, 2  ;;  %v267_v38 = vrot.slane %v254_v27, 2 }
  0x28   : > { %v269_v39 = vrot.slane %v255_v31, 2  ;;  %v271_v40 = vrot.slane %v256_v35, 2  ;;  %v282_v41 = vrot.slane %v251_v24, 3  ;;  %v283_v42 = vrot.slane %v253_v26, 3 }
  0x29   : > { %v265_v43 = vsel %vm152_vm1, %v263_v6, %v264_v36  ;;  %v268_v44 = vsel %vm152_vm1, %v266_v37, %v267_v38  ;;  %v285_v45 = vrot.slane %v252_v25, 3  ;;  %v286_v46 = vrot.slane %v254_v27, 3 }
  0x2a   : > { %v270_v47 = vsel %vm152_vm1, %v264_v36, %v269_v39  ;;  %v272_v48 = vsel %vm152_vm1, %v267_v38, %v271_v40  ;;  %v277_v49 = vmax.f32 %v244_v23, %v265_v43  ;;  %v278_v50 = vmax.f32 %v245_v32, %v268_v44 }
  0x2b   : > { %v279_v53 = vmax.f32 %v246_v33, %v270_v47  ;;  %v280_v54 = vmax.f32 %v247_v34, %v272_v48  ;;  %v284_v55 = vsel %vm281_vm5, %v282_v41, %v283_v42  ;;  %v287_v56 = vsel %vm281_vm5, %v285_v45, %v286_v46 }
  0x2c   : > { %v288_v57 = vrot.slane %v255_v31, 3  ;;  %v290_v58 = vrot.slane %v256_v35, 3  ;;  %v296_v59 = vmax.f32 %v277_v49, %v284_v55  ;;  %v297_v60 = vmax.f32 %v278_v50, %v287_v56 }
  0x2d   : > { %v302_v61 = vunpack.c.l.bf16 %v300_v51  ;;  %v303_v62 = vunpack.c.h.bf16 %v300_v51  ;;  %v304_v63 = vunpack.c.l.bf16 %v301_v52  ;;  %v305_v0 = vunpack.c.h.bf16 %v301_v52 }
  0x2e   : > { %v289_v1 = vsel %vm281_vm5, %v283_v42, %v288_v57  ;;  %v291_v2 = vsel %vm281_vm5, %v286_v46, %v290_v58  ;;  %v312_v3 = vrot.slane %v253_v26, 4  ;;  %v315_v4 = vrot.slane %v254_v27, 4 }
  0x2f   : > { %v298_v7 = vmax.f32 %v279_v53, %v289_v1  ;;  %v299_v8 = vmax.f32 %v280_v54, %v291_v2  ;;  %v311_v9 = vrot.slane %v302_v61, 4  ;;  %v314_v10 = vrot.slane %v303_v62, 4 }
  0x30   : > { %v317_v11 = vrot.slane %v304_v63, 4  ;;  %v319_v12 = vrot.slane %v305_v0, 4 }
  0x31   : > { %v313_v14 = vsel %vm310_vm7, %v311_v9, %v312_v3  ;;  %v316_v15 = vsel %vm310_vm7, %v314_v10, %v315_v4 }
  0x32   : > { %v318_v16 = vsel %vm310_vm7, %v312_v3, %v317_v11  ;;  %v320_v17 = vsel %vm310_vm7, %v315_v4, %v319_v12  ;;  %v325_v18 = vmax.f32 %v296_v59, %v313_v14  ;;  %v326_v19 = vmax.f32 %v297_v60, %v316_v15 }
  0x33   : > { %v327_v20 = vmax.f32 %v298_v7, %v318_v16  ;;  %v328_v21 = vmax.f32 %v299_v8, %v320_v17 }
  0x34   : > { %v424_v5 = vpack.c.bf16 %v326_v19, %v325_v18 }
  0x35   : > { %v425_v23 = vpack.c.bf16 %v328_v21, %v327_v20 }
  0x36   : > { %343 = vst.msk [vmem:[%s116_s15] sm:$0xff] %vm342_vm12, %v424_v5 }
  0x37   : > { %v352_v24 = vsel %vm350_vm13, %v425_v23, %v351_v22 }
  0x38   : > { %353 = vst [vmem:[%s116_s15 + $0x8] sm:$0xff] %v352_v24 }
  0x39 PF: > { %s11_s6 = sadd.s32 1, %s440_s6  }
  0x3a   : > { %p8_p4 = scmp.ge.s32.totalorder %s11_s6, 4  }
  0x3c   :  { %10 = sbr.rel (!%p8_p4) target bundleno = 1 (0x1), region = 54 }

// kernel: inception_encoder_forward.27
= control target key start
LH: loop header
LB: loop body
LE: loop exit
PB: predicated region body
PF: predicated region fallthrough
CT: control target
= control target key end

     0   :  { %s2151_s12 = smov 0   ;;  %s2619_s0 = inlined_call_operand.vmem [shape: bf16[2,56,80], index: 0, kind: input, shape index: {}]   ;;  %s2620_s1 = inlined_call_operand.vmem [shape: bf16[720,256], index: 1, kind: input, shape index: {}]   ;;  %s2621_s2 = inlined_call_operand.vmem [shape: f32[1,256], index: 2, kind: input, shape index: {}]   ;;  %s2622_s3 = inlined_call_operand.vmem [shape: bf16[2,35,256], index: 3, kind: output, shape index: {}]  }
   0x1 LB: > { %s1732_s13 = sadd.s32 4294967295, %s2128_s12   ;;  %p1736_p0 = scmp.ge.s32.totalorder %s2128_s12, 1  ;;  %s2128_s12 = sphi %s2151_s12, %s13_s12  }
   0x2   : > { %p137_p1 = scmp.lt.s32.totalorder %s2128_s12, 3 }
   0x4   : > { %p138_p2 = pnand %p1736_p0, %p137_p1 }
   0x5   : > { %v1970_v0 = vld [vmem:[%s2620_s1 + $0x54] ss:$8 sps:$4 sm:$0xff] (!%p138_p2)   ;;  %p161_p3 = scmp.lt.s32.totalorder (!%p138_p2), %s1732_s13, 1  ;;  %v1972_v1 = vld [vmem:[%s2620_s1 + $0x144] ss:$8 sps:$4 sm:$0xff] (!%p138_p2)   ;;  %v2130_v2 = vmov (!%p138_p2), 0  }
   0x6   : > { %141 = sbr.rel (%p138_p2) target bundleno = 354 (0x162), region = 32  ;;  %326 = vmatprep.mubr.bf16.mxu1 (!%p138_p2), %v2130_v2  ;;  %921 = vmatprep.mubr.bf16.mxu0 (!%p138_p2), %v2130_v2  ;;  %v1974_v3 = vld [vmem:[%s2620_s1 + $0x50] ss:$8 sps:$4 sm:$0xff] (!%p138_p2)   ;;  %v1975_v4 = vld [vmem:[%s2620_s1 + $0x140] ss:$8 sps:$4 sm:$0xff] (!%p138_p2)   ;;  %vm284_vm1 = vcmask (!%p138_p2), 654336  }
   0x7   : > { %294 = vmatprep.subr.bf16.mxu1 (!%p138_p2), %v1970_v0  ;;  %889 = vmatprep.subr.bf16.mxu0 (!%p138_p2), %v1972_v1  ;;  %v1976_v5 = vld [vmem:[%s2620_s1 + $0x64] ss:$8 sps:$4 sm:$0xff] (!%p138_p2)   ;;  %v1978_v6 = vld [vmem:[%s2620_s1 + $0x154] ss:$8 sps:$4 sm:$0xff] (!%p138_p2)   ;;  %v1980_v7 = vld [vmem:[%s2620_s1 + $0x60] ss:$8 sps:$4 sm:$0xff] (!%p138_p2)  }
   0x8   : > { %295 = vmatpush1.bf16.msra.mxu1 (!%p138_p2), %v1974_v3  ;;  %890 = vmatpush1.bf16.msra.mxu0 (!%p138_p2), %v1975_v4  ;;  %v1981_v8 = vld [vmem:[%s2620_s1 + $0x150] ss:$8 sps:$4 sm:$0xff] (!%p138_p2)   ;;  %v1982_v9 = vld [vmem:[%s2620_s1 + $0x74] ss:$8 sps:$4 sm:$0xff] (!%p138_p2)   ;;  %v1984_v10 = vld [vmem:[%s2620_s1 + $0x164] ss:$8 sps:$4 sm:$0xff] (!%p138_p2)  }
   0x9   : > { %296 = vmatprep.subr.bf16.mxu1 (!%p138_p2), %v1976_v5  ;;  %891 = vmatprep.subr.bf16.mxu0 (!%p138_p2), %v1978_v6  ;;  %v1986_v11 = vld [vmem:[%s2620_s1 + $0x70] ss:$8 sps:$4 sm:$0xff] (!%p138_p2)   ;;  %v1987_v12 = vld [vmem:[%s2620_s1 + $0x160] ss:$8 sps:$4 sm:$0xff] (!%p138_p2)   ;;  %v1988_v13 = vld [vmem:[%s2620_s1 + $0x84] ss:$8 sps:$4 sm:$0xff] (!%p138_p2)  }
   0xa   : > { %v1990_v14 = vld [vmem:[%s2620_s1 + $0x174] ss:$8 sps:$4 sm:$0xff] (!%p138_p2)   ;;  %v1992_v15 = vld [vmem:[%s2620_s1 + $0x80] ss:$8 sps:$4 sm:$0xff] (!%p138_p2)   ;;  %v1993_v16 = vld [vmem:[%s2620_s1 + $0x170] ss:$8 sps:$4 sm:$0xff] (!%p138_p2)  }
   0xb   : > { %v1994_v17 = vld [vmem:[%s2620_s1 + $0x94] ss:$8 sps:$4 sm:$0xff] (!%p138_p2)   ;;  %v1996_v18 = vld [vmem:[%s2620_s1 + $0x184] ss:$8 sps:$4 sm:$0xff] (!%p138_p2)   ;;  %v1998_v21 = vld [vmem:[%s2620_s1 + $0x90] ss:$8 sps:$4 sm:$0xff] (!%p138_p2)  }
   0xc   : > { %297 = vmatpush1.bf16.msra.mxu1 (!%p138_p2), %v1980_v7  ;;  %892 = vmatpush1.bf16.msra.mxu0 (!%p138_p2), %v1981_v8  ;;  %v1999_v24 = vld [vmem:[%s2620_s1 + $0x180] ss:$8 sps:$4 sm:$0xff] (!%p138_p2)   ;;  %vm210_vm0 = vsmask.f32 (!%p138_p2), 7424  ;;  %v2004_v28 = vld [vmem:[%s2620_s1 + $0x4] ss:$8 sps:$4 sm:$0xff] (!%p138_p2)  }
   0xd   : > { %s2624_s13 = smov (!%p161_p3, %s1732_s13), 1  ;;  %298 = vmatprep.subr.bf16.mxu1 %v1982_v9  ;;  %893 = vmatprep.subr.bf16.mxu0 %v1984_v10  ;;  %v2002_v34 = vld [vmem:[%s2620_s1] ss:$8 sps:$4 sm:$0xff]   ;;  %v2007_v37 = vld [vmem:[%s2620_s1 + $0x190] ss:$8 sps:$4 sm:$0xff]   ;;  %vm490_vm3 = vcmask 1046528  }
   0xe   : > { %s1959_s5 = smul.u32 28, %s2624_s13  ;;  %v2009_v38 = vld [vmem:[%s2620_s1 + $0x194] ss:$8 sps:$4 sm:$0xff]   ;;  %v2010_v47 = vld [vmem:[%s2620_s1 + $0x10] ss:$8 sps:$4 sm:$0xff]   ;;  %vm1151_vm4 = vcmask 1044480  }
   0xf   : > { %v2012_v42 = vld [vmem:[%s2620_s1 + $0x14] ss:$8 sps:$4 sm:$0xff]   ;;  %v2017_v56 = vld [vmem:[%s2620_s1 + $0x1a0] ss:$8 sps:$4 sm:$0xff]   ;;  %v2019_v57 = vld [vmem:[%s2620_s1 + $0x1a4] ss:$8 sps:$4 sm:$0xff]  }
  0x10   : > { %s2209_s20 = scalar_lea.vmem %s2619_s0, %s1959_s5  ;;  %299 = vmatpush1.bf16.msra.mxu1 %v1986_v11  ;;  %894 = vmatpush1.bf16.msra.mxu0 %v1987_v12  ;;  %v2022_v61 = vld [vmem:[%s2620_s1 + $0x24] ss:$8 sps:$4 sm:$0xff]   ;;  %vm657_vm2 = vsmask.f32 4352  ;;  %v2020_v1 = vld [vmem:[%s2620_s1 + $0x20] ss:$8 sps:$4 sm:$0xff]  }
  0x11   : > { %300 = vmatprep.subr.bf16.mxu1 %v1988_v13  ;;  %895 = vmatprep.subr.bf16.mxu0 %v1990_v14  ;;  %v172_v19 = vld [vmem:[%s2209_s20] sm:$0xf]  ;;  %v2225_v20 = vld [vmem:[%s2209_s20 + $0x4] sm:$0xf]  ;;  %v2234_v23 = vld [vmem:[%s2209_s20 + $0x8] sm:$0xff]   ;;  %s1960_s30 = smul.u32 40, %s2624_s13 }
  0x12   : > { %v2231_v22 = vcombine.low %v172_v19, %v2225_v20  ;;  %v219_v27 = vshll.u32 %v2234_v23, 16  ;;  %v626_v29 = vld [vmem:[%s2209_s20] sm:$0x8]  ;;  %v627_v30 = vld [vmem:[%s2209_s20 + $0x4] sm:$0xf]  ;;  %v223_v43 = vshrl.u32 %v2234_v23, 16 }
  0x13   : > { %v628_v31 = vld [vmem:[%s2209_s20 + $0x8] sm:$0xf]  ;;  %v1783_v35 = vcombine.low %v626_v29, %v627_v30  ;;  %v2264_v44 = vld [vmem:[%s2209_s20 + $0x10] ss:$0 sps:$4 sm:$0x33]   ;;  %s2606_s13 = scalar_lea.vmem %s2622_s3, %s1960_s30  ;;  %vm1667_vm5 = vcmask 1041408  }
  0x14   : > { %301 = vmatpush1.bf16.msra.mxu1 %v1992_v15  ;;  %896 = vmatpush1.bf16.msra.mxu0 %v1993_v16  ;;  %v212_v25 = vshrl.u32 %v2231_v22, 16  ;;  %v214_v26 = vshll.u32 %v2231_v22, 16  ;;  %v221_v33 = vrot.slane %v219_v27, 1  ;;  %v2251_v36 = vcombine.low %v627_v30, %v628_v31  ;;  %v629_v48 = vld [vmem:[%s2209_s20 + $0xc] sm:$0xf] }
  0x15   : > { %302 = vmatprep.subr.bf16.mxu1 %v1994_v17  ;;  %897 = vmatprep.subr.bf16.mxu0 %v1996_v18  ;;  %v659_v40 = vshrl.u32 %v1783_v35, 16  ;;  %v662_v41 = vshll.u32 %v1783_v35, 16  ;;  %v630_v49 = vld [vmem:[%s2209_s20 + $0x10] sm:$0xf]  ;;  %v227_v51 = vshll.u32 %v2264_v44, 16  ;;  %v1784_v53 = vcombine.low %v628_v31, %v629_v48 }
  0x16   : > { %v216_v32 = vrot.slane %v214_v26, 1  ;;  %v631_v52 = vld [vmem:[%s2209_s20 + $0x14] sm:$0x1]  ;;  %v225_v54 = vor.u32 %v223_v43, %v221_v33  ;;  %v2288_v0 = vcombine.low %v629_v48, %v630_v49  ;;  %v2023_v5 = vld [vmem:[%s2620_s1 + $0x1b0] ss:$8 sps:$4 sm:$0xff]   ;;  %v972_v11 = vshll.u32 %v2251_v36, 16 }
  0x17   : > { %v661_v46 = vrot.slane %v659_v40, 3  ;;  %v664_v50 = vrot.slane %v662_v41, 4  ;;  %v1785_v55 = vcombine.low %v630_v49, %v631_v52  ;;  %v229_v58 = vrot.slane %v227_v51, 1  ;;  %v2025_v6 = vld [vmem:[%s2620_s1 + $0x1b4] ss:$8 sps:$4 sm:$0xff]  }
  0x18   : > { %303 = vmatpush1.bf16.msra.mxu1 %v1998_v21  ;;  %898 = vmatpush1.bf16.msra.mxu0 %v1999_v24  ;;  %v217_v39 = vor.u32 %v216_v32, %v212_v25  ;;  %v667_v59 = vshrl.u32 %v1784_v53, 16  ;;  %v670_v60 = vshll.u32 %v1784_v53, 16  ;;  %v2028_v8 = vld [vmem:[%s2620_s1 + $0x34] ss:$8 sps:$4 sm:$0xff]   ;;  %v231_v12 = vshrl.u32 %v2264_v44, 16 }
  0x19   : > { %411 = vmatprep.subr.bf16.mxu1 %v2004_v28  ;;  %1049 = vmatprep.subr.bf16.mxu0 %v2009_v38  ;;  %v665_v3 = vor.u32 %v664_v50, %v661_v46  ;;  %v230_v4 = vsel %vm210_vm0, %v225_v54, %v229_v58  ;;  %v676_v7 = vshrl.u32 %v1785_v55, 16  ;;  %v679_v10 = vshll.u32 %v1785_v55, 16  ;;  %v2032_v13 = vld [vmem:[%s2620_s1 + $0x1c4] ss:$8 sps:$4 sm:$0xff]   ;;  %v2026_v17 = vld [vmem:[%s2620_s1 + $0x30] ss:$8 sps:$4 sm:$0xff]  }
  0x1a   : > { %v222_v45 = vsel %vm210_vm0, %v217_v39, %v221_v33  ;;  %v669_v62 = vrot.slane %v667_v59, 3  ;;  %v672_v63 = vrot.slane %v670_v60, 4  ;;  %v2030_v18 = vld [vmem:[%s2620_s1 + $0x1c0] ss:$8 sps:$4 sm:$0xff]   ;;  %v2035_v19 = vld [vmem:[%s2620_s1 + $0x44] ss:$8 sps:$4 sm:$0xff]   ;;  %v233_v27 = vor.u32 %v231_v12, %v229_v58 }
  0x1b   : > { %1752 = vmatmul.mubr.msk.bf16.vlgmr.msra.gmra.mrb[0].mxu1 %vm284_vm1, %v222_v45  ;;  %1812 = vmatmul.mubr.msk.bf16.vlgmr.msra.gmra.mrb[0].mxu0 %vm284_vm1, %v2251_v36  ;;  %v678_v15 = vrot.slane %v676_v7, 3  ;;  %v681_v16 = vrot.slane %v679_v10, 4  ;;  %v2038_v21 = vld [vmem:[%s2620_s1 + $0x1d4] ss:$8 sps:$4 sm:$0xff]   ;;  %v970_v25 = vshrl.u32 %v2251_v36, 16  ;;  %v974_v26 = vrot.slane %v972_v11, 1 }
  0x1c   : > { %412 = vmatpush1.bf16.msra.mxu1 %v2002_v34  ;;  %1050 = vmatpush1.bf16.msra.mxu0 %v2007_v37  ;;  %v673_v9 = vor.u32 %v672_v63, %v669_v62  ;;  %v2332_v28 = vld [vmem:[%s2209_s20 + $0x14] ss:$0 sps:$4 sm:$0x33]   ;;  %v976_v30 = vshll.u32 %v2288_v0, 16  ;;  %v2033_v31 = vld [vmem:[%s2620_s1 + $0x40] ss:$8 sps:$4 sm:$0xff]  }
  0x1d   : > { %413 = vmatprep.subr.bf16.mxu1 %v2012_v42  ;;  %336 = vmatprep.mubr.bf16.mxu1 %v2130_v2  ;;  %v2327_v24 = vor.u32 %v681_v16, %v678_v15  ;;  %v2036_v32 = vld [vmem:[%s2620_s1 + $0x1d0] ss:$8 sps:$4 sm:$0xff]   ;;  %v2041_v33 = vld [vmem:[%s2620_s1 + $0xa4] ss:$8 sps:$4 sm:$0xff]   ;;  %v975_v36 = vor.u32 %v974_v26, %v970_v25  ;;  %v980_v37 = vshrl.u32 %v2288_v0, 16  ;;  %v983_v41 = vshll.u32 %v2332_v28, 16 }
  0x1e   : > { %931 = vmatprep.mubr.bf16.mxu0 %v2130_v2  ;;  %1051 = vmatprep.subr.bf16.mxu0 %v2019_v57  ;;  %v2312_v14 = vsel %vm657_vm2, %v665_v3, %v673_v9  ;;  %v2044_v34 = vld [vmem:[%s2620_s1 + $0x1e4] ss:$8 sps:$4 sm:$0xff]   ;;  %v978_v35 = vrot.slane %v976_v30, 1  ;;  %v2039_v38 = vld [vmem:[%s2620_s1 + $0xa0] ss:$8 sps:$4 sm:$0xff]   ;;  %v987_v58 = vshrl.u32 %v2332_v28, 16 }
  0x1f   : > { %v2336_v29 = vsel %vm657_vm2, %v673_v9, %v2327_v24  ;;  %v2042_v40 = vld [vmem:[%s2620_s1 + $0x1e0] ss:$8 sps:$4 sm:$0xff]   ;;  %v2047_v42 = vld [vmem:[%s2620_s1 + $0xb4] ss:$8 sps:$4 sm:$0xff]   ;;  %v2045_v45 = vld [vmem:[%s2620_s1 + $0xb0] ss:$8 sps:$4 sm:$0xff]  }
  0x20   : > { %414 = vmatpush1.bf16.msra.mxu1 %v2010_v47  ;;  %1052 = vmatpush1.bf16.msra.mxu0 %v2017_v56  ;;  %v979_v39 = vsel %vm210_vm0, %v975_v36, %v978_v35  ;;  %v2050_v43 = vld [vmem:[%s2620_s1 + $0x1f4] ss:$8 sps:$4 sm:$0xff]   ;;  %v982_v46 = vor.u32 %v980_v37, %v978_v35  ;;  %v985_v47 = vrot.slane %v983_v41, 1  ;;  %v2048_v48 = vld [vmem:[%s2620_s1 + $0x1f0] ss:$8 sps:$4 sm:$0xff]   ;;  %v492_v10 = vrot.slane %v2234_v23, 1 }
  0x21   : > { %415 = vmatprep.subr.bf16.mxu1 %v2022_v61  ;;  %1053 = vmatprep.subr.bf16.mxu0 %v2025_v6  ;;  %v2056_v49 = vld [vmem:[%s2620_s1 + $0x204] ss:$8 sps:$4 sm:$0xff]   ;;  %v2051_v51 = vld [vmem:[%s2620_s1 + $0xc0] ss:$8 sps:$4 sm:$0xff]   ;;  %v2059_v53 = vld [vmem:[%s2620_s1 + $0xd4] ss:$8 sps:$4 sm:$0xff]  }
  0x22   : > { %v986_v50 = vsel %vm210_vm0, %v982_v46, %v985_v47  ;;  %v2054_v52 = vld [vmem:[%s2620_s1 + $0x200] ss:$8 sps:$4 sm:$0xff]   ;;  %v2057_v54 = vld [vmem:[%s2620_s1 + $0xd0] ss:$8 sps:$4 sm:$0xff]   ;;  %v2062_v56 = vld [vmem:[%s2620_s1 + $0x214] ss:$8 sps:$4 sm:$0xff]  }
  0x23   : > { %1753 = vmatmul.mubr.msk.bf16.gmra.mrb[4].mxu1 %vm284_vm1, %v230_v4  ;;  %1813 = vmatmul.mubr.msk.bf16.gmra.mrb[4].mxu0 %vm284_vm1, %v2288_v0  ;;  %v2060_v55 = vld [vmem:[%s2620_s1 + $0x210] ss:$8 sps:$4 sm:$0xff]   ;;  %v472_v57 = vld [vmem:[%s2209_s20] sm:$0xe]  ;;  %v2065_v59 = vld [vmem:[%s2620_s1 + $0xe4] ss:$8 sps:$4 sm:$0xff]  }
  0x24   : > { %416 = vmatpush1.bf16.msra.mxu1 %v2020_v1  ;;  %1054 = vmatpush1.bf16.msra.mxu0 %v2023_v5  ;;  %v2068_v60 = vld [vmem:[%s2620_s1 + $0x224] ss:$8 sps:$4 sm:$0xff]   ;;  %v2420_v62 = vld [vmem:[%s2209_s20 + $0x8] sm:$0xf]  ;;  %v2427_v0 = vld [vmem:[%s2209_s20 + $0x10] sm:$0xf]  ;;  %v989_v1 = vor.u32 %v987_v58, %v985_v47  ;;  %v1768_v4 = vcombine.low %v472_v57, %v2225_v20 }
  0x25   : > { %346 = vmatprep.mubr.bf16.mxu1 %v2130_v2  ;;  %417 = vmatprep.subr.bf16.mxu1 %v2028_v8  ;;  %v1120_v61 = vld [vmem:[%s2209_s20 + $0x4] sm:$0x8]  ;;  %v2423_v63 = vld [vmem:[%s2209_s20 + $0xc] sm:$0xf]  ;;  %v2063_v3 = vld [vmem:[%s2620_s1 + $0xe0] ss:$8 sps:$4 sm:$0xff]  }
  0x26   : > { %941 = vmatprep.mubr.bf16.mxu0 %v2130_v2  ;;  %1055 = vmatprep.subr.bf16.mxu0 %v2032_v13  ;;  %v2066_v5 = vld [vmem:[%s2620_s1 + $0x220] ss:$8 sps:$4 sm:$0xff]   ;;  %v2438_v6 = vcombine.low %v1120_v61, %v2420_v62  ;;  %v2442_v7 = vcombine.low %v2423_v63, %v2427_v0  ;;  %v2072_v20 = vld [vmem:[%s2620_s1 + $0xf4] ss:$8 sps:$4 sm:$0xff]   ;;  %v491_v9 = vrot.slane %v1768_v4, 1  ;;  %vm1670_vm7 = vcmask 1045508  }
  0x27   : > { %v2077_v8 = vld [vmem:[%s2620_s1 + $0x234] ss:$8 sps:$4 sm:$0xff]   ;;  %v2075_v15 = vld [vmem:[%s2620_s1 + $0x230] ss:$8 sps:$4 sm:$0xff]   ;;  %v2086_v25 = vld [vmem:[%s2620_s1 + $0x244] ss:$8 sps:$4 sm:$0xff]  }
  0x28   : > { %418 = vmatpush1.bf16.msra.mxu1 %v2026_v17  ;;  %1056 = vmatpush1.bf16.msra.mxu0 %v2030_v18  ;;  %v1152_v11 = vrot.slane %v2438_v6, 3  ;;  %v1153_v12 = vrot.slane %v2442_v7, 3  ;;  %v2457_v13 = vld [vmem:[%s2209_s20 + $0x14] sm:$0xf]  ;;  %v493_v16 = vsel %vm490_vm3, %v491_v9, %v492_v10  ;;  %v2078_v26 = vld [vmem:[%s2620_s1 + $0x100] ss:$8 sps:$4 sm:$0xff]  }
  0x29   : > { %419 = vmatprep.subr.bf16.mxu1 %v2035_v19  ;;  %1057 = vmatprep.subr.bf16.mxu0 %v2038_v21  ;;  %v2081_v18 = vld [vmem:[%s2209_s20 + $0x10] ss:$0 sps:$4 sm:$0x77]   ;;  %v2080_v21 = vld [vmem:[%s2620_s1 + $0x104] ss:$8 sps:$4 sm:$0xff]   ;;  %v1858_v9 = vcombine.low %v2427_v0, %v2457_v13 }
  0x2a   : > { %v1154_v17 = vsel %vm1151_vm4, %v1152_v11, %v1153_v12  ;;  %v2084_v30 = vld [vmem:[%s2620_s1 + $0x240] ss:$8 sps:$4 sm:$0xff]   ;;  %v2087_v35 = vld [vmem:[%s2620_s1 + $0x110] ss:$8 sps:$4 sm:$0xff]   ;;  %v2095_v37 = vld [vmem:[%s2620_s1 + $0x124] ss:$8 sps:$4 sm:$0xff]  }
  0x2b   : > { %1754 = vmatmul.mubr.msk.bf16.gmra.mrb[8].mxu1 %vm284_vm1, %v233_v27  ;;  %1814 = vmatmul.mubr.msk.bf16.gmra.mrb[8].mxu0 %vm284_vm1, %v2332_v28  ;;  %v494_v27 = vrot.slane %v2081_v18, 1  ;;  %v2090_v36 = vld [vmem:[%s2620_s1 + $0x250] ss:$8 sps:$4 sm:$0xff]   ;;  %v2093_v41 = vld [vmem:[%s2620_s1 + $0x120] ss:$8 sps:$4 sm:$0xff]  }
  0x2c   : > { %420 = vmatpush1.bf16.msra.mxu1 %v2033_v31  ;;  %1058 = vmatpush1.bf16.msra.mxu0 %v2036_v32  ;;  %v2089_v31 = vld [vmem:[%s2620_s1 + $0x114] ss:$8 sps:$4 sm:$0xff]   ;;  %vm1668_vm6 = vsmask.f32 1280  ;;  %vm1671_vm8 = vsmask.f32 5376 }
  0x2d   : > { %443 = vmatprep.mubr.bf16.mxu1 %v2130_v2  ;;  %1081 = vmatprep.mubr.bf16.mxu0 %v2130_v2  ;;  %v2092_v32 = vld [vmem:[%s2620_s1 + $0x254] ss:$8 sps:$4 sm:$0xff]   ;;  %vm1669_vm9 = vmand %vm1667_vm5, %vm1668_vm6 }
  0x2e   : > { %555 = vmatprep.subr.bf16.mxu1 %v2041_v33  ;;  %1216 = vmatprep.subr.bf16.mxu0 %v2044_v34  ;;  %v495_v33 = vsel %vm490_vm3, %v492_v10, %v494_v27  ;;  %v2101_v46 = vld [vmem:[%s2620_s1 + $0x134] ss:$8 sps:$4 sm:$0xff]   ;;  %v1857_v10 = vcombine.low %v2420_v62, %v2423_v63  ;;  %vm1672_vm10 = vmand %vm1670_vm7, %vm1671_vm8 }
  0x2f   : > { %v2104_v47 = vld [vmem:[%s2620_s1 + $0x274] ss:$8 sps:$4 sm:$0xff]   ;;  %vm1673_vm11 = vmor %vm1672_vm10, %vm1669_vm9 }
  0x33   : > { %1765 = vmatmul.mubr.msk.bf16.vlgmr.msra.gmra.mrb[0].mxu1 %vm284_vm1, %v2231_v22  ;;  %1825 = vmatmul.mubr.msk.bf16.vlgmr.msra.gmra.mrb[0].mxu0 %vm284_vm1, %v979_v39  ;;  %v2053_v22 = vld [vmem:[%s2620_s1 + $0xc4] ss:$8 sps:$4 sm:$0xff]   ;;  %v1298_v39 = vshrl.u32 %v2438_v6, 16 }
  0x34   : > { %556 = vmatpush1.bf16.msra.mxu1 %v2039_v38  ;;  %1217 = vmatpush1.bf16.msra.mxu0 %v2042_v40  ;;  %v2098_v38 = vld [vmem:[%s2620_s1 + $0x264] ss:$8 sps:$4 sm:$0xff]   ;;  %v1301_v40 = vshll.u32 %v2438_v6, 16  ;;  %v2111_v6 = vld [vmem:[%s2620_s1 + $0x2a0] ss:$8 sps:$4 sm:$0xff]  }
  0x35   : > { %557 = vmatprep.subr.bf16.mxu1 %v2047_v42  ;;  %453 = vmatprep.mubr.bf16.mxu1 %v2130_v2  ;;  %v2096_v42 = vld [vmem:[%s2620_s1 + $0x260] ss:$8 sps:$4 sm:$0xff]  }
  0x36   : > { %1091 = vmatprep.mubr.bf16.mxu0 %v2130_v2  ;;  %1218 = vmatprep.subr.bf16.mxu0 %v2050_v43  ;;  %v1306_v43 = vshrl.u32 %v2442_v7, 16 }
  0x38   : > { %558 = vmatpush1.bf16.msra.mxu1 %v2045_v45  ;;  %1219 = vmatpush1.bf16.msra.mxu0 %v2048_v48  ;;  %v1309_v45 = vshll.u32 %v2442_v7, 16  ;;  %v1300_v48 = vrot.slane %v1298_v39, 3  ;;  %v2116_v7 = vld [vmem:[%s2620_s1 + $0x2b4] ss:$8 sps:$4 sm:$0xff]  }
  0x39   : > { %559 = vmatprep.subr.bf16.mxu1 %v2053_v22  ;;  %1220 = vmatprep.subr.bf16.mxu0 %v2056_v49  ;;  %v1303_v22 = vrot.slane %v1301_v40, 4  ;;  %v2099_v49 = vld [vmem:[%s2620_s1 + $0x130] ss:$8 sps:$4 sm:$0xff]  }
  0x3b   : > { %1766 = vmatmul.mubr.msk.bf16.gmra.mrb[4].mxu1 %vm284_vm1, %v2234_v23  ;;  %1826 = vmatmul.mubr.msk.bf16.gmra.mrb[4].mxu0 %vm284_vm1, %v986_v50  ;;  %v2070_v23 = vld [vmem:[%s2620_s1 + $0xf0] ss:$8 sps:$4 sm:$0xff]  }
  0x3c   : > { %560 = vmatpush1.bf16.msra.mxu1 %v2051_v51  ;;  %1221 = vmatpush1.bf16.msra.mxu0 %v2054_v52  ;;  %v2102_v50 = vld [vmem:[%s2620_s1 + $0x270] ss:$8 sps:$4 sm:$0xff]   ;;  %v1308_v51 = vrot.slane %v1306_v43, 3  ;;  %v1311_v52 = vrot.slane %v1309_v45, 4 }
  0x3d   : > { %463 = vmatprep.mubr.bf16.mxu1 %v2130_v2  ;;  %561 = vmatprep.subr.bf16.mxu1 %v2059_v53  ;;  %v2107_v53 = vld [vmem:[%s2620_s1 + $0x284] ss:$8 sps:$4 sm:$0xff]  }
  0x3e   : > { %1101 = vmatprep.mubr.bf16.mxu0 %v2130_v2  ;;  %1222 = vmatprep.subr.bf16.mxu0 %v2062_v56 }
  0x40   : > { %562 = vmatpush1.bf16.msra.mxu1 %v2057_v54  ;;  %1223 = vmatpush1.bf16.msra.mxu0 %v2060_v55  ;;  %v1304_v54 = vor.u32 %v1303_v22, %v1300_v48  ;;  %v1312_v55 = vor.u32 %v1311_v52, %v1308_v51 }
  0x41   : > { %563 = vmatprep.subr.bf16.mxu1 %v2065_v59  ;;  %1224 = vmatprep.subr.bf16.mxu0 %v2068_v60  ;;  %v2105_v59 = vld [vmem:[%s2620_s1 + $0x280] ss:$8 sps:$4 sm:$0xff]  }
  0x42   : > { %v1313_v58 = vsel %vm657_vm2, %v1304_v54, %v1312_v55  ;;  %v1601_v54 = vlaneseq }
  0x43   : > { %1767 = vmatmul.mubr.msk.bf16.gmra.mrb[12].mxu1 %vm284_vm1, %v2264_v44  ;;  %1827 = vmatmul.mubr.msk.bf16.gmra.mrb[12].mxu0 %vm284_vm1, %v989_v1  ;;  %v1125_v44 = vld [vmem:[%s2209_s20 + $0x18] sm:$0x1]  ;;  %v2110_v1 = vld [vmem:[%s2620_s1 + $0x294] ss:$8 sps:$4 sm:$0xff]  }
  0x44   : > { %564 = vmatpush1.bf16.msra.mxu1 %v2063_v3  ;;  %1225 = vmatpush1.bf16.msra.mxu0 %v2066_v5  ;;  %v2472_v19 = vcombine.low %v2457_v13, %v1125_v44  ;;  %v2108_v3 = vld [vmem:[%s2620_s1 + $0x290] ss:$8 sps:$4 sm:$0xff]   ;;  %v2113_v5 = vld [vmem:[%s2620_s1 + $0x2a4] ss:$8 sps:$4 sm:$0xff]  }
  0x45   : > { %587 = vmatprep.mubr.bf16.mxu1 %v2130_v2  ;;  %1248 = vmatprep.mubr.bf16.mxu0 %v2130_v2 }
  0x46   : > { %743 = vmatprep.subr.bf16.mxu1 %v2072_v20  ;;  %1382 = vmatprep.subr.bf16.mxu0 %v2077_v8  ;;  %v1155_v28 = vrot.slane %v2472_v19, 3  ;;  %v1315_v56 = vshrl.u32 %v2472_v19, 16  ;;  %v1318_v57 = vshll.u32 %v2472_v19, 16  ;;  %v2114_v20 = vld [vmem:[%s2620_s1 + $0x2b0] ss:$8 sps:$4 sm:$0xff]  }
  0x47   : > { %v2119_v8 = vld [vmem:[%s2620_s1 + $0x2c4] ss:$8 sps:$4 sm:$0xff]  }
  0x48   : > { %v1156_v34 = vsel %vm1151_vm4, %v1153_v12, %v1155_v28  ;;  %v1317_v60 = vrot.slane %v1315_v56, 3  ;;  %v1320_v61 = vrot.slane %v1318_v57, 4  ;;  %v1602_v56 = vshrl.u32 %v1601_v54, 7 }
  0x4a   : > { %v1321_v4 = vor.u32 %v1320_v61, %v1317_v60 }
  0x4b   : > { %1780 = vmatmul.mubr.msk.bf16.vlgmr.msra.gmra.mrb[0].mxu1 %vm284_vm1, %v493_v16  ;;  %1841 = vmatmul.mubr.msk.bf16.vlgmr.msra.gmra.mrb[0].mxu0 %vm284_vm1, %v1154_v17 }
  0x4c   : > { %744 = vmatpush1.bf16.msra.mxu1 %v2070_v23  ;;  %1383 = vmatpush1.bf16.msra.mxu0 %v2075_v15 }
  0x4d   : > { %745 = vmatprep.subr.bf16.mxu1 %v2080_v21  ;;  %597 = vmatprep.mubr.bf16.mxu1 %v2130_v2 }
  0x4e   : > { %1258 = vmatprep.mubr.bf16.mxu0 %v2130_v2  ;;  %1384 = vmatprep.subr.bf16.mxu0 %v2086_v25 }
  0x50   : > { %746 = vmatpush1.bf16.msra.mxu1 %v2078_v26  ;;  %1385 = vmatpush1.bf16.msra.mxu0 %v2084_v30 }
  0x51   : > { %747 = vmatprep.subr.bf16.mxu1 %v2089_v31  ;;  %1386 = vmatprep.subr.bf16.mxu0 %v2092_v32 }
  0x53   : > { %1781 = vmatmul.mubr.msk.bf16.gmra.mrb[4].mxu1 %vm284_vm1, %v495_v33  ;;  %1842 = vmatmul.mubr.msk.bf16.gmra.mrb[4].mxu0 %vm284_vm1, %v1156_v34 }
  0x54   : > { %748 = vmatpush1.bf16.msra.mxu1 %v2087_v35  ;;  %1387 = vmatpush1.bf16.msra.mxu0 %v2090_v36 }
  0x55   : > { %607 = vmatprep.mubr.bf16.mxu1 %v2130_v2  ;;  %749 = vmatprep.subr.bf16.mxu1 %v2095_v37 }
  0x56   : > { %1268 = vmatprep.mubr.bf16.mxu0 %v2130_v2  ;;  %1388 = vmatprep.subr.bf16.mxu0 %v2098_v38 }
  0x58   : > { %750 = vmatpush1.bf16.msra.mxu1 %v2093_v41  ;;  %1389 = vmatpush1.bf16.msra.mxu0 %v2096_v42 }
  0x59   : > { %751 = vmatprep.subr.bf16.mxu1 %v2101_v46  ;;  %1390 = vmatprep.subr.bf16.mxu0 %v2104_v47 }
  0x5b   : > { %1782 = vmatmul.mubr.msk.bf16.gmra.mrb[16].mxu1 %vm284_vm1, %v494_v27  ;;  %1843 = vmatmul.mubr.msk.bf16.gmra.mrb[16].mxu0 %vm284_vm1, %v1155_v28 }
  0x5c   : > { %752 = vmatpush1.bf16.msra.mxu1 %v2099_v49  ;;  %1391 = vmatpush1.bf16.msra.mxu0 %v2102_v50 }
  0x5d   : > { %775 = vmatprep.mubr.bf16.mxu1 %v2130_v2  ;;  %1414 = vmatprep.mubr.bf16.mxu0 %v2130_v2 }
  0x5e   : > { %1885 = vmatprep.subr.bf16.mxu1 %v2107_v53  ;;  %1528 = vmatprep.subr.bf16.mxu0 %v2107_v53 }
  0x63   : > { %1796 = vmatmul.mubr.msk.bf16.vlgmr.msra.gmra.mrb[0].mxu1 %vm284_vm1, %v2312_v14  ;;  %1854 = vmatmul.mubr.msk.bf16.vlgmr.msra.gmra.mrb[0].mxu0 %vm284_vm1, %v1313_v58  ;;  %v1322_v14 = vsel %vm657_vm2, %v1312_v55, %v1321_v4 }
  0x64   : > { %1890 = vmatpush1.bf16.msra.mxu1 %v2105_v59  ;;  %1529 = vmatpush1.bf16.msra.mxu0 %v2105_v59 }
  0x65   : > { %1886 = vmatprep.subr.bf16.mxu1 %v2110_v1  ;;  %785 = vmatprep.mubr.bf16.mxu1 %v2130_v2 }
  0x66   : > { %1424 = vmatprep.mubr.bf16.mxu0 %v2130_v2  ;;  %1530 = vmatprep.subr.bf16.mxu0 %v2110_v1 }
  0x68   : > { %1891 = vmatpush1.bf16.msra.mxu1 %v2108_v3  ;;  %1531 = vmatpush1.bf16.msra.mxu0 %v2108_v3 }
  0x69   : > { %1887 = vmatprep.subr.bf16.mxu1 %v2113_v5  ;;  %1532 = vmatprep.subr.bf16.mxu0 %v2113_v5 }
  0x6b   : > { %1797 = vmatmul.mubr.msk.bf16.gmra.mrb[4].mxu1 %vm284_vm1, %v2336_v29  ;;  %1855 = vmatmul.mubr.msk.bf16.gmra.mrb[4].mxu0 %vm284_vm1, %v1322_v14  ;;  %v2117_v29 = vld [vmem:[%s2620_s1 + $0x2c0] ss:$8 sps:$4 sm:$0xff]  }
  0x6c   : > { %1892 = vmatpush1.bf16.msra.mxu1 %v2111_v6  ;;  %1533 = vmatpush1.bf16.msra.mxu0 %v2111_v6 }
  0x6d   : > { %795 = vmatprep.mubr.bf16.mxu1 %v2130_v2  ;;  %1434 = vmatprep.mubr.bf16.mxu0 %v2130_v2 }
  0x6e   : > { %1888 = vmatprep.subr.bf16.mxu1 %v2116_v7  ;;  %1534 = vmatprep.subr.bf16.mxu0 %v2116_v7  ;;  %v1603_v7 = vsub.s32 0, %v1602_v56 }
  0x70   : > { %1893 = vmatpush1.bf16.msra.mxu1 %v2114_v20  ;;  %1535 = vmatpush1.bf16.msra.mxu0 %v2114_v20 }
  0x71   : > { %1536 = vmatprep.subr.bf16.mxu0 %v2119_v8  ;;  %1889 = vmatprep.subr.bf16.mxu1 %v2119_v8  ;;  %v1599_v8 = vld [vmem:[%s2621_s2] sm:$0x3] }
  0x73   : > { %1798 = vmatmul.mubr.msk.bf16.gmra.mrb[20].mxu1 %vm284_vm1, %v2327_v24  ;;  %1856 = vmatmul.mubr.msk.bf16.gmra.mrb[20].mxu0 %vm284_vm1, %v1321_v4  ;;  %v2121_v24 = vld [vmem:[%s2209_s20 + $0x18] ss:$0 sps:$4 sm:$0x33]  }
  0x74   : > { %1537 = vmatpush1.bf16.msra.mxu0 %v2117_v29  ;;  %1894 = vmatpush1.bf16.msra.mxu1 %v2117_v29  ;;  %v1607_v29 = vsub.s32 1, %v1602_v56 }
  0x75   : > { %1560 = vmatprep.mubr.bf16.mxu0 %v2130_v2  ;;  %1570 = vmatprep.mubr.bf16.mxu1 %v2130_v2 }
  0x7b   : > { %1870 = vmatmul.mubr.msk.bf16.vlgmr.msra.gmra.mrb[0].mxu0 %vm284_vm1, %v1857_v10  ;;  %1871 = vmatmul.mubr.msk.bf16.vlgmr.msra.gmra.mrb[24].mxu1 %vm284_vm1, %v1858_v9 }
  0x7c   : > { %1580 = vmatprep.mubr.bf16.mxu1 %v2130_v2 }
  0x83   : > { %1872 = vmatmul.mubr.msk.bf16.gmra.mrb[28].mxu1 %vm284_vm1, %v2121_v24 }
  0xfe   : > { %v348_v11 = vpop.f32.mrb[8].mxu1  ;;  %v943_v12 = vpop.f32.mrb[8].mxu0 }
  0xff   : > { %v350_v44 = vpop.f32.mrb[9].mxu1  ;;  %v945_v23 = vpop.f32.mrb[9].mxu0 }
 0x100   : > { %v352_v15 = vpop.f32.mrb[10].mxu1  ;;  %v947_v16 = vpop.f32.mrb[10].mxu0 }
 0x101   : > { %v353_v17 = vpop.f32.mrb[11].mxu1  ;;  %v948_v0 = vpop.f32.mrb[11].mxu0 }
 0x102   : > { %v1608_v17 = vrot.slane %v1599_v8, %v1607_v29 }
 0x116   : > { %v465_v13 = vpop.f32.mrb[12].mxu1  ;;  %v1103_v18 = vpop.f32.mrb[12].mxu0 }
 0x117   : > { %v466_v62 = vadd.f32 %v465_v13, %v348_v11  ;;  %v467_v63 = vpop.f32.mrb[13].mxu1  ;;  %v1105_v19 = vpop.f32.mrb[13].mxu0  ;;  %v1604_v11 = vrot.slane %v1599_v8, %v1603_v7 }
 0x118   : > { %v468_v21 = vadd.f32 %v467_v63, %v350_v44  ;;  %v469_v25 = vpop.f32.mrb[14].mxu1  ;;  %v1107_v26 = vpop.f32.mrb[14].mxu0 }
 0x119   : > { %v470_v2 = vpop.f32.mrb[15].mxu1  ;;  %v1108_v27 = vpop.f32.mrb[15].mxu0 }
 0x12e   : > { %v609_v28 = vpop.f32.mrb[16].mxu1  ;;  %v1270_v30 = vpop.f32.mrb[16].mxu0 }
 0x12f   : > { %v624_v31 = vadd.f32 %v609_v28, %v466_v62  ;;  %v611_v32 = vpop.f32.mrb[17].mxu1  ;;  %v1272_v33 = vpop.f32.mrb[17].mxu0 }
 0x130   : > { %v625_v34 = vadd.f32 %v611_v32, %v468_v21  ;;  %v613_v35 = vpop.f32.mrb[18].mxu1  ;;  %v1274_v36 = vpop.f32.mrb[18].mxu0 }
 0x131   : > { %v614_v37 = vpop.f32.mrb[19].mxu1  ;;  %v1275_v38 = vpop.f32.mrb[19].mxu0 }
 0x136   : > { %v777_v39 = vpop.f32.mrb[0].mxu1 }
 0x137   : > { %v779_v40 = vpop.f32.mrb[1].mxu1 }
 0x138   : > { %v781_v41 = vpop.f32.mrb[2].mxu1 }
 0x139   : > { %v783_v42 = vpop.f32.mrb[3].mxu1 }
 0x13e   : > { %v787_v43 = vpop.f32.mrb[4].mxu1  ;;  %v1426_v45 = vpop.f32.mrb[4].mxu0 }
 0x13f   : > { %v1899_v46 = vadd.f32 %v1426_v45, %v787_v43  ;;  %v789_v47 = vpop.f32.mrb[5].mxu1  ;;  %v1428_v48 = vpop.f32.mrb[5].mxu0 }
 0x140   : > { %v1901_v22 = vadd.f32 %v1428_v48, %v789_v47  ;;  %v791_v49 = vpop.f32.mrb[6].mxu1  ;;  %v1430_v50 = vpop.f32.mrb[6].mxu0 }
 0x141   : > { %v1903_v51 = vadd.f32 %v1430_v50, %v791_v49  ;;  %v793_v52 = vpop.f32.mrb[7].mxu1  ;;  %v1432_v53 = vpop.f32.mrb[7].mxu0 }
 0x142   : > { %v1905_v55 = vadd.f32 %v1432_v53, %v793_v52 }
 0x146   : > { %v797_v57 = vpop.f32.mrb[20].mxu1  ;;  %v1436_v58 = vpop.f32.mrb[20].mxu0 }
 0x147   : > { %v812_v59 = vadd.f32 %v797_v57, %v624_v31  ;;  %v799_v60 = vpop.f32.mrb[21].mxu1  ;;  %v1438_v61 = vpop.f32.mrb[21].mxu0 }
 0x148   : > { %v813_v1 = vadd.f32 %v799_v60, %v625_v34  ;;  %v801_v3 = vpop.f32.mrb[22].mxu1  ;;  %v1440_v4 = vpop.f32.mrb[22].mxu0 }
 0x149   : > { %v958_v5 = vadd.f32 %v943_v12, %v812_v59  ;;  %v802_v14 = vpop.f32.mrb[23].mxu1  ;;  %v1441_v6 = vpop.f32.mrb[23].mxu0 }
 0x14a   : > { %v959_v20 = vadd.f32 %v945_v23, %v813_v1  ;;  %v1674_v1 = vld [vmem:[%s2606_s13 + $0x20] sm:$0x33] }
 0x14b   : > { %v1118_v9 = vadd.f32 %v1103_v18, %v958_v5 }
 0x14c   : > { %v1119_v10 = vadd.f32 %v1105_v19, %v959_v20 }
 0x14d   : > { %v1285_v24 = vadd.f32 %v1270_v30, %v1118_v9 }
 0x14e   : > { %v1286_v44 = vadd.f32 %v1272_v33, %v1119_v10  ;;  %v1562_v15 = vpop.f32.mrb[0].mxu0  ;;  %v1572_v16 = vpop.f32.mrb[24].mxu1 }
 0x14f   : > { %v1451_v0 = vadd.f32 %v1436_v58, %v1285_v24  ;;  %v1895_v12 = vadd.f32 %v1562_v15, %v777_v39  ;;  %v1900_v13 = vadd.f32 %v1899_v46, %v1572_v16  ;;  %v1564_v62 = vpop.f32.mrb[1].mxu0  ;;  %v1574_v63 = vpop.f32.mrb[25].mxu1 }
 0x150   : > { %v1452_v23 = vadd.f32 %v1438_v61, %v1286_v44  ;;  %v1896_v21 = vadd.f32 %v1564_v62, %v779_v40  ;;  %v1902_v25 = vadd.f32 %v1901_v22, %v1574_v63  ;;  %v1566_v26 = vpop.f32.mrb[2].mxu0  ;;  %v1576_v2 = vpop.f32.mrb[26].mxu1 }
 0x151   : > { %v1611_v27 = vadd.f32 %v1895_v12, %v1604_v11  ;;  %v1615_v18 = vadd.f32 %v1900_v13, %v1604_v11  ;;  %v1897_v19 = vadd.f32 %v1566_v26, %v781_v41  ;;  %v1904_v28 = vadd.f32 %v1903_v51, %v1576_v2  ;;  %v1568_v30 = vpop.f32.mrb[3].mxu0  ;;  %v1578_v31 = vpop.f32.mrb[27].mxu1 }
 0x152   : > { %v1612_v32 = vadd.f32 %v1896_v21, %v1608_v17  ;;  %v1616_v33 = vadd.f32 %v1902_v25, %v1608_v17  ;;  %v1898_v34 = vadd.f32 %v1568_v30, %v783_v42  ;;  %v1906_v35 = vadd.f32 %v1905_v55, %v1578_v31 }
 0x153   : > { %v1621_v36 = vmax.f32 %v1611_v27, 0.0  ;;  %v1625_v37 = vmax.f32 %v1615_v18, 0.0  ;;  %v1613_v38 = vadd.f32 %v1897_v19, %v1604_v11  ;;  %v1617_v39 = vadd.f32 %v1904_v28, %v1604_v11 }
 0x154   : > { %v1622_v43 = vmax.f32 %v1612_v32, 0.0  ;;  %v1626_v40 = vmax.f32 %v1616_v33, 0.0  ;;  %v1614_v45 = vadd.f32 %v1898_v34, %v1608_v17  ;;  %v1618_v46 = vadd.f32 %v1906_v35, %v1608_v17 }
 0x155   : > { %v1623_v41 = vmax.f32 %v1613_v38, 0.0  ;;  %v1627_v47 = vmax.f32 %v1617_v39, 0.0 }
 0x156   : > { %v1880_v42 = vpack.c.bf16 %v1622_v43, %v1621_v36  ;;  %v1882_v48 = vpack.c.bf16 %v1626_v40, %v1625_v37  ;;  %v1624_v22 = vmax.f32 %v1614_v45, 0.0  ;;  %v1628_v49 = vmax.f32 %v1618_v46, 0.0  ;;  %v1582_v50 = vpop.f32.mrb[28].mxu1 }
 0x157   : > { %v1597_v51 = vadd.f32 %v1582_v50, %v1451_v0  ;;  %v1584_v52 = vpop.f32.mrb[29].mxu1 }
 0x158   : > { %1663 = vst [vmem:[%s2606_s13] sm:$0xff] %v1880_v42  ;;  %1665 = vst [vmem:[%s2606_s13 + $0x10] sm:$0xff] %v1882_v48  ;;  %v1881_v53 = vpack.c.bf16 %v1624_v22, %v1623_v41  ;;  %v1883_v54 = vpack.c.bf16 %v1628_v49, %v1627_v47  ;;  %v1598_v55 = vadd.f32 %v1584_v52, %v1452_v23  ;;  %v1586_v56 = vpop.f32.mrb[30].mxu1 }
 0x159   : > { %v1619_v57 = vadd.f32 %v1604_v11, %v1597_v51  ;;  %v1587_v58 = vpop.f32.mrb[31].mxu1 }
 0x15a   : > { %1664 = vst [vmem:[%s2606_s13 + $0x8] sm:$0xff] %v1881_v53  ;;  %1666 = vst [vmem:[%s2606_s13 + $0x18] sm:$0xff] %v1883_v54  ;;  %v1620_v59 = vadd.f32 %v1608_v17, %v1598_v55 }
 0x15b   : > { %v1629_v60 = vmax.f32 %v1619_v57, 0.0 }
 0x15c   : > { %v1630_v61 = vmax.f32 %v1620_v59, 0.0 }
 0x15e   : > { %v1884_v3 = vpack.c.bf16 %v1630_v61, %v1629_v60 }
 0x160   : > { %v1675_v4 = vsel %vm1673_vm11, %v1884_v3, %v1674_v1 }
 0x161   : > { %1676 = vst [vmem:[%s2606_s13 + $0x20] sm:$0x33] %v1675_v4 }
 0x162 PF: > { %s13_s12 = sadd.s32 1, %s2128_s12  }
 0x163   : > { %p10_p4 = scmp.ge.s32.totalorder %s13_s12, 4  }
 0x165   :  { %12 = sbr.rel (!%p10_p4) target bundleno = 1 (0x1), region = 62 }

// kernel: inception_encoder_forward.29
= control target key start
LH: loop header
LB: loop body
LE: loop exit
PB: predicated region body
PF: predicated region fallthrough
CT: control target
= control target key end

     0   :  { %vm178_vm0 = vcmask 523264   ;;  %v42_v27 = vlaneseq  ;;  %s406_s1 = inlined_call_operand.vmem [shape: bf16[192,256], index: 1, kind: input, shape index: {}]   ;;  %s407_s0 = inlined_call_operand.vmem [shape: bf16[8,192], index: 0, kind: input, shape index: {}]   ;;  %s408_s2 = inlined_call_operand.vmem [shape: f32[1,256], index: 2, kind: input, shape index: {}]   ;;  %s409_s3 = inlined_call_operand.vmem [shape: bf16[8,256], index: 3, kind: output, shape index: {}]  }
   0x1   :  { %v267_v0 = vld [vmem:[%s406_s1 + $0x4] ss:$8 sps:$4 sm:$0xff]   ;;  %v269_v1 = vld [vmem:[%s406_s1] ss:$8 sps:$4 sm:$0xff]   ;;  %v270_v2 = vld [vmem:[%s406_s1 + $0x14] ss:$8 sps:$4 sm:$0xff]  }
   0x2   :  { %182 = vmatprep.subr.bf16.mxu0 %v267_v0  ;;  %v272_v3 = vld [vmem:[%s406_s1 + $0x10] ss:$8 sps:$4 sm:$0xff]   ;;  %v273_v4 = vld [vmem:[%s406_s1 + $0x24] ss:$8 sps:$4 sm:$0xff]   ;;  %v275_v5 = vld [vmem:[%s406_s1 + $0x20] ss:$8 sps:$4 sm:$0xff]  }
   0x3   :  { %183 = vmatpush1.bf16.msra.mxu0 %v269_v1  ;;  %v276_v6 = vld [vmem:[%s406_s1 + $0x34] ss:$8 sps:$4 sm:$0xff]   ;;  %v278_v7 = vld [vmem:[%s406_s1 + $0x30] ss:$8 sps:$4 sm:$0xff]   ;;  %v279_v8 = vld [vmem:[%s406_s1 + $0x44] ss:$8 sps:$4 sm:$0xff]  }
   0x4   :  { %184 = vmatprep.subr.bf16.mxu0 %v270_v2  ;;  %v281_v9 = vld [vmem:[%s406_s1 + $0x40] ss:$8 sps:$4 sm:$0xff]   ;;  %v282_v10 = vld [vmem:[%s406_s1 + $0x54] ss:$8 sps:$4 sm:$0xff]   ;;  %v284_v13 = vld [vmem:[%s406_s1 + $0x50] ss:$8 sps:$4 sm:$0xff]  }
   0x5   :  { %v15_v11 = vld [vmem:[%s407_s0] sm:$0xff]  ;;  %v288_v16 = vld [vmem:[%s406_s1 + $0x74] ss:$8 sps:$4 sm:$0xff]   ;;  %v290_v17 = vld [vmem:[%s406_s1 + $0x70] ss:$8 sps:$4 sm:$0xff]   ;;  %v43_v28 = vshrl.u32 %v42_v27, 7 }
   0x6   :  { %v239_v12 = vcombine.high %v15_v11, %v15_v11  ;;  %v285_v14 = vld [vmem:[%s406_s1 + $0x64] ss:$8 sps:$4 sm:$0xff]   ;;  %v287_v15 = vld [vmem:[%s406_s1 + $0x60] ss:$8 sps:$4 sm:$0xff]   ;;  %v294_v20 = vld [vmem:[%s406_s1 + $0x94] ss:$8 sps:$4 sm:$0xff]   ;;  %v238_v26 = vcombine.low %v15_v11, %v15_v11 }
   0x7   :  { %185 = vmatpush1.bf16.msra.mxu0 %v272_v3  ;;  %v291_v18 = vld [vmem:[%s406_s1 + $0x84] ss:$8 sps:$4 sm:$0xff]   ;;  %v293_v19 = vld [vmem:[%s406_s1 + $0x80] ss:$8 sps:$4 sm:$0xff]   ;;  %v296_v21 = vld [vmem:[%s406_s1 + $0x90] ss:$8 sps:$4 sm:$0xff]  }
   0x8   :  { %186 = vmatprep.subr.bf16.mxu0 %v273_v4  ;;  %264 = vmatprep.mubr.msk.bf16.mxu0 %vm178_vm0, %v239_v12  ;;  %v297_v22 = vld [vmem:[%s406_s1 + $0xa4] ss:$8 sps:$4 sm:$0xff]   ;;  %v299_v23 = vld [vmem:[%s406_s1 + $0xa0] ss:$8 sps:$4 sm:$0xff]   ;;  %v300_v24 = vld [vmem:[%s406_s1 + $0xb4] ss:$8 sps:$4 sm:$0xff]  }
   0x9   :  { %v302_v25 = vld [vmem:[%s406_s1 + $0xb0] ss:$8 sps:$4 sm:$0xff]   ;;  %v44_v29 = vsub.s32 0, %v43_v28  ;;  %v40_v30 = vld [vmem:[%s408_s2] sm:$0x3]  ;;  %v48_v31 = vsub.s32 1, %v43_v28 }
   0xb   :  { %187 = vmatpush1.bf16.msra.mxu0 %v275_v5  ;;  %v45_v32 = vrot.slane %v40_v30, %v44_v29  ;;  %v49_v33 = vrot.slane %v40_v30, %v48_v31 }
   0xc   :  { %188 = vmatprep.subr.bf16.mxu0 %v276_v6 }
   0xf   :  { %189 = vmatpush1.bf16.msra.mxu0 %v278_v7 }
  0x10   :  { %190 = vmatprep.subr.bf16.mxu0 %v279_v8 }
  0x13   :  { %191 = vmatpush1.bf16.msra.mxu0 %v281_v9 }
  0x14   :  { %192 = vmatprep.subr.bf16.mxu0 %v282_v10 }
  0x17   :  { %193 = vmatpush1.bf16.msra.mxu0 %v284_v13 }
  0x18   :  { %194 = vmatprep.subr.bf16.mxu0 %v285_v14 }
  0x1b   :  { %195 = vmatpush1.bf16.msra.mxu0 %v287_v15 }
  0x1c   :  { %196 = vmatprep.subr.bf16.mxu0 %v288_v16 }
  0x1f   :  { %197 = vmatpush1.bf16.msra.mxu0 %v290_v17 }
  0x20   :  { %198 = vmatprep.subr.bf16.mxu0 %v291_v18 }
  0x23   :  { %199 = vmatpush1.bf16.msra.mxu0 %v293_v19 }
  0x24   :  { %200 = vmatprep.subr.bf16.mxu0 %v294_v20 }
  0x27   :  { %201 = vmatpush1.bf16.msra.mxu0 %v296_v21 }
  0x28   :  { %202 = vmatprep.subr.bf16.mxu0 %v297_v22 }
  0x2b   :  { %203 = vmatpush1.bf16.msra.mxu0 %v299_v23 }
  0x2c   :  { %204 = vmatprep.subr.bf16.mxu0 %v300_v24 }
  0x2f   :  { %205 = vmatpush1.bf16.msra.mxu0 %v302_v25 }
  0x32   :  { %215 = vmatmul.mubr.bf16.vlgmr.msra.gmra.mrb[0].mxu0 %v238_v26 }
 0x105   :  { %v216_v34 = vpop.f32.mrb[0].mxu0 }
 0x106   :  { %v217_v35 = vadd.f32 %v216_v34, %v45_v32  ;;  %v218_v36 = vpop.f32.mrb[1].mxu0 }
 0x107   :  { %v219_v37 = vadd.f32 %v218_v36, %v49_v33  ;;  %v220_v38 = vpop.f32.mrb[2].mxu0 }
 0x108   :  { %v223_v39 = vmax.f32 %v217_v35, 0.0  ;;  %v221_v40 = vpop.f32.mrb[3].mxu0 }
 0x109   :  { %v224_v41 = vmax.f32 %v219_v37, 0.0 }
 0x10b   :  { %v266_v42 = vpack.c.bf16 %v224_v41, %v223_v39 }
 0x10d   :  { %233 = vst [vmem:[%s409_s3] sm:$0xff] %v266_v42 }

// kernel: inception_encoder_forward.31
= control target key start
LH: loop header
LB: loop body
LE: loop exit
PB: predicated region body
PF: predicated region fallthrough
CT: control target
= control target key end

     0   :  { %s1280_s12 = smov 0   ;;  %s1488_s0 = inlined_call_operand.vmem [shape: bf16[2,20,64], index: 0, kind: input, shape index: {}]   ;;  %s1489_s1 = inlined_call_operand.vmem [shape: bf16[576,128], index: 1, kind: input, shape index: {}]   ;;  %s1490_s2 = inlined_call_operand.vmem [shape: f32[1,128], index: 2, kind: input, shape index: {}]   ;;  %s1491_s3 = inlined_call_operand.vmem [shape: bf16[2,8,128], index: 3, kind: output, shape index: {}]  }
   0x1 LB: > { %s981_s13 = sadd.s32 4294967295, %s1256_s12   ;;  %p985_p0 = scmp.ge.s32.totalorder %s1256_s12, 1  ;;  %s1256_s12 = sphi %s1280_s12, %s13_s12  }
   0x2   : > { %p137_p1 = scmp.lt.s32.totalorder %s1256_s12, 3 }
   0x4   : > { %p138_p2 = pnand %p985_p0, %p137_p1 }
   0x5   : > { %v1207_v0 = vld [vmem:[%s1489_s1 + $0x20] sm:$0xff] (!%p138_p2)   ;;  %v1258_v1 = vmov (!%p138_p2), 0.0   ;;  %v1209_v3 = vld [vmem:[%s1489_s1 + $0x28] sm:$0xff] (!%p138_p2)   ;;  %vm1259_vm0 = vmmov (!%p138_p2), 0   ;;  %p160_p3 = scmp.lt.s32.totalorder (!%p138_p2), %s981_s13, 1  ;;  %v1211_v5 = vld [vmem:[%s1489_s1 + $0x30] sm:$0xff] (!%p138_p2)  }
   0x6   : > { %141 = sbr.rel (%p138_p2) target bundleno = 311 (0x137), region = 32  ;;  %1088 = vmatprep.subr.bf16.mxu0 (!%p138_p2), %v1258_v1  ;;  %1100 = vmatprep.subr.bf16.mxu1 (!%p138_p2), %v1258_v1  ;;  %v1208_v2 = vld [vmem:[%s1489_s1] sm:$0xff] (!%p138_p2)   ;;  %v1210_v4 = vld [vmem:[%s1489_s1 + $0x8] sm:$0xff] (!%p138_p2)   ;;  %v1212_v6 = vld [vmem:[%s1489_s1 + $0x10] sm:$0xff] (!%p138_p2)   ;;  %vm224_vm1 = vcmask (!%p138_p2), 523264  }
   0x7   : > { %1089 = vmatpush3.bf16.msra.mxu0 (!%p138_p2), %v1207_v0  ;;  %1096 = vmatprep.mubr.msk.bf16.mxu0 (!%p138_p2), %vm1259_vm0, %v1258_v1  ;;  %v1213_v9 = vld [vmem:[%s1489_s1 + $0x38] sm:$0xff] (!%p138_p2)   ;;  %v1216_v15 = vld [vmem:[%s1489_s1 + $0x40] sm:$0xff] (!%p138_p2)   ;;  %v1218_v18 = vld [vmem:[%s1489_s1 + $0x48] sm:$0xff] (!%p138_p2)  }
   0x8   : > { %1101 = vmatpush3.bf16.msra.mxu1 (!%p138_p2), %v1208_v2  ;;  %1090 = vmatprep.subr.bf16.mxu0 (!%p138_p2), %v1258_v1  ;;  %v1214_v11 = vld [vmem:[%s1489_s1 + $0x18] sm:$0xff] (!%p138_p2)   ;;  %v1217_v16 = vld [vmem:[%s1489_s1 + $0x60] sm:$0xff] (!%p138_p2)   ;;  %v1219_v19 = vld [vmem:[%s1489_s1 + $0x68] sm:$0xff] (!%p138_p2)  }
   0x9   : > { %1102 = vmatprep.subr.bf16.mxu1 (!%p138_p2), %v1258_v1  ;;  %1108 = vmatprep.mubr.msk.bf16.mxu1 (!%p138_p2), %vm1259_vm0, %v1258_v1  ;;  %v1220_v20 = vld [vmem:[%s1489_s1 + $0x50] sm:$0xff] (!%p138_p2)   ;;  %v1222_v25 = vld [vmem:[%s1489_s1 + $0x58] sm:$0xff] (!%p138_p2)   ;;  %v1225_v29 = vld [vmem:[%s1489_s1 + $0x80] sm:$0xff] (!%p138_p2)  }
   0xa   : > { %v1221_v21 = vld [vmem:[%s1489_s1 + $0x70] sm:$0xff] (!%p138_p2)   ;;  %v1223_v28 = vld [vmem:[%s1489_s1 + $0x78] sm:$0xff] (!%p138_p2)   ;;  %v1228_v33 = vld [vmem:[%s1489_s1 + $0xa0] sm:$0xff] (!%p138_p2)  }
   0xb   : > { %1091 = vmatpush3.bf16.msra.mxu0 (!%p138_p2), %v1209_v3  ;;  %v1229_v35 = vld [vmem:[%s1489_s1 + $0x88] sm:$0xff] (!%p138_p2)   ;;  %v1231_v39 = vld [vmem:[%s1489_s1 + $0x90] sm:$0xff] (!%p138_p2)   ;;  %v1233_v45 = vld [vmem:[%s1489_s1 + $0x98] sm:$0xff] (!%p138_p2)  }
   0xc   : > { %1103 = vmatpush3.bf16.msra.mxu1 (!%p138_p2), %v1210_v4  ;;  %1092 = vmatprep.subr.bf16.mxu0 (!%p138_p2), %v1258_v1  ;;  %v1230_v36 = vld [vmem:[%s1489_s1 + $0xa8] sm:$0xff] (!%p138_p2)   ;;  %v1232_v40 = vld [vmem:[%s1489_s1 + $0xb0] sm:$0xff] (!%p138_p2)   ;;  %v1234_v46 = vld [vmem:[%s1489_s1 + $0xb8] sm:$0xff] (!%p138_p2)  }
   0xd   : > { %s1493_s13 = smov (!%p160_p3, %s981_s13), 1  ;;  %1104 = vmatprep.subr.bf16.mxu1 %v1258_v1  ;;  %v1235_v48 = vld [vmem:[%s1489_s1 + $0xc0] sm:$0xff]   ;;  %v1238_v54 = vld [vmem:[%s1489_s1 + $0xc8] sm:$0xff]   ;;  %v1240_v57 = vld [vmem:[%s1489_s1 + $0xd0] sm:$0xff]  }
   0xe   : > { %s1196_s24 = smul.u32 12, %s1493_s13  ;;  %v1237_v50 = vld [vmem:[%s1489_s1 + $0xe0] sm:$0xff]   ;;  %v1239_v55 = vld [vmem:[%s1489_s1 + $0xe8] sm:$0xff]   ;;  %v1241_v58 = vld [vmem:[%s1489_s1 + $0xf0] sm:$0xff]   ;;  %s987_s18 = sshll.u32 %s1493_s13, 2 }
   0xf   : > { %1093 = vmatpush3.bf16.msra.mxu0 %v1211_v5  ;;  %v1242_v61 = vld [vmem:[%s1489_s1 + $0xd8] sm:$0xff]   ;;  %v1244_v2 = vld [vmem:[%s1489_s1 + $0x100] sm:$0xff]   ;;  %v1246_v3 = vld [vmem:[%s1489_s1 + $0x108] sm:$0xff]   ;;  %s168_s21 = scalar_lea.vmem %s1491_s3, %s987_s18 }
  0x10   : > { %s1322_s29 = scalar_lea.vmem %s1488_s0, %s1196_s24  ;;  %1105 = vmatpush3.bf16.msra.mxu1 %v1212_v6  ;;  %1094 = vmatprep.subr.bf16.mxu0 %v1258_v1  ;;  %v1243_v62 = vld [vmem:[%s1489_s1 + $0xf8] sm:$0xff]   ;;  %v1247_v4 = vld [vmem:[%s1489_s1 + $0x110] sm:$0xff]  }
  0x11   : > { %v170_v7 = vld [vmem:[%s1322_s29] sm:$0xf]  ;;  %v179_v8 = vld [vmem:[%s1322_s29 + $0x4] sm:$0x1]  ;;  %1106 = vmatprep.subr.bf16.mxu1 %v1258_v1  ;;  %v747_v52 = vld [vmem:[%s1322_s29 + $0x8] sm:$0x1] }
  0x12   : > { %v988_v10 = vcombine.low %v170_v7, %v179_v8  ;;  %v335_v22 = vld [vmem:[%s1322_s29] sm:$0xe]  ;;  %v417_v24 = vld [vmem:[%s1322_s29 + $0x4] sm:$0x3] }
  0x13   : > { %1095 = vmatpush3.bf16.msra.mxu0 %v1213_v9  ;;  %v416_v23 = vld [vmem:[%s1322_s29] sm:$0xc]  ;;  %v999_v26 = vcombine.low %v335_v22, %v179_v8  ;;  %v500_v30 = vld [vmem:[%s1322_s29 + $0x4] sm:$0x7] }
  0x14   : > { %v194_v12 = vshrl.u32 %v988_v10, 16  ;;  %v196_v13 = vshll.u32 %v988_v10, 16  ;;  %1107 = vmatpush3.bf16.msra.mxu1 %v1214_v11  ;;  %1112 = vmatprep.subr.bf16.mxu0 %v1258_v1  ;;  %v1005_v27 = vcombine.low %v416_v23, %v417_v24  ;;  %v1011_v34 = vcombine.low %v416_v23, %v500_v30  ;;  %v588_v41 = vld [vmem:[%s1322_s29] sm:$0x8]  ;;  %v746_v51 = vld [vmem:[%s1322_s29 + $0x4] sm:$0xf] }
  0x15   : > { %1124 = vmatprep.subr.bf16.mxu1 %v1258_v1  ;;  %v347_v31 = vrot.slane %v999_v26, 1  ;;  %v1017_v44 = vcombine.low %v588_v41, %v500_v30  ;;  %v1028_v53 = vcombine.low %v746_v51, %v747_v52  ;;  %v669_v0 = vld [vmem:[%s1322_s29 + $0x4] sm:$0xf] }
  0x16   : > { %v198_v14 = vrot.slane %v196_v13, 1  ;;  %v431_v32 = vrot.slane %v1005_v27, 2  ;;  %v513_v37 = vshrl.u32 %v1011_v34, 16  ;;  %v516_v38 = vshll.u32 %v1011_v34, 16  ;;  %v836_v5 = vld [vmem:[%s1322_s29 + $0x4] sm:$0xe] }
  0x17   : > { %1109 = vmatmul.mubr.msk.bf16.vlgmr.msra.gmra.mrb[0].mxu1 %vm224_vm1, %v170_v7  ;;  %v600_v49 = vrot.slane %v1017_v44, 3  ;;  %v764_v56 = vshll.u32 %v1028_v53, 16  ;;  %v762_v59 = vshrl.u32 %v1028_v53, 16  ;;  %v1034_v6 = vcombine.low %v836_v5, %v747_v52  ;;  %v1248_v7 = vld [vmem:[%s1489_s1 + $0x118] sm:$0xff]  }
  0x18   : > { %v199_v17 = vor.u32 %v198_v14, %v194_v12  ;;  %1125 = vmatpush3.bf16.msra.mxu1 %v1217_v16  ;;  %1132 = vmatprep.mubr.msk.bf16.mxu1 %vm1259_vm0, %v1258_v1  ;;  %v515_v42 = vrot.slane %v513_v37, 2  ;;  %v518_v43 = vrot.slane %v516_v38, 3 }
  0x19   : > { %1126 = vmatprep.subr.bf16.mxu1 %v1258_v1  ;;  %v766_v60 = vrot.slane %v764_v56, 1  ;;  %v848_v8 = vrot.slane %v1034_v6, 1 }
  0x1a   : > { %1097 = vmatmul.mubr.msk.bf16.vlgmr.msra.gmra.mrb[0].mxu0 %vm224_vm1, %v199_v17  ;;  %v519_v47 = vor.u32 %v518_v43, %v515_v42 }
  0x1b   : > { %1113 = vmatpush3.bf16.msra.mxu0 %v1216_v15  ;;  %1120 = vmatprep.mubr.msk.bf16.mxu0 %vm1259_vm0, %v1258_v1  ;;  %v767_v63 = vor.u32 %v766_v60, %v762_v59 }
  0x1c   : > { %1114 = vmatprep.subr.bf16.mxu0 %v1258_v1  ;;  %1127 = vmatpush3.bf16.msra.mxu1 %v1219_v19 }
  0x1d   : > { %1128 = vmatprep.subr.bf16.mxu1 %v1258_v1 }
  0x1f   : > { %1115 = vmatpush3.bf16.msra.mxu0 %v1218_v18 }
  0x20   : > { %1116 = vmatprep.subr.bf16.mxu0 %v1258_v1  ;;  %1129 = vmatpush3.bf16.msra.mxu1 %v1221_v21 }
  0x21   : > { %1130 = vmatprep.subr.bf16.mxu1 %v1258_v1 }
  0x23   : > { %1117 = vmatpush3.bf16.msra.mxu0 %v1220_v20 }
  0x24   : > { %1118 = vmatprep.subr.bf16.mxu0 %v1258_v1  ;;  %1131 = vmatpush3.bf16.msra.mxu1 %v1223_v28 }
  0x25   : > { %1148 = vmatprep.subr.bf16.mxu1 %v1258_v1 }
  0x27   : > { %1119 = vmatpush3.bf16.msra.mxu0 %v1222_v25  ;;  %1133 = vmatmul.mubr.msk.bf16.vlgmr.msra.gmra.mrb[4].mxu1 %vm224_vm1, %v431_v32 }
  0x28   : > { %1136 = vmatprep.subr.bf16.mxu0 %v1258_v1  ;;  %1149 = vmatpush3.bf16.msra.mxu1 %v1228_v33 }
  0x29   : > { %1150 = vmatprep.subr.bf16.mxu1 %v1258_v1  ;;  %1156 = vmatprep.mubr.msk.bf16.mxu1 %vm1259_vm0, %v1258_v1 }
  0x2a   : > { %1121 = vmatmul.mubr.msk.bf16.vlgmr.msra.gmra.mrb[4].mxu0 %vm224_vm1, %v347_v31 }
  0x2b   : > { %1137 = vmatpush3.bf16.msra.mxu0 %v1225_v29  ;;  %1144 = vmatprep.mubr.msk.bf16.mxu0 %vm1259_vm0, %v1258_v1 }
  0x2c   : > { %1138 = vmatprep.subr.bf16.mxu0 %v1258_v1  ;;  %1151 = vmatpush3.bf16.msra.mxu1 %v1230_v36 }
  0x2d   : > { %1152 = vmatprep.subr.bf16.mxu1 %v1258_v1 }
  0x2f   : > { %1139 = vmatpush3.bf16.msra.mxu0 %v1229_v35 }
  0x30   : > { %1140 = vmatprep.subr.bf16.mxu0 %v1258_v1  ;;  %1153 = vmatpush3.bf16.msra.mxu1 %v1232_v40 }
  0x31   : > { %1154 = vmatprep.subr.bf16.mxu1 %v1258_v1 }
  0x33   : > { %1141 = vmatpush3.bf16.msra.mxu0 %v1231_v39 }
  0x34   : > { %1142 = vmatprep.subr.bf16.mxu0 %v1258_v1  ;;  %1155 = vmatpush3.bf16.msra.mxu1 %v1234_v46 }
  0x35   : > { %1172 = vmatprep.subr.bf16.mxu1 %v1258_v1 }
  0x37   : > { %1143 = vmatpush3.bf16.msra.mxu0 %v1233_v45  ;;  %1157 = vmatmul.mubr.msk.bf16.vlgmr.msra.gmra.mrb[8].mxu1 %vm224_vm1, %v600_v49 }
  0x38   : > { %1160 = vmatprep.subr.bf16.mxu0 %v1258_v1  ;;  %1173 = vmatpush3.bf16.msra.mxu1 %v1237_v50 }
  0x39   : > { %1174 = vmatprep.subr.bf16.mxu1 %v1258_v1  ;;  %1180 = vmatprep.mubr.msk.bf16.mxu1 %vm1259_vm0, %v1258_v1 }
  0x3a   : > { %1145 = vmatmul.mubr.msk.bf16.vlgmr.msra.gmra.mrb[8].mxu0 %vm224_vm1, %v519_v47 }
  0x3b   : > { %1161 = vmatpush3.bf16.msra.mxu0 %v1235_v48  ;;  %1168 = vmatprep.mubr.msk.bf16.mxu0 %vm1259_vm0, %v1258_v1  ;;  %v1040_v48 = vld [vmem:[%s1490_s2] ss:$0 sm:$0xff] }
  0x3c   : > { %1162 = vmatprep.subr.bf16.mxu0 %v1258_v1  ;;  %1175 = vmatpush3.bf16.msra.mxu1 %v1239_v55 }
  0x3d   : > { %1176 = vmatprep.subr.bf16.mxu1 %v1258_v1 }
  0x3f   : > { %1163 = vmatpush3.bf16.msra.mxu0 %v1238_v54 }
  0x40   : > { %1164 = vmatprep.subr.bf16.mxu0 %v1258_v1  ;;  %1177 = vmatpush3.bf16.msra.mxu1 %v1241_v58 }
  0x41   : > { %1178 = vmatprep.subr.bf16.mxu1 %v1258_v1 }
  0x43   : > { %1165 = vmatpush3.bf16.msra.mxu0 %v1240_v57 }
  0x44   : > { %1166 = vmatprep.subr.bf16.mxu0 %v1258_v1  ;;  %1179 = vmatpush3.bf16.msra.mxu1 %v1243_v62 }
  0x47   : > { %1167 = vmatpush3.bf16.msra.mxu0 %v1242_v61  ;;  %1181 = vmatmul.mubr.msk.bf16.vlgmr.msra.gmra.mrb[12].mxu1 %vm224_vm1, %v767_v63 }
  0x48   : > { %1184 = vmatprep.subr.bf16.mxu0 %v1258_v1 }
  0x4a   : > { %1169 = vmatmul.mubr.msk.bf16.vlgmr.msra.gmra.mrb[12].mxu0 %vm224_vm1, %v669_v0 }
  0x4b   : > { %1185 = vmatpush3.bf16.msra.mxu0 %v1244_v2  ;;  %1192 = vmatprep.mubr.msk.bf16.mxu0 %vm1259_vm0, %v1258_v1 }
  0x4c   : > { %1186 = vmatprep.subr.bf16.mxu0 %v1258_v1 }
  0x4f   : > { %1187 = vmatpush3.bf16.msra.mxu0 %v1246_v3 }
  0x50   : > { %1188 = vmatprep.subr.bf16.mxu0 %v1258_v1 }
  0x53   : > { %1189 = vmatpush3.bf16.msra.mxu0 %v1247_v4 }
  0x54   : > { %1190 = vmatprep.subr.bf16.mxu0 %v1258_v1 }
  0x57   : > { %1191 = vmatpush3.bf16.msra.mxu0 %v1248_v7 }
  0x5a   : > { %1193 = vmatmul.mubr.msk.bf16.vlgmr.msra.gmra.mrb[16].mxu0 %vm224_vm1, %v848_v8 }
  0xea   : > { %v329_v10 = vpop.f32.mrb[0].mxu1 }
  0xeb   : > { %v1110_v13 = vpop.f32.mrb[1].mxu1 }
  0xec   : > { %v332_v15 = vpop.f32.mrb[2].mxu1 }
  0xed   : > { %v262_v9 = vpop.f32.mrb[0].mxu0  ;;  %v1111_v17 = vpop.f32.mrb[3].mxu1 }
  0xee   : > { %v1098_v11 = vpop.f32.mrb[1].mxu0  ;;  %v330_v12 = vadd.f32 %v329_v10, %v262_v9 }
  0xef   : > { %v265_v14 = vpop.f32.mrb[2].mxu0 }
  0xf0   : > { %v1099_v16 = vpop.f32.mrb[3].mxu0 }
  0xfa   : > { %v493_v19 = vpop.f32.mrb[4].mxu1 }
  0xfb   : > { %v1134_v22 = vpop.f32.mrb[5].mxu1 }
  0xfc   : > { %v496_v1 = vpop.f32.mrb[6].mxu1 }
  0xfd   : > { %v409_v18 = vpop.f32.mrb[4].mxu0  ;;  %v1135_v26 = vpop.f32.mrb[7].mxu1 }
  0xfe   : > { %v415_v20 = vadd.f32 %v409_v18, %v330_v12  ;;  %v1122_v21 = vpop.f32.mrb[5].mxu0 }
  0xff   : > { %v412_v23 = vpop.f32.mrb[6].mxu0 }
 0x100   : > { %v499_v24 = vadd.f32 %v493_v19, %v415_v20  ;;  %v1123_v25 = vpop.f32.mrb[7].mxu0 }
 0x10a   : > { %v662_v28 = vpop.f32.mrb[8].mxu1 }
 0x10b   : > { %v1158_v31 = vpop.f32.mrb[9].mxu1 }
 0x10c   : > { %v665_v33 = vpop.f32.mrb[10].mxu1 }
 0x10d   : > { %v581_v27 = vpop.f32.mrb[8].mxu0  ;;  %v1159_v36 = vpop.f32.mrb[11].mxu1 }
 0x10e   : > { %v587_v29 = vadd.f32 %v581_v27, %v499_v24  ;;  %v1146_v30 = vpop.f32.mrb[9].mxu0 }
 0x10f   : > { %v584_v32 = vpop.f32.mrb[10].mxu0 }
 0x110   : > { %v668_v34 = vadd.f32 %v662_v28, %v587_v29  ;;  %v1147_v35 = vpop.f32.mrb[11].mxu0 }
 0x11a   : > { %v829_v38 = vpop.f32.mrb[12].mxu1 }
 0x11b   : > { %v1182_v41 = vpop.f32.mrb[13].mxu1 }
 0x11c   : > { %v832_v43 = vpop.f32.mrb[14].mxu1 }
 0x11d   : > { %v739_v37 = vpop.f32.mrb[12].mxu0  ;;  %v1183_v46 = vpop.f32.mrb[15].mxu1 }
 0x11e   : > { %v745_v39 = vadd.f32 %v739_v37, %v668_v34  ;;  %v1170_v40 = vpop.f32.mrb[13].mxu0 }
 0x11f   : > { %v742_v42 = vpop.f32.mrb[14].mxu0 }
 0x120   : > { %v835_v44 = vadd.f32 %v829_v38, %v745_v39  ;;  %v1171_v45 = vpop.f32.mrb[15].mxu0 }
 0x12d   : > { %v910_v47 = vpop.f32.mrb[16].mxu0 }
 0x12e   : > { %v916_v49 = vadd.f32 %v910_v47, %v835_v44  ;;  %v1194_v50 = vpop.f32.mrb[17].mxu0 }
 0x12f   : > { %v913_v51 = vpop.f32.mrb[18].mxu0 }
 0x130   : > { %v924_v52 = vadd.f32 %v1040_v48, %v916_v49  ;;  %v1195_v53 = vpop.f32.mrb[19].mxu0 }
 0x132   : > { %v925_v54 = vmax.f32 %v924_v52, 0.0 }
 0x134   : > { %v926_v55 = vpack.c.bf16 %v925_v54, %v925_v54 }
 0x136   : > { %927 = vst [vmem:[%s168_s21] sm:$0xf] %v926_v55 }
 0x137 PF: > { %s13_s12 = sadd.s32 1, %s1256_s12  }
 0x138   : > { %p10_p4 = scmp.ge.s32.totalorder %s13_s12, 4  }
 0x13a   :  { %12 = sbr.rel (!%p10_p4) target bundleno = 1 (0x1), region = 62 }

// kernel: inception_encoder_forward.32
= control target key start
LH: loop header
LB: loop body
LE: loop exit
PB: predicated region body
PF: predicated region fallthrough
CT: control target
= control target key end

     0   :  { %s1514_s12 = smov 0   ;;  %s1798_s0 = inlined_call_operand.vmem [shape: bf16[2,20,96], index: 0, kind: input, shape index: {}]   ;;  %s1799_s1 = inlined_call_operand.vmem [shape: bf16[864,128], index: 1, kind: input, shape index: {}]   ;;  %s1800_s2 = inlined_call_operand.vmem [shape: f32[1,128], index: 2, kind: input, shape index: {}]   ;;  %s1801_s3 = inlined_call_operand.vmem [shape: bf16[2,8,128], index: 3, kind: output, shape index: {}]  }
   0x1 LB: > { %s1125_s13 = sadd.s32 4294967295, %s1490_s12   ;;  %p1129_p0 = scmp.ge.s32.totalorder %s1490_s12, 1  ;;  %s1490_s12 = sphi %s1514_s12, %s13_s12  }
   0x2   : > { %p137_p1 = scmp.lt.s32.totalorder %s1490_s12, 3 }
   0x4   : > { %p138_p2 = pnand %p1129_p0, %p137_p1 }
   0x5   : > { %v1423_v0 = vld [vmem:[%s1799_s1 + $0x30] sm:$0xff] (!%p138_p2)   ;;  %v1492_v1 = vmov (!%p138_p2), 0.0   ;;  %v1424_v2 = vld [vmem:[%s1799_s1] sm:$0xff] (!%p138_p2)   ;;  %v1425_v3 = vld [vmem:[%s1799_s1 + $0x38] sm:$0xff] (!%p138_p2)   ;;  %vm1493_vm0 = vmmov (!%p138_p2), 0   ;;  %p160_p3 = scmp.lt.s32.totalorder (!%p138_p2), %s1125_s13, 1 }
   0x6   : > { %141 = sbr.rel (%p138_p2) target bundleno = 347 (0x15b), region = 32  ;;  %1268 = vmatprep.subr.bf16.mxu0 (!%p138_p2), %v1492_v1  ;;  %1284 = vmatprep.subr.bf16.mxu1 (!%p138_p2), %v1492_v1  ;;  %v1426_v4 = vld [vmem:[%s1799_s1 + $0x8] sm:$0xff] (!%p138_p2)   ;;  %v1427_v5 = vld [vmem:[%s1799_s1 + $0x40] sm:$0xff] (!%p138_p2)   ;;  %v1428_v6 = vld [vmem:[%s1799_s1 + $0x10] sm:$0xff] (!%p138_p2)   ;;  %vm244_vm1 = vcmask (!%p138_p2), 785408  }
   0x7   : > { %1269 = vmatpush3.bf16.msra.mxu0 (!%p138_p2), %v1423_v0  ;;  %1280 = vmatprep.mubr.msk.bf16.mxu0 (!%p138_p2), %vm1493_vm0, %v1492_v1  ;;  %v1429_v7 = vld [vmem:[%s1799_s1 + $0x48] sm:$0xff] (!%p138_p2)   ;;  %v1430_v8 = vld [vmem:[%s1799_s1 + $0x18] sm:$0xff] (!%p138_p2)   ;;  %v1431_v12 = vld [vmem:[%s1799_s1 + $0x50] sm:$0xff] (!%p138_p2)  }
   0x8   : > { %1285 = vmatpush3.bf16.msra.mxu1 (!%p138_p2), %v1424_v2  ;;  %1270 = vmatprep.subr.bf16.mxu0 (!%p138_p2), %v1492_v1  ;;  %v1432_v13 = vld [vmem:[%s1799_s1 + $0x20] sm:$0xff] (!%p138_p2)   ;;  %v1433_v17 = vld [vmem:[%s1799_s1 + $0x58] sm:$0xff] (!%p138_p2)   ;;  %v1434_v18 = vld [vmem:[%s1799_s1 + $0x28] sm:$0xff] (!%p138_p2)  }
   0x9   : > { %1286 = vmatprep.subr.bf16.mxu1 (!%p138_p2), %v1492_v1  ;;  %1296 = vmatprep.mubr.msk.bf16.mxu1 (!%p138_p2), %vm1493_vm0, %v1492_v1  ;;  %v1436_v20 = vld [vmem:[%s1799_s1 + $0x60] sm:$0xff] (!%p138_p2)   ;;  %v1437_v21 = vld [vmem:[%s1799_s1 + $0x90] sm:$0xff] (!%p138_p2)   ;;  %v1438_v22 = vld [vmem:[%s1799_s1 + $0x68] sm:$0xff] (!%p138_p2)  }
   0xa   : > { %v1439_v23 = vld [vmem:[%s1799_s1 + $0x98] sm:$0xff] (!%p138_p2)   ;;  %v1440_v24 = vld [vmem:[%s1799_s1 + $0x70] sm:$0xff] (!%p138_p2)   ;;  %v1441_v25 = vld [vmem:[%s1799_s1 + $0xa0] sm:$0xff] (!%p138_p2)  }
   0xb   : > { %1271 = vmatpush3.bf16.msra.mxu0 (!%p138_p2), %v1425_v3  ;;  %v1442_v26 = vld [vmem:[%s1799_s1 + $0x78] sm:$0xff] (!%p138_p2)   ;;  %v1443_v27 = vld [vmem:[%s1799_s1 + $0xa8] sm:$0xff] (!%p138_p2)   ;;  %v1444_v28 = vld [vmem:[%s1799_s1 + $0x80] sm:$0xff] (!%p138_p2)  }
   0xc   : > { %1287 = vmatpush3.bf16.msra.mxu1 (!%p138_p2), %v1426_v4  ;;  %1272 = vmatprep.subr.bf16.mxu0 (!%p138_p2), %v1492_v1  ;;  %v1445_v29 = vld [vmem:[%s1799_s1 + $0xb0] sm:$0xff] (!%p138_p2)   ;;  %v1446_v34 = vld [vmem:[%s1799_s1 + $0x88] sm:$0xff] (!%p138_p2)   ;;  %v1447_v36 = vld [vmem:[%s1799_s1 + $0xb8] sm:$0xff] (!%p138_p2)  }
   0xd   : > { %s1803_s13 = smov (!%p160_p3, %s1125_s13), 1  ;;  %1288 = vmatprep.subr.bf16.mxu1 %v1492_v1  ;;  %v1449_v38 = vld [vmem:[%s1799_s1 + $0xc0] sm:$0xff]   ;;  %v1452_v40 = vld [vmem:[%s1799_s1 + $0xf0] sm:$0xff]   ;;  %v1453_v41 = vld [vmem:[%s1799_s1 + $0xc8] sm:$0xff]  }
   0xe   : > { %s1412_s24 = smul.u32 12, %s1803_s13  ;;  %v1454_v42 = vld [vmem:[%s1799_s1 + $0xf8] sm:$0xff]   ;;  %v1455_v44 = vld [vmem:[%s1799_s1 + $0xd0] sm:$0xff]   ;;  %v1456_v45 = vld [vmem:[%s1799_s1 + $0x100] sm:$0xff]   ;;  %s1131_s4 = sshll.u32 %s1803_s13, 2 }
   0xf   : > { %1273 = vmatpush3.bf16.msra.mxu0 %v1427_v5  ;;  %v1457_v47 = vld [vmem:[%s1799_s1 + $0xd8] sm:$0xff]   ;;  %v1458_v48 = vld [vmem:[%s1799_s1 + $0x108] sm:$0xff]   ;;  %v1459_v51 = vld [vmem:[%s1799_s1 + $0xe0] sm:$0xff]   ;;  %s168_s7 = scalar_lea.vmem %s1801_s3, %s1131_s4 }
  0x10   : > { %s1556_s29 = scalar_lea.vmem %s1798_s0, %s1412_s24  ;;  %1289 = vmatpush3.bf16.msra.mxu1 %v1428_v6  ;;  %1274 = vmatprep.subr.bf16.mxu0 %v1492_v1  ;;  %v1460_v52 = vld [vmem:[%s1799_s1 + $0x110] sm:$0xff]   ;;  %v1461_v56 = vld [vmem:[%s1799_s1 + $0xe8] sm:$0xff]   ;;  %v1462_v58 = vld [vmem:[%s1799_s1 + $0x118] sm:$0xff]  }
  0x11   : > { %1290 = vmatprep.subr.bf16.mxu1 %v1492_v1  ;;  %v170_v9 = vld [vmem:[%s1556_s29] sm:$0xf]  ;;  %v1568_v10 = vld [vmem:[%s1556_s29 + $0x4] sm:$0x1]  ;;  %v1465_v62 = vld [vmem:[%s1799_s1 + $0x150] sm:$0xff]  }
  0x12   : > { %v1132_v11 = vcombine.low %v170_v9, %v1568_v10  ;;  %v367_v30 = vld [vmem:[%s1556_s29] sm:$0xe]  ;;  %v465_v32 = vld [vmem:[%s1556_s29 + $0x4] sm:$0x3]  ;;  %v1466_v63 = vld [vmem:[%s1799_s1 + $0x128] sm:$0xff]  }
  0x13   : > { %1275 = vmatpush3.bf16.msra.mxu0 %v1429_v7  ;;  %v464_v31 = vld [vmem:[%s1556_s29] sm:$0xc]  ;;  %v1147_v33 = vcombine.low %v367_v30, %v1568_v10  ;;  %v564_v43 = vld [vmem:[%s1556_s29 + $0x4] sm:$0x7]  ;;  %v1467_v0 = vld [vmem:[%s1799_s1 + $0x158] sm:$0xff]  }
  0x14   : > { %1291 = vmatpush3.bf16.msra.mxu1 %v1430_v8  ;;  %1276 = vmatprep.subr.bf16.mxu0 %v1492_v1  ;;  %v204_v14 = vshll.u32 %v1132_v11, 16  ;;  %v202_v15 = vshrl.u32 %v1132_v11, 16  ;;  %v1155_v35 = vcombine.low %v464_v31, %v465_v32  ;;  %v1163_v46 = vcombine.low %v464_v31, %v564_v43  ;;  %v668_v53 = vld [vmem:[%s1556_s29] sm:$0x8]  ;;  %v1468_v2 = vld [vmem:[%s1799_s1 + $0x130] sm:$0xff]   ;;  %v1470_v6 = vld [vmem:[%s1799_s1 + $0x138] sm:$0xff]  }
  0x15   : > { %1292 = vmatprep.subr.bf16.mxu1 %v1492_v1  ;;  %v383_v37 = vrot.slane %v1147_v33, 1  ;;  %v1171_v57 = vcombine.low %v668_v53, %v564_v43  ;;  %v1463_v60 = vld [vmem:[%s1799_s1 + $0x120] sm:$0xff]   ;;  %v859_v5 = vld [vmem:[%s1556_s29 + $0x8] sm:$0x1]  ;;  %v1473_v11 = vld [vmem:[%s1799_s1 + $0x170] sm:$0xff]  }
  0x16   : > { %v206_v16 = vrot.slane %v204_v14, 1  ;;  %v483_v39 = vrot.slane %v1155_v35, 2  ;;  %v581_v49 = vshrl.u32 %v1163_v46, 16  ;;  %v584_v50 = vshll.u32 %v1163_v46, 16  ;;  %v1469_v3 = vld [vmem:[%s1799_s1 + $0x160] sm:$0xff]   ;;  %v1471_v8 = vld [vmem:[%s1799_s1 + $0x168] sm:$0xff]  }
  0x17   : > { %1277 = vmatpush3.bf16.msra.mxu0 %v1431_v12  ;;  %v684_v61 = vrot.slane %v1171_v57, 3  ;;  %v858_v4 = vld [vmem:[%s1556_s29 + $0x4] sm:$0xf]  ;;  %v1474_v12 = vld [vmem:[%s1799_s1 + $0x148] sm:$0xff]  }
  0x18   : > { %1293 = vmatpush3.bf16.msra.mxu1 %v1432_v13  ;;  %1278 = vmatprep.subr.bf16.mxu0 %v1492_v1  ;;  %v207_v19 = vor.u32 %v206_v16, %v202_v15  ;;  %v583_v54 = vrot.slane %v581_v49, 2  ;;  %v586_v55 = vrot.slane %v584_v50, 3  ;;  %v1186_v7 = vcombine.low %v858_v4, %v859_v5  ;;  %v1475_v15 = vld [vmem:[%s1799_s1 + $0x178] sm:$0xff]   ;;  %v765_v16 = vld [vmem:[%s1556_s29 + $0x4] sm:$0xf] }
  0x19   : > { %1294 = vmatprep.subr.bf16.mxu1 %v1492_v1 }
  0x1a   : > { %v587_v59 = vor.u32 %v586_v55, %v583_v54  ;;  %v880_v10 = vshll.u32 %v1186_v7, 16  ;;  %v878_v13 = vshrl.u32 %v1186_v7, 16 }
  0x1b   : > { %1279 = vmatpush3.bf16.msra.mxu0 %v1433_v17  ;;  %v1476_v17 = vld [vmem:[%s1799_s1 + $0x180] sm:$0xff]  }
  0x1c   : > { %1295 = vmatpush3.bf16.msra.mxu1 %v1434_v18  ;;  %1300 = vmatprep.subr.bf16.mxu0 %v1492_v1  ;;  %v882_v14 = vrot.slane %v880_v10, 1 }
  0x1d   : > { %1316 = vmatprep.subr.bf16.mxu1 %v1492_v1 }
  0x1e   : > { %1281 = vmatmul.mubr.msk.bf16.vlgmr.msra.gmra.mrb[0].mxu0 %vm244_vm1, %v207_v19  ;;  %v883_v18 = vor.u32 %v882_v14, %v878_v13  ;;  %v1478_v19 = vld [vmem:[%s1799_s1 + $0x188] sm:$0xff]  }
  0x1f   : > { %1297 = vmatmul.mubr.msk.bf16.vlgmr.msra.gmra.mrb[0].mxu1 %vm244_vm1, %v170_v9  ;;  %1301 = vmatpush3.bf16.msra.mxu0 %v1436_v20  ;;  %v1472_v9 = vld [vmem:[%s1799_s1 + $0x140] sm:$0xff]   ;;  %v1479_v20 = vld [vmem:[%s1799_s1 + $0x190] sm:$0xff]  }
  0x20   : > { %1317 = vmatpush3.bf16.msra.mxu1 %v1437_v21  ;;  %1302 = vmatprep.subr.bf16.mxu0 %v1492_v1  ;;  %v1480_v21 = vld [vmem:[%s1799_s1 + $0x198] sm:$0xff]  }
  0x21   : > { %1318 = vmatprep.subr.bf16.mxu1 %v1492_v1  ;;  %1312 = vmatprep.mubr.msk.bf16.mxu0 %vm1493_vm0, %v1492_v1 }
  0x22   : > { %1328 = vmatprep.mubr.msk.bf16.mxu1 %vm1493_vm0, %v1492_v1 }
  0x23   : > { %1303 = vmatpush3.bf16.msra.mxu0 %v1438_v22  ;;  %v1481_v22 = vld [vmem:[%s1799_s1 + $0x1a0] sm:$0xff]  }
  0x24   : > { %1319 = vmatpush3.bf16.msra.mxu1 %v1439_v23  ;;  %1304 = vmatprep.subr.bf16.mxu0 %v1492_v1  ;;  %v964_v23 = vld [vmem:[%s1556_s29 + $0x4] sm:$0xe] }
  0x25   : > { %1320 = vmatprep.subr.bf16.mxu1 %v1492_v1 }
  0x27   : > { %1305 = vmatpush3.bf16.msra.mxu0 %v1440_v24  ;;  %v1194_v24 = vcombine.low %v964_v23, %v859_v5 }
  0x28   : > { %1321 = vmatpush3.bf16.msra.mxu1 %v1441_v25  ;;  %1306 = vmatprep.subr.bf16.mxu0 %v1492_v1  ;;  %v1482_v25 = vld [vmem:[%s1799_s1 + $0x1a8] sm:$0xff]  }
  0x29   : > { %1322 = vmatprep.subr.bf16.mxu1 %v1492_v1 }
  0x2b   : > { %1307 = vmatpush3.bf16.msra.mxu0 %v1442_v26  ;;  %v980_v26 = vrot.slane %v1194_v24, 1 }
  0x2c   : > { %1323 = vmatpush3.bf16.msra.mxu1 %v1443_v27  ;;  %1308 = vmatprep.subr.bf16.mxu0 %v1492_v1 }
  0x2d   : > { %1324 = vmatprep.subr.bf16.mxu1 %v1492_v1 }
  0x2f   : > { %1309 = vmatpush3.bf16.msra.mxu0 %v1444_v28 }
  0x30   : > { %1325 = vmatpush3.bf16.msra.mxu1 %v1445_v29  ;;  %1310 = vmatprep.subr.bf16.mxu0 %v1492_v1 }
  0x31   : > { %1326 = vmatprep.subr.bf16.mxu1 %v1492_v1 }
  0x33   : > { %1311 = vmatpush3.bf16.msra.mxu0 %v1446_v34 }
  0x34   : > { %1327 = vmatpush3.bf16.msra.mxu1 %v1447_v36  ;;  %1332 = vmatprep.subr.bf16.mxu0 %v1492_v1 }
  0x35   : > { %1348 = vmatprep.subr.bf16.mxu1 %v1492_v1 }
  0x36   : > { %1313 = vmatmul.mubr.msk.bf16.vlgmr.msra.gmra.mrb[4].mxu0 %vm244_vm1, %v383_v37 }
  0x37   : > { %1333 = vmatpush3.bf16.msra.mxu0 %v1449_v38  ;;  %1329 = vmatmul.mubr.msk.bf16.vlgmr.msra.gmra.mrb[4].mxu1 %vm244_vm1, %v483_v39 }
  0x38   : > { %1349 = vmatpush3.bf16.msra.mxu1 %v1452_v40  ;;  %1334 = vmatprep.subr.bf16.mxu0 %v1492_v1 }
  0x39   : > { %1350 = vmatprep.subr.bf16.mxu1 %v1492_v1  ;;  %1344 = vmatprep.mubr.msk.bf16.mxu0 %vm1493_vm0, %v1492_v1 }
  0x3a   : > { %1360 = vmatprep.mubr.msk.bf16.mxu1 %vm1493_vm0, %v1492_v1 }
  0x3b   : > { %1335 = vmatpush3.bf16.msra.mxu0 %v1453_v41 }
  0x3c   : > { %1351 = vmatpush3.bf16.msra.mxu1 %v1454_v42  ;;  %1336 = vmatprep.subr.bf16.mxu0 %v1492_v1 }
  0x3d   : > { %1352 = vmatprep.subr.bf16.mxu1 %v1492_v1 }
  0x3f   : > { %1337 = vmatpush3.bf16.msra.mxu0 %v1455_v44 }
  0x40   : > { %1353 = vmatpush3.bf16.msra.mxu1 %v1456_v45  ;;  %1338 = vmatprep.subr.bf16.mxu0 %v1492_v1 }
  0x41   : > { %1354 = vmatprep.subr.bf16.mxu1 %v1492_v1 }
  0x43   : > { %1339 = vmatpush3.bf16.msra.mxu0 %v1457_v47 }
  0x44   : > { %1355 = vmatpush3.bf16.msra.mxu1 %v1458_v48  ;;  %1340 = vmatprep.subr.bf16.mxu0 %v1492_v1 }
  0x45   : > { %1356 = vmatprep.subr.bf16.mxu1 %v1492_v1 }
  0x47   : > { %1341 = vmatpush3.bf16.msra.mxu0 %v1459_v51 }
  0x48   : > { %1357 = vmatpush3.bf16.msra.mxu1 %v1460_v52  ;;  %1342 = vmatprep.subr.bf16.mxu0 %v1492_v1 }
  0x49   : > { %1358 = vmatprep.subr.bf16.mxu1 %v1492_v1 }
  0x4b   : > { %1343 = vmatpush3.bf16.msra.mxu0 %v1461_v56 }
  0x4c   : > { %1359 = vmatpush3.bf16.msra.mxu1 %v1462_v58  ;;  %1364 = vmatprep.subr.bf16.mxu0 %v1492_v1 }
  0x4d   : > { %1380 = vmatprep.subr.bf16.mxu1 %v1492_v1 }
  0x4e   : > { %1345 = vmatmul.mubr.msk.bf16.vlgmr.msra.gmra.mrb[8].mxu0 %vm244_vm1, %v587_v59 }
  0x4f   : > { %1365 = vmatpush3.bf16.msra.mxu0 %v1463_v60  ;;  %1361 = vmatmul.mubr.msk.bf16.vlgmr.msra.gmra.mrb[8].mxu1 %vm244_vm1, %v684_v61 }
  0x50   : > { %1381 = vmatpush3.bf16.msra.mxu1 %v1465_v62  ;;  %1366 = vmatprep.subr.bf16.mxu0 %v1492_v1 }
  0x51   : > { %1382 = vmatprep.subr.bf16.mxu1 %v1492_v1  ;;  %1376 = vmatprep.mubr.msk.bf16.mxu0 %vm1493_vm0, %v1492_v1 }
  0x52   : > { %1392 = vmatprep.mubr.msk.bf16.mxu1 %vm1493_vm0, %v1492_v1 }
  0x53   : > { %1367 = vmatpush3.bf16.msra.mxu0 %v1466_v63 }
  0x54   : > { %1383 = vmatpush3.bf16.msra.mxu1 %v1467_v0  ;;  %1368 = vmatprep.subr.bf16.mxu0 %v1492_v1 }
  0x55   : > { %1384 = vmatprep.subr.bf16.mxu1 %v1492_v1 }
  0x57   : > { %1369 = vmatpush3.bf16.msra.mxu0 %v1468_v2 }
  0x58   : > { %1385 = vmatpush3.bf16.msra.mxu1 %v1469_v3  ;;  %1370 = vmatprep.subr.bf16.mxu0 %v1492_v1  ;;  %v1202_v3 = vld [vmem:[%s1800_s2] ss:$0 sm:$0xff] }
  0x59   : > { %1386 = vmatprep.subr.bf16.mxu1 %v1492_v1 }
  0x5b   : > { %1371 = vmatpush3.bf16.msra.mxu0 %v1470_v6 }
  0x5c   : > { %1387 = vmatpush3.bf16.msra.mxu1 %v1471_v8  ;;  %1372 = vmatprep.subr.bf16.mxu0 %v1492_v1 }
  0x5d   : > { %1388 = vmatprep.subr.bf16.mxu1 %v1492_v1 }
  0x5f   : > { %1373 = vmatpush3.bf16.msra.mxu0 %v1472_v9 }
  0x60   : > { %1389 = vmatpush3.bf16.msra.mxu1 %v1473_v11  ;;  %1374 = vmatprep.subr.bf16.mxu0 %v1492_v1 }
  0x61   : > { %1390 = vmatprep.subr.bf16.mxu1 %v1492_v1 }
  0x63   : > { %1375 = vmatpush3.bf16.msra.mxu0 %v1474_v12 }
  0x64   : > { %1391 = vmatpush3.bf16.msra.mxu1 %v1475_v15  ;;  %1396 = vmatprep.subr.bf16.mxu0 %v1492_v1 }
  0x66   : > { %1377 = vmatmul.mubr.msk.bf16.vlgmr.msra.gmra.mrb[12].mxu0 %vm244_vm1, %v765_v16 }
  0x67   : > { %1397 = vmatpush3.bf16.msra.mxu0 %v1476_v17  ;;  %1393 = vmatmul.mubr.msk.bf16.vlgmr.msra.gmra.mrb[12].mxu1 %vm244_vm1, %v883_v18 }
  0x68   : > { %1398 = vmatprep.subr.bf16.mxu0 %v1492_v1  ;;  %1408 = vmatprep.mubr.msk.bf16.mxu0 %vm1493_vm0, %v1492_v1 }
  0x6b   : > { %1399 = vmatpush3.bf16.msra.mxu0 %v1478_v19 }
  0x6c   : > { %1400 = vmatprep.subr.bf16.mxu0 %v1492_v1 }
  0x6f   : > { %1401 = vmatpush3.bf16.msra.mxu0 %v1479_v20 }
  0x70   : > { %1402 = vmatprep.subr.bf16.mxu0 %v1492_v1 }
  0x73   : > { %1403 = vmatpush3.bf16.msra.mxu0 %v1480_v21 }
  0x74   : > { %1404 = vmatprep.subr.bf16.mxu0 %v1492_v1 }
  0x77   : > { %1405 = vmatpush3.bf16.msra.mxu0 %v1481_v22 }
  0x78   : > { %1406 = vmatprep.subr.bf16.mxu0 %v1492_v1 }
  0x7b   : > { %1407 = vmatpush3.bf16.msra.mxu0 %v1482_v25 }
  0x7e   : > { %1409 = vmatmul.mubr.msk.bf16.vlgmr.msra.gmra.mrb[16].mxu0 %vm244_vm1, %v980_v26 }
  0xf1   : > { %v282_v27 = vpop.f32.mrb[0].mxu0 }
  0xf2   : > { %v1282_v28 = vpop.f32.mrb[1].mxu0  ;;  %v361_v29 = vpop.f32.mrb[0].mxu1 }
  0xf3   : > { %v362_v30 = vadd.f32 %v361_v29, %v282_v27  ;;  %v285_v31 = vpop.f32.mrb[2].mxu0  ;;  %v1298_v32 = vpop.f32.mrb[1].mxu1 }
  0xf4   : > { %v1283_v33 = vpop.f32.mrb[3].mxu0  ;;  %v364_v34 = vpop.f32.mrb[2].mxu1 }
  0xf5   : > { %v1299_v35 = vpop.f32.mrb[3].mxu1 }
 0x109   : > { %v457_v36 = vpop.f32.mrb[4].mxu0 }
 0x10a   : > { %v463_v37 = vadd.f32 %v457_v36, %v362_v30  ;;  %v1314_v38 = vpop.f32.mrb[5].mxu0  ;;  %v557_v39 = vpop.f32.mrb[4].mxu1 }
 0x10b   : > { %v460_v40 = vpop.f32.mrb[6].mxu0  ;;  %v1330_v41 = vpop.f32.mrb[5].mxu1 }
 0x10c   : > { %v563_v1 = vadd.f32 %v557_v39, %v463_v37  ;;  %v1315_v42 = vpop.f32.mrb[7].mxu0  ;;  %v560_v43 = vpop.f32.mrb[6].mxu1 }
 0x10d   : > { %v1331_v44 = vpop.f32.mrb[7].mxu1 }
 0x121   : > { %v661_v45 = vpop.f32.mrb[8].mxu0 }
 0x122   : > { %v667_v46 = vadd.f32 %v661_v45, %v563_v1  ;;  %v1346_v47 = vpop.f32.mrb[9].mxu0  ;;  %v758_v48 = vpop.f32.mrb[8].mxu1 }
 0x123   : > { %v664_v49 = vpop.f32.mrb[10].mxu0  ;;  %v1362_v50 = vpop.f32.mrb[9].mxu1 }
 0x124   : > { %v764_v51 = vadd.f32 %v758_v48, %v667_v46  ;;  %v1347_v52 = vpop.f32.mrb[11].mxu0  ;;  %v761_v53 = vpop.f32.mrb[10].mxu1 }
 0x125   : > { %v1363_v54 = vpop.f32.mrb[11].mxu1 }
 0x139   : > { %v851_v55 = vpop.f32.mrb[12].mxu0 }
 0x13a   : > { %v857_v56 = vadd.f32 %v851_v55, %v764_v51  ;;  %v1378_v57 = vpop.f32.mrb[13].mxu0  ;;  %v957_v58 = vpop.f32.mrb[12].mxu1 }
 0x13b   : > { %v854_v59 = vpop.f32.mrb[14].mxu0  ;;  %v1394_v60 = vpop.f32.mrb[13].mxu1 }
 0x13c   : > { %v963_v61 = vadd.f32 %v957_v58, %v857_v56  ;;  %v1379_v62 = vpop.f32.mrb[15].mxu0  ;;  %v960_v63 = vpop.f32.mrb[14].mxu1 }
 0x13d   : > { %v1395_v0 = vpop.f32.mrb[15].mxu1 }
 0x151   : > { %v1054_v2 = vpop.f32.mrb[16].mxu0 }
 0x152   : > { %v1060_v4 = vadd.f32 %v1054_v2, %v963_v61  ;;  %v1410_v5 = vpop.f32.mrb[17].mxu0 }
 0x153   : > { %v1057_v6 = vpop.f32.mrb[18].mxu0 }
 0x154   : > { %v1068_v7 = vadd.f32 %v1202_v3, %v1060_v4  ;;  %v1411_v8 = vpop.f32.mrb[19].mxu0 }
 0x156   : > { %v1069_v9 = vmax.f32 %v1068_v7, 0.0 }
 0x158   : > { %v1070_v10 = vpack.c.bf16 %v1069_v9, %v1069_v9 }
 0x15a   : > { %1071 = vst [vmem:[%s168_s7] sm:$0xf] %v1070_v10 }
 0x15b PF: > { %s13_s12 = sadd.s32 1, %s1490_s12  }
 0x15c   : > { %p10_p4 = scmp.ge.s32.totalorder %s13_s12, 4  }
 0x15e   :  { %12 = sbr.rel (!%p10_p4) target bundleno = 1 (0x1), region = 62 }

// kernel: inception_encoder_forward.33
= control target key start
LH: loop header
LB: loop body
LE: loop exit
PB: predicated region body
PF: predicated region fallthrough
CT: control target
= control target key end

     0   :  { %s576_s12 = smov 0   ;;  %s678_s0 = inlined_call_operand.vmem [shape: bf16[2,20,192], index: 0, kind: input, shape index: {}]   ;;  %s679_s1 = inlined_call_operand.vmem [shape: bf16[192,128], index: 1, kind: input, shape index: {}]   ;;  %s680_s2 = inlined_call_operand.vmem [shape: f32[1,128], index: 2, kind: input, shape index: {}]   ;;  %s681_s3 = inlined_call_operand.vmem [shape: bf16[2,8,128], index: 3, kind: output, shape index: {}]  }
   0x1 LB: > { %s502_s13 = sadd.s32 4294967295, %s553_s12   ;;  %p506_p0 = scmp.ge.s32.totalorder %s553_s12, 1  ;;  %s553_s12 = sphi %s576_s12, %s13_s12  }
   0x2   : > { %p137_p1 = scmp.lt.s32.totalorder %s553_s12, 3 }
   0x4   : > { %p138_p2 = pnand %p506_p0, %p137_p1 }
   0x5   : > { %v535_v0 = vld [vmem:[%s679_s1] sm:$0xff] (!%p138_p2)   ;;  %v555_v1 = vmov (!%p138_p2), 0   ;;  %p160_p3 = scmp.lt.s32.totalorder (!%p138_p2), %s502_s13, 1  ;;  %v536_v2 = vld [vmem:[%s679_s1 + $0x8] sm:$0xff] (!%p138_p2)   ;;  %v537_v3 = vld [vmem:[%s679_s1 + $0x10] sm:$0xff] (!%p138_p2)   ;;  %vm180_vm0 = vcmask (!%p138_p2), 1046528  }
   0x6   : > { %141 = sbr.rel (%p138_p2) target bundleno = 273 (0x111), region = 32  ;;  %406 = vmatprep.subr.bf16.mxu0 (!%p138_p2), %v555_v1  ;;  %v538_v4 = vld [vmem:[%s679_s1 + $0x18] sm:$0xff] (!%p138_p2)   ;;  %vm196_vm1 = vcmask (!%p138_p2), 1045504   ;;  %vm217_vm2 = vcmask (!%p138_p2), 1043456   ;;  %vm233_vm3 = vcmask (!%p138_p2), 1042432   ;;  %v539_v13 = vld [vmem:[%s679_s1 + $0x20] sm:$0xff] (!%p138_p2)  }
   0x7   : > { %407 = vmatpush1.bf16.msra.mxu0 (!%p138_p2), %v535_v0  ;;  %v540_v32 = vld [vmem:[%s679_s1 + $0x28] sm:$0xff] (!%p138_p2)   ;;  %vm249_vm4 = vcmask (!%p138_p2), 1041408   ;;  %v541_v51 = vld [vmem:[%s679_s1 + $0x30] sm:$0xff] (!%p138_p2)   ;;  %vm402_vm5 = vcmask (!%p138_p2), 523264  }
   0x8   : > { %408 = vmatprep.subr.bf16.mxu0 (!%p138_p2), %v555_v1 }
   0xb   : > { %409 = vmatpush1.bf16.msra.mxu0 (!%p138_p2), %v536_v2 }
   0xc   : > { %410 = vmatprep.subr.bf16.mxu0 (!%p138_p2), %v555_v1 }
   0xd   : > { %s683_s13 = smov (!%p160_p3, %s502_s13), 1 }
   0xe   : > { %s525_s18 = smul.u32 24, %s683_s13  ;;  %s508_s19 = sshll.u32 %s683_s13, 2 }
   0xf   : > { %411 = vmatpush1.bf16.msra.mxu0 %v537_v3  ;;  %s168_s22 = scalar_lea.vmem %s681_s3, %s508_s19 }
  0x10   : > { %s602_s23 = scalar_lea.vmem %s678_s0, %s525_s18  ;;  %412 = vmatprep.subr.bf16.mxu0 %v555_v1 }
  0x11   : > { %v170_v5 = vld [vmem:[%s602_s23] sm:$0xff]  ;;  %v173_v6 = vld [vmem:[%s602_s23 + $0x8] sm:$0x11]  ;;  %v265_v50 = vld [vmem:[%s602_s23 + $0x10] sm:$0x11] }
  0x12   : > { %v191_v7 = vld [vmem:[%s602_s23] sm:$0xee]  ;;  %v171_v8 = vunpack.c.l.bf16 %v170_v5  ;;  %v172_v9 = vunpack.c.h.bf16 %v170_v5  ;;  %v174_v10 = vunpack.c.l.bf16 %v173_v6  ;;  %v175_v11 = vunpack.c.h.bf16 %v173_v6  ;;  %v208_v16 = vld [vmem:[%s602_s23 + $0x8] sm:$0x33]  ;;  %v542_v6 = vld [vmem:[%s679_s1 + $0x38] sm:$0xff]  }
  0x13   : > { %v612_v12 = vld [vmem:[%s602_s23] sm:$0xcc]  ;;  %413 = vmatpush1.bf16.msra.mxu0 %v538_v4  ;;  %v192_v14 = vunpack.c.l.bf16 %v191_v7  ;;  %v193_v15 = vunpack.c.h.bf16 %v191_v7  ;;  %v211_v29 = vunpack.c.l.bf16 %v208_v16  ;;  %v212_v30 = vunpack.c.h.bf16 %v208_v16  ;;  %v228_v31 = vld [vmem:[%s602_s23 + $0x8] sm:$0x77] }
  0x14   : > { %v209_v17 = vunpack.c.l.bf16 %v612_v12  ;;  %v210_v18 = vunpack.c.h.bf16 %v612_v12  ;;  %414 = vmatprep.subr.bf16.mxu0 %v555_v1  ;;  %v181_v19 = vrot.slane %v171_v8, 1  ;;  %v182_v20 = vrot.slane %v174_v10, 1  ;;  %v244_v41 = vld [vmem:[%s602_s23] sm:$0x88]  ;;  %v260_v45 = vld [vmem:[%s602_s23 + $0x8] sm:$0xff] }
  0x15   : > { %v184_v21 = vrot.slane %v172_v9, 1  ;;  %v185_v22 = vrot.slane %v175_v11, 1  ;;  %v197_v23 = vrot.slane %v192_v14, 2  ;;  %v198_v24 = vrot.slane %v174_v10, 2  ;;  %v282_v56 = vld [vmem:[%s602_s23 + $0x8] sm:$0xee] }
  0x16   : > { %v200_v25 = vrot.slane %v193_v15, 2  ;;  %v201_v26 = vrot.slane %v175_v11, 2  ;;  %v183_v27 = vsel %vm180_vm0, %v181_v19, %v182_v20  ;;  %v218_v37 = vrot.slane %v209_v17, 4  ;;  %v543_v20 = vld [vmem:[%s679_s1 + $0x40] sm:$0xff]  }
  0x17   : > { %v186_v28 = vsel %vm180_vm0, %v184_v21, %v185_v22  ;;  %415 = vmatpush1.bf16.msra.mxu0 %v539_v13  ;;  %v189_v33 = vadd.f32 %v183_v27, %v171_v8  ;;  %v199_v35 = vsel %vm196_vm1, %v197_v23, %v198_v24  ;;  %v219_v38 = vrot.slane %v211_v29, 4  ;;  %v544_v29 = vld [vmem:[%s679_s1 + $0x48] sm:$0xff]  }
  0x18   : > { %v190_v34 = vadd.f32 %v186_v28, %v172_v9  ;;  %v202_v36 = vsel %vm196_vm1, %v200_v25, %v201_v26  ;;  %416 = vmatprep.subr.bf16.mxu0 %v555_v1  ;;  %v221_v39 = vrot.slane %v210_v18, 4  ;;  %v222_v40 = vrot.slane %v212_v30, 4 }
  0x19   : > { %v205_v42 = vadd.f32 %v199_v35, %v189_v33  ;;  %v230_v44 = vunpack.c.h.bf16 %v228_v31  ;;  %v220_v46 = vsel %vm217_vm2, %v218_v37, %v219_v38  ;;  %v229_v48 = vunpack.c.l.bf16 %v228_v31  ;;  %v545_v35 = vld [vmem:[%s679_s1 + $0x50] sm:$0xff]   ;;  %v546_v38 = vld [vmem:[%s679_s1 + $0x58] sm:$0xff]  }
  0x1a   : > { %v206_v43 = vadd.f32 %v202_v36, %v190_v34  ;;  %v223_v47 = vsel %vm217_vm2, %v221_v39, %v222_v40  ;;  %v237_v49 = vrot.slane %v210_v18, 5  ;;  %v245_v54 = vunpack.c.l.bf16 %v244_v41  ;;  %v509_v40 = vld [vmem:[%s680_s2] ss:$0 sm:$0xff] }
  0x1b   : > { %417 = vmatpush1.bf16.msra.mxu0 %v540_v32  ;;  %v238_v53 = vrot.slane %v230_v44, 5  ;;  %v246_v55 = vunpack.c.h.bf16 %v244_v41  ;;  %v226_v57 = vadd.f32 %v220_v46, %v205_v42  ;;  %v254_v58 = vrot.slane %v230_v44, 6 }
  0x1c   : > { %v227_v52 = vadd.f32 %v223_v47, %v206_v43  ;;  %418 = vmatprep.subr.bf16.mxu0 %v555_v1  ;;  %v261_v59 = vunpack.c.l.bf16 %v260_v45  ;;  %v262_v60 = vunpack.c.h.bf16 %v260_v45  ;;  %v266_v63 = vunpack.c.l.bf16 %v265_v50 }
  0x1d   : > { %v239_v61 = vsel %vm233_vm3, %v237_v49, %v238_v53  ;;  %v253_v62 = vrot.slane %v246_v55, 6  ;;  %v267_v0 = vunpack.c.h.bf16 %v265_v50  ;;  %v284_v4 = vunpack.c.h.bf16 %v282_v56 }
  0x1e   : > { %v243_v2 = vadd.f32 %v239_v61, %v227_v52  ;;  %v275_v3 = vrot.slane %v262_v60, 1  ;;  %v234_v5 = vrot.slane %v209_v17, 5  ;;  %v235_v10 = vrot.slane %v229_v48, 5 }
  0x1f   : > { %419 = vmatpush1.bf16.msra.mxu0 %v541_v51  ;;  %v255_v7 = vsel %vm249_vm4, %v253_v62, %v254_v58  ;;  %v276_v8 = vrot.slane %v267_v0, 1  ;;  %v291_v9 = vrot.slane %v267_v0, 2  ;;  %v290_v12 = vrot.slane %v284_v4, 2 }
  0x20   : > { %420 = vmatprep.subr.bf16.mxu0 %v555_v1  ;;  %v259_v11 = vadd.f32 %v255_v7, %v243_v2  ;;  %v250_v13 = vrot.slane %v245_v54, 6  ;;  %v251_v14 = vrot.slane %v229_v48, 6  ;;  %v236_v16 = vsel %vm233_vm3, %v234_v5, %v235_v10 }
  0x21   : > { %v277_v15 = vsel %vm180_vm0, %v275_v3, %v276_v8  ;;  %v242_v18 = vadd.f32 %v236_v16, %v226_v57  ;;  %v283_v21 = vunpack.c.l.bf16 %v282_v56  ;;  %v292_v22 = vsel %vm196_vm1, %v290_v12, %v291_v9 }
  0x22   : > { %v264_v17 = vadd.f32 %v262_v60, %v259_v11  ;;  %v252_v19 = vsel %vm249_vm4, %v250_v13, %v251_v14  ;;  %v272_v23 = vrot.slane %v261_v59, 1  ;;  %v273_v24 = vrot.slane %v266_v63, 1 }
  0x23   : > { %421 = vmatpush1.bf16.msra.mxu0 %v542_v6  ;;  %v258_v26 = vadd.f32 %v252_v19, %v242_v18  ;;  %v287_v31 = vrot.slane %v283_v21, 2  ;;  %v288_v32 = vrot.slane %v266_v63, 2 }
  0x24   : > { %422 = vmatprep.subr.bf16.mxu0 %v555_v1  ;;  %v281_v25 = vadd.f32 %v277_v15, %v264_v17  ;;  %v274_v30 = vsel %vm180_vm0, %v272_v23, %v273_v24 }
  0x25   : > { %v263_v28 = vadd.f32 %v261_v59, %v258_v26  ;;  %v289_v36 = vsel %vm196_vm1, %v287_v31, %v288_v32 }
  0x26   : > { %v296_v27 = vadd.f32 %v292_v22, %v281_v25 }
  0x27   : > { %423 = vmatpush1.bf16.msra.mxu0 %v543_v20  ;;  %v280_v34 = vadd.f32 %v274_v30, %v263_v28 }
  0x28   : > { %424 = vmatprep.subr.bf16.mxu0 %v555_v1  ;;  %v298_v33 = vpack.c.bf16 %v296_v27, %v296_v27 }
  0x29   : > { %v295_v37 = vadd.f32 %v289_v36, %v280_v34 }
  0x2a   : > { %522 = vmatprep.mubr.msk.bf16.mxu0 %vm402_vm5, %v298_v33 }
  0x2b   : > { %425 = vmatpush1.bf16.msra.mxu0 %v544_v29  ;;  %v297_v39 = vpack.c.bf16 %v295_v37, %v295_v37 }
  0x2c   : > { %426 = vmatprep.subr.bf16.mxu0 %v555_v1 }
  0x2f   : > { %427 = vmatpush1.bf16.msra.mxu0 %v545_v35 }
  0x30   : > { %428 = vmatprep.subr.bf16.mxu0 %v555_v1 }
  0x33   : > { %429 = vmatpush1.bf16.msra.mxu0 %v546_v38 }
  0x36   : > { %439 = vmatmul.mubr.bf16.vlgmr.msra.gmra.mrb[0].mxu0 %v297_v39 }
 0x109   : > { %v440_v41 = vpop.f32.mrb[0].mxu0 }
 0x10a   : > { %v441_v42 = vadd.f32 %v509_v40, %v440_v41  ;;  %v442_v43 = vpop.f32.mrb[1].mxu0 }
 0x10b   : > { %v443_v44 = vpop.f32.mrb[2].mxu0 }
 0x10c   : > { %v446_v45 = vmax.f32 %v441_v42, 0.0  ;;  %v444_v46 = vpop.f32.mrb[3].mxu0 }
 0x10e   : > { %v447_v47 = vpack.c.bf16 %v446_v45, %v446_v45 }
 0x110   : > { %448 = vst [vmem:[%s168_s22] sm:$0xf] %v447_v47 }
 0x111 PF: > { %s13_s12 = sadd.s32 1, %s553_s12  }
 0x112   : > { %p10_p4 = scmp.ge.s32.totalorder %s13_s12, 4  }
 0x114   :  { %12 = sbr.rel (!%p10_p4) target bundleno = 1 (0x1), region = 62 }

// kernel: inception_encoder_forward.34
= control target key start
LH: loop header
LB: loop body
LE: loop exit
PB: predicated region body
PF: predicated region fallthrough
CT: control target
= control target key end

     0   :  { %v49_v35 = vlaneseq  ;;  %s493_s1 = inlined_call_operand.vmem [shape: bf16[256,256], index: 1, kind: input, shape index: {}]   ;;  %s494_s0 = inlined_call_operand.vmem [shape: bf16[8,256], index: 0, kind: input, shape index: {}]   ;;  %s495_s2 = inlined_call_operand.vmem [shape: f32[1,256], index: 2, kind: input, shape index: {}]   ;;  %s496_s3 = inlined_call_operand.vmem [shape: bf16[8,256], index: 3, kind: output, shape index: {}]  }
   0x1   :  { %v318_v0 = vld [vmem:[%s493_s1 + $0x4] ss:$8 sps:$4 sm:$0xff]   ;;  %v320_v1 = vld [vmem:[%s493_s1] ss:$8 sps:$4 sm:$0xff]   ;;  %v321_v2 = vld [vmem:[%s493_s1 + $0x14] ss:$8 sps:$4 sm:$0xff]  }
   0x2   :  { %226 = vmatprep.subr.bf16.mxu0 %v318_v0  ;;  %v323_v3 = vld [vmem:[%s493_s1 + $0x10] ss:$8 sps:$4 sm:$0xff]   ;;  %v324_v4 = vld [vmem:[%s493_s1 + $0x24] ss:$8 sps:$4 sm:$0xff]   ;;  %v326_v5 = vld [vmem:[%s493_s1 + $0x20] ss:$8 sps:$4 sm:$0xff]  }
   0x3   :  { %227 = vmatpush1.bf16.msra.mxu0 %v320_v1  ;;  %v327_v6 = vld [vmem:[%s493_s1 + $0x34] ss:$8 sps:$4 sm:$0xff]   ;;  %v329_v7 = vld [vmem:[%s493_s1 + $0x30] ss:$8 sps:$4 sm:$0xff]   ;;  %v330_v8 = vld [vmem:[%s493_s1 + $0x44] ss:$8 sps:$4 sm:$0xff]  }
   0x4   :  { %228 = vmatprep.subr.bf16.mxu0 %v321_v2  ;;  %v332_v9 = vld [vmem:[%s493_s1 + $0x40] ss:$8 sps:$4 sm:$0xff]   ;;  %v333_v10 = vld [vmem:[%s493_s1 + $0x54] ss:$8 sps:$4 sm:$0xff]   ;;  %v335_v11 = vld [vmem:[%s493_s1 + $0x50] ss:$8 sps:$4 sm:$0xff]  }
   0x5   :  { %v336_v12 = vld [vmem:[%s493_s1 + $0x64] ss:$8 sps:$4 sm:$0xff]   ;;  %v338_v15 = vld [vmem:[%s493_s1 + $0x60] ss:$8 sps:$4 sm:$0xff]   ;;  %v339_v16 = vld [vmem:[%s493_s1 + $0x74] ss:$8 sps:$4 sm:$0xff]  }
   0x6   :  { %v14_v13 = vld [vmem:[%s494_s0] sm:$0xff]  ;;  %v341_v17 = vld [vmem:[%s493_s1 + $0x70] ss:$8 sps:$4 sm:$0xff]   ;;  %v345_v20 = vld [vmem:[%s493_s1 + $0x94] ss:$8 sps:$4 sm:$0xff]   ;;  %v50_v36 = vshrl.u32 %v49_v35, 7 }
   0x7   :  { %229 = vmatpush1.bf16.msra.mxu0 %v323_v3  ;;  %v283_v14 = vcombine.high %v14_v13, %v14_v13  ;;  %v342_v18 = vld [vmem:[%s493_s1 + $0x84] ss:$8 sps:$4 sm:$0xff]   ;;  %v344_v19 = vld [vmem:[%s493_s1 + $0x80] ss:$8 sps:$4 sm:$0xff]   ;;  %v347_v21 = vld [vmem:[%s493_s1 + $0x90] ss:$8 sps:$4 sm:$0xff]   ;;  %v282_v34 = vcombine.low %v14_v13, %v14_v13 }
   0x8   :  { %230 = vmatprep.subr.bf16.mxu0 %v324_v4  ;;  %v348_v22 = vld [vmem:[%s493_s1 + $0xa4] ss:$8 sps:$4 sm:$0xff]   ;;  %v350_v23 = vld [vmem:[%s493_s1 + $0xa0] ss:$8 sps:$4 sm:$0xff]   ;;  %v351_v24 = vld [vmem:[%s493_s1 + $0xb4] ss:$8 sps:$4 sm:$0xff]  }
   0x9   :  { %258 = vmatprep.mubr.bf16.mxu0 %v283_v14  ;;  %v353_v25 = vld [vmem:[%s493_s1 + $0xb0] ss:$8 sps:$4 sm:$0xff]   ;;  %v354_v26 = vld [vmem:[%s493_s1 + $0xc4] ss:$8 sps:$4 sm:$0xff]   ;;  %v356_v27 = vld [vmem:[%s493_s1 + $0xc0] ss:$8 sps:$4 sm:$0xff]  }
   0xa   :  { %v357_v28 = vld [vmem:[%s493_s1 + $0xd4] ss:$8 sps:$4 sm:$0xff]   ;;  %v359_v29 = vld [vmem:[%s493_s1 + $0xd0] ss:$8 sps:$4 sm:$0xff]   ;;  %v360_v30 = vld [vmem:[%s493_s1 + $0xe4] ss:$8 sps:$4 sm:$0xff]  }
   0xb   :  { %231 = vmatpush1.bf16.msra.mxu0 %v326_v5  ;;  %v362_v31 = vld [vmem:[%s493_s1 + $0xe0] ss:$8 sps:$4 sm:$0xff]   ;;  %v363_v32 = vld [vmem:[%s493_s1 + $0xf4] ss:$8 sps:$4 sm:$0xff]   ;;  %v365_v33 = vld [vmem:[%s493_s1 + $0xf0] ss:$8 sps:$4 sm:$0xff]  }
   0xc   :  { %232 = vmatprep.subr.bf16.mxu0 %v327_v6  ;;  %v51_v37 = vsub.s32 0, %v50_v36  ;;  %v47_v38 = vld [vmem:[%s495_s2] sm:$0x3]  ;;  %v55_v39 = vsub.s32 1, %v50_v36 }
   0xe   :  { %v52_v40 = vrot.slane %v47_v38, %v51_v37  ;;  %v56_v41 = vrot.slane %v47_v38, %v55_v39 }
   0xf   :  { %233 = vmatpush1.bf16.msra.mxu0 %v329_v7 }
  0x10   :  { %234 = vmatprep.subr.bf16.mxu0 %v330_v8 }
  0x13   :  { %235 = vmatpush1.bf16.msra.mxu0 %v332_v9 }
  0x14   :  { %236 = vmatprep.subr.bf16.mxu0 %v333_v10 }
  0x17   :  { %237 = vmatpush1.bf16.msra.mxu0 %v335_v11 }
  0x18   :  { %238 = vmatprep.subr.bf16.mxu0 %v336_v12 }
  0x1b   :  { %239 = vmatpush1.bf16.msra.mxu0 %v338_v15 }
  0x1c   :  { %240 = vmatprep.subr.bf16.mxu0 %v339_v16 }
  0x1f   :  { %241 = vmatpush1.bf16.msra.mxu0 %v341_v17 }
  0x20   :  { %242 = vmatprep.subr.bf16.mxu0 %v342_v18 }
  0x23   :  { %243 = vmatpush1.bf16.msra.mxu0 %v344_v19 }
  0x24   :  { %244 = vmatprep.subr.bf16.mxu0 %v345_v20 }
  0x27   :  { %245 = vmatpush1.bf16.msra.mxu0 %v347_v21 }
  0x28   :  { %246 = vmatprep.subr.bf16.mxu0 %v348_v22 }
  0x2b   :  { %247 = vmatpush1.bf16.msra.mxu0 %v350_v23 }
  0x2c   :  { %248 = vmatprep.subr.bf16.mxu0 %v351_v24 }
  0x2f   :  { %249 = vmatpush1.bf16.msra.mxu0 %v353_v25 }
  0x30   :  { %250 = vmatprep.subr.bf16.mxu0 %v354_v26 }
  0x33   :  { %251 = vmatpush1.bf16.msra.mxu0 %v356_v27 }
  0x34   :  { %252 = vmatprep.subr.bf16.mxu0 %v357_v28 }
  0x37   :  { %253 = vmatpush1.bf16.msra.mxu0 %v359_v29 }
  0x38   :  { %254 = vmatprep.subr.bf16.mxu0 %v360_v30 }
  0x3b   :  { %255 = vmatpush1.bf16.msra.mxu0 %v362_v31 }
  0x3c   :  { %256 = vmatprep.subr.bf16.mxu0 %v363_v32 }
  0x3f   :  { %257 = vmatpush1.bf16.msra.mxu0 %v365_v33 }
  0x42   :  { %259 = vmatmul.mubr.bf16.vlgmr.msra.gmra.mrb[0].mxu0 %v282_v34 }
 0x115   :  { %v260_v42 = vpop.f32.mrb[0].mxu0 }
 0x116   :  { %v261_v43 = vadd.f32 %v260_v42, %v52_v40  ;;  %v262_v44 = vpop.f32.mrb[1].mxu0 }
 0x117   :  { %v263_v45 = vadd.f32 %v262_v44, %v56_v41  ;;  %v264_v46 = vpop.f32.mrb[2].mxu0 }
 0x118   :  { %v267_v47 = vmax.f32 %v261_v43, 0.0  ;;  %v265_v48 = vpop.f32.mrb[3].mxu0 }
 0x119   :  { %v268_v49 = vmax.f32 %v263_v45, 0.0 }
 0x11b   :  { %v317_v50 = vpack.c.bf16 %v268_v49, %v267_v47 }
 0x11d   :  { %277 = vst [vmem:[%s496_s3] sm:$0xff] %v317_v50 }

// kernel: inception_encoder_forward.30
= control target key start
LH: loop header
LB: loop body
LE: loop exit
PB: predicated region body
PF: predicated region fallthrough
CT: control target
= control target key end

     0   :  { %s2882_s12 = smov 0   ;;  %s3359_s0 = inlined_call_operand.vmem [shape: bf16[2,42,48], index: 0, kind: input, shape index: {}]   ;;  %s3360_s1 = inlined_call_operand.vmem [shape: bf16[1200,128], index: 1, kind: input, shape index: {}]   ;;  %s3361_s2 = inlined_call_operand.vmem [shape: f32[1,128], index: 2, kind: input, shape index: {}]   ;;  %s3362_s3 = inlined_call_operand.vmem [shape: bf16[2,12,128], index: 3, kind: output, shape index: {}]  }
   0x1 LB: > { %s2244_s13 = sadd.s32 4294967295, %s2858_s12   ;;  %p2248_p0 = scmp.ge.s32.totalorder %s2858_s12, 1  ;;  %s2858_s12 = sphi %s2882_s12, %s13_s12  }
   0x2   : > { %p137_p1 = scmp.lt.s32.totalorder %s2858_s12, 3 }
   0x4   : > { %p138_p2 = pnand %p2248_p0, %p137_p1 }
   0x5   : > { %v2749_v0 = vld [vmem:[%s3360_s1 + $0x18] sm:$0xff] (!%p138_p2)   ;;  %v2860_v1 = vmov (!%p138_p2), 0.0   ;;  %v2750_v2 = vld [vmem:[%s3360_s1] sm:$0xff] (!%p138_p2)   ;;  %vm2861_vm0 = vmmov (!%p138_p2), 0   ;;  %p161_p3 = scmp.lt.s32.totalorder (!%p138_p2), %s2244_s13, 1  ;;  %v2752_v4 = vld [vmem:[%s3360_s1 + $0x8] sm:$0xff] (!%p138_p2)  }
   0x6   : > { %141 = sbr.rel (%p138_p2) target bundleno = 393 (0x189), region = 32  ;;  %2488 = vmatprep.subr.bf16.mxu0 (!%p138_p2), %v2860_v1  ;;  %2498 = vmatprep.subr.bf16.mxu1 (!%p138_p2), %v2860_v1  ;;  %v2751_v3 = vld [vmem:[%s3360_s1 + $0x20] sm:$0xff] (!%p138_p2)   ;;  %v2753_v5 = vld [vmem:[%s3360_s1 + $0x28] sm:$0xff] (!%p138_p2)   ;;  %v2754_v6 = vld [vmem:[%s3360_s1 + $0x10] sm:$0xff] (!%p138_p2)   ;;  %vm217_vm1 = vcmask (!%p138_p2), 392192   ;;  %vm576_vm2 = vcmask (!%p138_p2), 1044480  }
   0x7   : > { %2489 = vmatpush3.bf16.msra.mxu0 (!%p138_p2), %v2749_v0  ;;  %2494 = vmatprep.mubr.msk.bf16.mxu0 (!%p138_p2), %vm2861_vm0, %v2860_v1  ;;  %v2758_v12 = vld [vmem:[%s3360_s1 + $0x48] sm:$0xff] (!%p138_p2)   ;;  %v2757_v18 = vld [vmem:[%s3360_s1 + $0x30] sm:$0xff] (!%p138_p2)   ;;  %v2759_v24 = vld [vmem:[%s3360_s1 + $0x38] sm:$0xff] (!%p138_p2)   ;;  %vm654_vm3 = vsmask.f32 (!%p138_p2), 4352 }
   0x8   : > { %2499 = vmatpush3.bf16.msra.mxu1 (!%p138_p2), %v2750_v2  ;;  %2490 = vmatprep.subr.bf16.mxu0 (!%p138_p2), %v2860_v1  ;;  %v2760_v20 = vld [vmem:[%s3360_s1 + $0x50] sm:$0xff] (!%p138_p2)   ;;  %v2762_v25 = vld [vmem:[%s3360_s1 + $0x58] sm:$0xff] (!%p138_p2)   ;;  %v2761_v29 = vld [vmem:[%s3360_s1 + $0x40] sm:$0xff] (!%p138_p2)   ;;  %vm1058_vm4 = vsmask.f32 (!%p138_p2), 5376 }
   0x9   : > { %2500 = vmatprep.subr.bf16.mxu1 (!%p138_p2), %v2860_v1  ;;  %2504 = vmatprep.mubr.msk.bf16.mxu1 (!%p138_p2), %vm2861_vm0, %v2860_v1  ;;  %v2766_v31 = vld [vmem:[%s3360_s1 + $0x78] sm:$0xff] (!%p138_p2)   ;;  %v2765_v35 = vld [vmem:[%s3360_s1 + $0x60] sm:$0xff] (!%p138_p2)   ;;  %v2767_v39 = vld [vmem:[%s3360_s1 + $0x68] sm:$0xff] (!%p138_p2)  }
   0xa   : > { %v2768_v37 = vld [vmem:[%s3360_s1 + $0x80] sm:$0xff] (!%p138_p2)   ;;  %v2770_v40 = vld [vmem:[%s3360_s1 + $0x88] sm:$0xff] (!%p138_p2)   ;;  %v2769_v46 = vld [vmem:[%s3360_s1 + $0x70] sm:$0xff] (!%p138_p2)  }
   0xb   : > { %2491 = vmatpush3.bf16.msra.mxu0 (!%p138_p2), %v2751_v3  ;;  %v2775_v48 = vld [vmem:[%s3360_s1 + $0xa8] sm:$0xff] (!%p138_p2)   ;;  %v2772_v51 = vld [vmem:[%s3360_s1 + $0x90] sm:$0xff] (!%p138_p2)   ;;  %v2776_v57 = vld [vmem:[%s3360_s1 + $0x98] sm:$0xff] (!%p138_p2)  }
   0xc   : > { %2501 = vmatpush3.bf16.msra.mxu1 (!%p138_p2), %v2752_v4  ;;  %2492 = vmatprep.subr.bf16.mxu0 (!%p138_p2), %v2860_v1  ;;  %v2777_v52 = vld [vmem:[%s3360_s1 + $0xb0] sm:$0xff] (!%p138_p2)   ;;  %v2779_v58 = vld [vmem:[%s3360_s1 + $0xb8] sm:$0xff] (!%p138_p2)   ;;  %v2778_v2 = vld [vmem:[%s3360_s1 + $0xa0] sm:$0xff] (!%p138_p2)  }
   0xd   : > { %s3364_s13 = smov (!%p161_p3, %s2244_s13), 1  ;;  %2502 = vmatprep.subr.bf16.mxu1 %v2860_v1 }
   0xe   : > { %s2738_s24 = smul.u32 24, %s3364_s13 }
   0xf   : > { %2493 = vmatpush3.bf16.msra.mxu0 %v2753_v5  ;;  %v2783_v5 = vld [vmem:[%s3360_s1 + $0xd8] sm:$0xff]  }
  0x10   : > { %s2924_s29 = scalar_lea.vmem %s3359_s0, %s2738_s24  ;;  %2503 = vmatpush3.bf16.msra.mxu1 %v2754_v6  ;;  %2508 = vmatprep.subr.bf16.mxu0 %v2860_v1  ;;  %v2781_v6 = vld [vmem:[%s3360_s1 + $0xc0] sm:$0xff]   ;;  %s2385_s24 = sshll.u32 %s3364_s13, 3 }
  0x11   : > { %v172_v7 = vld [vmem:[%s2924_s29] sm:$0xf]  ;;  %v180_v8 = vld [vmem:[%s2924_s29 + $0x4] sm:$0x7]  ;;  %2518 = vmatprep.subr.bf16.mxu1 %v2860_v1  ;;  %v644_v44 = vld [vmem:[%s2924_s29 + $0x8] sm:$0x3]  ;;  %s170_s27 = scalar_lea.vmem %s3362_s3, %s2385_s24 }
  0x12   : > { %v173_v9 = vld [vmem:[%s2924_s29 + $0x4] sm:$0x3]  ;;  %v2252_v10 = vcombine.low %v172_v7, %v180_v8  ;;  %v327_v15 = vld [vmem:[%s2924_s29] sm:$0xe]  ;;  %v2283_v49 = vcombine.low %v644_v44, %v644_v44  ;;  %v807_v0 = vld [vmem:[%s2924_s29 + $0x8] sm:$0x7] }
  0x13   : > { %v2257_v11 = vcombine.low %v172_v7, %v173_v9  ;;  %v2936_v16 = vld [vmem:[%s2924_s29 + $0x4] sm:$0xf]  ;;  %v2262_v28 = vcombine.low %v327_v15, %v180_v8  ;;  %v559_v32 = vld [vmem:[%s2924_s29] sm:$0x8] }
  0x14   : > { %v193_v13 = vshrl.u32 %v2252_v10, 16  ;;  %v195_v14 = vshll.u32 %v2252_v10, 16  ;;  %v2267_v19 = vcombine.low %v327_v15, %v2936_v16  ;;  %v2970_v33 = vld [vmem:[%s2924_s29 + $0x4] sm:$0xf]  ;;  %v484_v41 = vld [vmem:[%s2924_s29] sm:$0xc] }
  0x15   : > { %2505 = vmatmul.mubr.msk.bf16.vlgmr.msra.gmra.mrb[0].mxu1 %vm217_vm1, %v2257_v11  ;;  %v337_v34 = vrot.slane %v2262_v28, 1  ;;  %v2774_v36 = vld [vmem:[%s2924_s29 + $0x8] ss:$0 sps:$4 sm:$0x11]   ;;  %v2277_v38 = vcombine.low %v559_v32, %v2970_v33  ;;  %v2272_v45 = vcombine.low %v484_v41, %v2936_v16  ;;  %v664_v55 = vshrl.u32 %v2283_v49, 16  ;;  %v2785_v7 = vld [vmem:[%s3360_s1 + $0xe0] sm:$0xff]  }
  0x16   : > { %v197_v17 = vrot.slane %v195_v14, 1  ;;  %2519 = vmatpush3.bf16.msra.mxu1 %v2758_v12  ;;  %2524 = vmatprep.mubr.msk.bf16.mxu1 %vm2861_vm0, %v2860_v1  ;;  %v413_v22 = vshrl.u32 %v2267_v19, 16  ;;  %v416_v23 = vshll.u32 %v2267_v19, 16  ;;  %v578_v43 = vrot.slane %v2774_v36, 3  ;;  %v888_v9 = vld [vmem:[%s2924_s29 + $0x4] sm:$0xe] }
  0x17   : > { %2520 = vmatprep.subr.bf16.mxu1 %v2860_v1  ;;  %v577_v42 = vrot.slane %v2277_v38, 3  ;;  %v494_v50 = vrot.slane %v2272_v45, 2  ;;  %v656_v53 = vshrl.u32 %v2277_v38, 16  ;;  %v659_v54 = vshll.u32 %v2277_v38, 16  ;;  %v1041_v10 = vld [vmem:[%s2924_s29 + $0x4] sm:$0xc] }
  0x18   : > { %v198_v21 = vor.u32 %v197_v17, %v193_v13  ;;  %v415_v26 = vrot.slane %v413_v22, 1  ;;  %v418_v27 = vrot.slane %v416_v23, 2  ;;  %v667_v56 = vshll.u32 %v2283_v49, 16  ;;  %v3052_v12 = vld [vmem:[%s2924_s29 + $0x8] sm:$0xf]  ;;  %v2795_v36 = vld [vmem:[%s3360_s1 + $0x118] sm:$0xff]  }
  0x19   : > { %v579_v47 = vsel %vm576_vm2, %v577_v42, %v578_v43  ;;  %v658_v59 = vrot.slane %v656_v53, 3  ;;  %v661_v60 = vrot.slane %v659_v54, 4  ;;  %v666_v61 = vrot.slane %v664_v55, 3  ;;  %v2784_v16 = vld [vmem:[%s3360_s1 + $0xc8] sm:$0xff]   ;;  %v1136_v32 = vld [vmem:[%s2924_s29 + $0x4] sm:$0x8] }
  0x1a   : > { %2495 = vmatmul.mubr.msk.bf16.vlgmr.msra.gmra.mrb[0].mxu0 %vm217_vm1, %v198_v21  ;;  %2521 = vmatpush3.bf16.msra.mxu1 %v2760_v20  ;;  %v419_v30 = vor.u32 %v418_v27, %v415_v26  ;;  %v669_v62 = vrot.slane %v667_v56, 4  ;;  %v2288_v63 = vcombine.low %v2970_v33, %v644_v44  ;;  %v2293_v8 = vcombine.low %v2970_v33, %v807_v0  ;;  %v2787_v17 = vld [vmem:[%s3360_s1 + $0xe8] sm:$0xff]   ;;  %v2786_v20 = vld [vmem:[%s3360_s1 + $0xd0] sm:$0xff]   ;;  %v2794_v41 = vld [vmem:[%s3360_s1 + $0x100] sm:$0xff]  }
  0x1b   : > { %2509 = vmatpush3.bf16.msra.mxu0 %v2757_v18  ;;  %2522 = vmatprep.subr.bf16.mxu1 %v2860_v1  ;;  %v662_v3 = vor.u32 %v661_v60, %v658_v59  ;;  %v2298_v13 = vcombine.low %v888_v9, %v807_v0  ;;  %v2308_v15 = vcombine.low %v1041_v10, %v3052_v12  ;;  %v3074_v22 = vld [vmem:[%s2924_s29 + $0xc] ss:$0 sps:$4 sm:$0x11]   ;;  %v2789_v26 = vld [vmem:[%s3360_s1 + $0xf0] sm:$0xff]   ;;  %v2800_v42 = vld [vmem:[%s3360_s1 + $0x138] sm:$0xff]  }
  0x1c   : > { %2510 = vmatprep.subr.bf16.mxu0 %v2860_v1  ;;  %2514 = vmatprep.mubr.msk.bf16.mxu0 %vm2861_vm0, %v2860_v1  ;;  %v670_v4 = vor.u32 %v669_v62, %v666_v61  ;;  %v820_v14 = vshll.u32 %v2293_v8, 16  ;;  %v818_v18 = vshrl.u32 %v2293_v8, 16  ;;  %v2793_v27 = vld [vmem:[%s3360_s1 + $0x110] sm:$0xff]   ;;  %v1068_v28 = vshll.u32 %v3074_v22, 16  ;;  %v3093_v33 = vld [vmem:[%s2924_s29 + $0xc] sm:$0x3] }
  0x1d   : > { %v898_v19 = vrot.slane %v2298_v13, 1  ;;  %v1060_v23 = vshrl.u32 %v2308_v15, 16  ;;  %v2801_v55 = vld [vmem:[%s3360_s1 + $0x128] sm:$0xff]   ;;  %v2803_v59 = vld [vmem:[%s3360_s1 + $0x130] sm:$0xff]   ;;  %v1147_v60 = vrot.slane %v3074_v22, 3  ;;  %v2812_v8 = vld [vmem:[%s3360_s1 + $0x178] sm:$0xff]  }
  0x1e   : > { %2523 = vmatpush3.bf16.msra.mxu1 %v2762_v25  ;;  %v671_v11 = vsel %vm654_vm3, %v662_v3, %v670_v4  ;;  %v822_v21 = vrot.slane %v820_v14, 1  ;;  %v2791_v25 = vld [vmem:[%s3360_s1 + $0x108] sm:$0xff]   ;;  %v1070_v38 = vrot.slane %v1068_v28, 3  ;;  %v2806_v0 = vld [vmem:[%s3360_s1 + $0x150] sm:$0xff]   ;;  %v2811_v10 = vld [vmem:[%s3360_s1 + $0x160] sm:$0xff]   ;;  %v2324_v14 = vcombine.low %v3052_v12, %v3093_v33 }
  0x1f   : > { %2511 = vmatpush3.bf16.msra.mxu0 %v2759_v24  ;;  %2538 = vmatprep.subr.bf16.mxu1 %v2860_v1  ;;  %v1063_v24 = vshll.u32 %v2308_v15, 16  ;;  %v2804_v56 = vld [vmem:[%s3360_s1 + $0x148] sm:$0xff]   ;;  %v2817_v13 = vld [vmem:[%s3360_s1 + $0x198] sm:$0xff]   ;;  %v2820_v28 = vld [vmem:[%s3360_s1 + $0x190] sm:$0xff]  }
  0x20   : > { %2512 = vmatprep.subr.bf16.mxu0 %v2860_v1  ;;  %v1375_v3 = vld [vmem:[%s2924_s29 + $0x8] sm:$0xe]  ;;  %v1376_v4 = vld [vmem:[%s2924_s29 + $0xc] sm:$0x7] }
  0x21   : > { %2525 = vmatmul.mubr.msk.bf16.vlgmr.msra.gmra.mrb[4].mxu1 %vm217_vm1, %v419_v30  ;;  %v1062_v30 = vrot.slane %v1060_v23, 2  ;;  %v2821_v22 = vld [vmem:[%s3360_s1 + $0x1a8] sm:$0xff]  }
  0x22   : > { %2539 = vmatpush3.bf16.msra.mxu1 %v2766_v31  ;;  %2544 = vmatprep.mubr.msk.bf16.mxu1 %vm2861_vm0, %v2860_v1  ;;  %v1065_v31 = vrot.slane %v1063_v24, 3  ;;  %v1610_v23 = vld [vmem:[%s2924_s29 + $0x8] sm:$0xc]  ;;  %v3217_v24 = vld [vmem:[%s2924_s29 + $0xc] sm:$0xf] }
  0x23   : > { %2513 = vmatpush3.bf16.msra.mxu0 %v2761_v29  ;;  %2540 = vmatprep.subr.bf16.mxu1 %v2860_v1  ;;  %v823_v29 = vor.u32 %v822_v21, %v818_v18  ;;  %v1535_v18 = vld [vmem:[%s2924_s29 + $0x8] sm:$0xc] }
  0x24   : > { %2528 = vmatprep.subr.bf16.mxu0 %v2860_v1  ;;  %v2818_v21 = vld [vmem:[%s3360_s1 + $0x188] sm:$0xff]  }
  0x26   : > { %2515 = vmatmul.mubr.msk.bf16.vlgmr.msra.gmra.mrb[4].mxu0 %vm217_vm1, %v337_v34  ;;  %2541 = vmatpush3.bf16.msra.mxu1 %v2768_v37  ;;  %v3099_v34 = vcombine.low %v1136_v32, %v3052_v12  ;;  %v1066_v37 = vor.u32 %v1065_v31, %v1062_v30  ;;  %v2344_v30 = vcombine.low %v1610_v23, %v3217_v24  ;;  %v1704_v31 = vld [vmem:[%s2924_s29 + $0x8] sm:$0x8] }
  0x27   : > { %2529 = vmatpush3.bf16.msra.mxu0 %v2765_v35  ;;  %2542 = vmatprep.subr.bf16.mxu1 %v2860_v1  ;;  %v2792_v35 = vld [vmem:[%s3360_s1 + $0xf8] sm:$0xff]  }
  0x28   : > { %2530 = vmatprep.subr.bf16.mxu0 %v2860_v1  ;;  %2534 = vmatprep.mubr.msk.bf16.mxu0 %vm2861_vm0, %v2860_v1  ;;  %v1224_v43 = vshrl.u32 %v3099_v34, 16  ;;  %v1227_v44 = vshll.u32 %v3099_v34, 16  ;;  %v1071_v45 = vsel %vm1058_vm4, %v1066_v37, %v1070_v38  ;;  %v1146_v61 = vrot.slane %v3099_v34, 3  ;;  %v2822_v34 = vld [vmem:[%s3360_s1 + $0x1b0] sm:$0xff]  }
  0x29   : > { %v1631_v37 = vshll.u32 %v2344_v30, 16  ;;  %v2350_v38 = vcombine.low %v1704_v31, %v3217_v24 }
  0x2a   : > { %2543 = vmatpush3.bf16.msra.mxu1 %v2770_v40  ;;  %v2796_v40 = vld [vmem:[%s2924_s29 + $0x4] sm:$0xfc]  }
  0x2b   : > { %2531 = vmatpush3.bf16.msra.mxu0 %v2767_v39  ;;  %2558 = vmatprep.subr.bf16.mxu1 %v2860_v1  ;;  %v2319_v39 = vcombine.low %v3093_v33, %v3093_v33  ;;  %v976_v49 = vrot.slane %v2796_v40, 2  ;;  %v2830_v33 = vld [vmem:[%s2924_s29 + $0x10] ss:$0 sps:$4 sm:$0x11]   ;;  %v2828_v40 = vld [vmem:[%s3360_s1 + $0x1d8] sm:$0xff]  }
  0x2c   : > { %2532 = vmatprep.subr.bf16.mxu0 %v2860_v1 }
  0x2d   : > { %2545 = vmatmul.mubr.msk.bf16.vlgmr.msra.gmra.mrb[8].mxu1 %vm217_vm1, %v579_v47  ;;  %v1235_v47 = vshll.u32 %v2319_v39, 16 }
  0x2e   : > { %2559 = vmatpush3.bf16.msra.mxu1 %v2775_v48  ;;  %2564 = vmatprep.mubr.msk.bf16.mxu1 %vm2861_vm0, %v2860_v1  ;;  %v2797_v48 = vld [vmem:[%s3360_s1 + $0x120] sm:$0xff]  }
  0x2f   : > { %2533 = vmatpush3.bf16.msra.mxu0 %v2769_v46  ;;  %2560 = vmatprep.subr.bf16.mxu1 %v2860_v1  ;;  %v1232_v46 = vshrl.u32 %v2319_v39, 16  ;;  %v1237_v54 = vrot.slane %v1235_v47, 4  ;;  %v2825_v39 = vld [vmem:[%s3360_s1 + $0x1b8] sm:$0xff]  }
  0x30   : > { %2548 = vmatprep.subr.bf16.mxu0 %v2860_v1 }
  0x31   : > { %v1234_v53 = vrot.slane %v1232_v46, 3  ;;  %v3252_v46 = vld [vmem:[%s2924_s29 + $0x10] sm:$0x7] }
  0x32   : > { %2535 = vmatmul.mubr.msk.bf16.vlgmr.msra.gmra.mrb[8].mxu0 %vm217_vm1, %v494_v50  ;;  %2561 = vmatpush3.bf16.msra.mxu1 %v2777_v52  ;;  %v2802_v50 = vld [vmem:[%s3360_s1 + $0x140] sm:$0xff]   ;;  %v1229_v52 = vrot.slane %v1227_v44, 4  ;;  %v1714_v44 = vrot.slane %v2350_v38, 3  ;;  %v2360_v47 = vcombine.low %v3217_v24, %v3252_v46 }
  0x33   : > { %2549 = vmatpush3.bf16.msra.mxu0 %v2772_v51  ;;  %2562 = vmatprep.subr.bf16.mxu1 %v2860_v1  ;;  %v1226_v51 = vrot.slane %v1224_v43, 3  ;;  %v1633_v43 = vrot.slane %v1631_v37, 3 }
  0x34   : > { %2550 = vmatprep.subr.bf16.mxu0 %v2860_v1  ;;  %2554 = vmatprep.mubr.msk.bf16.mxu0 %vm2861_vm0, %v2860_v1 }
  0x36   : > { %2563 = vmatpush3.bf16.msra.mxu1 %v2779_v58  ;;  %v1238_v58 = vor.u32 %v1237_v54, %v1234_v53  ;;  %v1868_v53 = vshll.u32 %v2360_v47, 16 }
  0x37   : > { %2551 = vmatpush3.bf16.msra.mxu0 %v2776_v57  ;;  %2578 = vmatprep.subr.bf16.mxu1 %v2860_v1  ;;  %v1230_v57 = vor.u32 %v1229_v52, %v1226_v51  ;;  %v2833_v52 = vld [vmem:[%s3360_s1 + $0x1f8] sm:$0xff]  }
  0x38   : > { %2552 = vmatprep.subr.bf16.mxu0 %v2860_v1 }
  0x39   : > { %2565 = vmatmul.mubr.msk.bf16.vlgmr.msra.gmra.mrb[12].mxu1 %vm217_vm1, %v2288_v63  ;;  %v1239_v62 = vsel %vm654_vm3, %v1230_v57, %v1238_v58  ;;  %v2808_v63 = vld [vmem:[%s3360_s1 + $0x168] sm:$0xff]   ;;  %v1866_v58 = vshrl.u32 %v2360_v47, 16 }
  0x3a   : > { %2579 = vmatpush3.bf16.msra.mxu1 %v2783_v5  ;;  %2584 = vmatprep.mubr.msk.bf16.mxu1 %vm2861_vm0, %v2860_v1  ;;  %v1148_v5 = vsel %vm576_vm2, %v1146_v61, %v1147_v60  ;;  %v2834_v57 = vld [vmem:[%s3360_s1 + $0x1e8] sm:$0xff]  }
  0x3b   : > { %2553 = vmatpush3.bf16.msra.mxu0 %v2778_v2  ;;  %2580 = vmatprep.subr.bf16.mxu1 %v2860_v1  ;;  %v2810_v2 = vld [vmem:[%s3360_s1 + $0x170] sm:$0xff]   ;;  %v2837_v60 = vld [vmem:[%s3360_s1 + $0x208] sm:$0xff]  }
  0x3c   : > { %2568 = vmatprep.subr.bf16.mxu0 %v2860_v1  ;;  %v1936_v61 = vld [vmem:[%s2924_s29 + $0xc] sm:$0xe] }
  0x3e   : > { %2555 = vmatmul.mubr.msk.bf16.vlgmr.msra.gmra.mrb[12].mxu0 %vm217_vm1, %v671_v11  ;;  %2581 = vmatpush3.bf16.msra.mxu1 %v2785_v7  ;;  %v2809_v7 = vld [vmem:[%s3360_s1 + $0x158] sm:$0xff]   ;;  %v1453_v11 = vld [vmem:[%s2924_s29 + $0xc] sm:$0xf] }
  0x3f   : > { %2569 = vmatpush3.bf16.msra.mxu0 %v2781_v6  ;;  %2582 = vmatprep.subr.bf16.mxu1 %v2860_v1  ;;  %v2329_v6 = vcombine.low %v1375_v3, %v1376_v4  ;;  %v2334_v15 = vcombine.low %v1375_v3, %v1453_v11  ;;  %v1781_v3 = vld [vmem:[%s2924_s29 + $0x10] sm:$0x3]  ;;  %v2841_v4 = vld [vmem:[%s3360_s1 + $0x228] sm:$0xff]  }
  0x40   : > { %2570 = vmatprep.subr.bf16.mxu0 %v2860_v1  ;;  %2574 = vmatprep.mubr.msk.bf16.mxu0 %vm2861_vm0, %v2860_v1 }
  0x41   : > { %v1388_v9 = vrot.slane %v2329_v6, 1  ;;  %v1464_v12 = vshrl.u32 %v2334_v15, 16 }
  0x42   : > { %2583 = vmatpush3.bf16.msra.mxu1 %v2787_v17  ;;  %v2819_v17 = vld [vmem:[%s3360_s1 + $0x1a0] sm:$0xff]  }
  0x43   : > { %2571 = vmatpush3.bf16.msra.mxu0 %v2784_v16  ;;  %2598 = vmatprep.subr.bf16.mxu1 %v2860_v1  ;;  %v2814_v16 = vld [vmem:[%s3360_s1 + $0x180] sm:$0xff]  }
  0x44   : > { %2572 = vmatprep.subr.bf16.mxu0 %v2860_v1 }
  0x45   : > { %2585 = vmatmul.mubr.msk.bf16.vlgmr.msra.gmra.mrb[16].mxu1 %vm217_vm1, %v898_v19  ;;  %v1467_v19 = vshll.u32 %v2334_v15, 16  ;;  %v2365_v15 = vcombine.low %v1936_v61, %v3252_v46 }
  0x46   : > { %2599 = vmatpush3.bf16.msra.mxu1 %v2791_v25  ;;  %2604 = vmatprep.mubr.msk.bf16.mxu1 %vm2861_vm0, %v2860_v1  ;;  %v1466_v25 = vrot.slane %v1464_v12, 1  ;;  %v2848_v12 = vld [vmem:[%s3360_s1 + $0x240] sm:$0xff]  }
  0x47   : > { %2573 = vmatpush3.bf16.msra.mxu0 %v2786_v20  ;;  %2600 = vmatprep.subr.bf16.mxu1 %v2860_v1  ;;  %v2339_v20 = vcombine.low %v1535_v18, %v1453_v11  ;;  %v1946_v18 = vrot.slane %v2365_v15, 1 }
  0x48   : > { %2588 = vmatprep.subr.bf16.mxu0 %v2860_v1 }
  0x4a   : > { %2575 = vmatmul.mubr.msk.bf16.vlgmr.msra.gmra.mrb[16].mxu0 %vm217_vm1, %v823_v29  ;;  %2601 = vmatpush3.bf16.msra.mxu1 %v2793_v27  ;;  %v1545_v27 = vrot.slane %v2339_v20, 2  ;;  %v2824_v29 = vld [vmem:[%s3360_s1 + $0x1c8] sm:$0xff]  }
  0x4b   : > { %2589 = vmatpush3.bf16.msra.mxu0 %v2789_v26  ;;  %2602 = vmatprep.subr.bf16.mxu1 %v2860_v1  ;;  %v1469_v26 = vrot.slane %v1467_v19, 2  ;;  %v2849_v19 = vld [vmem:[%s3360_s1 + $0x248] sm:$0xff]  }
  0x4c   : > { %2590 = vmatprep.subr.bf16.mxu0 %v2860_v1  ;;  %2594 = vmatprep.mubr.msk.bf16.mxu0 %vm2861_vm0, %v2860_v1  ;;  %v2093_v20 = vld [vmem:[%s2924_s29 + $0xc] sm:$0xc] }
  0x4d   : > { %v1470_v32 = vor.u32 %v1469_v26, %v1466_v25 }
  0x4e   : > { %2603 = vmatpush3.bf16.msra.mxu1 %v2795_v36  ;;  %v1628_v36 = vshrl.u32 %v2344_v30, 16 }
  0x4f   : > { %2591 = vmatpush3.bf16.msra.mxu0 %v2792_v35  ;;  %2618 = vmatprep.subr.bf16.mxu1 %v2860_v1  ;;  %v2826_v35 = vld [vmem:[%s3360_s1 + $0x1d0] sm:$0xff]  }
  0x50   : > { %2592 = vmatprep.subr.bf16.mxu0 %v2860_v1 }
  0x51   : > { %2605 = vmatmul.mubr.msk.bf16.vlgmr.msra.gmra.mrb[20].mxu1 %vm217_vm1, %v1071_v45  ;;  %v1715_v45 = vrot.slane %v2830_v33, 3 }
  0x52   : > { %2619 = vmatpush3.bf16.msra.mxu1 %v2800_v42  ;;  %2624 = vmatprep.mubr.msk.bf16.mxu1 %vm2861_vm0, %v2860_v1  ;;  %v1630_v42 = vrot.slane %v1628_v36, 2 }
  0x53   : > { %2593 = vmatpush3.bf16.msra.mxu0 %v2794_v41  ;;  %2620 = vmatprep.subr.bf16.mxu1 %v2860_v1  ;;  %v1636_v41 = vshll.u32 %v2830_v33, 16  ;;  %v1716_v51 = vsel %vm576_vm2, %v1714_v44, %v1715_v45 }
  0x54   : > { %2608 = vmatprep.subr.bf16.mxu0 %v2860_v1 }
  0x56   : > { %2595 = vmatmul.mubr.msk.bf16.vlgmr.msra.gmra.mrb[20].mxu0 %vm217_vm1, %v976_v49  ;;  %2621 = vmatpush3.bf16.msra.mxu1 %v2802_v50  ;;  %v1634_v49 = vor.u32 %v1633_v43, %v1630_v42  ;;  %v1638_v50 = vrot.slane %v1636_v41, 3 }
  0x57   : > { %2609 = vmatpush3.bf16.msra.mxu0 %v2797_v48  ;;  %2622 = vmatprep.subr.bf16.mxu1 %v2860_v1  ;;  %v2827_v48 = vld [vmem:[%s3360_s1 + $0x1c0] sm:$0xff]  }
  0x58   : > { %2610 = vmatprep.subr.bf16.mxu0 %v2860_v1  ;;  %2614 = vmatprep.mubr.msk.bf16.mxu0 %vm2861_vm0, %v2860_v1  ;;  %v1639_v54 = vsel %vm1058_vm4, %v1634_v49, %v1638_v50 }
  0x5a   : > { %2623 = vmatpush3.bf16.msra.mxu1 %v2804_v56  ;;  %v2835_v56 = vld [vmem:[%s3360_s1 + $0x200] sm:$0xff]  }
  0x5b   : > { %2611 = vmatpush3.bf16.msra.mxu0 %v2801_v55  ;;  %2638 = vmatprep.subr.bf16.mxu1 %v2860_v1  ;;  %v2831_v55 = vld [vmem:[%s3360_s1 + $0x1e0] sm:$0xff]  }
  0x5c   : > { %2612 = vmatprep.subr.bf16.mxu0 %v2860_v1 }
  0x5d   : > { %2625 = vmatmul.mubr.msk.bf16.vlgmr.msra.gmra.mrb[24].mxu1 %vm217_vm1, %v1239_v62  ;;  %v2011_v62 = vld [vmem:[%s2924_s29 + $0x10] sm:$0xf] }
  0x5e   : > { %2639 = vmatpush3.bf16.msra.mxu1 %v2808_v63  ;;  %2644 = vmatprep.mubr.msk.bf16.mxu1 %vm2861_vm0, %v2860_v1 }
  0x5f   : > { %2613 = vmatpush3.bf16.msra.mxu0 %v2803_v59  ;;  %2640 = vmatprep.subr.bf16.mxu1 %v2860_v1  ;;  %v1870_v59 = vrot.slane %v1868_v53, 1 }
  0x60   : > { %2628 = vmatprep.subr.bf16.mxu0 %v2860_v1 }
  0x61   : > { %v1871_v63 = vor.u32 %v1870_v59, %v1866_v58 }
  0x62   : > { %2615 = vmatmul.mubr.msk.bf16.vlgmr.msra.gmra.mrb[24].mxu0 %vm217_vm1, %v1148_v5  ;;  %2641 = vmatpush3.bf16.msra.mxu1 %v2810_v2  ;;  %v2836_v2 = vld [vmem:[%s3360_s1 + $0x1f0] sm:$0xff]   ;;  %v2355_v5 = vcombine.low %v3217_v24, %v1781_v3 }
  0x63   : > { %2629 = vmatpush3.bf16.msra.mxu0 %v2806_v0  ;;  %2642 = vmatprep.subr.bf16.mxu1 %v2860_v1  ;;  %v2370_v0 = vcombine.low %v1936_v61, %v2011_v62 }
  0x64   : > { %2630 = vmatprep.subr.bf16.mxu0 %v2860_v1  ;;  %2634 = vmatprep.mubr.msk.bf16.mxu0 %vm2861_vm0, %v2860_v1 }
  0x65   : > { %v2022_v6 = vshrl.u32 %v2370_v0, 16 }
  0x66   : > { %2643 = vmatpush3.bf16.msra.mxu1 %v2812_v8  ;;  %v2839_v8 = vld [vmem:[%s3360_s1 + $0x210] sm:$0xff]  }
  0x67   : > { %2631 = vmatpush3.bf16.msra.mxu0 %v2809_v7  ;;  %2658 = vmatprep.subr.bf16.mxu1 %v2860_v1  ;;  %v2025_v7 = vshll.u32 %v2370_v0, 16 }
  0x68   : > { %2632 = vmatprep.subr.bf16.mxu0 %v2860_v1 }
  0x69   : > { %2645 = vmatmul.mubr.msk.bf16.vlgmr.msra.gmra.mrb[28].mxu1 %vm217_vm1, %v1388_v9  ;;  %v2843_v9 = vld [vmem:[%s3360_s1 + $0x230] sm:$0xff]   ;;  %v2027_v11 = vrot.slane %v2025_v7, 2 }
  0x6a   : > { %2659 = vmatpush3.bf16.msra.mxu1 %v2817_v13  ;;  %2664 = vmatprep.mubr.msk.bf16.mxu1 %vm2861_vm0, %v2860_v1  ;;  %v2842_v13 = vld [vmem:[%s3360_s1 + $0x218] sm:$0xff]  }
  0x6b   : > { %2633 = vmatpush3.bf16.msra.mxu0 %v2811_v10  ;;  %2660 = vmatprep.subr.bf16.mxu1 %v2860_v1  ;;  %v2024_v10 = vrot.slane %v2022_v6, 1 }
  0x6c   : > { %2648 = vmatprep.subr.bf16.mxu0 %v2860_v1 }
  0x6e   : > { %2635 = vmatmul.mubr.msk.bf16.vlgmr.msra.gmra.mrb[28].mxu0 %vm217_vm1, %v2324_v14  ;;  %2661 = vmatpush3.bf16.msra.mxu1 %v2819_v17  ;;  %v2845_v14 = vld [vmem:[%s3360_s1 + $0x238] sm:$0xff]   ;;  %v2844_v17 = vld [vmem:[%s3360_s1 + $0x220] sm:$0xff]  }
  0x6f   : > { %2649 = vmatpush3.bf16.msra.mxu0 %v2814_v16  ;;  %2662 = vmatprep.subr.bf16.mxu1 %v2860_v1  ;;  %v2028_v16 = vor.u32 %v2027_v11, %v2024_v10 }
  0x70   : > { %2650 = vmatprep.subr.bf16.mxu0 %v2860_v1  ;;  %2654 = vmatprep.mubr.msk.bf16.mxu0 %vm2861_vm0, %v2860_v1 }
  0x72   : > { %2663 = vmatpush3.bf16.msra.mxu1 %v2821_v22  ;;  %v2850_v22 = vld [vmem:[%s3360_s1 + $0x250] sm:$0xff]  }
  0x73   : > { %2651 = vmatpush3.bf16.msra.mxu0 %v2818_v21  ;;  %2678 = vmatprep.subr.bf16.mxu1 %v2860_v1  ;;  %v2375_v21 = vcombine.low %v2093_v20, %v2011_v62 }
  0x74   : > { %2652 = vmatprep.subr.bf16.mxu0 %v2860_v1 }
  0x75   : > { %2665 = vmatmul.mubr.msk.bf16.vlgmr.msra.gmra.mrb[32].mxu1 %vm217_vm1, %v1545_v27  ;;  %v2103_v23 = vrot.slane %v2375_v21, 2 }
  0x76   : > { %2679 = vmatpush3.bf16.msra.mxu1 %v2824_v29  ;;  %2684 = vmatprep.mubr.msk.bf16.mxu1 %vm2861_vm0, %v2860_v1 }
  0x77   : > { %2653 = vmatpush3.bf16.msra.mxu0 %v2820_v28  ;;  %2680 = vmatprep.subr.bf16.mxu1 %v2860_v1 }
  0x78   : > { %2668 = vmatprep.subr.bf16.mxu0 %v2860_v1 }
  0x7a   : > { %2655 = vmatmul.mubr.msk.bf16.vlgmr.msra.gmra.mrb[32].mxu0 %vm217_vm1, %v1470_v32  ;;  %2681 = vmatpush3.bf16.msra.mxu1 %v2826_v35 }
  0x7b   : > { %2669 = vmatpush3.bf16.msra.mxu0 %v2822_v34  ;;  %2682 = vmatprep.subr.bf16.mxu1 %v2860_v1 }
  0x7c   : > { %2670 = vmatprep.subr.bf16.mxu0 %v2860_v1  ;;  %2674 = vmatprep.mubr.msk.bf16.mxu0 %vm2861_vm0, %v2860_v1 }
  0x7e   : > { %2683 = vmatpush3.bf16.msra.mxu1 %v2828_v40 }
  0x7f   : > { %2671 = vmatpush3.bf16.msra.mxu0 %v2825_v39  ;;  %2698 = vmatprep.subr.bf16.mxu1 %v2860_v1 }
  0x80   : > { %2672 = vmatprep.subr.bf16.mxu0 %v2860_v1 }
  0x81   : > { %2685 = vmatmul.mubr.msk.bf16.vlgmr.msra.gmra.mrb[36].mxu1 %vm217_vm1, %v1716_v51 }
  0x82   : > { %2699 = vmatpush3.bf16.msra.mxu1 %v2833_v52  ;;  %2704 = vmatprep.mubr.msk.bf16.mxu1 %vm2861_vm0, %v2860_v1 }
  0x83   : > { %2673 = vmatpush3.bf16.msra.mxu0 %v2827_v48  ;;  %2700 = vmatprep.subr.bf16.mxu1 %v2860_v1 }
  0x84   : > { %2688 = vmatprep.subr.bf16.mxu0 %v2860_v1 }
  0x86   : > { %2675 = vmatmul.mubr.msk.bf16.vlgmr.msra.gmra.mrb[36].mxu0 %vm217_vm1, %v1639_v54  ;;  %2701 = vmatpush3.bf16.msra.mxu1 %v2835_v56 }
  0x87   : > { %2689 = vmatpush3.bf16.msra.mxu0 %v2831_v55  ;;  %2702 = vmatprep.subr.bf16.mxu1 %v2860_v1 }
  0x88   : > { %2690 = vmatprep.subr.bf16.mxu0 %v2860_v1  ;;  %2694 = vmatprep.mubr.msk.bf16.mxu0 %vm2861_vm0, %v2860_v1 }
  0x8a   : > { %2703 = vmatpush3.bf16.msra.mxu1 %v2837_v60 }
  0x8b   : > { %2691 = vmatpush3.bf16.msra.mxu0 %v2834_v57  ;;  %2718 = vmatprep.subr.bf16.mxu1 %v2860_v1 }
  0x8c   : > { %2692 = vmatprep.subr.bf16.mxu0 %v2860_v1 }
  0x8d   : > { %2705 = vmatmul.mubr.msk.bf16.vlgmr.msra.gmra.mrb[40].mxu1 %vm217_vm1, %v1871_v63 }
  0x8e   : > { %2719 = vmatpush3.bf16.msra.mxu1 %v2841_v4  ;;  %2724 = vmatprep.mubr.msk.bf16.mxu1 %vm2861_vm0, %v2860_v1 }
  0x8f   : > { %2693 = vmatpush3.bf16.msra.mxu0 %v2836_v2  ;;  %2720 = vmatprep.subr.bf16.mxu1 %v2860_v1 }
  0x90   : > { %2708 = vmatprep.subr.bf16.mxu0 %v2860_v1 }
  0x92   : > { %2695 = vmatmul.mubr.msk.bf16.vlgmr.msra.gmra.mrb[40].mxu0 %vm217_vm1, %v2355_v5  ;;  %2721 = vmatpush3.bf16.msra.mxu1 %v2843_v9 }
  0x93   : > { %2709 = vmatpush3.bf16.msra.mxu0 %v2839_v8  ;;  %2722 = vmatprep.subr.bf16.mxu1 %v2860_v1 }
  0x94   : > { %2710 = vmatprep.subr.bf16.mxu0 %v2860_v1  ;;  %2714 = vmatprep.mubr.msk.bf16.mxu0 %vm2861_vm0, %v2860_v1 }
  0x96   : > { %2723 = vmatpush3.bf16.msra.mxu1 %v2845_v14 }
  0x97   : > { %2711 = vmatpush3.bf16.msra.mxu0 %v2842_v13 }
  0x98   : > { %2712 = vmatprep.subr.bf16.mxu0 %v2860_v1 }
  0x99   : > { %2725 = vmatmul.mubr.msk.bf16.vlgmr.msra.gmra.mrb[44].mxu1 %vm217_vm1, %v2028_v16 }
  0x9b   : > { %2713 = vmatpush3.bf16.msra.mxu0 %v2844_v17 }
  0x9c   : > { %2728 = vmatprep.subr.bf16.mxu0 %v2860_v1 }
  0x9e   : > { %2715 = vmatmul.mubr.msk.bf16.vlgmr.msra.gmra.mrb[44].mxu0 %vm217_vm1, %v1946_v18 }
  0x9f   : > { %2729 = vmatpush3.bf16.msra.mxu0 %v2848_v12  ;;  %2734 = vmatprep.mubr.msk.bf16.mxu0 %vm2861_vm0, %v2860_v1 }
  0xa0   : > { %2730 = vmatprep.subr.bf16.mxu0 %v2860_v1 }
  0xa3   : > { %2731 = vmatpush3.bf16.msra.mxu0 %v2849_v19 }
  0xa4   : > { %2732 = vmatprep.subr.bf16.mxu0 %v2860_v1 }
  0xa7   : > { %2733 = vmatpush3.bf16.msra.mxu0 %v2850_v22 }
  0xaa   : > { %2735 = vmatmul.mubr.msk.bf16.vlgmr.msra.gmra.mrb[48].mxu0 %vm217_vm1, %v2103_v23 }
  0xe8   : > { %v320_v24 = vpop.f32.mrb[0].mxu1 }
  0xe9   : > { %v2506_v25 = vpop.f32.mrb[1].mxu1 }
  0xea   : > { %v323_v26 = vpop.f32.mrb[2].mxu1 }
  0xeb   : > { %v2507_v27 = vpop.f32.mrb[3].mxu1 }
  0xed   : > { %v255_v28 = vpop.f32.mrb[0].mxu0 }
  0xee   : > { %v321_v29 = vadd.f32 %v320_v24, %v255_v28  ;;  %v2496_v30 = vpop.f32.mrb[1].mxu0 }
  0xef   : > { %v258_v31 = vpop.f32.mrb[2].mxu0 }
  0xf0   : > { %v324_v32 = vadd.f32 %v323_v26, %v258_v31  ;;  %v2497_v33 = vpop.f32.mrb[3].mxu0 }
  0xf4   : > { %v475_v34 = vpop.f32.mrb[4].mxu1 }
  0xf5   : > { %v2526_v35 = vpop.f32.mrb[5].mxu1 }
  0xf6   : > { %v478_v36 = vpop.f32.mrb[6].mxu1 }
  0xf7   : > { %v2527_v37 = vpop.f32.mrb[7].mxu1 }
  0xf9   : > { %v393_v38 = vpop.f32.mrb[4].mxu0 }
  0xfa   : > { %v400_v1 = vadd.f32 %v393_v38, %v321_v29  ;;  %v2516_v39 = vpop.f32.mrb[5].mxu0 }
  0xfb   : > { %v396_v40 = vpop.f32.mrb[6].mxu0 }
  0xfc   : > { %v401_v41 = vadd.f32 %v396_v40, %v324_v32  ;;  %v482_v42 = vadd.f32 %v475_v34, %v400_v1  ;;  %v2517_v43 = vpop.f32.mrb[7].mxu0 }
  0xfe   : > { %v483_v44 = vadd.f32 %v478_v36, %v401_v41 }
 0x100   : > { %v635_v45 = vpop.f32.mrb[8].mxu1 }
 0x101   : > { %v2546_v46 = vpop.f32.mrb[9].mxu1 }
 0x102   : > { %v638_v47 = vpop.f32.mrb[10].mxu1 }
 0x103   : > { %v2547_v48 = vpop.f32.mrb[11].mxu1 }
 0x105   : > { %v550_v49 = vpop.f32.mrb[8].mxu0 }
 0x106   : > { %v557_v50 = vadd.f32 %v550_v49, %v482_v42  ;;  %v2536_v51 = vpop.f32.mrb[9].mxu0 }
 0x107   : > { %v553_v52 = vpop.f32.mrb[10].mxu0 }
 0x108   : > { %v558_v53 = vadd.f32 %v553_v52, %v483_v44  ;;  %v642_v54 = vadd.f32 %v635_v45, %v557_v50  ;;  %v2537_v55 = vpop.f32.mrb[11].mxu0 }
 0x10a   : > { %v643_v56 = vadd.f32 %v638_v47, %v558_v53 }
 0x10c   : > { %v798_v57 = vpop.f32.mrb[12].mxu1 }
 0x10d   : > { %v2566_v58 = vpop.f32.mrb[13].mxu1 }
 0x10e   : > { %v801_v59 = vpop.f32.mrb[14].mxu1 }
 0x10f   : > { %v2567_v60 = vpop.f32.mrb[15].mxu1 }
 0x111   : > { %v727_v61 = vpop.f32.mrb[12].mxu0 }
 0x112   : > { %v734_v62 = vadd.f32 %v727_v61, %v642_v54  ;;  %v2556_v63 = vpop.f32.mrb[13].mxu0 }
 0x113   : > { %v730_v0 = vpop.f32.mrb[14].mxu0 }
 0x114   : > { %v735_v2 = vadd.f32 %v730_v0, %v643_v56  ;;  %v805_v3 = vadd.f32 %v798_v57, %v734_v62  ;;  %v2557_v4 = vpop.f32.mrb[15].mxu0 }
 0x116   : > { %v806_v5 = vadd.f32 %v801_v59, %v735_v2 }
 0x118   : > { %v954_v6 = vpop.f32.mrb[16].mxu1 }
 0x119   : > { %v2586_v7 = vpop.f32.mrb[17].mxu1 }
 0x11a   : > { %v957_v8 = vpop.f32.mrb[18].mxu1 }
 0x11b   : > { %v2587_v9 = vpop.f32.mrb[19].mxu1 }
 0x11d   : > { %v879_v10 = vpop.f32.mrb[16].mxu0 }
 0x11e   : > { %v886_v11 = vadd.f32 %v879_v10, %v805_v3  ;;  %v2576_v13 = vpop.f32.mrb[17].mxu0 }
 0x11f   : > { %v882_v14 = vpop.f32.mrb[18].mxu0 }
 0x120   : > { %v887_v15 = vadd.f32 %v882_v14, %v806_v5  ;;  %v961_v16 = vadd.f32 %v954_v6, %v886_v11  ;;  %v2577_v17 = vpop.f32.mrb[19].mxu0 }
 0x122   : > { %v962_v18 = vadd.f32 %v957_v8, %v887_v15 }
 0x124   : > { %v1127_v12 = vpop.f32.mrb[20].mxu1 }
 0x125   : > { %v2606_v19 = vpop.f32.mrb[21].mxu1 }
 0x126   : > { %v1130_v20 = vpop.f32.mrb[22].mxu1 }
 0x127   : > { %v2607_v21 = vpop.f32.mrb[23].mxu1 }
 0x129   : > { %v1032_v22 = vpop.f32.mrb[20].mxu0 }
 0x12a   : > { %v1039_v23 = vadd.f32 %v1032_v22, %v961_v16  ;;  %v2596_v24 = vpop.f32.mrb[21].mxu0 }
 0x12b   : > { %v1035_v25 = vpop.f32.mrb[22].mxu0 }
 0x12c   : > { %v1040_v26 = vadd.f32 %v1035_v25, %v962_v18  ;;  %v1134_v27 = vadd.f32 %v1127_v12, %v1039_v23  ;;  %v2597_v28 = vpop.f32.mrb[23].mxu0 }
 0x12e   : > { %v1135_v29 = vadd.f32 %v1130_v20, %v1040_v26 }
 0x130   : > { %v1295_v30 = vpop.f32.mrb[24].mxu1 }
 0x131   : > { %v2626_v31 = vpop.f32.mrb[25].mxu1 }
 0x132   : > { %v1298_v32 = vpop.f32.mrb[26].mxu1 }
 0x133   : > { %v2627_v33 = vpop.f32.mrb[27].mxu1 }
 0x135   : > { %v1204_v34 = vpop.f32.mrb[24].mxu0 }
 0x136   : > { %v1211_v35 = vadd.f32 %v1204_v34, %v1134_v27  ;;  %v2616_v36 = vpop.f32.mrb[25].mxu0 }
 0x137   : > { %v1207_v37 = vpop.f32.mrb[26].mxu0 }
 0x138   : > { %v1212_v38 = vadd.f32 %v1207_v37, %v1135_v29  ;;  %v1302_v1 = vadd.f32 %v1295_v30, %v1211_v35  ;;  %v2617_v39 = vpop.f32.mrb[27].mxu0 }
 0x13a   : > { %v1303_v40 = vadd.f32 %v1298_v32, %v1212_v38 }
 0x13c   : > { %v1444_v41 = vpop.f32.mrb[28].mxu1 }
 0x13d   : > { %v2646_v42 = vpop.f32.mrb[29].mxu1 }
 0x13e   : > { %v1447_v43 = vpop.f32.mrb[30].mxu1 }
 0x13f   : > { %v2647_v44 = vpop.f32.mrb[31].mxu1 }
 0x141   : > { %v1366_v45 = vpop.f32.mrb[28].mxu0 }
 0x142   : > { %v1373_v46 = vadd.f32 %v1366_v45, %v1302_v1  ;;  %v2636_v47 = vpop.f32.mrb[29].mxu0  ;;  %v2380_v1 = vld [vmem:[%s3361_s2] ss:$0 sm:$0xff] }
 0x143   : > { %v1369_v48 = vpop.f32.mrb[30].mxu0 }
 0x144   : > { %v1374_v49 = vadd.f32 %v1369_v48, %v1303_v40  ;;  %v1451_v50 = vadd.f32 %v1444_v41, %v1373_v46  ;;  %v2637_v51 = vpop.f32.mrb[31].mxu0 }
 0x146   : > { %v1452_v52 = vadd.f32 %v1447_v43, %v1374_v49 }
 0x148   : > { %v1601_v53 = vpop.f32.mrb[32].mxu1 }
 0x149   : > { %v2666_v54 = vpop.f32.mrb[33].mxu1 }
 0x14a   : > { %v1604_v55 = vpop.f32.mrb[34].mxu1 }
 0x14b   : > { %v2667_v56 = vpop.f32.mrb[35].mxu1 }
 0x14d   : > { %v1526_v57 = vpop.f32.mrb[32].mxu0 }
 0x14e   : > { %v1533_v58 = vadd.f32 %v1526_v57, %v1451_v50  ;;  %v2656_v59 = vpop.f32.mrb[33].mxu0 }
 0x14f   : > { %v1529_v60 = vpop.f32.mrb[34].mxu0 }
 0x150   : > { %v1534_v61 = vadd.f32 %v1529_v60, %v1452_v52  ;;  %v1608_v62 = vadd.f32 %v1601_v53, %v1533_v58  ;;  %v2657_v63 = vpop.f32.mrb[35].mxu0 }
 0x152   : > { %v1609_v0 = vadd.f32 %v1604_v55, %v1534_v61 }
 0x154   : > { %v1772_v2 = vpop.f32.mrb[36].mxu1 }
 0x155   : > { %v2686_v3 = vpop.f32.mrb[37].mxu1 }
 0x156   : > { %v1775_v4 = vpop.f32.mrb[38].mxu1 }
 0x157   : > { %v2687_v5 = vpop.f32.mrb[39].mxu1 }
 0x159   : > { %v1695_v6 = vpop.f32.mrb[36].mxu0 }
 0x15a   : > { %v1702_v7 = vadd.f32 %v1695_v6, %v1608_v62  ;;  %v2676_v8 = vpop.f32.mrb[37].mxu0 }
 0x15b   : > { %v1698_v9 = vpop.f32.mrb[38].mxu0 }
 0x15c   : > { %v1703_v10 = vadd.f32 %v1698_v9, %v1609_v0  ;;  %v1779_v11 = vadd.f32 %v1772_v2, %v1702_v7  ;;  %v2677_v13 = vpop.f32.mrb[39].mxu0 }
 0x15e   : > { %v1780_v14 = vadd.f32 %v1775_v4, %v1703_v10 }
 0x160   : > { %v1927_v15 = vpop.f32.mrb[40].mxu1 }
 0x161   : > { %v2706_v16 = vpop.f32.mrb[41].mxu1 }
 0x162   : > { %v1930_v17 = vpop.f32.mrb[42].mxu1 }
 0x163   : > { %v2707_v18 = vpop.f32.mrb[43].mxu1 }
 0x165   : > { %v1846_v12 = vpop.f32.mrb[40].mxu0 }
 0x166   : > { %v1853_v19 = vadd.f32 %v1846_v12, %v1779_v11  ;;  %v2696_v20 = vpop.f32.mrb[41].mxu0 }
 0x167   : > { %v1849_v21 = vpop.f32.mrb[42].mxu0 }
 0x168   : > { %v1854_v22 = vadd.f32 %v1849_v21, %v1780_v14  ;;  %v1934_v23 = vadd.f32 %v1927_v15, %v1853_v19  ;;  %v2697_v24 = vpop.f32.mrb[43].mxu0 }
 0x16a   : > { %v1935_v25 = vadd.f32 %v1930_v17, %v1854_v22 }
 0x16c   : > { %v2084_v26 = vpop.f32.mrb[44].mxu1 }
 0x16d   : > { %v2726_v27 = vpop.f32.mrb[45].mxu1 }
 0x16e   : > { %v2087_v28 = vpop.f32.mrb[46].mxu1 }
 0x16f   : > { %v2727_v29 = vpop.f32.mrb[47].mxu1 }
 0x171   : > { %v2002_v30 = vpop.f32.mrb[44].mxu0 }
 0x172   : > { %v2009_v31 = vadd.f32 %v2002_v30, %v1934_v23  ;;  %v2716_v32 = vpop.f32.mrb[45].mxu0 }
 0x173   : > { %v2005_v33 = vpop.f32.mrb[46].mxu0 }
 0x174   : > { %v2010_v34 = vadd.f32 %v2005_v33, %v1935_v25  ;;  %v2091_v35 = vadd.f32 %v2084_v26, %v2009_v31  ;;  %v2717_v36 = vpop.f32.mrb[47].mxu0 }
 0x176   : > { %v2092_v37 = vadd.f32 %v2087_v28, %v2010_v34 }
 0x17d   : > { %v2159_v38 = vpop.f32.mrb[48].mxu0 }
 0x17e   : > { %v2166_v39 = vadd.f32 %v2159_v38, %v2091_v35  ;;  %v2736_v40 = vpop.f32.mrb[49].mxu0 }
 0x17f   : > { %v2162_v41 = vpop.f32.mrb[50].mxu0 }
 0x180   : > { %v2175_v42 = vadd.f32 %v2380_v1, %v2166_v39  ;;  %v2167_v43 = vadd.f32 %v2162_v41, %v2092_v37  ;;  %v2737_v44 = vpop.f32.mrb[51].mxu0 }
 0x182   : > { %v2177_v45 = vmax.f32 %v2175_v42, 0.0  ;;  %v2176_v46 = vadd.f32 %v2380_v1, %v2167_v43 }
 0x184   : > { %v2386_v47 = vpack.c.bf16 %v2177_v45, %v2177_v45  ;;  %v2178_v48 = vmax.f32 %v2176_v46, 0.0 }
 0x186   : > { %2187 = vst [vmem:[%s170_s27] sm:$0xf] %v2386_v47  ;;  %v2387_v49 = vpack.c.bf16 %v2178_v48, %v2178_v48 }
 0x188   : > { %2188 = vst [vmem:[%s170_s27 + $0x4] sm:$0x3] %v2387_v49 }
 0x189 PF: > { %s13_s12 = sadd.s32 1, %s2858_s12  }
 0x18a   : > { %p10_p4 = scmp.ge.s32.totalorder %s13_s12, 4  }
 0x18c   :  { %12 = sbr.rel (!%p10_p4) target bundleno = 1 (0x1), region = 62 }

// kernel: inception_encoder_forward.38
= control target key start
LH: loop header
LB: loop body
LE: loop exit
PB: predicated region body
PF: predicated region fallthrough
CT: control target
= control target key end

     0   :  { %s631_s12 = smov 0   ;;  %s737_s0 = inlined_call_operand.vmem [shape: bf16[2,20,256], index: 0, kind: input, shape index: {}]   ;;  %s738_s1 = inlined_call_operand.vmem [shape: bf16[256,128], index: 1, kind: input, shape index: {}]   ;;  %s739_s2 = inlined_call_operand.vmem [shape: f32[1,128], index: 2, kind: input, shape index: {}]   ;;  %s740_s3 = inlined_call_operand.vmem [shape: bf16[2,8,128], index: 3, kind: output, shape index: {}]  }
   0x1 LB: > { %s530_s13 = sadd.s32 4294967295, %s609_s12   ;;  %p534_p0 = scmp.ge.s32.totalorder %s609_s12, 1  ;;  %s609_s12 = sphi %s631_s12, %s13_s12  }
   0x2   : > { %p137_p1 = scmp.lt.s32.totalorder %s609_s12, 3 }
   0x4   : > { %p138_p2 = pnand %p534_p0, %p137_p1 }
   0x5   : > { %v587_v0 = vld [vmem:[%s738_s1 + $0x40] sm:$0xff] (!%p138_p2)   ;;  %p160_p3 = scmp.lt.s32.totalorder (!%p138_p2), %s530_s13, 1  ;;  %v589_v2 = vld [vmem:[%s738_s1 + $0x48] sm:$0xff] (!%p138_p2)   ;;  %v591_v4 = vld [vmem:[%s738_s1 + $0x50] sm:$0xff] (!%p138_p2)   ;;  %vm180_vm0 = vcmask (!%p138_p2), 1046528   ;;  %vm196_vm1 = vcmask (!%p138_p2), 1045504  }
   0x6   : > { %141 = sbr.rel (%p138_p2) target bundleno = 269 (0x10d), region = 32  ;;  %v588_v1 = vld [vmem:[%s738_s1] sm:$0xff] (!%p138_p2)   ;;  %556 = vmatprep.subr.bf16.mxu0 (!%p138_p2), %v587_v0  ;;  %v590_v3 = vld [vmem:[%s738_s1 + $0x8] sm:$0xff] (!%p138_p2)   ;;  %v592_v5 = vld [vmem:[%s738_s1 + $0x10] sm:$0xff] (!%p138_p2)   ;;  %vm217_vm2 = vcmask (!%p138_p2), 1043456   ;;  %vm233_vm3 = vcmask (!%p138_p2), 1042432  }
   0x7   : > { %557 = vmatpush3.bf16.msra.mxu0 (!%p138_p2), %v588_v1  ;;  %v593_v6 = vld [vmem:[%s738_s1 + $0x58] sm:$0xff] (!%p138_p2)   ;;  %v595_v8 = vld [vmem:[%s738_s1 + $0x60] sm:$0xff] (!%p138_p2)   ;;  %v597_v10 = vld [vmem:[%s738_s1 + $0x68] sm:$0xff] (!%p138_p2)   ;;  %vm249_vm4 = vcmask (!%p138_p2), 1041408  }
   0x8   : > { %558 = vmatprep.subr.bf16.mxu0 (!%p138_p2), %v589_v2  ;;  %v594_v7 = vld [vmem:[%s738_s1 + $0x18] sm:$0xff] (!%p138_p2)   ;;  %v596_v9 = vld [vmem:[%s738_s1 + $0x20] sm:$0xff] (!%p138_p2)   ;;  %v598_v24 = vld [vmem:[%s738_s1 + $0x28] sm:$0xff] (!%p138_p2)  }
   0x9   : > { %v599_v29 = vld [vmem:[%s738_s1 + $0x70] sm:$0xff] (!%p138_p2)   ;;  %v601_v49 = vld [vmem:[%s738_s1 + $0x78] sm:$0xff] (!%p138_p2)  }
   0xa   : > { %v600_v44 = vld [vmem:[%s738_s1 + $0x30] sm:$0xff] (!%p138_p2)   ;;  %v602_v62 = vld [vmem:[%s738_s1 + $0x38] sm:$0xff] (!%p138_p2)  }
   0xb   : > { %559 = vmatpush3.bf16.msra.mxu0 (!%p138_p2), %v590_v3 }
   0xc   : > { %560 = vmatprep.subr.bf16.mxu0 (!%p138_p2), %v591_v4 }
   0xd   : > { %s742_s13 = smov (!%p160_p3, %s530_s13), 1 }
   0xe   : > { %s578_s28 = smul.u32 24, %s742_s13  ;;  %s536_s27 = sshll.u32 %s742_s13, 2 }
   0xf   : > { %561 = vmatpush3.bf16.msra.mxu0 %v592_v5  ;;  %s168_s30 = scalar_lea.vmem %s740_s3, %s536_s27 }
  0x10   : > { %562 = vmatprep.subr.bf16.mxu0 %v593_v6  ;;  %s672_s8 = scalar_lea.vmem %s737_s0, %s578_s28 }
  0x11   : > { %v170_v11 = vld [vmem:[%s672_s8] sm:$0xff]  ;;  %v173_v12 = vld [vmem:[%s672_s8 + $0x8] sm:$0x11]  ;;  %v265_v58 = vld [vmem:[%s672_s8 + $0x10] sm:$0x11] }
  0x12   : > { %v191_v13 = vld [vmem:[%s672_s8] sm:$0xee]  ;;  %v171_v14 = vunpack.c.l.bf16 %v170_v11  ;;  %v172_v15 = vunpack.c.h.bf16 %v170_v11  ;;  %v174_v16 = vunpack.c.l.bf16 %v173_v12  ;;  %v175_v17 = vunpack.c.h.bf16 %v173_v12  ;;  %v208_v21 = vld [vmem:[%s672_s8 + $0x8] sm:$0x33] }
  0x13   : > { %563 = vmatpush3.bf16.msra.mxu0 %v594_v7  ;;  %v684_v18 = vld [vmem:[%s672_s8] sm:$0xcc]  ;;  %v192_v19 = vunpack.c.l.bf16 %v191_v13  ;;  %v193_v20 = vunpack.c.h.bf16 %v191_v13  ;;  %v211_v36 = vunpack.c.l.bf16 %v208_v21  ;;  %v212_v37 = vunpack.c.h.bf16 %v208_v21  ;;  %v228_v38 = vld [vmem:[%s672_s8 + $0x8] sm:$0x77] }
  0x14   : > { %564 = vmatprep.subr.bf16.mxu0 %v595_v8  ;;  %v209_v22 = vunpack.c.l.bf16 %v684_v18  ;;  %v210_v23 = vunpack.c.h.bf16 %v684_v18  ;;  %v181_v25 = vrot.slane %v171_v14, 1  ;;  %v182_v26 = vrot.slane %v174_v16, 1  ;;  %v244_v43 = vld [vmem:[%s672_s8] sm:$0x88]  ;;  %v260_v53 = vld [vmem:[%s672_s8 + $0x8] sm:$0xff] }
  0x15   : > { %v184_v27 = vrot.slane %v172_v15, 1  ;;  %v185_v28 = vrot.slane %v175_v17, 1  ;;  %v197_v30 = vrot.slane %v192_v19, 2  ;;  %v198_v31 = vrot.slane %v174_v16, 2  ;;  %v282_v3 = vld [vmem:[%s672_s8 + $0x8] sm:$0xee] }
  0x16   : > { %v200_v32 = vrot.slane %v193_v20, 2  ;;  %v201_v33 = vrot.slane %v175_v17, 2  ;;  %v183_v34 = vsel %vm180_vm0, %v181_v25, %v182_v26  ;;  %v218_v45 = vrot.slane %v209_v22, 4 }
  0x17   : > { %565 = vmatpush3.bf16.msra.mxu0 %v596_v9  ;;  %v186_v35 = vsel %vm180_vm0, %v184_v27, %v185_v28  ;;  %v189_v39 = vadd.f32 %v183_v34, %v171_v14  ;;  %v199_v41 = vsel %vm196_vm1, %v197_v30, %v198_v31  ;;  %v219_v46 = vrot.slane %v211_v36, 4 }
  0x18   : > { %566 = vmatprep.subr.bf16.mxu0 %v597_v10  ;;  %v190_v40 = vadd.f32 %v186_v35, %v172_v15  ;;  %v202_v42 = vsel %vm196_vm1, %v200_v32, %v201_v33  ;;  %v221_v47 = vrot.slane %v210_v23, 4  ;;  %v222_v48 = vrot.slane %v212_v37, 4 }
  0x19   : > { %v205_v50 = vadd.f32 %v199_v41, %v189_v39  ;;  %v230_v52 = vunpack.c.h.bf16 %v228_v38  ;;  %v220_v54 = vsel %vm217_vm2, %v218_v45, %v219_v46  ;;  %v237_v56 = vrot.slane %v210_v23, 5 }
  0x1a   : > { %v206_v51 = vadd.f32 %v202_v42, %v190_v40  ;;  %v223_v55 = vsel %vm217_vm2, %v221_v47, %v222_v48  ;;  %v245_v57 = vunpack.c.l.bf16 %v244_v43  ;;  %v246_v61 = vunpack.c.h.bf16 %v244_v43  ;;  %v537_v43 = vld [vmem:[%s739_s2] ss:$0 sm:$0xff] }
  0x1b   : > { %567 = vmatpush3.bf16.msra.mxu0 %v598_v24  ;;  %v238_v60 = vrot.slane %v230_v52, 5  ;;  %v226_v63 = vadd.f32 %v220_v54, %v205_v50  ;;  %v229_v0 = vunpack.c.l.bf16 %v228_v38  ;;  %v254_v1 = vrot.slane %v230_v52, 6 }
  0x1c   : > { %568 = vmatprep.subr.bf16.mxu0 %v599_v29  ;;  %v227_v59 = vadd.f32 %v223_v55, %v206_v51  ;;  %v262_v2 = vunpack.c.h.bf16 %v260_v53  ;;  %v250_v5 = vrot.slane %v245_v57, 6  ;;  %v253_v6 = vrot.slane %v246_v61, 6 }
  0x1d   : > { %v239_v4 = vsel %vm233_vm3, %v237_v56, %v238_v60  ;;  %v267_v7 = vunpack.c.h.bf16 %v265_v58  ;;  %v261_v9 = vunpack.c.l.bf16 %v260_v53  ;;  %v266_v10 = vunpack.c.l.bf16 %v265_v58 }
  0x1e   : > { %v243_v8 = vadd.f32 %v239_v4, %v227_v59  ;;  %v275_v11 = vrot.slane %v262_v2, 1  ;;  %v255_v12 = vsel %vm249_vm4, %v253_v6, %v254_v1  ;;  %v284_v14 = vunpack.c.h.bf16 %v282_v3 }
  0x1f   : > { %569 = vmatpush3.bf16.msra.mxu0 %v600_v44  ;;  %v276_v13 = vrot.slane %v267_v7, 1  ;;  %v291_v15 = vrot.slane %v267_v7, 2  ;;  %v283_v17 = vunpack.c.l.bf16 %v282_v3  ;;  %v234_v19 = vrot.slane %v209_v22, 5 }
  0x20   : > { %570 = vmatprep.subr.bf16.mxu0 %v601_v49  ;;  %v259_v16 = vadd.f32 %v255_v12, %v243_v8  ;;  %v235_v20 = vrot.slane %v229_v0, 5  ;;  %v290_v23 = vrot.slane %v284_v14, 2  ;;  %v251_v24 = vrot.slane %v229_v0, 6 }
  0x21   : > { %v277_v21 = vsel %vm180_vm0, %v275_v11, %v276_v13  ;;  %v272_v26 = vrot.slane %v261_v9, 1  ;;  %v273_v28 = vrot.slane %v266_v10, 1  ;;  %v287_v33 = vrot.slane %v283_v17, 2 }
  0x22   : > { %v264_v25 = vadd.f32 %v262_v2, %v259_v16  ;;  %v236_v27 = vsel %vm233_vm3, %v234_v19, %v235_v20  ;;  %v292_v29 = vsel %vm196_vm1, %v290_v23, %v291_v15  ;;  %v252_v31 = vsel %vm249_vm4, %v250_v5, %v251_v24 }
  0x23   : > { %571 = vmatpush3.bf16.msra.mxu0 %v602_v62  ;;  %v242_v30 = vadd.f32 %v236_v27, %v226_v63  ;;  %v288_v34 = vrot.slane %v266_v10, 2  ;;  %v274_v35 = vsel %vm180_vm0, %v272_v26, %v273_v28 }
  0x24   : > { %v281_v32 = vadd.f32 %v277_v21, %v264_v25 }
  0x25   : > { %v258_v18 = vadd.f32 %v252_v31, %v242_v30  ;;  %v289_v38 = vsel %vm196_vm1, %v287_v33, %v288_v34 }
  0x26   : > { %v296_v22 = vadd.f32 %v292_v29, %v281_v32 }
  0x27   : > { %v263_v36 = vadd.f32 %v261_v9, %v258_v18 }
  0x28   : > { %v298_v37 = vpack.c.bf16 %v296_v22, %v296_v22 }
  0x29   : > { %v280_v39 = vadd.f32 %v274_v35, %v263_v36 }
  0x2a   : > { %466 = vmatprep.mubr.bf16.mxu0 %v298_v37 }
  0x2b   : > { %v295_v40 = vadd.f32 %v289_v38, %v280_v39 }
  0x2d   : > { %v297_v41 = vpack.c.bf16 %v295_v40, %v295_v40 }
  0x2f   : > { %467 = vmatmul.mubr.bf16.vlgmr.msra.gmra.mrb[0].mxu0 %v297_v41 }
 0x102   : > { %v572_v42 = vpop.f32.mrb[0].mxu0 }
 0x103   : > { %v573_v44 = vpop.f32.mrb[1].mxu0 }
 0x104   : > { %v574_v45 = vadd.f32 %v573_v44, %v572_v42  ;;  %v575_v46 = vpop.f32.mrb[2].mxu0 }
 0x105   : > { %v576_v47 = vpop.f32.mrb[3].mxu0 }
 0x106   : > { %v469_v48 = vadd.f32 %v574_v45, %v537_v43 }
 0x108   : > { %v474_v49 = vmax.f32 %v469_v48, 0.0 }
 0x10a   : > { %v475_v50 = vpack.c.bf16 %v474_v49, %v474_v49 }
 0x10c   : > { %476 = vst [vmem:[%s168_s30] sm:$0xf] %v475_v50 }
 0x10d PF: > { %s13_s12 = sadd.s32 1, %s609_s12  }
 0x10e   : > { %p10_p4 = scmp.ge.s32.totalorder %s13_s12, 4  }
 0x110   :  { %12 = sbr.rel (!%p10_p4) target bundleno = 1 (0x1), region = 62 }

// kernel: inception_encoder_forward.39
= control target key start
LH: loop header
LB: loop body
LE: loop exit
PB: predicated region body
PF: predicated region fallthrough
CT: control target
= control target key end

     0   :  { %v460_v1 = vmov 0   ;;  %vm255_vm0 = vcmask 261120   ;;  %v55_v45 = vlaneseq  ;;  %s601_s1 = inlined_call_operand.vmem [shape: bf16[288,256], index: 1, kind: input, shape index: {}]   ;;  %s602_s0 = inlined_call_operand.vmem [shape: bf16[8,288], index: 0, kind: input, shape index: {}]   ;;  %s603_s2 = inlined_call_operand.vmem [shape: f32[1,256], index: 2, kind: input, shape index: {}]   ;;  %s604_s3 = inlined_call_operand.vmem [shape: bf16[8,256], index: 3, kind: output, shape index: {}]  }
   0x1   :  { %v403_v0 = vld [vmem:[%s601_s1 + $0x4] ss:$8 sps:$4 sm:$0xff]   ;;  %332 = vmatprep.mubr.bf16.mxu0 %v460_v1  ;;  %v405_v2 = vld [vmem:[%s601_s1] ss:$8 sps:$4 sm:$0xff]   ;;  %v406_v3 = vld [vmem:[%s601_s1 + $0x14] ss:$8 sps:$4 sm:$0xff]  }
   0x2   :  { %259 = vmatprep.subr.bf16.mxu1 %v403_v0  ;;  %v408_v4 = vld [vmem:[%s601_s1 + $0x10] ss:$8 sps:$4 sm:$0xff]   ;;  %v409_v5 = vld [vmem:[%s601_s1 + $0x24] ss:$8 sps:$4 sm:$0xff]   ;;  %v411_v6 = vld [vmem:[%s601_s1 + $0x20] ss:$8 sps:$4 sm:$0xff]  }
   0x3   :  { %260 = vmatpush1.bf16.msra.mxu1 %v405_v2  ;;  %v412_v7 = vld [vmem:[%s601_s1 + $0x34] ss:$8 sps:$4 sm:$0xff]   ;;  %v414_v8 = vld [vmem:[%s601_s1 + $0x30] ss:$8 sps:$4 sm:$0xff]   ;;  %v415_v9 = vld [vmem:[%s601_s1 + $0x44] ss:$8 sps:$4 sm:$0xff]  }
   0x4   :  { %261 = vmatprep.subr.bf16.mxu1 %v406_v3  ;;  %v417_v10 = vld [vmem:[%s601_s1 + $0x40] ss:$8 sps:$4 sm:$0xff]   ;;  %v418_v11 = vld [vmem:[%s601_s1 + $0x54] ss:$8 sps:$4 sm:$0xff]   ;;  %v420_v12 = vld [vmem:[%s601_s1 + $0x50] ss:$8 sps:$4 sm:$0xff]  }
   0x5   :  { %v445_v13 = vld [vmem:[%s601_s1 + $0x104] ss:$8 sps:$4 sm:$0xff]   ;;  %v449_v15 = vld [vmem:[%s601_s1 + $0x100] ss:$8 sps:$4 sm:$0xff]   ;;  %v451_v16 = vld [vmem:[%s601_s1 + $0x114] ss:$8 sps:$4 sm:$0xff]  }
   0x6   :  { %v421_v14 = vld [vmem:[%s601_s1 + $0x64] ss:$8 sps:$4 sm:$0xff]   ;;  %300 = vmatprep.subr.bf16.mxu0 %v445_v13  ;;  %v423_v17 = vld [vmem:[%s601_s1 + $0x60] ss:$8 sps:$4 sm:$0xff]   ;;  %v455_v18 = vld [vmem:[%s601_s1 + $0x110] ss:$8 sps:$4 sm:$0xff]  }
   0x7   :  { %262 = vmatpush1.bf16.msra.mxu1 %v408_v4  ;;  %301 = vmatpush1.bf16.msra.mxu0 %v449_v15  ;;  %v424_v19 = vld [vmem:[%s601_s1 + $0x74] ss:$8 sps:$4 sm:$0xff]   ;;  %v15_v20 = vld [vmem:[%s602_s0] sm:$0xff]  ;;  %v459_v22 = vld [vmem:[%s602_s0 + $0x8] ss:$0 sps:$4 sm:$0xff]   ;;  %v56_v46 = vshrl.u32 %v55_v45, 7 }
   0x8   :  { %263 = vmatprep.subr.bf16.mxu1 %v409_v5  ;;  %302 = vmatprep.subr.bf16.mxu0 %v451_v16  ;;  %v357_v21 = vcombine.high %v15_v20, %v15_v20  ;;  %v426_v23 = vld [vmem:[%s601_s1 + $0x70] ss:$8 sps:$4 sm:$0xff]   ;;  %v427_v24 = vld [vmem:[%s601_s1 + $0x84] ss:$8 sps:$4 sm:$0xff]   ;;  %v429_v25 = vld [vmem:[%s601_s1 + $0x80] ss:$8 sps:$4 sm:$0xff]   ;;  %v356_v40 = vcombine.low %v15_v20, %v15_v20 }
   0x9   :  { %v430_v26 = vld [vmem:[%s601_s1 + $0x94] ss:$8 sps:$4 sm:$0xff]   ;;  %v432_v27 = vld [vmem:[%s601_s1 + $0x90] ss:$8 sps:$4 sm:$0xff]   ;;  %v433_v28 = vld [vmem:[%s601_s1 + $0xa4] ss:$8 sps:$4 sm:$0xff]  }
   0xa   :  { %291 = vmatprep.mubr.bf16.mxu1 %v357_v21  ;;  %v435_v29 = vld [vmem:[%s601_s1 + $0xa0] ss:$8 sps:$4 sm:$0xff]   ;;  %v436_v30 = vld [vmem:[%s601_s1 + $0xb4] ss:$8 sps:$4 sm:$0xff]   ;;  %v438_v31 = vld [vmem:[%s601_s1 + $0xb0] ss:$8 sps:$4 sm:$0xff]  }
   0xb   :  { %264 = vmatpush1.bf16.msra.mxu1 %v411_v6  ;;  %303 = vmatpush1.bf16.msra.mxu0 %v455_v18  ;;  %v439_v32 = vld [vmem:[%s601_s1 + $0xc4] ss:$8 sps:$4 sm:$0xff]   ;;  %v441_v33 = vld [vmem:[%s601_s1 + $0xc0] ss:$8 sps:$4 sm:$0xff]   ;;  %v442_v34 = vld [vmem:[%s601_s1 + $0xd4] ss:$8 sps:$4 sm:$0xff]  }
   0xc   :  { %265 = vmatprep.subr.bf16.mxu1 %v412_v7  ;;  %v444_v35 = vld [vmem:[%s601_s1 + $0xd0] ss:$8 sps:$4 sm:$0xff]   ;;  %v447_v36 = vld [vmem:[%s601_s1 + $0xe4] ss:$8 sps:$4 sm:$0xff]   ;;  %v450_v37 = vld [vmem:[%s601_s1 + $0xe0] ss:$8 sps:$4 sm:$0xff]  }
   0xd   :  { %v453_v38 = vld [vmem:[%s601_s1 + $0xf4] ss:$8 sps:$4 sm:$0xff]   ;;  %v456_v39 = vld [vmem:[%s601_s1 + $0xf0] ss:$8 sps:$4 sm:$0xff]   ;;  %v57_v47 = vsub.s32 0, %v56_v46  ;;  %v61_v49 = vsub.s32 1, %v56_v46 }
   0xe   :  { %395 = vmatmul.mubr.msk.bf16.vlgmr.msra.gmra.mrb[0].mxu0 %vm255_vm0, %v459_v22  ;;  %v53_v48 = vld [vmem:[%s603_s2] sm:$0x3] }
   0xf   :  { %266 = vmatpush1.bf16.msra.mxu1 %v414_v8  ;;  %v58_v50 = vrot.slane %v53_v48, %v57_v47  ;;  %v62_v51 = vrot.slane %v53_v48, %v61_v49 }
  0x10   :  { %267 = vmatprep.subr.bf16.mxu1 %v415_v9 }
  0x13   :  { %268 = vmatpush1.bf16.msra.mxu1 %v417_v10 }
  0x14   :  { %269 = vmatprep.subr.bf16.mxu1 %v418_v11 }
  0x17   :  { %270 = vmatpush1.bf16.msra.mxu1 %v420_v12 }
  0x18   :  { %271 = vmatprep.subr.bf16.mxu1 %v421_v14 }
  0x1b   :  { %272 = vmatpush1.bf16.msra.mxu1 %v423_v17 }
  0x1c   :  { %273 = vmatprep.subr.bf16.mxu1 %v424_v19 }
  0x1f   :  { %274 = vmatpush1.bf16.msra.mxu1 %v426_v23 }
  0x20   :  { %275 = vmatprep.subr.bf16.mxu1 %v427_v24 }
  0x23   :  { %276 = vmatpush1.bf16.msra.mxu1 %v429_v25 }
  0x24   :  { %277 = vmatprep.subr.bf16.mxu1 %v430_v26 }
  0x27   :  { %278 = vmatpush1.bf16.msra.mxu1 %v432_v27 }
  0x28   :  { %279 = vmatprep.subr.bf16.mxu1 %v433_v28 }
  0x2b   :  { %280 = vmatpush1.bf16.msra.mxu1 %v435_v29 }
  0x2c   :  { %281 = vmatprep.subr.bf16.mxu1 %v436_v30 }
  0x2f   :  { %282 = vmatpush1.bf16.msra.mxu1 %v438_v31 }
  0x30   :  { %283 = vmatprep.subr.bf16.mxu1 %v439_v32 }
  0x33   :  { %284 = vmatpush1.bf16.msra.mxu1 %v441_v33 }
  0x34   :  { %285 = vmatprep.subr.bf16.mxu1 %v442_v34 }
  0x37   :  { %286 = vmatpush1.bf16.msra.mxu1 %v444_v35 }
  0x38   :  { %287 = vmatprep.subr.bf16.mxu1 %v447_v36 }
  0x3b   :  { %288 = vmatpush1.bf16.msra.mxu1 %v450_v37 }
  0x3c   :  { %289 = vmatprep.subr.bf16.mxu1 %v453_v38 }
  0x3f   :  { %290 = vmatpush1.bf16.msra.mxu1 %v456_v39 }
  0x42   :  { %292 = vmatmul.mubr.bf16.vlgmr.msra.gmra.mrb[0].mxu1 %v356_v40 }
  0xe1   :  { %v334_v41 = vpop.f32.mrb[0].mxu0 }
  0xe2   :  { %v336_v42 = vpop.f32.mrb[1].mxu0 }
  0xe3   :  { %v338_v43 = vpop.f32.mrb[2].mxu0 }
  0xe4   :  { %v339_v44 = vpop.f32.mrb[3].mxu0 }
 0x115   :  { %v293_v52 = vpop.f32.mrb[0].mxu1 }
 0x116   :  { %v294_v53 = vadd.f32 %v293_v52, %v58_v50  ;;  %v295_v54 = vpop.f32.mrb[1].mxu1 }
 0x117   :  { %v296_v55 = vadd.f32 %v295_v54, %v62_v51  ;;  %v297_v56 = vpop.f32.mrb[2].mxu1 }
 0x118   :  { %v335_v57 = vadd.f32 %v334_v41, %v294_v53  ;;  %v298_v58 = vpop.f32.mrb[3].mxu1 }
 0x119   :  { %v337_v59 = vadd.f32 %v336_v42, %v296_v55 }
 0x11a   :  { %v341_v60 = vmax.f32 %v335_v57, 0.0 }
 0x11b   :  { %v342_v61 = vmax.f32 %v337_v59, 0.0 }
 0x11d   :  { %v397_v62 = vpack.c.bf16 %v342_v61, %v341_v60 }
 0x11f   :  { %351 = vst [vmem:[%s604_s3] sm:$0xff] %v397_v62 }

// kernel: inception_encoder_forward.43
= control target key start
LH: loop header
LB: loop body
LE: loop exit
PB: predicated region body
PF: predicated region fallthrough
CT: control target
= control target key end

     0   :  { %s778_s12 = smov 0   ;;  %s938_s0 = inlined_call_operand.vmem [shape: bf16[2,20,288], index: 0, kind: input, shape index: {}]   ;;  %s939_s1 = inlined_call_operand.vmem [shape: bf16[288,128], index: 1, kind: input, shape index: {}]   ;;  %s940_s2 = inlined_call_operand.vmem [shape: f32[1,128], index: 2, kind: input, shape index: {}]   ;;  %s941_s3 = inlined_call_operand.vmem [shape: bf16[2,8,128], index: 3, kind: output, shape index: {}]  }
   0x1 LB: > { %s657_s13 = sadd.s32 4294967295, %s754_s12   ;;  %p661_p0 = scmp.ge.s32.totalorder %s754_s12, 1  ;;  %s754_s12 = sphi %s778_s12, %s13_s12  }
   0x2   : > { %p137_p1 = scmp.lt.s32.totalorder %s754_s12, 3 }
   0x4   : > { %p138_p2 = pnand %p661_p0, %p137_p1 }
   0x5   : > { %v730_v0 = vld [vmem:[%s939_s1 + $0x40] sm:$0xff] (!%p138_p2)   ;;  %v756_v2 = vmov (!%p138_p2), 0.0   ;;  %v732_v3 = vld [vmem:[%s939_s1 + $0x48] sm:$0xff] (!%p138_p2)   ;;  %p160_p3 = scmp.lt.s32.totalorder (!%p138_p2), %s657_s13, 1  ;;  %v734_v5 = vld [vmem:[%s939_s1 + $0x50] sm:$0xff] (!%p138_p2)   ;;  %vm757_vm0 = vmmov (!%p138_p2), 0  }
   0x6   : > { %141 = sbr.rel (%p138_p2) target bundleno = 281 (0x119), region = 32  ;;  %v731_v1 = vld [vmem:[%s939_s1] sm:$0xff] (!%p138_p2)   ;;  %711 = vmatprep.subr.bf16.mxu1 (!%p138_p2), %v756_v2  ;;  %686 = vmatprep.subr.bf16.mxu0 (!%p138_p2), %v730_v0  ;;  %v733_v4 = vld [vmem:[%s939_s1 + $0x8] sm:$0xff] (!%p138_p2)   ;;  %v735_v6 = vld [vmem:[%s939_s1 + $0x10] sm:$0xff] (!%p138_p2)   ;;  %vm186_vm1 = vcmask (!%p138_p2), 1046528   ;;  %vm210_vm2 = vcmask (!%p138_p2), 1045504  }
   0x7   : > { %687 = vmatpush3.bf16.msra.mxu0 (!%p138_p2), %v731_v1  ;;  %v736_v7 = vld [vmem:[%s939_s1 + $0x58] sm:$0xff] (!%p138_p2)   ;;  %715 = vmatprep.mubr.msk.bf16.mxu1 (!%p138_p2), %vm757_vm0, %v756_v2  ;;  %v738_v9 = vld [vmem:[%s939_s1 + $0x60] sm:$0xff] (!%p138_p2)   ;;  %v740_v12 = vld [vmem:[%s939_s1 + $0x68] sm:$0xff] (!%p138_p2)   ;;  %vm242_vm3 = vcmask (!%p138_p2), 1043456   ;;  %vm266_vm4 = vcmask (!%p138_p2), 1042432   ;;  %vm290_vm5 = vcmask (!%p138_p2), 1041408  }
   0x8   : > { %688 = vmatprep.subr.bf16.mxu0 (!%p138_p2), %v732_v3  ;;  %v737_v8 = vld [vmem:[%s939_s1 + $0x18] sm:$0xff] (!%p138_p2)   ;;  %v744_v10 = vld [vmem:[%s939_s1 + $0x80] sm:$0xff] (!%p138_p2)   ;;  %v741_v21 = vld [vmem:[%s939_s1 + $0x28] sm:$0xff] (!%p138_p2)   ;;  %vm517_vm6 = vcmask (!%p138_p2), 261120  }
   0x9   : > { %v739_v11 = vld [vmem:[%s939_s1 + $0x20] sm:$0xff] (!%p138_p2)   ;;  %712 = vmatpush3.bf16.msra.mxu1 (!%p138_p2), %v744_v10  ;;  %v742_v22 = vld [vmem:[%s939_s1 + $0x70] sm:$0xff] (!%p138_p2)   ;;  %v747_v40 = vld [vmem:[%s939_s1 + $0x88] sm:$0xff] (!%p138_p2)  }
   0xa   : > { %713 = vmatprep.subr.bf16.mxu1 (!%p138_p2), %v756_v2  ;;  %v743_v41 = vld [vmem:[%s939_s1 + $0x30] sm:$0xff] (!%p138_p2)   ;;  %v745_v42 = vld [vmem:[%s939_s1 + $0x78] sm:$0xff] (!%p138_p2)  }
   0xb   : > { %689 = vmatpush3.bf16.msra.mxu0 (!%p138_p2), %v733_v4  ;;  %v746_v61 = vld [vmem:[%s939_s1 + $0x38] sm:$0xff] (!%p138_p2)  }
   0xc   : > { %690 = vmatprep.subr.bf16.mxu0 (!%p138_p2), %v734_v5 }
   0xd   : > { %s943_s13 = smov (!%p160_p3, %s657_s13), 1  ;;  %714 = vmatpush3.bf16.msra.mxu1 %v747_v40 }
   0xe   : > { %s719_s28 = smul.u32 36, %s943_s13  ;;  %s663_s4 = sshll.u32 %s943_s13, 2 }
   0xf   : > { %691 = vmatpush3.bf16.msra.mxu0 %v735_v6  ;;  %s168_s7 = scalar_lea.vmem %s941_s3, %s663_s4 }
  0x10   : > { %692 = vmatprep.subr.bf16.mxu0 %v736_v7  ;;  %s822_s10 = scalar_lea.vmem %s938_s0, %s719_s28 }
  0x11   : > { %v831_v13 = vld [vmem:[%s822_s10] sm:$0xff]  ;;  %v834_v14 = vld [vmem:[%s822_s10 + $0x8] ss:$12 sps:$4 sm:$0xff]   ;;  %v837_v15 = vld [vmem:[%s822_s10 + $0xc] sm:$0x11] }
  0x12   : > { %v173_v16 = vunpack.c.h.bf16 %v831_v13  ;;  %v174_v17 = vunpack.c.l.bf16 %v834_v14  ;;  %v176_v18 = vld [vmem:[%s822_s10 + $0x14] sm:$0x1]  ;;  %v843_v19 = vld [vmem:[%s822_s10] sm:$0xee]  ;;  %v203_v20 = vld [vmem:[%s822_s10 + $0x8] sm:$0xe]  ;;  %v178_v23 = vunpack.c.h.bf16 %v837_v15  ;;  %v172_v35 = vunpack.c.l.bf16 %v831_v13 }
  0x13   : > { %693 = vmatpush3.bf16.msra.mxu0 %v737_v8  ;;  %v179_v24 = vunpack.c.l.bf16 %v176_v18  ;;  %v205_v25 = vunpack.c.h.bf16 %v843_v19  ;;  %v206_v28 = vunpack.c.l.bf16 %v203_v20  ;;  %v855_v29 = vld [vmem:[%s822_s10] sm:$0xcc]  ;;  %v227_v30 = vld [vmem:[%s822_s10 + $0x8] sm:$0xc]  ;;  %v859_v34 = vld [vmem:[%s822_s10 + $0xc] sm:$0x33]  ;;  %v177_v56 = vunpack.c.l.bf16 %v837_v15 }
  0x14   : > { %694 = vmatprep.subr.bf16.mxu0 %v738_v9  ;;  %v190_v26 = vrot.slane %v173_v16, 1  ;;  %v193_v27 = vrot.slane %v174_v17, 1  ;;  %v191_v31 = vrot.slane %v178_v23, 1  ;;  %v215_v36 = vrot.slane %v178_v23, 2  ;;  %v229_v39 = vld [vmem:[%s822_s10 + $0x14] sm:$0x3] }
  0x15   : > { %v194_v32 = vrot.slane %v179_v24, 1  ;;  %v214_v33 = vrot.slane %v205_v25, 2  ;;  %v217_v37 = vrot.slane %v206_v28, 2  ;;  %v218_v38 = vrot.slane %v179_v24, 2  ;;  %v878_v51 = vld [vmem:[%s822_s10 + $0xc] sm:$0x77] }
  0x16   : > { %v192_v43 = vsel %vm186_vm1, %v190_v26, %v191_v31  ;;  %v231_v45 = vunpack.c.h.bf16 %v855_v29  ;;  %v232_v46 = vunpack.c.l.bf16 %v227_v30  ;;  %v234_v52 = vunpack.c.h.bf16 %v859_v34  ;;  %v259_v55 = vld [vmem:[%s822_s10 + $0x14] sm:$0x7]  ;;  %v282_v60 = vld [vmem:[%s822_s10] sm:$0x88]  ;;  %v283_v2 = vld [vmem:[%s822_s10 + $0x8] sm:$0x8] }
  0x17   : > { %695 = vmatpush3.bf16.msra.mxu0 %v739_v11  ;;  %v195_v44 = vsel %vm186_vm1, %v193_v27, %v194_v32  ;;  %v200_v47 = vadd.f32 %v192_v43, %v173_v16  ;;  %v216_v49 = vsel %vm210_vm2, %v214_v33, %v215_v36  ;;  %v219_v50 = vsel %vm210_vm2, %v217_v37, %v218_v38  ;;  %v340_v32 = vld [vmem:[%s822_s10 + $0xc] sm:$0xee] }
  0x18   : > { %696 = vmatprep.subr.bf16.mxu0 %v740_v12  ;;  %v201_v48 = vadd.f32 %v195_v44, %v174_v17  ;;  %v235_v53 = vunpack.c.l.bf16 %v229_v39  ;;  %v246_v54 = vrot.slane %v231_v45, 4  ;;  %v249_v59 = vrot.slane %v232_v46, 4  ;;  %v895_v17 = vld [vmem:[%s822_s10 + $0xc] sm:$0xff] }
  0x19   : > { %v224_v57 = vadd.f32 %v216_v49, %v200_v47  ;;  %v204_v62 = vunpack.c.l.bf16 %v843_v19  ;;  %v247_v63 = vrot.slane %v234_v52, 4  ;;  %v261_v1 = vunpack.c.h.bf16 %v878_v51 }
  0x1a   : > { %v225_v58 = vadd.f32 %v219_v50, %v201_v48  ;;  %v250_v0 = vrot.slane %v235_v53, 4  ;;  %v187_v3 = vrot.slane %v172_v35, 1  ;;  %v262_v4 = vunpack.c.l.bf16 %v259_v55 }
  0x1b   : > { %697 = vmatpush3.bf16.msra.mxu0 %v741_v21  ;;  %v270_v5 = vrot.slane %v231_v45, 5  ;;  %v273_v6 = vrot.slane %v232_v46, 5  ;;  %v248_v7 = vsel %vm242_vm3, %v246_v54, %v247_v63  ;;  %v271_v9 = vrot.slane %v261_v1, 5 }
  0x1c   : > { %698 = vmatprep.subr.bf16.mxu0 %v742_v22  ;;  %v251_v8 = vsel %vm242_vm3, %v249_v59, %v250_v0  ;;  %v285_v10 = vunpack.c.h.bf16 %v282_v60  ;;  %v256_v11 = vadd.f32 %v248_v7, %v224_v57  ;;  %v274_v15 = vrot.slane %v262_v4, 5  ;;  %v900_v22 = vld [vmem:[%s822_s10 + $0x18] sm:$0x11]  ;;  %v341_v59 = vld [vmem:[%s822_s10 + $0x14] sm:$0xe] }
  0x1d   : > { %v257_v12 = vadd.f32 %v251_v8, %v225_v58  ;;  %v286_v16 = vunpack.c.l.bf16 %v283_v2  ;;  %v233_v18 = vunpack.c.l.bf16 %v859_v34  ;;  %v272_v19 = vsel %vm266_vm4, %v270_v5, %v271_v9  ;;  %v315_v58 = vld [vmem:[%s822_s10 + $0x20] sm:$0x1] }
  0x1e   : > { %v294_v20 = vrot.slane %v285_v10, 6  ;;  %v295_v21 = vrot.slane %v261_v1, 6  ;;  %v275_v23 = vsel %vm266_vm4, %v273_v6, %v274_v15  ;;  %v280_v24 = vadd.f32 %v272_v19, %v256_v11 }
  0x1f   : > { %699 = vmatpush3.bf16.msra.mxu0 %v743_v41  ;;  %v297_v25 = vrot.slane %v286_v16, 6  ;;  %v298_v26 = vrot.slane %v262_v4, 6  ;;  %v230_v27 = vunpack.c.l.bf16 %v855_v29  ;;  %v284_v28 = vunpack.c.l.bf16 %v282_v60 }
  0x20   : > { %700 = vmatprep.subr.bf16.mxu0 %v745_v42  ;;  %v296_v30 = vsel %vm290_vm5, %v294_v20, %v295_v21  ;;  %v309_v31 = vunpack.c.h.bf16 %v895_v17  ;;  %v211_v33 = vrot.slane %v204_v62, 2  ;;  %v281_v34 = vadd.f32 %v275_v23, %v257_v12 }
  0x21   : > { %v304_v36 = vadd.f32 %v296_v30, %v280_v24  ;;  %v317_v37 = vunpack.c.h.bf16 %v900_v22  ;;  %v244_v38 = vrot.slane %v233_v18, 4  ;;  %v260_v39 = vunpack.c.l.bf16 %v878_v51 }
  0x22   : > { %v299_v40 = vsel %vm290_vm5, %v297_v25, %v298_v26  ;;  %v328_v41 = vrot.slane %v309_v31, 1  ;;  %v343_v43 = vunpack.c.h.bf16 %v340_v32  ;;  %v291_v45 = vrot.slane %v284_v28, 6 }
  0x23   : > { %701 = vmatpush3.bf16.msra.mxu0 %v746_v61  ;;  %v312_v42 = vadd.f32 %v309_v31, %v304_v36  ;;  %v329_v29 = vrot.slane %v317_v37, 1  ;;  %v352_v44 = vrot.slane %v317_v37, 2  ;;  %v188_v46 = vrot.slane %v177_v56, 1 }
  0x24   : > { %v212_v47 = vrot.slane %v177_v56, 2  ;;  %v243_v48 = vrot.slane %v230_v27, 4  ;;  %v305_v49 = vadd.f32 %v299_v40, %v281_v34  ;;  %v351_v52 = vrot.slane %v343_v43, 2  ;;  %v664_v40 = vld [vmem:[%s940_s2] ss:$0 sm:$0xff] }
  0x25   : > { %v330_v50 = vsel %vm186_vm1, %v328_v41, %v329_v29  ;;  %v267_v53 = vrot.slane %v230_v27, 5  ;;  %v189_v51 = vsel %vm186_vm1, %v187_v3, %v188_v46  ;;  %v268_v57 = vrot.slane %v260_v39, 5 }
  0x26   : > { %v338_v54 = vadd.f32 %v330_v50, %v312_v42  ;;  %v213_v55 = vsel %vm210_vm2, %v211_v33, %v212_v47  ;;  %v308_v60 = vunpack.c.l.bf16 %v895_v17  ;;  %v316_v61 = vunpack.c.l.bf16 %v900_v22 }
  0x27   : > { %v353_v56 = vsel %vm210_vm2, %v351_v52, %v352_v44  ;;  %v199_v62 = vadd.f32 %v189_v51, %v172_v35  ;;  %v245_v0 = vsel %vm242_vm3, %v243_v48, %v244_v38  ;;  %v292_v1 = vrot.slane %v260_v39, 6 }
  0x28   : > { %v361_v63 = vadd.f32 %v353_v56, %v338_v54  ;;  %v310_v2 = vunpack.c.h.bf16 %v834_v14  ;;  %v318_v4 = vunpack.c.l.bf16 %v315_v58  ;;  %v344_v5 = vunpack.c.l.bf16 %v341_v59 }
  0x29   : > { %v223_v3 = vadd.f32 %v213_v55, %v199_v62  ;;  %v342_v6 = vunpack.c.l.bf16 %v340_v32  ;;  %v269_v8 = vsel %vm266_vm4, %v267_v53, %v268_v57  ;;  %v325_v13 = vrot.slane %v308_v60, 1 }
  0x2a   : > { %v364_v7 = vpack.c.bf16 %v361_v63, %v361_v63  ;;  %v313_v9 = vadd.f32 %v310_v2, %v305_v49  ;;  %v331_v11 = vrot.slane %v310_v2, 1  ;;  %v332_v12 = vrot.slane %v318_v4, 1 }
  0x2b   : > { %v255_v10 = vadd.f32 %v245_v0, %v223_v3  ;;  %v354_v15 = vrot.slane %v344_v5, 2  ;;  %v293_v35 = vsel %vm290_vm5, %v291_v45, %v292_v1  ;;  %v326_v16 = vrot.slane %v316_v61, 1 }
  0x2c   : > { %553 = vmatprep.mubr.bf16.mxu0 %v364_v7  ;;  %v355_v17 = vrot.slane %v318_v4, 2  ;;  %v333_v14 = vsel %vm186_vm1, %v331_v11, %v332_v12  ;;  %v348_v19 = vrot.slane %v342_v6, 2  ;;  %v349_v20 = vrot.slane %v316_v61, 2 }
  0x2d   : > { %v279_v18 = vadd.f32 %v269_v8, %v255_v10  ;;  %v339_v21 = vadd.f32 %v333_v14, %v313_v9  ;;  %v327_v24 = vsel %vm186_vm1, %v325_v13, %v326_v16 }
  0x2e   : > { %v356_v22 = vsel %vm210_vm2, %v354_v15, %v355_v17  ;;  %v350_v27 = vsel %vm210_vm2, %v348_v19, %v349_v20 }
  0x2f   : > { %v303_v23 = vadd.f32 %v293_v35, %v279_v18  ;;  %v362_v25 = vadd.f32 %v356_v22, %v339_v21 }
  0x31   : > { %v311_v26 = vadd.f32 %v308_v60, %v303_v23  ;;  %v365_v28 = vpack.c.bf16 %v362_v25, %v362_v25 }
  0x33   : > { %v337_v30 = vadd.f32 %v327_v24, %v311_v26  ;;  %716 = vmatmul.mubr.msk.bf16.vlgmr.msra.gmra.mrb[0].mxu1 %vm517_vm6, %v365_v28 }
  0x35   : > { %v360_v31 = vadd.f32 %v350_v27, %v337_v30 }
  0x37   : > { %v363_v32 = vpack.c.bf16 %v360_v31, %v360_v31 }
  0x39   : > { %554 = vmatmul.mubr.bf16.vlgmr.msra.gmra.mrb[0].mxu0 %v363_v32 }
 0x106   : > { %v595_v33 = vpop.f32.mrb[0].mxu1 }
 0x107   : > { %v717_v34 = vpop.f32.mrb[1].mxu1 }
 0x108   : > { %v598_v36 = vpop.f32.mrb[2].mxu1 }
 0x109   : > { %v718_v37 = vpop.f32.mrb[3].mxu1 }
 0x10c   : > { %v702_v38 = vpop.f32.mrb[0].mxu0 }
 0x10d   : > { %v703_v39 = vpop.f32.mrb[1].mxu0 }
 0x10e   : > { %v704_v41 = vadd.f32 %v703_v39, %v702_v38  ;;  %v705_v42 = vpop.f32.mrb[2].mxu0 }
 0x10f   : > { %v706_v29 = vpop.f32.mrb[3].mxu0 }
 0x110   : > { %v556_v43 = vadd.f32 %v704_v41, %v664_v40 }
 0x112   : > { %v596_v44 = vadd.f32 %v595_v33, %v556_v43 }
 0x114   : > { %v601_v45 = vmax.f32 %v596_v44, 0.0 }
 0x116   : > { %v602_v46 = vpack.c.bf16 %v601_v45, %v601_v45 }
 0x118   : > { %603 = vst [vmem:[%s168_s7] sm:$0xf] %v602_v46 }
 0x119 PF: > { %s13_s12 = sadd.s32 1, %s754_s12  }
 0x11a   : > { %p10_p4 = scmp.ge.s32.totalorder %s13_s12, 4  }
 0x11c   :  { %12 = sbr.rel (!%p10_p4) target bundleno = 1 (0x1), region = 62 }

</bundles_post_ra>
